<compile_context>
chip_gen: v7x
topology: tpu7x:2x2x1
jax: 0.10.0
libtpu: 0.0.40
codegen_flags: <defaults>
</compile_context>

<pallas_src>
import math
from functools import partial

import numpy as np
import jax
import jax.numpy as jnp
from jax import lax
from jax.experimental import pallas as pl
from jax.experimental.pallas import tpu as pltpu


# TODO(synk): self.global_pos_weight is referenced but never defined in the reference
# module's __init__; a deterministic 1.0 placeholder is used for the BCE pos_weight.
GLOBAL_POS_WEIGHT = 1.0

_VMEM_LIMIT = 64 * 1024 * 1024   # explicit scoped-VMEM cap with headroom (fits v5e/v6e/v7x)

# tile-size preferences (largest that evenly divides the dim; otherwise full dim)
_TM_PREFS = (256, 128, 64, 32, 16)       # sublane dim of activations (bf16-friendly)
_TN_PREFS = (512, 256, 128)              # lane dim of outputs / weights
_TK_PREFS = (512, 256, 128)              # contraction dim
_TR_PREFS = (512, 256, 128, 64, 32, 16, 8)   # loss row tiles (f32)


def _pick(dim, prefs):
    for t in prefs:
        if dim >= t and dim % t == 0:
            return t
    return dim


# ----------------------------------------------------------------------------
# In-kernel math helpers (basic ops only -> guaranteed Mosaic lowering)
# ----------------------------------------------------------------------------

def _erf(x):
    # Abramowitz & Stegun 7.1.26 rational approximation, |err| <= 1.5e-7 (f32-accurate).
    a1, a2, a3, a4, a5 = 0.254829592, -0.284496736, 1.421413741, -1.453152027, 1.061405429
    p = 0.3275911
    ax = jnp.abs(x)
    t = 1.0 / (1.0 + p * ax)
    poly = t * (a1 + t * (a2 + t * (a3 + t * (a4 + t * a5))))
    y = 1.0 - poly * jnp.exp(-(ax * ax))
    return jnp.where(x >= 0.0, y, -y)


def _gelu(x):
    # exact (erf-based) GELU, matching PyTorch nn.GELU default
    return 0.5 * x * (1.0 + _erf(x * 0.7071067811865476))


# ----------------------------------------------------------------------------
# Tiled linear kernel: o = act(x @ w + b) [+ residual]
# ----------------------------------------------------------------------------

def _make_matmul_kernel(activation, has_residual):
    def kernel(*refs):
        if has_residual:
            x_ref, w_ref, b_ref, r_ref, o_ref, acc_ref = refs
        else:
            x_ref, w_ref, b_ref, o_ref, acc_ref = refs
            r_ref = None
        k = pl.program_id(2)

        @pl.when(k == 0)
        def _init():
            acc_ref[...] = jnp.zeros_like(acc_ref)

        acc_ref[...] += jnp.dot(
            x_ref[...].astype(jnp.bfloat16),       # bf16 MXU operands
            w_ref[...],                            # weights already bf16
            preferred_element_type=jnp.float32)    # f32 accumulation

        @pl.when(k == pl.num_programs(2) - 1)
        def _finalize():
            y = acc_ref[...] + b_ref[...]
            if activation == "gelu":
                y = _gelu(y)                       # fused GELU epilogue (EUP/VPU filler)
            if has_residual:
                y = y + r_ref[...]                 # fused residual add
            o_ref[...] = y
    return kernel


def pallas_linear(x, w, b, residual=None, activation=None):
    M, K = x.shape
    N = w.shape[1]
    tm, tn, tk = _pick(M, _TM_PREFS), _pick(N, _TN_PREFS), _pick(K, _TK_PREFS)
    grid = (M // tm, N // tn, K // tk)

    in_specs = [
        pl.BlockSpec((tm, tk), lambda i, j, k: (i, k)),
        pl.BlockSpec((tk, tn), lambda i, j, k: (k, j)),
        pl.BlockSpec((1, tn), lambda i, j, k: (0, j)),
    ]
    args = [x, w.astype(jnp.bfloat16), b.reshape(1, N).astype(jnp.float32)]
    if residual is not None:
        in_specs.append(pl.BlockSpec((tm, tn), lambda i, j, k: (i, j)))
        args.append(residual)

    return pl.pallas_call(
        _make_matmul_kernel(activation, residual is not None),
        out_shape=jax.ShapeDtypeStruct((M, N), jnp.float32),
        grid=grid,
        in_specs=in_specs,
        out_specs=pl.BlockSpec((tm, tn), lambda i, j, k: (i, j)),
        scratch_shapes=[pltpu.VMEM((tm, tn), jnp.float32)],
        compiler_params=pltpu.CompilerParams(
            dimension_semantics=("parallel", "parallel", "arbitrary"),
            vmem_limit_bytes=_VMEM_LIMIT),
    )(*args)


# ----------------------------------------------------------------------------
# Fused LayerNorm + linear kernel: o = act(LN(x) @ w + b)
# (LN needs the full feature row, so K is kept un-tiled per block)
# ----------------------------------------------------------------------------

def _make_ln_matmul_kernel(activation, eps):
    def kernel(x_ref, g_ref, bl_ref, w_ref, b_ref, o_ref):
        x = x_ref[...]                                            # f32 (tm, K)
        mu = jnp.mean(x, axis=-1, keepdims=True)
        var = jnp.mean((x - mu) ** 2, axis=-1, keepdims=True)     # biased var (PyTorch LN)
        h = (x - mu) * lax.rsqrt(var + eps) * g_ref[...] + bl_ref[...]
        y = jnp.dot(h.astype(jnp.bfloat16), w_ref[...],
                    preferred_element_type=jnp.float32) + b_ref[...]
        if activation == "gelu":
            y = _gelu(y)
        o_ref[...] = y
    return kernel


def pallas_ln_linear(x, g, bln, w, b, activation=None, eps=1e-5):
    M, K = x.shape
    N = w.shape[1]
    tm, tn = _pick(M, _TM_PREFS), _pick(N, _TN_PREFS)
    grid = (M // tm, N // tn)

    return pl.pallas_call(
        _make_ln_matmul_kernel(activation, eps),
        out_shape=jax.ShapeDtypeStruct((M, N), jnp.float32),
        grid=grid,
        in_specs=[
            pl.BlockSpec((tm, K), lambda i, j: (i, 0)),
            pl.BlockSpec((1, K), lambda i, j: (0, 0)),
            pl.BlockSpec((1, K), lambda i, j: (0, 0)),
            pl.BlockSpec((K, tn), lambda i, j: (0, j)),
            pl.BlockSpec((1, tn), lambda i, j: (0, j)),
        ],
        out_specs=pl.BlockSpec((tm, tn), lambda i, j: (i, j)),
        compiler_params=pltpu.CompilerParams(
            dimension_semantics=("parallel", "parallel"),
            vmem_limit_bytes=_VMEM_LIMIT),
    )(x, g.reshape(1, K), bln.reshape(1, K), w.astype(jnp.bfloat16),
      b.reshape(1, N).astype(jnp.float32))


# ----------------------------------------------------------------------------
# Attention kernel: one batch element per grid step, all heads in the block
# ----------------------------------------------------------------------------

def _attn_kernel(q_ref, k_ref, v_ref, o_ref, *, scale):
    q = q_ref[...].astype(jnp.bfloat16)        # (H, T, Dh)
    k = k_ref[...].astype(jnp.bfloat16)
    v = v_ref[...].astype(jnp.bfloat16)
    s = jnp.einsum("htd,hsd->hts", q, k,
                   preferred_element_type=jnp.float32) * scale          # (H, T, T)
    s = s - jnp.max(s, axis=-1, keepdims=True)                          # f32 softmax
    p = jnp.exp(s)
    p = p * pl.reciprocal(jnp.sum(p, axis=-1, keepdims=True), approx=True)
    o_ref[...] = jnp.einsum("hts,hsd->htd", p.astype(jnp.bfloat16), v,
                            preferred_element_type=jnp.float32)


def pallas_attention(q, k, v, scale):
    # q, k, v: (B, H, T, Dh) -> out (B, H, T, Dh); grid over batch only (heads grouped)
    B, H, T, Dh = q.shape
    spec = pl.BlockSpec((None, H, T, Dh), lambda b: (b, 0, 0, 0))
    return pl.pallas_call(
        partial(_attn_kernel, scale=scale),
        out_shape=jax.ShapeDtypeStruct((B, H, T, Dh), jnp.float32),
        grid=(B,),
        in_specs=[spec, spec, spec],
        out_specs=pl.BlockSpec((None, H, T, Dh), lambda b: (b, 0, 0, 0)),
        compiler_params=pltpu.CompilerParams(
            dimension_semantics=("parallel",),
            vmem_limit_bytes=_VMEM_LIMIT),
    )(q, k, v)


# ----------------------------------------------------------------------------
# Masked hybrid loss kernel: 0.4*MSE(sigmoid(pred), tgt) + 0.6*BCEWithLogits
# restricted to masked patches; tiled over rows with running accumulators.
# ----------------------------------------------------------------------------

def _make_loss_kernel(pos_weight, patch_dim):
    def kernel(pred_ref, tgt_ref, m_ref, o_ref, mse_acc, bce_acc, cnt_acc):
        i = pl.program_id(0)

        @pl.when(i == 0)
        def _init():
            mse_acc[...] = jnp.zeros_like(mse_acc)
            bce_acc[...] = jnp.zeros_like(bce_acc)
            cnt_acc[...] = jnp.zeros_like(cnt_acc)

        x = pred_ref[...]                         # (tr, P) logits
        t = tgt_ref[...]
        m = m_ref[...]                            # (tr, 1), 1 = masked patch
        e = jnp.exp(-jnp.abs(x))                  # reused by sigmoid and both softplus
        log1pe = jnp.log(1.0 + e)
        sig = jnp.where(x >= 0.0, 1.0, e) / (1.0 + e)        # stable sigmoid(x)
        sp_x = jnp.maximum(x, 0.0) + log1pe                  # softplus(x)  = -log(1-sig)
        sp_nx = jnp.maximum(-x, 0.0) + log1pe                # softplus(-x) = -log(sig)
        mse_el = (sig - t) ** 2
        bce_el = pos_weight * t * sp_nx + (1.0 - t) * sp_x

        mse_acc[...] += jnp.sum(m * mse_el)
        bce_acc[...] += jnp.sum(m * bce_el)
        cnt_acc[...] += jnp.sum(m)

        @pl.when(i == pl.num_programs(0) - 1)
        def _finalize():
            denom = jnp.maximum(cnt_acc[...], 1.0) * patch_dim   # guard mask.sum()==0
            o_ref[...] = (0.4 * mse_acc[...] + 0.6 * bce_acc[...]) / denom
    return kernel


def pallas_loss(pred, target, mask, pos_weight):
    N, L, P = pred.shape
    R = N * L
    tr = _pick(R, _TR_PREFS)
    out = pl.pallas_call(
        _make_loss_kernel(float(pos_weight), float(P)),
        out_shape=jax.ShapeDtypeStruct((1, 1), jnp.float32),
        grid=(R // tr,),
        in_specs=[
            pl.BlockSpec((tr, P), lambda i: (i, 0)),
            pl.BlockSpec((tr, P), lambda i: (i, 0)),
            pl.BlockSpec((tr, 1), lambda i: (i, 0)),
        ],
        out_specs=pl.BlockSpec((1, 1), lambda i: (0, 0)),
        scratch_shapes=[pltpu.VMEM((1, 1), jnp.float32)] * 3,
        compiler_params=pltpu.CompilerParams(
            dimension_semantics=("arbitrary",),
            vmem_limit_bytes=_VMEM_LIMIT),
    )(pred.reshape(R, P), target.reshape(R, P).astype(jnp.float32),
      mask.reshape(R, 1))
    return out[0, 0]


# ----------------------------------------------------------------------------
# Plain-JAX glue: patchify, sincos pos-embed, parameter init, model assembly
# ----------------------------------------------------------------------------

def patchify(imgs, p):
    # imgs: (N, 1, H, W) -> (N, L, p*p)  (same einsum convention as the module)
    N, C, H, W = imgs.shape
    h, w = H // p, W // p
    x = imgs.reshape(N, C, h, p, w, p)
    x = jnp.einsum("nchpwq->nhwpqc", x)
    return x.reshape(N, h * w, p * p * C)


def _get_1d_sincos(embed_dim, pos):
    omega = np.arange(embed_dim // 2, dtype=np.float64) / (embed_dim / 2.0)
    omega = 1.0 / 10000 ** omega
    pos = pos.reshape(-1)
    out = np.einsum("m,d->md", pos, omega)
    return np.concatenate([np.sin(out), np.cos(out)], axis=1)


def get_2d_sincos_pos_embed(embed_dim, grid_size, cls_token=False):
    gh = np.arange(grid_size, dtype=np.float64)
    gw = np.arange(grid_size, dtype=np.float64)
    grid = np.meshgrid(gw, gh)
    grid = np.stack(grid, axis=0).reshape([2, 1, grid_size, grid_size])
    emb_h = _get_1d_sincos(embed_dim // 2, grid[0])
    emb_w = _get_1d_sincos(embed_dim // 2, grid[1])
    emb = np.concatenate([emb_h, emb_w], axis=1)
    if cls_token:
        emb = np.concatenate([np.zeros([1, embed_dim]), emb], axis=0)
    return jnp.asarray(emb, dtype=jnp.float32)


def xavier_uniform(key, shape):
    fan_in, fan_out = shape
    limit = math.sqrt(6.0 / (fan_in + fan_out))
    return jax.random.uniform(key, shape, jnp.float32, -limit, limit)


def make_block_params(key, dim, mlp_ratio):
    hidden = int(dim * mlp_ratio)
    k = jax.random.split(key, 4)
    return dict(
        ln1_g=jnp.ones((1, dim), jnp.float32), ln1_b=jnp.zeros((1, dim), jnp.float32),
        qkv_w=xavier_uniform(k[0], (dim, 3 * dim)), qkv_b=jnp.zeros((1, 3 * dim), jnp.float32),
        proj_w=xavier_uniform(k[1], (dim, dim)), proj_b=jnp.zeros((1, dim), jnp.float32),
        ln2_g=jnp.ones((1, dim), jnp.float32), ln2_b=jnp.zeros((1, dim), jnp.float32),
        fc1_w=xavier_uniform(k[2], (dim, hidden)), fc1_b=jnp.zeros((1, hidden), jnp.float32),
        fc2_w=xavier_uniform(k[3], (hidden, dim)), fc2_b=jnp.zeros((1, dim), jnp.float32),
    )


def init_mae_params(key, cfg):
    p = cfg["patch_size"]
    D, Dd = cfg["embed_dim"], cfg["dec_embed_dim"]
    L = cfg["num_patches"]
    keys = jax.random.split(key, 5 + cfg["depth"] + cfg["dec_depth"])
    return dict(
        # PatchEmbed conv (D, 1, p, p) stored as (p*p, D) matmul weight
        patch_w=xavier_uniform(keys[0], (p * p * cfg["in_chans"], D)),
        patch_b=jnp.zeros((1, D), jnp.float32),
        cls_token=0.02 * jax.random.normal(keys[1], (1, 1, D), jnp.float32),
        mask_token=0.02 * jax.random.normal(keys[2], (1, 1, Dd), jnp.float32),
        pos_embed=get_2d_sincos_pos_embed(D, int(L ** 0.5), cls_token=True)[None],
        dec_pos_embed=get_2d_sincos_pos_embed(Dd, int(L ** 0.5), cls_token=True)[None],
        enc_ln_g=jnp.ones((1, D), jnp.float32), enc_ln_b=jnp.zeros((1, D), jnp.float32),
        dec_embed_w=xavier_uniform(keys[3], (D, Dd)), dec_embed_b=jnp.zeros((1, Dd), jnp.float32),
        dec_ln_g=jnp.ones((1, Dd), jnp.float32), dec_ln_b=jnp.zeros((1, Dd), jnp.float32),
        dec_pred_w=xavier_uniform(keys[4], (Dd, p * p * cfg["in_chans"])),
        dec_pred_b=jnp.zeros((1, p * p * cfg["in_chans"]), jnp.float32),
        enc_blocks=[make_block_params(keys[5 + i], D, cfg["mlp_ratio"])
                    for i in range(cfg["depth"])],
        dec_blocks=[make_block_params(keys[5 + cfg["depth"] + i], Dd, cfg["mlp_ratio"])
                    for i in range(cfg["dec_depth"])],
    )


def block_forward(x, bp, num_heads):
    B, T, D = x.shape
    Dh = D // num_heads
    x2 = x.reshape(B * T, D)

    # ---- attention branch: LN1 fused into the QKV projection ----
    qkv = pallas_ln_linear(x2, bp["ln1_g"], bp["ln1_b"], bp["qkv_w"], bp["qkv_b"])
    qkv = qkv.reshape(B, T, 3, num_heads, Dh)
    # TODO(synk): head split/merge transposes around attention remain in XLA glue.
    qkv = jnp.transpose(qkv, (2, 0, 3, 1, 4))                 # (3, B, H, T, Dh)
    o = pallas_attention(qkv[0], qkv[1], qkv[2], Dh ** -0.5)  # (B, H, T, Dh)
    o = jnp.transpose(o, (0, 2, 1, 3)).reshape(B * T, D)
    # output projection with fused residual add
    x2 = pallas_linear(o, bp["proj_w"], bp["proj_b"], residual=x2)

    # ---- MLP branch: LN2 + fc1 + GELU fused; fc2 with fused residual ----
    h = pallas_ln_linear(x2, bp["ln2_g"], bp["ln2_b"], bp["fc1_w"], bp["fc1_b"],
                         activation="gelu")
    x2 = pallas_linear(h, bp["fc2_w"], bp["fc2_b"], residual=x2)
    return x2.reshape(B, T, D)


def mae_forward(imgs, params, mask_key, cfg, mask_ratio=0.75):
    p = cfg["patch_size"]
    L = cfg["num_patches"]
    D, Dd = cfg["embed_dim"], cfg["dec_embed_dim"]
    B = imgs.shape[0]

    # ---- encoder --------------------------------------------------------
    # PatchEmbed: Conv2d(kernel=stride=p) == patchify + linear (MXU kernel)
    # TODO(synk): patch-dim (p*p=16) tensors are not padded to 128 lanes here.
    xp = patchify(imgs, p)                                            # (B, L, p*p)
    x = pallas_linear(xp.reshape(B * L, p * p * cfg["in_chans"]),
                      params["patch_w"], params["patch_b"]).reshape(B, L, D)
    x = x + params["pos_embed"][:, 1:, :]

    # random masking (per-sample shuffle by argsort of uniform noise) — XLA glue
    len_keep = int(L * (1 - mask_ratio))
    noise = jax.random.uniform(mask_key, (B, L), jnp.float32)
    ids_shuffle = jnp.argsort(noise, axis=1)
    ids_restore = jnp.argsort(ids_shuffle, axis=1)
    ids_keep = ids_shuffle[:, :len_keep]
    x = jnp.take_along_axis(
        x, jnp.broadcast_to(ids_keep[:, :, None], (B, len_keep, D)), axis=1)
    mask = jnp.ones((B, L), jnp.float32).at[:, :len_keep].set(0.0)
    mask = jnp.take_along_axis(mask, ids_restore, axis=1)

    cls_tok = params["cls_token"] + params["pos_embed"][:, :1, :]
    x = jnp.concatenate([jnp.broadcast_to(cls_tok, (B, 1, D)), x], axis=1)
    for bp in params["enc_blocks"]:
        x = block_forward(x, bp, cfg["num_heads"])
    T = x.shape[1]
    # encoder final LayerNorm fused with decoder_embed projection
    x = pallas_ln_linear(x.reshape(B * T, D), params["enc_ln_g"], params["enc_ln_b"],
                         params["dec_embed_w"], params["dec_embed_b"]).reshape(B, T, Dd)

    # ---- decoder --------------------------------------------------------
    n_mask = L + 1 - T
    mask_tokens = jnp.broadcast_to(params["mask_token"], (B, n_mask, Dd))
    x_ = jnp.concatenate([x[:, 1:, :], mask_tokens], axis=1)          # (B, L, Dd)
    x_ = jnp.take_along_axis(
        x_, jnp.broadcast_to(ids_restore[:, :, None], (B, L, Dd)), axis=1)
    x = jnp.concatenate([x[:, :1, :], x_], axis=1)                    # (B, L+1, Dd)
    x = x + params["dec_pos_embed"]
    for bp in params["dec_blocks"]:
        x = block_forward(x, bp, cfg["dec_num_heads"])
    Td = x.shape[1]
    # decoder_norm fused with decoder_pred projection
    pred = pallas_ln_linear(x.reshape(B * Td, Dd), params["dec_ln_g"], params["dec_ln_b"],
                            params["dec_pred_w"], params["dec_pred_b"]
                            ).reshape(B, Td, p * p * cfg["in_chans"])
    pred = pred[:, 1:, :]                                             # (B, L, p*p)

    # ---- loss (hybrid masked MSE + BCEWithLogits), fully in Pallas ------
    target = patchify(imgs, p)
    loss = pallas_loss(pred, target, mask, GLOBAL_POS_WEIGHT)
    return loss, pred, mask


# ----------------------------------------------------------------------------
# main
# ----------------------------------------------------------------------------

if __name__ == "__main__":
    # small but structurally faithful config
    cfg = dict(
        img_size=16, patch_size=4, in_chans=1,
        embed_dim=32, depth=2, num_heads=4,
        dec_embed_dim=32, dec_depth=1, dec_num_heads=4,
        mlp_ratio=4.0,
    )
    cfg["num_patches"] = (cfg["img_size"] // cfg["patch_size"]) ** 2  # 16

    root = jax.random.PRNGKey(0)
    k_param, k_img, k_mask = jax.random.split(root, 3)

    params = init_mae_params(k_param, cfg)

    # binary "grayscale" images, NCHW (N, 1, H, W)
    imgs = (jax.random.uniform(k_img, (2, 1, cfg["img_size"], cfg["img_size"]))
            > 0.5).astype(jnp.float32)

    forward = jax.jit(partial(mae_forward, cfg=cfg, mask_ratio=0.75))
    loss, pred, mask = forward(imgs, params, k_mask)
    jax.block_until_ready((loss, pred, mask))

    assert pred.shape == (2, cfg["num_patches"], cfg["patch_size"] ** 2)
    assert mask.shape == (2, cfg["num_patches"])
    assert bool(jnp.isfinite(loss))
    print("KERNEL_OK")
</pallas_src>

<mosaic_0001>
module attributes {stable_mosaic.version = 11 : i64} {
  func.func @kernel(%arg0: i32, %arg1: i32, %arg2: i32, %arg3: memref<32x16xf32, #tpu.memory_space<vmem>>, %arg4: memref<16x32xbf16, #tpu.memory_space<vmem>>, %arg5: memref<1x32xf32, #tpu.memory_space<vmem>>, %arg6: memref<32x32xf32, #tpu.memory_space<vmem>>, %arg7: memref<32x32xf32, #tpu.memory_space<vmem>>) attributes {dimension_semantics = [#tpu.dimension_semantics<parallel>, #tpu.dimension_semantics<parallel>, #tpu.dimension_semantics<arbitrary>], iteration_bounds = array<i64: 1, 1, 1>, scalar_prefetch = 0 : i64, scratch_operands = 1 : i64, tpu.core_type = #tpu.core_type<tc>, window_params = [{transform_indices = @transform_0, window_bounds = array<i64: 32, 16>}, {transform_indices = @transform_1, window_bounds = array<i64: 16, 32>}, {transform_indices = @transform_2, window_bounds = array<i64: 1, 32>}, {transform_indices = @transform_3, window_bounds = array<i64: 32, 32>}]} {
    %c0_i32 = arith.constant 0 : i32
    %0 = arith.cmpi eq, %arg2, %c0_i32 : i32
    %1 = arith.extui %0 : i1 to i32
    %c0_i32_0 = arith.constant 0 : i32
    %2 = arith.cmpi ne, %1, %c0_i32_0 : i32
    scf.if %2 {
      %cst_10 = arith.constant 0.000000e+00 : f32
      %13 = vector.broadcast %cst_10 : f32 to vector<32x32xf32>
      %c0_11 = arith.constant 0 : index
      %c0_12 = arith.constant 0 : index
      %14 = vector.load %arg7[%c0_11, %c0_12] : memref<32x32xf32, #tpu.memory_space<vmem>>, vector<32x32xf32>
      tpu.vector_store %arg7[%c0_11, %c0_12], %13 {strides = array<i32>} : memref<32x32xf32, #tpu.memory_space<vmem>>, vector<32x32xf32>,
    } else {
    }
    %c0 = arith.constant 0 : index
    %c0_1 = arith.constant 0 : index
    %3 = vector.load %arg7[%c0, %c0_1] : memref<32x32xf32, #tpu.memory_space<vmem>>, vector<32x32xf32>
    %c0_2 = arith.constant 0 : index
    %c0_3 = arith.constant 0 : index
    %4 = vector.load %arg3[%c0_2, %c0_3] : memref<32x16xf32, #tpu.memory_space<vmem>>, vector<32x16xf32>
    %5 = arith.truncf %4 : vector<32x16xf32> to vector<32x16xbf16>
    %c0_4 = arith.constant 0 : index
    %c0_5 = arith.constant 0 : index
    %6 = vector.load %arg4[%c0_4, %c0_5] : memref<16x32xbf16, #tpu.memory_space<vmem>>, vector<16x32xbf16>
    %cst = arith.constant dense<0.000000e+00> : vector<32x32xf32>
    %7 = tpu.matmul %5, %6, %cst {dimension_numbers = #tpu.dot_dimension_numbers<[1], [0], [0], [1], [0, 0, 1, 1], [], []>} : vector<32x16xbf16>, vector<16x32xbf16>, vector<32x32xf32> -> vector<32x32xf32>
    %8 = arith.addf %3, %7 : vector<32x32xf32>
    %c0_6 = arith.constant 0 : index
    %c0_7 = arith.constant 0 : index
    %9 = vector.load %arg7[%c0_6, %c0_7] : memref<32x32xf32, #tpu.memory_space<vmem>>, vector<32x32xf32>
    tpu.vector_store %arg7[%c0_6, %c0_7], %8 {strides = array<i32>} : memref<32x32xf32, #tpu.memory_space<vmem>>, vector<32x32xf32>,
    %c0_i32_8 = arith.constant 0 : i32
    %10 = arith.cmpi eq, %arg2, %c0_i32_8 : i32
    %11 = arith.extui %10 : i1 to i32
    %c0_i32_9 = arith.constant 0 : i32
    %12 = arith.cmpi ne, %11, %c0_i32_9 : i32
    scf.if %12 {
      %c0_10 = arith.constant 0 : index
      %c0_11 = arith.constant 0 : index
      %13 = vector.load %arg7[%c0_10, %c0_11] : memref<32x32xf32, #tpu.memory_space<vmem>>, vector<32x32xf32>
      %c0_12 = arith.constant 0 : index
      %c0_13 = arith.constant 0 : index
      %14 = vector.load %arg5[%c0_12, %c0_13] : memref<1x32xf32, #tpu.memory_space<vmem>>, vector<1x32xf32>
      %15 = vector.broadcast %14 : vector<1x32xf32> to vector<32x32xf32>
      %16 = arith.addf %13, %15 : vector<32x32xf32>
      %c0_14 = arith.constant 0 : index
      %c0_15 = arith.constant 0 : index
      %17 = vector.load %arg6[%c0_14, %c0_15] : memref<32x32xf32, #tpu.memory_space<vmem>>, vector<32x32xf32>
      tpu.vector_store %arg6[%c0_14, %c0_15], %16 {strides = array<i32>} : memref<32x32xf32, #tpu.memory_space<vmem>>, vector<32x32xf32>,
    } else {
    }
    return
  }
  func.func @transform_0(%arg0: i32, %arg1: i32, %arg2: i32) -> (i32, i32) {
    %c0_i32 = arith.constant 0 : i32
    return %arg0, %arg2 : i32, i32
  }
  func.func @transform_1(%arg0: i32, %arg1: i32, %arg2: i32) -> (i32, i32) {
    %c0_i32 = arith.constant 0 : i32
    return %arg2, %arg1 : i32, i32
  }
  func.func @transform_2(%arg0: i32, %arg1: i32, %arg2: i32) -> (i32, i32) {
    %c0_i32 = arith.constant 0 : i32
    %c0_i32_0 = arith.constant 0 : i32
    return %c0_i32, %arg1 : i32, i32
  }
  func.func @transform_3(%arg0: i32, %arg1: i32, %arg2: i32) -> (i32, i32) {
    %c0_i32 = arith.constant 0 : i32
    return %arg0, %arg1 : i32, i32
  }
}

module attributes {stable_mosaic.version = 11 : i64} {
  func.func @kernel(%arg0: i32, %arg1: i32, %arg2: memref<10x32xf32, #tpu.memory_space<vmem>>, %arg3: memref<1x32xf32, #tpu.memory_space<vmem>>, %arg4: memref<1x32xf32, #tpu.memory_space<vmem>>, %arg5: memref<32x96xbf16, #tpu.memory_space<vmem>>, %arg6: memref<1x96xf32, #tpu.memory_space<vmem>>, %arg7: memref<10x96xf32, #tpu.memory_space<vmem>>) attributes {dimension_semantics = [#tpu.dimension_semantics<parallel>, #tpu.dimension_semantics<parallel>], iteration_bounds = array<i64: 1, 1>, scalar_prefetch = 0 : i64, scratch_operands = 0 : i64, tpu.core_type = #tpu.core_type<tc>, window_params = [{transform_indices = @transform_0, window_bounds = array<i64: 10, 32>}, {pipeline_mode = #tpu.pipeline_mode<synchronous>, transform_indices = @transform_1, window_bounds = array<i64: 1, 32>}, {pipeline_mode = #tpu.pipeline_mode<synchronous>, transform_indices = @transform_2, window_bounds = array<i64: 1, 32>}, {transform_indices = @transform_3, window_bounds = array<i64: 32, 96>}, {transform_indices = @transform_4, window_bounds = array<i64: 1, 96>}, {transform_indices = @transform_5, window_bounds = array<i64: 10, 96>}]} {
    %c0 = arith.constant 0 : index
    %c0_0 = arith.constant 0 : index
    %0 = vector.load %arg2[%c0, %c0_0] : memref<10x32xf32, #tpu.memory_space<vmem>>, vector<10x32xf32>
    %cst = arith.constant dense<0.000000e+00> : vector<10xf32>
    %1 = vector.multi_reduction <add>, %0, %cst [1] : vector<10x32xf32> to vector<10xf32>
    %2 = vector.shape_cast %1 : vector<10xf32> to vector<10x1xf32>
    %cst_1 = arith.constant 3.200000e+01 : f32
    %3 = vector.broadcast %cst_1 : f32 to vector<10x1xf32>
    %4 = arith.divf %2, %3 : vector<10x1xf32>
    %5 = vector.broadcast %4 : vector<10x1xf32> to vector<10x32xf32>
    %6 = arith.subf %0, %5 : vector<10x32xf32>
    %7 = arith.mulf %6, %6 : vector<10x32xf32>
    %cst_2 = arith.constant dense<0.000000e+00> : vector<10xf32>
    %8 = vector.multi_reduction <add>, %7, %cst_2 [1] : vector<10x32xf32> to vector<10xf32>
    %9 = vector.shape_cast %8 : vector<10xf32> to vector<10x1xf32>
    %cst_3 = arith.constant 3.200000e+01 : f32
    %10 = vector.broadcast %cst_3 : f32 to vector<10x1xf32>
    %11 = arith.divf %9, %10 : vector<10x1xf32>
    %12 = vector.broadcast %4 : vector<10x1xf32> to vector<10x32xf32>
    %13 = arith.subf %0, %12 : vector<10x32xf32>
    %cst_4 = arith.constant 9.99999974E-6 : f32
    %14 = vector.broadcast %cst_4 : f32 to vector<10x1xf32>
    %15 = arith.addf %11, %14 : vector<10x1xf32>
    %16 = math.rsqrt %15 : vector<10x1xf32>
    %17 = vector.broadcast %16 : vector<10x1xf32> to vector<10x32xf32>
    %18 = arith.mulf %13, %17 : vector<10x32xf32>
    %c0_5 = arith.constant 0 : index
    %c0_6 = arith.constant 0 : index
    %19 = vector.load %arg3[%c0_5, %c0_6] : memref<1x32xf32, #tpu.memory_space<vmem>>, vector<1x32xf32>
    %20 = vector.broadcast %19 : vector<1x32xf32> to vector<10x32xf32>
    %21 = arith.mulf %18, %20 : vector<10x32xf32>
    %c0_7 = arith.constant 0 : index
    %c0_8 = arith.constant 0 : index
    %22 = vector.load %arg4[%c0_7, %c0_8] : memref<1x32xf32, #tpu.memory_space<vmem>>, vector<1x32xf32>
    %23 = vector.broadcast %22 : vector<1x32xf32> to vector<10x32xf32>
    %24 = arith.addf %21, %23 : vector<10x32xf32>
    %25 = arith.truncf %24 : vector<10x32xf32> to vector<10x32xbf16>
    %c0_9 = arith.constant 0 : index
    %c0_10 = arith.constant 0 : index
    %26 = vector.load %arg5[%c0_9, %c0_10] : memref<32x96xbf16, #tpu.memory_space<vmem>>, vector<32x96xbf16>
    %cst_11 = arith.constant dense<0.000000e+00> : vector<10x96xf32>
    %27 = tpu.matmul %25, %26, %cst_11 {dimension_numbers = #tpu.dot_dimension_numbers<[1], [0], [0], [1], [0, 0, 1, 1], [], []>} : vector<10x32xbf16>, vector<32x96xbf16>, vector<10x96xf32> -> vector<10x96xf32>
    %c0_12 = arith.constant 0 : index
    %c0_13 = arith.constant 0 : index
    %28 = vector.load %arg6[%c0_12, %c0_13] : memref<1x96xf32, #tpu.memory_space<vmem>>, vector<1x96xf32>
    %29 = vector.broadcast %28 : vector<1x96xf32> to vector<10x96xf32>
    %30 = arith.addf %27, %29 : vector<10x96xf32>
    %c0_14 = arith.constant 0 : index
    %c0_15 = arith.constant 0 : index
    %31 = vector.load %arg7[%c0_14, %c0_15] : memref<10x96xf32, #tpu.memory_space<vmem>>, vector<10x96xf32>
    tpu.vector_store %arg7[%c0_14, %c0_15], %30 {strides = array<i32>} : memref<10x96xf32, #tpu.memory_space<vmem>>, vector<10x96xf32>,
    return
  }
  func.func @transform_0(%arg0: i32, %arg1: i32) -> (i32, i32) {
    %c0_i32 = arith.constant 0 : i32
    %c0_i32_0 = arith.constant 0 : i32
    return %arg0, %c0_i32 : i32, i32
  }
  func.func @transform_1(%arg0: i32, %arg1: i32) -> (i32, i32) {
    %c0_i32 = arith.constant 0 : i32
    %c0_i32_0 = arith.constant 0 : i32
    %c0_i32_1 = arith.constant 0 : i32
    return %c0_i32, %c0_i32_0 : i32, i32
  }
  func.func @transform_2(%arg0: i32, %arg1: i32) -> (i32, i32) {
    %c0_i32 = arith.constant 0 : i32
    %c0_i32_0 = arith.constant 0 : i32
    %c0_i32_1 = arith.constant 0 : i32
    return %c0_i32, %c0_i32_0 : i32, i32
  }
  func.func @transform_3(%arg0: i32, %arg1: i32) -> (i32, i32) {
    %c0_i32 = arith.constant 0 : i32
    %c0_i32_0 = arith.constant 0 : i32
    return %c0_i32, %arg1 : i32, i32
  }
  func.func @transform_4(%arg0: i32, %arg1: i32) -> (i32, i32) {
    %c0_i32 = arith.constant 0 : i32
    %c0_i32_0 = arith.constant 0 : i32
    return %c0_i32, %arg1 : i32, i32
  }
  func.func @transform_5(%arg0: i32, %arg1: i32) -> (i32, i32) {
    %c0_i32 = arith.constant 0 : i32
    return %arg0, %arg1 : i32, i32
  }
}

module attributes {stable_mosaic.version = 11 : i64} {
  func.func @_attn_kernel(%arg0: i32, %arg1: memref<1x4x5x8xf32, #tpu.memory_space<vmem>>, %arg2: memref<1x4x5x8xf32, #tpu.memory_space<vmem>>, %arg3: memref<1x4x5x8xf32, #tpu.memory_space<vmem>>, %arg4: memref<1x4x5x8xf32, #tpu.memory_space<vmem>>) attributes {dimension_semantics = [#tpu.dimension_semantics<parallel>], iteration_bounds = array<i64: 2>, scalar_prefetch = 0 : i64, scratch_operands = 0 : i64, tpu.core_type = #tpu.core_type<tc>, window_params = [{transform_indices = @transform_0, window_bounds = array<i64: 1, 4, 5, 8>}, {transform_indices = @transform_1, window_bounds = array<i64: 1, 4, 5, 8>}, {transform_indices = @transform_2, window_bounds = array<i64: 1, 4, 5, 8>}, {transform_indices = @transform_3, window_bounds = array<i64: 1, 4, 5, 8>}]} {
    %c0 = arith.constant 0 : index
    %c0_0 = arith.constant 0 : index
    %c0_1 = arith.constant 0 : index
    %c0_2 = arith.constant 0 : index
    %0 = vector.load %arg1[%c0, %c0_0, %c0_1, %c0_2] : memref<1x4x5x8xf32, #tpu.memory_space<vmem>>, vector<1x4x5x8xf32>
    %1 = vector.shape_cast %0 : vector<1x4x5x8xf32> to vector<4x5x8xf32>
    %2 = arith.truncf %1 : vector<4x5x8xf32> to vector<4x5x8xbf16>
    %c0_3 = arith.constant 0 : index
    %c0_4 = arith.constant 0 : index
    %c0_5 = arith.constant 0 : index
    %c0_6 = arith.constant 0 : index
    %3 = vector.load %arg2[%c0_3, %c0_4, %c0_5, %c0_6] : memref<1x4x5x8xf32, #tpu.memory_space<vmem>>, vector<1x4x5x8xf32>
    %4 = vector.shape_cast %3 : vector<1x4x5x8xf32> to vector<4x5x8xf32>
    %5 = arith.truncf %4 : vector<4x5x8xf32> to vector<4x5x8xbf16>
    %c0_7 = arith.constant 0 : index
    %c0_8 = arith.constant 0 : index
    %c0_9 = arith.constant 0 : index
    %c0_10 = arith.constant 0 : index
    %6 = vector.load %arg3[%c0_7, %c0_8, %c0_9, %c0_10] : memref<1x4x5x8xf32, #tpu.memory_space<vmem>>, vector<1x4x5x8xf32>
    %7 = vector.shape_cast %6 : vector<1x4x5x8xf32> to vector<4x5x8xf32>
    %8 = arith.truncf %7 : vector<4x5x8xf32> to vector<4x5x8xbf16>
    "tpu.trace_start"() <{level = 10 : i32, message = "htd,hsd->hts"}> : () -> ()
    %cst = arith.constant dense<0.000000e+00> : vector<4x5x5xf32>
    %9 = tpu.matmul %2, %5, %cst {dimension_numbers = #tpu.dot_dimension_numbers<[2], [2], [1], [1], [0, 0, 0, 1, 1, 1], [0], [0]>} : vector<4x5x8xbf16>, vector<4x5x8xbf16>, vector<4x5x5xf32> -> vector<4x5x5xf32>
    "tpu.trace_stop"() : () -> ()
    %cst_11 = arith.constant 0.353553385 : f32
    %10 = vector.broadcast %cst_11 : f32 to vector<4x5x5xf32>
    %11 = arith.mulf %9, %10 : vector<4x5x5xf32>
    %cst_12 = arith.constant dense<0xFF800000> : vector<4x5xf32>
    %12 = vector.multi_reduction <maximumf>, %11, %cst_12 [2] : vector<4x5x5xf32> to vector<4x5xf32>
    %13 = vector.shape_cast %12 : vector<4x5xf32> to vector<4x5x1xf32>
    %14 = vector.broadcast %13 : vector<4x5x1xf32> to vector<4x5x5xf32>
    %15 = arith.subf %11, %14 : vector<4x5x5xf32>
    %16 = math.exp %15 : vector<4x5x5xf32>
    %cst_13 = arith.constant dense<0.000000e+00> : vector<4x5xf32>
    %17 = vector.multi_reduction <add>, %16, %cst_13 [2] : vector<4x5x5xf32> to vector<4x5xf32>
    %18 = vector.shape_cast %17 : vector<4x5xf32> to vector<4x5x1xf32>
    %19 = tpu.reciprocal %18 {approx = true} : vector<4x5x1xf32> -> vector<4x5x1xf32>
    %20 = vector.broadcast %19 : vector<4x5x1xf32> to vector<4x5x5xf32>
    %21 = arith.mulf %16, %20 : vector<4x5x5xf32>
    %22 = arith.truncf %21 : vector<4x5x5xf32> to vector<4x5x5xbf16>
    "tpu.trace_start"() <{level = 10 : i32, message = "hts,hsd->htd"}> : () -> ()
    %cst_14 = arith.constant dense<0.000000e+00> : vector<4x5x8xf32>
    %23 = tpu.matmul %22, %8, %cst_14 {dimension_numbers = #tpu.dot_dimension_numbers<[2], [1], [1], [2], [0, 0, 0, 1, 1, 2], [0], [0]>} : vector<4x5x5xbf16>, vector<4x5x8xbf16>, vector<4x5x8xf32> -> vector<4x5x8xf32>
    "tpu.trace_stop"() : () -> ()
    %c0_15 = arith.constant 0 : index
    %c0_16 = arith.constant 0 : index
    %c0_17 = arith.constant 0 : index
    %c0_18 = arith.constant 0 : index
    %24 = vector.load %arg4[%c0_15, %c0_16, %c0_17, %c0_18] : memref<1x4x5x8xf32, #tpu.memory_space<vmem>>, vector<1x4x5x8xf32>
    %25 = vector.shape_cast %24 : vector<1x4x5x8xf32> to vector<4x5x8xf32>
    %26 = vector.shape_cast %23 : vector<4x5x8xf32> to vector<1x4x5x8xf32>
    tpu.vector_store %arg4[%c0_15, %c0_16, %c0_17, %c0_18], %26 {strides = array<i32>} : memref<1x4x5x8xf32, #tpu.memory_space<vmem>>, vector<1x4x5x8xf32>,
    return
  }
  func.func @transform_0(%arg0: i32) -> (i32, i32, i32, i32) {
    %c0_i32 = arith.constant 0 : i32
    %c0_i32_0 = arith.constant 0 : i32
    %c0_i32_1 = arith.constant 0 : i32
    %c0_i32_2 = arith.constant 0 : i32
    return %arg0, %c0_i32, %c0_i32_0, %c0_i32_1 : i32, i32, i32, i32
  }
  func.func @transform_1(%arg0: i32) -> (i32, i32, i32, i32) {
    %c0_i32 = arith.constant 0 : i32
    %c0_i32_0 = arith.constant 0 : i32
    %c0_i32_1 = arith.constant 0 : i32
    %c0_i32_2 = arith.constant 0 : i32
    return %arg0, %c0_i32, %c0_i32_0, %c0_i32_1 : i32, i32, i32, i32
  }
  func.func @transform_2(%arg0: i32) -> (i32, i32, i32, i32) {
    %c0_i32 = arith.constant 0 : i32
    %c0_i32_0 = arith.constant 0 : i32
    %c0_i32_1 = arith.constant 0 : i32
    %c0_i32_2 = arith.constant 0 : i32
    return %arg0, %c0_i32, %c0_i32_0, %c0_i32_1 : i32, i32, i32, i32
  }
  func.func @transform_3(%arg0: i32) -> (i32, i32, i32, i32) {
    %c0_i32 = arith.constant 0 : i32
    %c0_i32_0 = arith.constant 0 : i32
    %c0_i32_1 = arith.constant 0 : i32
    %c0_i32_2 = arith.constant 0 : i32
    return %arg0, %c0_i32, %c0_i32_0, %c0_i32_1 : i32, i32, i32, i32
  }
}

module attributes {stable_mosaic.version = 11 : i64} {
  func.func @kernel(%arg0: i32, %arg1: i32, %arg2: i32, %arg3: memref<10x32xf32, #tpu.memory_space<vmem>>, %arg4: memref<32x32xbf16, #tpu.memory_space<vmem>>, %arg5: memref<1x32xf32, #tpu.memory_space<vmem>>, %arg6: memref<10x32xf32, #tpu.memory_space<vmem>>, %arg7: memref<10x32xf32, #tpu.memory_space<vmem>>, %arg8: memref<10x32xf32, #tpu.memory_space<vmem>>) attributes {dimension_semantics = [#tpu.dimension_semantics<parallel>, #tpu.dimension_semantics<parallel>, #tpu.dimension_semantics<arbitrary>], iteration_bounds = array<i64: 1, 1, 1>, scalar_prefetch = 0 : i64, scratch_operands = 1 : i64, tpu.core_type = #tpu.core_type<tc>, window_params = [{transform_indices = @transform_0, window_bounds = array<i64: 10, 32>}, {transform_indices = @transform_1, window_bounds = array<i64: 32, 32>}, {transform_indices = @transform_2, window_bounds = array<i64: 1, 32>}, {transform_indices = @transform_3, window_bounds = array<i64: 10, 32>}, {transform_indices = @transform_4, window_bounds = array<i64: 10, 32>}]} {
    %c0_i32 = arith.constant 0 : i32
    %0 = arith.cmpi eq, %arg2, %c0_i32 : i32
    %1 = arith.extui %0 : i1 to i32
    %c0_i32_0 = arith.constant 0 : i32
    %2 = arith.cmpi ne, %1, %c0_i32_0 : i32
    scf.if %2 {
      %cst_10 = arith.constant 0.000000e+00 : f32
      %13 = vector.broadcast %cst_10 : f32 to vector<10x32xf32>
      %c0_11 = arith.constant 0 : index
      %c0_12 = arith.constant 0 : index
      %14 = vector.load %arg8[%c0_11, %c0_12] : memref<10x32xf32, #tpu.memory_space<vmem>>, vector<10x32xf32>
      tpu.vector_store %arg8[%c0_11, %c0_12], %13 {strides = array<i32>} : memref<10x32xf32, #tpu.memory_space<vmem>>, vector<10x32xf32>,
    } else {
    }
    %c0 = arith.constant 0 : index
    %c0_1 = arith.constant 0 : index
    %3 = vector.load %arg8[%c0, %c0_1] : memref<10x32xf32, #tpu.memory_space<vmem>>, vector<10x32xf32>
    %c0_2 = arith.constant 0 : index
    %c0_3 = arith.constant 0 : index
    %4 = vector.load %arg3[%c0_2, %c0_3] : memref<10x32xf32, #tpu.memory_space<vmem>>, vector<10x32xf32>
    %5 = arith.truncf %4 : vector<10x32xf32> to vector<10x32xbf16>
    %c0_4 = arith.constant 0 : index
    %c0_5 = arith.constant 0 : index
    %6 = vector.load %arg4[%c0_4, %c0_5] : memref<32x32xbf16, #tpu.memory_space<vmem>>, vector<32x32xbf16>
    %cst = arith.constant dense<0.000000e+00> : vector<10x32xf32>
    %7 = tpu.matmul %5, %6, %cst {dimension_numbers = #tpu.dot_dimension_numbers<[1], [0], [0], [1], [0, 0, 1, 1], [], []>} : vector<10x32xbf16>, vector<32x32xbf16>, vector<10x32xf32> -> vector<10x32xf32>
    %8 = arith.addf %3, %7 : vector<10x32xf32>
    %c0_6 = arith.constant 0 : index
    %c0_7 = arith.constant 0 : index
    %9 = vector.load %arg8[%c0_6, %c0_7] : memref<10x32xf32, #tpu.memory_space<vmem>>, vector<10x32xf32>
    tpu.vector_store %arg8[%c0_6, %c0_7], %8 {strides = array<i32>} : memref<10x32xf32, #tpu.memory_space<vmem>>, vector<10x32xf32>,
    %c0_i32_8 = arith.constant 0 : i32
    %10 = arith.cmpi eq, %arg2, %c0_i32_8 : i32
    %11 = arith.extui %10 : i1 to i32
    %c0_i32_9 = arith.constant 0 : i32
    %12 = arith.cmpi ne, %11, %c0_i32_9 : i32
    scf.if %12 {
      %c0_10 = arith.constant 0 : index
      %c0_11 = arith.constant 0 : index
      %13 = vector.load %arg8[%c0_10, %c0_11] : memref<10x32xf32, #tpu.memory_space<vmem>>, vector<10x32xf32>
      %c0_12 = arith.constant 0 : index
      %c0_13 = arith.constant 0 : index
      %14 = vector.load %arg5[%c0_12, %c0_13] : memref<1x32xf32, #tpu.memory_space<vmem>>, vector<1x32xf32>
      %15 = vector.broadcast %14 : vector<1x32xf32> to vector<10x32xf32>
      %16 = arith.addf %13, %15 : vector<10x32xf32>
      %c0_14 = arith.constant 0 : index
      %c0_15 = arith.constant 0 : index
      %17 = vector.load %arg6[%c0_14, %c0_15] : memref<10x32xf32, #tpu.memory_space<vmem>>, vector<10x32xf32>
      %18 = arith.addf %16, %17 : vector<10x32xf32>
      %c0_16 = arith.constant 0 : index
      %c0_17 = arith.constant 0 : index
      %19 = vector.load %arg7[%c0_16, %c0_17] : memref<10x32xf32, #tpu.memory_space<vmem>>, vector<10x32xf32>
      tpu.vector_store %arg7[%c0_16, %c0_17], %18 {strides = array<i32>} : memref<10x32xf32, #tpu.memory_space<vmem>>, vector<10x32xf32>,
    } else {
    }
    return
  }
  func.func @transform_0(%arg0: i32, %arg1: i32, %arg2: i32) -> (i32, i32) {
    %c0_i32 = arith.constant 0 : i32
    return %arg0, %arg2 : i32, i32
  }
  func.func @transform_1(%arg0: i32, %arg1: i32, %arg2: i32) -> (i32, i32) {
    %c0_i32 = arith.constant 0 : i32
    return %arg2, %arg1 : i32, i32
  }
  func.func @transform_2(%arg0: i32, %arg1: i32, %arg2: i32) -> (i32, i32) {
    %c0_i32 = arith.constant 0 : i32
    %c0_i32_0 = arith.constant 0 : i32
    return %c0_i32, %arg1 : i32, i32
  }
  func.func @transform_3(%arg0: i32, %arg1: i32, %arg2: i32) -> (i32, i32) {
    %c0_i32 = arith.constant 0 : i32
    return %arg0, %arg1 : i32, i32
  }
  func.func @transform_4(%arg0: i32, %arg1: i32, %arg2: i32) -> (i32, i32) {
    %c0_i32 = arith.constant 0 : i32
    return %arg0, %arg1 : i32, i32
  }
}

module attributes {stable_mosaic.version = 11 : i64} {
  func.func @kernel(%arg0: i32, %arg1: i32, %arg2: memref<10x32xf32, #tpu.memory_space<vmem>>, %arg3: memref<1x32xf32, #tpu.memory_space<vmem>>, %arg4: memref<1x32xf32, #tpu.memory_space<vmem>>, %arg5: memref<32x128xbf16, #tpu.memory_space<vmem>>, %arg6: memref<1x128xf32, #tpu.memory_space<vmem>>, %arg7: memref<10x128xf32, #tpu.memory_space<vmem>>) attributes {dimension_semantics = [#tpu.dimension_semantics<parallel>, #tpu.dimension_semantics<parallel>], iteration_bounds = array<i64: 1, 1>, scalar_prefetch = 0 : i64, scratch_operands = 0 : i64, tpu.core_type = #tpu.core_type<tc>, window_params = [{transform_indices = @transform_0, window_bounds = array<i64: 10, 32>}, {pipeline_mode = #tpu.pipeline_mode<synchronous>, transform_indices = @transform_1, window_bounds = array<i64: 1, 32>}, {pipeline_mode = #tpu.pipeline_mode<synchronous>, transform_indices = @transform_2, window_bounds = array<i64: 1, 32>}, {transform_indices = @transform_3, window_bounds = array<i64: 32, 128>}, {transform_indices = @transform_4, window_bounds = array<i64: 1, 128>}, {transform_indices = @transform_5, window_bounds = array<i64: 10, 128>}]} {
    %c0 = arith.constant 0 : index
    %c0_0 = arith.constant 0 : index
    %0 = vector.load %arg2[%c0, %c0_0] : memref<10x32xf32, #tpu.memory_space<vmem>>, vector<10x32xf32>
    %cst = arith.constant dense<0.000000e+00> : vector<10xf32>
    %1 = vector.multi_reduction <add>, %0, %cst [1] : vector<10x32xf32> to vector<10xf32>
    %2 = vector.shape_cast %1 : vector<10xf32> to vector<10x1xf32>
    %cst_1 = arith.constant 3.200000e+01 : f32
    %3 = vector.broadcast %cst_1 : f32 to vector<10x1xf32>
    %4 = arith.divf %2, %3 : vector<10x1xf32>
    %5 = vector.broadcast %4 : vector<10x1xf32> to vector<10x32xf32>
    %6 = arith.subf %0, %5 : vector<10x32xf32>
    %7 = arith.mulf %6, %6 : vector<10x32xf32>
    %cst_2 = arith.constant dense<0.000000e+00> : vector<10xf32>
    %8 = vector.multi_reduction <add>, %7, %cst_2 [1] : vector<10x32xf32> to vector<10xf32>
    %9 = vector.shape_cast %8 : vector<10xf32> to vector<10x1xf32>
    %cst_3 = arith.constant 3.200000e+01 : f32
    %10 = vector.broadcast %cst_3 : f32 to vector<10x1xf32>
    %11 = arith.divf %9, %10 : vector<10x1xf32>
    %12 = vector.broadcast %4 : vector<10x1xf32> to vector<10x32xf32>
    %13 = arith.subf %0, %12 : vector<10x32xf32>
    %cst_4 = arith.constant 9.99999974E-6 : f32
    %14 = vector.broadcast %cst_4 : f32 to vector<10x1xf32>
    %15 = arith.addf %11, %14 : vector<10x1xf32>
    %16 = math.rsqrt %15 : vector<10x1xf32>
    %17 = vector.broadcast %16 : vector<10x1xf32> to vector<10x32xf32>
    %18 = arith.mulf %13, %17 : vector<10x32xf32>
    %c0_5 = arith.constant 0 : index
    %c0_6 = arith.constant 0 : index
    %19 = vector.load %arg3[%c0_5, %c0_6] : memref<1x32xf32, #tpu.memory_space<vmem>>, vector<1x32xf32>
    %20 = vector.broadcast %19 : vector<1x32xf32> to vector<10x32xf32>
    %21 = arith.mulf %18, %20 : vector<10x32xf32>
    %c0_7 = arith.constant 0 : index
    %c0_8 = arith.constant 0 : index
    %22 = vector.load %arg4[%c0_7, %c0_8] : memref<1x32xf32, #tpu.memory_space<vmem>>, vector<1x32xf32>
    %23 = vector.broadcast %22 : vector<1x32xf32> to vector<10x32xf32>
    %24 = arith.addf %21, %23 : vector<10x32xf32>
    %25 = arith.truncf %24 : vector<10x32xf32> to vector<10x32xbf16>
    %c0_9 = arith.constant 0 : index
    %c0_10 = arith.constant 0 : index
    %26 = vector.load %arg5[%c0_9, %c0_10] : memref<32x128xbf16, #tpu.memory_space<vmem>>, vector<32x128xbf16>
    %cst_11 = arith.constant dense<0.000000e+00> : vector<10x128xf32>
    %27 = tpu.matmul %25, %26, %cst_11 {dimension_numbers = #tpu.dot_dimension_numbers<[1], [0], [0], [1], [0, 0, 1, 1], [], []>} : vector<10x32xbf16>, vector<32x128xbf16>, vector<10x128xf32> -> vector<10x128xf32>
    %c0_12 = arith.constant 0 : index
    %c0_13 = arith.constant 0 : index
    %28 = vector.load %arg6[%c0_12, %c0_13] : memref<1x128xf32, #tpu.memory_space<vmem>>, vector<1x128xf32>
    %29 = vector.broadcast %28 : vector<1x128xf32> to vector<10x128xf32>
    %30 = arith.addf %27, %29 : vector<10x128xf32>
    %cst_14 = arith.constant 5.000000e-01 : f32
    %31 = vector.broadcast %cst_14 : f32 to vector<10x128xf32>
    %32 = arith.mulf %31, %30 : vector<10x128xf32>
    %cst_15 = arith.constant 0.707106769 : f32
    %33 = vector.broadcast %cst_15 : f32 to vector<10x128xf32>
    %34 = arith.mulf %30, %33 : vector<10x128xf32>
    %35 = math.absf %34 : vector<10x128xf32>
    %cst_16 = arith.constant 0.327591091 : f32
    %36 = vector.broadcast %cst_16 : f32 to vector<10x128xf32>
    %37 = arith.mulf %36, %35 : vector<10x128xf32>
    %cst_17 = arith.constant 1.000000e+00 : f32
    %38 = vector.broadcast %cst_17 : f32 to vector<10x128xf32>
    %39 = arith.addf %38, %37 : vector<10x128xf32>
    %cst_18 = arith.constant 1.000000e+00 : f32
    %40 = vector.broadcast %cst_18 : f32 to vector<10x128xf32>
    %41 = arith.divf %40, %39 : vector<10x128xf32>
    %cst_19 = arith.constant 1.06140542 : f32
    %42 = vector.broadcast %cst_19 : f32 to vector<10x128xf32>
    %43 = arith.mulf %41, %42 : vector<10x128xf32>
    %cst_20 = arith.constant -1.45315206 : f32
    %44 = vector.broadcast %cst_20 : f32 to vector<10x128xf32>
    %45 = arith.addf %44, %43 : vector<10x128xf32>
    %46 = arith.mulf %41, %45 : vector<10x128xf32>
    %cst_21 = arith.constant 1.42141378 : f32
    %47 = vector.broadcast %cst_21 : f32 to vector<10x128xf32>
    %48 = arith.addf %47, %46 : vector<10x128xf32>
    %49 = arith.mulf %41, %48 : vector<10x128xf32>
    %cst_22 = arith.constant -0.284496725 : f32
    %50 = vector.broadcast %cst_22 : f32 to vector<10x128xf32>
    %51 = arith.addf %50, %49 : vector<10x128xf32>
    %52 = arith.mulf %41, %51 : vector<10x128xf32>
    %cst_23 = arith.constant 0.254829586 : f32
    %53 = vector.broadcast %cst_23 : f32 to vector<10x128xf32>
    %54 = arith.addf %53, %52 : vector<10x128xf32>
    %55 = arith.mulf %41, %54 : vector<10x128xf32>
    %56 = arith.mulf %35, %35 : vector<10x128xf32>
    %cst_24 = arith.constant 0.000000e+00 : f32
    %57 = vector.broadcast %cst_24 : f32 to vector<10x128xf32>
    %58 = arith.subf %57, %56 : vector<10x128xf32>
    %59 = math.exp %58 : vector<10x128xf32>
    %60 = arith.mulf %55, %59 : vector<10x128xf32>
    %cst_25 = arith.constant 1.000000e+00 : f32
    %61 = vector.broadcast %cst_25 : f32 to vector<10x128xf32>
    %62 = arith.subf %61, %60 : vector<10x128xf32>
    %cst_26 = arith.constant 0.000000e+00 : f32
    %63 = vector.broadcast %cst_26 : f32 to vector<10x128xf32>
    %64 = arith.cmpf oge, %34, %63 : vector<10x128xf32>
    %cst_27 = arith.constant 0.000000e+00 : f32
    %65 = vector.broadcast %cst_27 : f32 to vector<10x128xf32>
    %66 = arith.subf %65, %62 : vector<10x128xf32>
    %67 = arith.select %64, %62, %66 : vector<10x128xi1>, vector<10x128xf32>
    %cst_28 = arith.constant 1.000000e+00 : f32
    %68 = vector.broadcast %cst_28 : f32 to vector<10x128xf32>
    %69 = arith.addf %68, %67 : vector<10x128xf32>
    %70 = arith.mulf %32, %69 : vector<10x128xf32>
    %c0_29 = arith.constant 0 : index
    %c0_30 = arith.constant 0 : index
    %71 = vector.load %arg7[%c0_29, %c0_30] : memref<10x128xf32, #tpu.memory_space<vmem>>, vector<10x128xf32>
    tpu.vector_store %arg7[%c0_29, %c0_30], %70 {strides = array<i32>} : memref<10x128xf32, #tpu.memory_space<vmem>>, vector<10x128xf32>,
    return
  }
  func.func @transform_0(%arg0: i32, %arg1: i32) -> (i32, i32) {
    %c0_i32 = arith.constant 0 : i32
    %c0_i32_0 = arith.constant 0 : i32
    return %arg0, %c0_i32 : i32, i32
  }
  func.func @transform_1(%arg0: i32, %arg1: i32) -> (i32, i32) {
    %c0_i32 = arith.constant 0 : i32
    %c0_i32_0 = arith.constant 0 : i32
    %c0_i32_1 = arith.constant 0 : i32
    return %c0_i32, %c0_i32_0 : i32, i32
  }
  func.func @transform_2(%arg0: i32, %arg1: i32) -> (i32, i32) {
    %c0_i32 = arith.constant 0 : i32
    %c0_i32_0 = arith.constant 0 : i32
    %c0_i32_1 = arith.constant 0 : i32
    return %c0_i32, %c0_i32_0 : i32, i32
  }
  func.func @transform_3(%arg0: i32, %arg1: i32) -> (i32, i32) {
    %c0_i32 = arith.constant 0 : i32
    %c0_i32_0 = arith.constant 0 : i32
    return %c0_i32, %arg1 : i32, i32
  }
  func.func @transform_4(%arg0: i32, %arg1: i32) -> (i32, i32) {
    %c0_i32 = arith.constant 0 : i32
    %c0_i32_0 = arith.constant 0 : i32
    return %c0_i32, %arg1 : i32, i32
  }
  func.func @transform_5(%arg0: i32, %arg1: i32) -> (i32, i32) {
    %c0_i32 = arith.constant 0 : i32
    return %arg0, %arg1 : i32, i32
  }
}

module attributes {stable_mosaic.version = 11 : i64} {
  func.func @kernel(%arg0: i32, %arg1: i32, %arg2: i32, %arg3: memref<10x128xf32, #tpu.memory_space<vmem>>, %arg4: memref<128x32xbf16, #tpu.memory_space<vmem>>, %arg5: memref<1x32xf32, #tpu.memory_space<vmem>>, %arg6: memref<10x32xf32, #tpu.memory_space<vmem>>, %arg7: memref<10x32xf32, #tpu.memory_space<vmem>>, %arg8: memref<10x32xf32, #tpu.memory_space<vmem>>) attributes {dimension_semantics = [#tpu.dimension_semantics<parallel>, #tpu.dimension_semantics<parallel>, #tpu.dimension_semantics<arbitrary>], iteration_bounds = array<i64: 1, 1, 1>, scalar_prefetch = 0 : i64, scratch_operands = 1 : i64, tpu.core_type = #tpu.core_type<tc>, window_params = [{transform_indices = @transform_0, window_bounds = array<i64: 10, 128>}, {transform_indices = @transform_1, window_bounds = array<i64: 128, 32>}, {transform_indices = @transform_2, window_bounds = array<i64: 1, 32>}, {transform_indices = @transform_3, window_bounds = array<i64: 10, 32>}, {transform_indices = @transform_4, window_bounds = array<i64: 10, 32>}]} {
    %c0_i32 = arith.constant 0 : i32
    %0 = arith.cmpi eq, %arg2, %c0_i32 : i32
    %1 = arith.extui %0 : i1 to i32
    %c0_i32_0 = arith.constant 0 : i32
    %2 = arith.cmpi ne, %1, %c0_i32_0 : i32
    scf.if %2 {
      %cst_10 = arith.constant 0.000000e+00 : f32
      %13 = vector.broadcast %cst_10 : f32 to vector<10x32xf32>
      %c0_11 = arith.constant 0 : index
      %c0_12 = arith.constant 0 : index
      %14 = vector.load %arg8[%c0_11, %c0_12] : memref<10x32xf32, #tpu.memory_space<vmem>>, vector<10x32xf32>
      tpu.vector_store %arg8[%c0_11, %c0_12], %13 {strides = array<i32>} : memref<10x32xf32, #tpu.memory_space<vmem>>, vector<10x32xf32>,
    } else {
    }
    %c0 = arith.constant 0 : index
    %c0_1 = arith.constant 0 : index
    %3 = vector.load %arg8[%c0, %c0_1] : memref<10x32xf32, #tpu.memory_space<vmem>>, vector<10x32xf32>
    %c0_2 = arith.constant 0 : index
    %c0_3 = arith.constant 0 : index
    %4 = vector.load %arg3[%c0_2, %c0_3] : memref<10x128xf32, #tpu.memory_space<vmem>>, vector<10x128xf32>
    %5 = arith.truncf %4 : vector<10x128xf32> to vector<10x128xbf16>
    %c0_4 = arith.constant 0 : index
    %c0_5 = arith.constant 0 : index
    %6 = vector.load %arg4[%c0_4, %c0_5] : memref<128x32xbf16, #tpu.memory_space<vmem>>, vector<128x32xbf16>
    %cst = arith.constant dense<0.000000e+00> : vector<10x32xf32>
    %7 = tpu.matmul %5, %6, %cst {dimension_numbers = #tpu.dot_dimension_numbers<[1], [0], [0], [1], [0, 0, 1, 1], [], []>} : vector<10x128xbf16>, vector<128x32xbf16>, vector<10x32xf32> -> vector<10x32xf32>
    %8 = arith.addf %3, %7 : vector<10x32xf32>
    %c0_6 = arith.constant 0 : index
    %c0_7 = arith.constant 0 : index
    %9 = vector.load %arg8[%c0_6, %c0_7] : memref<10x32xf32, #tpu.memory_space<vmem>>, vector<10x32xf32>
    tpu.vector_store %arg8[%c0_6, %c0_7], %8 {strides = array<i32>} : memref<10x32xf32, #tpu.memory_space<vmem>>, vector<10x32xf32>,
    %c0_i32_8 = arith.constant 0 : i32
    %10 = arith.cmpi eq, %arg2, %c0_i32_8 : i32
    %11 = arith.extui %10 : i1 to i32
    %c0_i32_9 = arith.constant 0 : i32
    %12 = arith.cmpi ne, %11, %c0_i32_9 : i32
    scf.if %12 {
      %c0_10 = arith.constant 0 : index
      %c0_11 = arith.constant 0 : index
      %13 = vector.load %arg8[%c0_10, %c0_11] : memref<10x32xf32, #tpu.memory_space<vmem>>, vector<10x32xf32>
      %c0_12 = arith.constant 0 : index
      %c0_13 = arith.constant 0 : index
      %14 = vector.load %arg5[%c0_12, %c0_13] : memref<1x32xf32, #tpu.memory_space<vmem>>, vector<1x32xf32>
      %15 = vector.broadcast %14 : vector<1x32xf32> to vector<10x32xf32>
      %16 = arith.addf %13, %15 : vector<10x32xf32>
      %c0_14 = arith.constant 0 : index
      %c0_15 = arith.constant 0 : index
      %17 = vector.load %arg6[%c0_14, %c0_15] : memref<10x32xf32, #tpu.memory_space<vmem>>, vector<10x32xf32>
      %18 = arith.addf %16, %17 : vector<10x32xf32>
      %c0_16 = arith.constant 0 : index
      %c0_17 = arith.constant 0 : index
      %19 = vector.load %arg7[%c0_16, %c0_17] : memref<10x32xf32, #tpu.memory_space<vmem>>, vector<10x32xf32>
      tpu.vector_store %arg7[%c0_16, %c0_17], %18 {strides = array<i32>} : memref<10x32xf32, #tpu.memory_space<vmem>>, vector<10x32xf32>,
    } else {
    }
    return
  }
  func.func @transform_0(%arg0: i32, %arg1: i32, %arg2: i32) -> (i32, i32) {
    %c0_i32 = arith.constant 0 : i32
    return %arg0, %arg2 : i32, i32
  }
  func.func @transform_1(%arg0: i32, %arg1: i32, %arg2: i32) -> (i32, i32) {
    %c0_i32 = arith.constant 0 : i32
    return %arg2, %arg1 : i32, i32
  }
  func.func @transform_2(%arg0: i32, %arg1: i32, %arg2: i32) -> (i32, i32) {
    %c0_i32 = arith.constant 0 : i32
    %c0_i32_0 = arith.constant 0 : i32
    return %c0_i32, %arg1 : i32, i32
  }
  func.func @transform_3(%arg0: i32, %arg1: i32, %arg2: i32) -> (i32, i32) {
    %c0_i32 = arith.constant 0 : i32
    return %arg0, %arg1 : i32, i32
  }
  func.func @transform_4(%arg0: i32, %arg1: i32, %arg2: i32) -> (i32, i32) {
    %c0_i32 = arith.constant 0 : i32
    return %arg0, %arg1 : i32, i32
  }
}

module attributes {stable_mosaic.version = 11 : i64} {
  func.func @kernel(%arg0: i32, %arg1: i32, %arg2: memref<10x32xf32, #tpu.memory_space<vmem>>, %arg3: memref<1x32xf32, #tpu.memory_space<vmem>>, %arg4: memref<1x32xf32, #tpu.memory_space<vmem>>, %arg5: memref<32x32xbf16, #tpu.memory_space<vmem>>, %arg6: memref<1x32xf32, #tpu.memory_space<vmem>>, %arg7: memref<10x32xf32, #tpu.memory_space<vmem>>) attributes {dimension_semantics = [#tpu.dimension_semantics<parallel>, #tpu.dimension_semantics<parallel>], iteration_bounds = array<i64: 1, 1>, scalar_prefetch = 0 : i64, scratch_operands = 0 : i64, tpu.core_type = #tpu.core_type<tc>, window_params = [{transform_indices = @transform_0, window_bounds = array<i64: 10, 32>}, {pipeline_mode = #tpu.pipeline_mode<synchronous>, transform_indices = @transform_1, window_bounds = array<i64: 1, 32>}, {pipeline_mode = #tpu.pipeline_mode<synchronous>, transform_indices = @transform_2, window_bounds = array<i64: 1, 32>}, {transform_indices = @transform_3, window_bounds = array<i64: 32, 32>}, {transform_indices = @transform_4, window_bounds = array<i64: 1, 32>}, {transform_indices = @transform_5, window_bounds = array<i64: 10, 32>}]} {
    %c0 = arith.constant 0 : index
    %c0_0 = arith.constant 0 : index
    %0 = vector.load %arg2[%c0, %c0_0] : memref<10x32xf32, #tpu.memory_space<vmem>>, vector<10x32xf32>
    %cst = arith.constant dense<0.000000e+00> : vector<10xf32>
    %1 = vector.multi_reduction <add>, %0, %cst [1] : vector<10x32xf32> to vector<10xf32>
    %2 = vector.shape_cast %1 : vector<10xf32> to vector<10x1xf32>
    %cst_1 = arith.constant 3.200000e+01 : f32
    %3 = vector.broadcast %cst_1 : f32 to vector<10x1xf32>
    %4 = arith.divf %2, %3 : vector<10x1xf32>
    %5 = vector.broadcast %4 : vector<10x1xf32> to vector<10x32xf32>
    %6 = arith.subf %0, %5 : vector<10x32xf32>
    %7 = arith.mulf %6, %6 : vector<10x32xf32>
    %cst_2 = arith.constant dense<0.000000e+00> : vector<10xf32>
    %8 = vector.multi_reduction <add>, %7, %cst_2 [1] : vector<10x32xf32> to vector<10xf32>
    %9 = vector.shape_cast %8 : vector<10xf32> to vector<10x1xf32>
    %cst_3 = arith.constant 3.200000e+01 : f32
    %10 = vector.broadcast %cst_3 : f32 to vector<10x1xf32>
    %11 = arith.divf %9, %10 : vector<10x1xf32>
    %12 = vector.broadcast %4 : vector<10x1xf32> to vector<10x32xf32>
    %13 = arith.subf %0, %12 : vector<10x32xf32>
    %cst_4 = arith.constant 9.99999974E-6 : f32
    %14 = vector.broadcast %cst_4 : f32 to vector<10x1xf32>
    %15 = arith.addf %11, %14 : vector<10x1xf32>
    %16 = math.rsqrt %15 : vector<10x1xf32>
    %17 = vector.broadcast %16 : vector<10x1xf32> to vector<10x32xf32>
    %18 = arith.mulf %13, %17 : vector<10x32xf32>
    %c0_5 = arith.constant 0 : index
    %c0_6 = arith.constant 0 : index
    %19 = vector.load %arg3[%c0_5, %c0_6] : memref<1x32xf32, #tpu.memory_space<vmem>>, vector<1x32xf32>
    %20 = vector.broadcast %19 : vector<1x32xf32> to vector<10x32xf32>
    %21 = arith.mulf %18, %20 : vector<10x32xf32>
    %c0_7 = arith.constant 0 : index
    %c0_8 = arith.constant 0 : index
    %22 = vector.load %arg4[%c0_7, %c0_8] : memref<1x32xf32, #tpu.memory_space<vmem>>, vector<1x32xf32>
    %23 = vector.broadcast %22 : vector<1x32xf32> to vector<10x32xf32>
    %24 = arith.addf %21, %23 : vector<10x32xf32>
    %25 = arith.truncf %24 : vector<10x32xf32> to vector<10x32xbf16>
    %c0_9 = arith.constant 0 : index
    %c0_10 = arith.constant 0 : index
    %26 = vector.load %arg5[%c0_9, %c0_10] : memref<32x32xbf16, #tpu.memory_space<vmem>>, vector<32x32xbf16>
    %cst_11 = arith.constant dense<0.000000e+00> : vector<10x32xf32>
    %27 = tpu.matmul %25, %26, %cst_11 {dimension_numbers = #tpu.dot_dimension_numbers<[1], [0], [0], [1], [0, 0, 1, 1], [], []>} : vector<10x32xbf16>, vector<32x32xbf16>, vector<10x32xf32> -> vector<10x32xf32>
    %c0_12 = arith.constant 0 : index
    %c0_13 = arith.constant 0 : index
    %28 = vector.load %arg6[%c0_12, %c0_13] : memref<1x32xf32, #tpu.memory_space<vmem>>, vector<1x32xf32>
    %29 = vector.broadcast %28 : vector<1x32xf32> to vector<10x32xf32>
    %30 = arith.addf %27, %29 : vector<10x32xf32>
    %c0_14 = arith.constant 0 : index
    %c0_15 = arith.constant 0 : index
    %31 = vector.load %arg7[%c0_14, %c0_15] : memref<10x32xf32, #tpu.memory_space<vmem>>, vector<10x32xf32>
    tpu.vector_store %arg7[%c0_14, %c0_15], %30 {strides = array<i32>} : memref<10x32xf32, #tpu.memory_space<vmem>>, vector<10x32xf32>,
    return
  }
  func.func @transform_0(%arg0: i32, %arg1: i32) -> (i32, i32) {
    %c0_i32 = arith.constant 0 : i32
    %c0_i32_0 = arith.constant 0 : i32
    return %arg0, %c0_i32 : i32, i32
  }
  func.func @transform_1(%arg0: i32, %arg1: i32) -> (i32, i32) {
    %c0_i32 = arith.constant 0 : i32
    %c0_i32_0 = arith.constant 0 : i32
    %c0_i32_1 = arith.constant 0 : i32
    return %c0_i32, %c0_i32_0 : i32, i32
  }
  func.func @transform_2(%arg0: i32, %arg1: i32) -> (i32, i32) {
    %c0_i32 = arith.constant 0 : i32
    %c0_i32_0 = arith.constant 0 : i32
    %c0_i32_1 = arith.constant 0 : i32
    return %c0_i32, %c0_i32_0 : i32, i32
  }
  func.func @transform_3(%arg0: i32, %arg1: i32) -> (i32, i32) {
    %c0_i32 = arith.constant 0 : i32
    %c0_i32_0 = arith.constant 0 : i32
    return %c0_i32, %arg1 : i32, i32
  }
  func.func @transform_4(%arg0: i32, %arg1: i32) -> (i32, i32) {
    %c0_i32 = arith.constant 0 : i32
    %c0_i32_0 = arith.constant 0 : i32
    return %c0_i32, %arg1 : i32, i32
  }
  func.func @transform_5(%arg0: i32, %arg1: i32) -> (i32, i32) {
    %c0_i32 = arith.constant 0 : i32
    return %arg0, %arg1 : i32, i32
  }
}

module attributes {stable_mosaic.version = 11 : i64} {
  func.func @kernel(%arg0: i32, %arg1: i32, %arg2: memref<34x32xf32, #tpu.memory_space<vmem>>, %arg3: memref<1x32xf32, #tpu.memory_space<vmem>>, %arg4: memref<1x32xf32, #tpu.memory_space<vmem>>, %arg5: memref<32x96xbf16, #tpu.memory_space<vmem>>, %arg6: memref<1x96xf32, #tpu.memory_space<vmem>>, %arg7: memref<34x96xf32, #tpu.memory_space<vmem>>) attributes {dimension_semantics = [#tpu.dimension_semantics<parallel>, #tpu.dimension_semantics<parallel>], iteration_bounds = array<i64: 1, 1>, scalar_prefetch = 0 : i64, scratch_operands = 0 : i64, tpu.core_type = #tpu.core_type<tc>, window_params = [{transform_indices = @transform_0, window_bounds = array<i64: 34, 32>}, {pipeline_mode = #tpu.pipeline_mode<synchronous>, transform_indices = @transform_1, window_bounds = array<i64: 1, 32>}, {pipeline_mode = #tpu.pipeline_mode<synchronous>, transform_indices = @transform_2, window_bounds = array<i64: 1, 32>}, {transform_indices = @transform_3, window_bounds = array<i64: 32, 96>}, {transform_indices = @transform_4, window_bounds = array<i64: 1, 96>}, {transform_indices = @transform_5, window_bounds = array<i64: 34, 96>}]} {
    %c0 = arith.constant 0 : index
    %c0_0 = arith.constant 0 : index
    %0 = vector.load %arg2[%c0, %c0_0] : memref<34x32xf32, #tpu.memory_space<vmem>>, vector<34x32xf32>
    %cst = arith.constant dense<0.000000e+00> : vector<34xf32>
    %1 = vector.multi_reduction <add>, %0, %cst [1] : vector<34x32xf32> to vector<34xf32>
    %2 = vector.shape_cast %1 : vector<34xf32> to vector<34x1xf32>
    %cst_1 = arith.constant 3.200000e+01 : f32
    %3 = vector.broadcast %cst_1 : f32 to vector<34x1xf32>
    %4 = arith.divf %2, %3 : vector<34x1xf32>
    %5 = vector.broadcast %4 : vector<34x1xf32> to vector<34x32xf32>
    %6 = arith.subf %0, %5 : vector<34x32xf32>
    %7 = arith.mulf %6, %6 : vector<34x32xf32>
    %cst_2 = arith.constant dense<0.000000e+00> : vector<34xf32>
    %8 = vector.multi_reduction <add>, %7, %cst_2 [1] : vector<34x32xf32> to vector<34xf32>
    %9 = vector.shape_cast %8 : vector<34xf32> to vector<34x1xf32>
    %cst_3 = arith.constant 3.200000e+01 : f32
    %10 = vector.broadcast %cst_3 : f32 to vector<34x1xf32>
    %11 = arith.divf %9, %10 : vector<34x1xf32>
    %12 = vector.broadcast %4 : vector<34x1xf32> to vector<34x32xf32>
    %13 = arith.subf %0, %12 : vector<34x32xf32>
    %cst_4 = arith.constant 9.99999974E-6 : f32
    %14 = vector.broadcast %cst_4 : f32 to vector<34x1xf32>
    %15 = arith.addf %11, %14 : vector<34x1xf32>
    %16 = math.rsqrt %15 : vector<34x1xf32>
    %17 = vector.broadcast %16 : vector<34x1xf32> to vector<34x32xf32>
    %18 = arith.mulf %13, %17 : vector<34x32xf32>
    %c0_5 = arith.constant 0 : index
    %c0_6 = arith.constant 0 : index
    %19 = vector.load %arg3[%c0_5, %c0_6] : memref<1x32xf32, #tpu.memory_space<vmem>>, vector<1x32xf32>
    %20 = vector.broadcast %19 : vector<1x32xf32> to vector<34x32xf32>
    %21 = arith.mulf %18, %20 : vector<34x32xf32>
    %c0_7 = arith.constant 0 : index
    %c0_8 = arith.constant 0 : index
    %22 = vector.load %arg4[%c0_7, %c0_8] : memref<1x32xf32, #tpu.memory_space<vmem>>, vector<1x32xf32>
    %23 = vector.broadcast %22 : vector<1x32xf32> to vector<34x32xf32>
    %24 = arith.addf %21, %23 : vector<34x32xf32>
    %25 = arith.truncf %24 : vector<34x32xf32> to vector<34x32xbf16>
    %c0_9 = arith.constant 0 : index
    %c0_10 = arith.constant 0 : index
    %26 = vector.load %arg5[%c0_9, %c0_10] : memref<32x96xbf16, #tpu.memory_space<vmem>>, vector<32x96xbf16>
    %cst_11 = arith.constant dense<0.000000e+00> : vector<34x96xf32>
    %27 = tpu.matmul %25, %26, %cst_11 {dimension_numbers = #tpu.dot_dimension_numbers<[1], [0], [0], [1], [0, 0, 1, 1], [], []>} : vector<34x32xbf16>, vector<32x96xbf16>, vector<34x96xf32> -> vector<34x96xf32>
    %c0_12 = arith.constant 0 : index
    %c0_13 = arith.constant 0 : index
    %28 = vector.load %arg6[%c0_12, %c0_13] : memref<1x96xf32, #tpu.memory_space<vmem>>, vector<1x96xf32>
    %29 = vector.broadcast %28 : vector<1x96xf32> to vector<34x96xf32>
    %30 = arith.addf %27, %29 : vector<34x96xf32>
    %c0_14 = arith.constant 0 : index
    %c0_15 = arith.constant 0 : index
    %31 = vector.load %arg7[%c0_14, %c0_15] : memref<34x96xf32, #tpu.memory_space<vmem>>, vector<34x96xf32>
    tpu.vector_store %arg7[%c0_14, %c0_15], %30 {strides = array<i32>} : memref<34x96xf32, #tpu.memory_space<vmem>>, vector<34x96xf32>,
    return
  }
  func.func @transform_0(%arg0: i32, %arg1: i32) -> (i32, i32) {
    %c0_i32 = arith.constant 0 : i32
    %c0_i32_0 = arith.constant 0 : i32
    return %arg0, %c0_i32 : i32, i32
  }
  func.func @transform_1(%arg0: i32, %arg1: i32) -> (i32, i32) {
    %c0_i32 = arith.constant 0 : i32
    %c0_i32_0 = arith.constant 0 : i32
    %c0_i32_1 = arith.constant 0 : i32
    return %c0_i32, %c0_i32_0 : i32, i32
  }
  func.func @transform_2(%arg0: i32, %arg1: i32) -> (i32, i32) {
    %c0_i32 = arith.constant 0 : i32
    %c0_i32_0 = arith.constant 0 : i32
    %c0_i32_1 = arith.constant 0 : i32
    return %c0_i32, %c0_i32_0 : i32, i32
  }
  func.func @transform_3(%arg0: i32, %arg1: i32) -> (i32, i32) {
    %c0_i32 = arith.constant 0 : i32
    %c0_i32_0 = arith.constant 0 : i32
    return %c0_i32, %arg1 : i32, i32
  }
  func.func @transform_4(%arg0: i32, %arg1: i32) -> (i32, i32) {
    %c0_i32 = arith.constant 0 : i32
    %c0_i32_0 = arith.constant 0 : i32
    return %c0_i32, %arg1 : i32, i32
  }
  func.func @transform_5(%arg0: i32, %arg1: i32) -> (i32, i32) {
    %c0_i32 = arith.constant 0 : i32
    return %arg0, %arg1 : i32, i32
  }
}

module attributes {stable_mosaic.version = 11 : i64} {
  func.func @_attn_kernel(%arg0: i32, %arg1: memref<1x4x17x8xf32, #tpu.memory_space<vmem>>, %arg2: memref<1x4x17x8xf32, #tpu.memory_space<vmem>>, %arg3: memref<1x4x17x8xf32, #tpu.memory_space<vmem>>, %arg4: memref<1x4x17x8xf32, #tpu.memory_space<vmem>>) attributes {dimension_semantics = [#tpu.dimension_semantics<parallel>], iteration_bounds = array<i64: 2>, scalar_prefetch = 0 : i64, scratch_operands = 0 : i64, tpu.core_type = #tpu.core_type<tc>, window_params = [{transform_indices = @transform_0, window_bounds = array<i64: 1, 4, 17, 8>}, {transform_indices = @transform_1, window_bounds = array<i64: 1, 4, 17, 8>}, {transform_indices = @transform_2, window_bounds = array<i64: 1, 4, 17, 8>}, {transform_indices = @transform_3, window_bounds = array<i64: 1, 4, 17, 8>}]} {
    %c0 = arith.constant 0 : index
    %c0_0 = arith.constant 0 : index
    %c0_1 = arith.constant 0 : index
    %c0_2 = arith.constant 0 : index
    %0 = vector.load %arg1[%c0, %c0_0, %c0_1, %c0_2] : memref<1x4x17x8xf32, #tpu.memory_space<vmem>>, vector<1x4x17x8xf32>
    %1 = vector.shape_cast %0 : vector<1x4x17x8xf32> to vector<4x17x8xf32>
    %2 = arith.truncf %1 : vector<4x17x8xf32> to vector<4x17x8xbf16>
    %c0_3 = arith.constant 0 : index
    %c0_4 = arith.constant 0 : index
    %c0_5 = arith.constant 0 : index
    %c0_6 = arith.constant 0 : index
    %3 = vector.load %arg2[%c0_3, %c0_4, %c0_5, %c0_6] : memref<1x4x17x8xf32, #tpu.memory_space<vmem>>, vector<1x4x17x8xf32>
    %4 = vector.shape_cast %3 : vector<1x4x17x8xf32> to vector<4x17x8xf32>
    %5 = arith.truncf %4 : vector<4x17x8xf32> to vector<4x17x8xbf16>
    %c0_7 = arith.constant 0 : index
    %c0_8 = arith.constant 0 : index
    %c0_9 = arith.constant 0 : index
    %c0_10 = arith.constant 0 : index
    %6 = vector.load %arg3[%c0_7, %c0_8, %c0_9, %c0_10] : memref<1x4x17x8xf32, #tpu.memory_space<vmem>>, vector<1x4x17x8xf32>
    %7 = vector.shape_cast %6 : vector<1x4x17x8xf32> to vector<4x17x8xf32>
    %8 = arith.truncf %7 : vector<4x17x8xf32> to vector<4x17x8xbf16>
    "tpu.trace_start"() <{level = 10 : i32, message = "htd,hsd->hts"}> : () -> ()
    %cst = arith.constant dense<0.000000e+00> : vector<4x17x17xf32>
    %9 = tpu.matmul %2, %5, %cst {dimension_numbers = #tpu.dot_dimension_numbers<[2], [2], [1], [1], [0, 0, 0, 1, 1, 1], [0], [0]>} : vector<4x17x8xbf16>, vector<4x17x8xbf16>, vector<4x17x17xf32> -> vector<4x17x17xf32>
    "tpu.trace_stop"() : () -> ()
    %cst_11 = arith.constant 0.353553385 : f32
    %10 = vector.broadcast %cst_11 : f32 to vector<4x17x17xf32>
    %11 = arith.mulf %9, %10 : vector<4x17x17xf32>
    %cst_12 = arith.constant dense<0xFF800000> : vector<4x17xf32>
    %12 = vector.multi_reduction <maximumf>, %11, %cst_12 [2] : vector<4x17x17xf32> to vector<4x17xf32>
    %13 = vector.shape_cast %12 : vector<4x17xf32> to vector<4x17x1xf32>
    %14 = vector.broadcast %13 : vector<4x17x1xf32> to vector<4x17x17xf32>
    %15 = arith.subf %11, %14 : vector<4x17x17xf32>
    %16 = math.exp %15 : vector<4x17x17xf32>
    %cst_13 = arith.constant dense<0.000000e+00> : vector<4x17xf32>
    %17 = vector.multi_reduction <add>, %16, %cst_13 [2] : vector<4x17x17xf32> to vector<4x17xf32>
    %18 = vector.shape_cast %17 : vector<4x17xf32> to vector<4x17x1xf32>
    %19 = tpu.reciprocal %18 {approx = true} : vector<4x17x1xf32> -> vector<4x17x1xf32>
    %20 = vector.broadcast %19 : vector<4x17x1xf32> to vector<4x17x17xf32>
    %21 = arith.mulf %16, %20 : vector<4x17x17xf32>
    %22 = arith.truncf %21 : vector<4x17x17xf32> to vector<4x17x17xbf16>
    "tpu.trace_start"() <{level = 10 : i32, message = "hts,hsd->htd"}> : () -> ()
    %cst_14 = arith.constant dense<0.000000e+00> : vector<4x17x8xf32>
    %23 = tpu.matmul %22, %8, %cst_14 {dimension_numbers = #tpu.dot_dimension_numbers<[2], [1], [1], [2], [0, 0, 0, 1, 1, 2], [0], [0]>} : vector<4x17x17xbf16>, vector<4x17x8xbf16>, vector<4x17x8xf32> -> vector<4x17x8xf32>
    "tpu.trace_stop"() : () -> ()
    %c0_15 = arith.constant 0 : index
    %c0_16 = arith.constant 0 : index
    %c0_17 = arith.constant 0 : index
    %c0_18 = arith.constant 0 : index
    %24 = vector.load %arg4[%c0_15, %c0_16, %c0_17, %c0_18] : memref<1x4x17x8xf32, #tpu.memory_space<vmem>>, vector<1x4x17x8xf32>
    %25 = vector.shape_cast %24 : vector<1x4x17x8xf32> to vector<4x17x8xf32>
    %26 = vector.shape_cast %23 : vector<4x17x8xf32> to vector<1x4x17x8xf32>
    tpu.vector_store %arg4[%c0_15, %c0_16, %c0_17, %c0_18], %26 {strides = array<i32>} : memref<1x4x17x8xf32, #tpu.memory_space<vmem>>, vector<1x4x17x8xf32>,
    return
  }
  func.func @transform_0(%arg0: i32) -> (i32, i32, i32, i32) {
    %c0_i32 = arith.constant 0 : i32
    %c0_i32_0 = arith.constant 0 : i32
    %c0_i32_1 = arith.constant 0 : i32
    %c0_i32_2 = arith.constant 0 : i32
    return %arg0, %c0_i32, %c0_i32_0, %c0_i32_1 : i32, i32, i32, i32
  }
  func.func @transform_1(%arg0: i32) -> (i32, i32, i32, i32) {
    %c0_i32 = arith.constant 0 : i32
    %c0_i32_0 = arith.constant 0 : i32
    %c0_i32_1 = arith.constant 0 : i32
    %c0_i32_2 = arith.constant 0 : i32
    return %arg0, %c0_i32, %c0_i32_0, %c0_i32_1 : i32, i32, i32, i32
  }
  func.func @transform_2(%arg0: i32) -> (i32, i32, i32, i32) {
    %c0_i32 = arith.constant 0 : i32
    %c0_i32_0 = arith.constant 0 : i32
    %c0_i32_1 = arith.constant 0 : i32
    %c0_i32_2 = arith.constant 0 : i32
    return %arg0, %c0_i32, %c0_i32_0, %c0_i32_1 : i32, i32, i32, i32
  }
  func.func @transform_3(%arg0: i32) -> (i32, i32, i32, i32) {
    %c0_i32 = arith.constant 0 : i32
    %c0_i32_0 = arith.constant 0 : i32
    %c0_i32_1 = arith.constant 0 : i32
    %c0_i32_2 = arith.constant 0 : i32
    return %arg0, %c0_i32, %c0_i32_0, %c0_i32_1 : i32, i32, i32, i32
  }
}

module attributes {stable_mosaic.version = 11 : i64} {
  func.func @kernel(%arg0: i32, %arg1: i32, %arg2: i32, %arg3: memref<34x32xf32, #tpu.memory_space<vmem>>, %arg4: memref<32x32xbf16, #tpu.memory_space<vmem>>, %arg5: memref<1x32xf32, #tpu.memory_space<vmem>>, %arg6: memref<34x32xf32, #tpu.memory_space<vmem>>, %arg7: memref<34x32xf32, #tpu.memory_space<vmem>>, %arg8: memref<34x32xf32, #tpu.memory_space<vmem>>) attributes {dimension_semantics = [#tpu.dimension_semantics<parallel>, #tpu.dimension_semantics<parallel>, #tpu.dimension_semantics<arbitrary>], iteration_bounds = array<i64: 1, 1, 1>, scalar_prefetch = 0 : i64, scratch_operands = 1 : i64, tpu.core_type = #tpu.core_type<tc>, window_params = [{transform_indices = @transform_0, window_bounds = array<i64: 34, 32>}, {transform_indices = @transform_1, window_bounds = array<i64: 32, 32>}, {transform_indices = @transform_2, window_bounds = array<i64: 1, 32>}, {transform_indices = @transform_3, window_bounds = array<i64: 34, 32>}, {transform_indices = @transform_4, window_bounds = array<i64: 34, 32>}]} {
    %c0_i32 = arith.constant 0 : i32
    %0 = arith.cmpi eq, %arg2, %c0_i32 : i32
    %1 = arith.extui %0 : i1 to i32
    %c0_i32_0 = arith.constant 0 : i32
    %2 = arith.cmpi ne, %1, %c0_i32_0 : i32
    scf.if %2 {
      %cst_10 = arith.constant 0.000000e+00 : f32
      %13 = vector.broadcast %cst_10 : f32 to vector<34x32xf32>
      %c0_11 = arith.constant 0 : index
      %c0_12 = arith.constant 0 : index
      %14 = vector.load %arg8[%c0_11, %c0_12] : memref<34x32xf32, #tpu.memory_space<vmem>>, vector<34x32xf32>
      tpu.vector_store %arg8[%c0_11, %c0_12], %13 {strides = array<i32>} : memref<34x32xf32, #tpu.memory_space<vmem>>, vector<34x32xf32>,
    } else {
    }
    %c0 = arith.constant 0 : index
    %c0_1 = arith.constant 0 : index
    %3 = vector.load %arg8[%c0, %c0_1] : memref<34x32xf32, #tpu.memory_space<vmem>>, vector<34x32xf32>
    %c0_2 = arith.constant 0 : index
    %c0_3 = arith.constant 0 : index
    %4 = vector.load %arg3[%c0_2, %c0_3] : memref<34x32xf32, #tpu.memory_space<vmem>>, vector<34x32xf32>
    %5 = arith.truncf %4 : vector<34x32xf32> to vector<34x32xbf16>
    %c0_4 = arith.constant 0 : index
    %c0_5 = arith.constant 0 : index
    %6 = vector.load %arg4[%c0_4, %c0_5] : memref<32x32xbf16, #tpu.memory_space<vmem>>, vector<32x32xbf16>
    %cst = arith.constant dense<0.000000e+00> : vector<34x32xf32>
    %7 = tpu.matmul %5, %6, %cst {dimension_numbers = #tpu.dot_dimension_numbers<[1], [0], [0], [1], [0, 0, 1, 1], [], []>} : vector<34x32xbf16>, vector<32x32xbf16>, vector<34x32xf32> -> vector<34x32xf32>
    %8 = arith.addf %3, %7 : vector<34x32xf32>
    %c0_6 = arith.constant 0 : index
    %c0_7 = arith.constant 0 : index
    %9 = vector.load %arg8[%c0_6, %c0_7] : memref<34x32xf32, #tpu.memory_space<vmem>>, vector<34x32xf32>
    tpu.vector_store %arg8[%c0_6, %c0_7], %8 {strides = array<i32>} : memref<34x32xf32, #tpu.memory_space<vmem>>, vector<34x32xf32>,
    %c0_i32_8 = arith.constant 0 : i32
    %10 = arith.cmpi eq, %arg2, %c0_i32_8 : i32
    %11 = arith.extui %10 : i1 to i32
    %c0_i32_9 = arith.constant 0 : i32
    %12 = arith.cmpi ne, %11, %c0_i32_9 : i32
    scf.if %12 {
      %c0_10 = arith.constant 0 : index
      %c0_11 = arith.constant 0 : index
      %13 = vector.load %arg8[%c0_10, %c0_11] : memref<34x32xf32, #tpu.memory_space<vmem>>, vector<34x32xf32>
      %c0_12 = arith.constant 0 : index
      %c0_13 = arith.constant 0 : index
      %14 = vector.load %arg5[%c0_12, %c0_13] : memref<1x32xf32, #tpu.memory_space<vmem>>, vector<1x32xf32>
      %15 = vector.broadcast %14 : vector<1x32xf32> to vector<34x32xf32>
      %16 = arith.addf %13, %15 : vector<34x32xf32>
      %c0_14 = arith.constant 0 : index
      %c0_15 = arith.constant 0 : index
      %17 = vector.load %arg6[%c0_14, %c0_15] : memref<34x32xf32, #tpu.memory_space<vmem>>, vector<34x32xf32>
      %18 = arith.addf %16, %17 : vector<34x32xf32>
      %c0_16 = arith.constant 0 : index
      %c0_17 = arith.constant 0 : index
      %19 = vector.load %arg7[%c0_16, %c0_17] : memref<34x32xf32, #tpu.memory_space<vmem>>, vector<34x32xf32>
      tpu.vector_store %arg7[%c0_16, %c0_17], %18 {strides = array<i32>} : memref<34x32xf32, #tpu.memory_space<vmem>>, vector<34x32xf32>,
    } else {
    }
    return
  }
  func.func @transform_0(%arg0: i32, %arg1: i32, %arg2: i32) -> (i32, i32) {
    %c0_i32 = arith.constant 0 : i32
    return %arg0, %arg2 : i32, i32
  }
  func.func @transform_1(%arg0: i32, %arg1: i32, %arg2: i32) -> (i32, i32) {
    %c0_i32 = arith.constant 0 : i32
    return %arg2, %arg1 : i32, i32
  }
  func.func @transform_2(%arg0: i32, %arg1: i32, %arg2: i32) -> (i32, i32) {
    %c0_i32 = arith.constant 0 : i32
    %c0_i32_0 = arith.constant 0 : i32
    return %c0_i32, %arg1 : i32, i32
  }
  func.func @transform_3(%arg0: i32, %arg1: i32, %arg2: i32) -> (i32, i32) {
    %c0_i32 = arith.constant 0 : i32
    return %arg0, %arg1 : i32, i32
  }
  func.func @transform_4(%arg0: i32, %arg1: i32, %arg2: i32) -> (i32, i32) {
    %c0_i32 = arith.constant 0 : i32
    return %arg0, %arg1 : i32, i32
  }
}

module attributes {stable_mosaic.version = 11 : i64} {
  func.func @kernel(%arg0: i32, %arg1: i32, %arg2: memref<34x32xf32, #tpu.memory_space<vmem>>, %arg3: memref<1x32xf32, #tpu.memory_space<vmem>>, %arg4: memref<1x32xf32, #tpu.memory_space<vmem>>, %arg5: memref<32x128xbf16, #tpu.memory_space<vmem>>, %arg6: memref<1x128xf32, #tpu.memory_space<vmem>>, %arg7: memref<34x128xf32, #tpu.memory_space<vmem>>) attributes {dimension_semantics = [#tpu.dimension_semantics<parallel>, #tpu.dimension_semantics<parallel>], iteration_bounds = array<i64: 1, 1>, scalar_prefetch = 0 : i64, scratch_operands = 0 : i64, tpu.core_type = #tpu.core_type<tc>, window_params = [{transform_indices = @transform_0, window_bounds = array<i64: 34, 32>}, {pipeline_mode = #tpu.pipeline_mode<synchronous>, transform_indices = @transform_1, window_bounds = array<i64: 1, 32>}, {pipeline_mode = #tpu.pipeline_mode<synchronous>, transform_indices = @transform_2, window_bounds = array<i64: 1, 32>}, {transform_indices = @transform_3, window_bounds = array<i64: 32, 128>}, {transform_indices = @transform_4, window_bounds = array<i64: 1, 128>}, {transform_indices = @transform_5, window_bounds = array<i64: 34, 128>}]} {
    %c0 = arith.constant 0 : index
    %c0_0 = arith.constant 0 : index
    %0 = vector.load %arg2[%c0, %c0_0] : memref<34x32xf32, #tpu.memory_space<vmem>>, vector<34x32xf32>
    %cst = arith.constant dense<0.000000e+00> : vector<34xf32>
    %1 = vector.multi_reduction <add>, %0, %cst [1] : vector<34x32xf32> to vector<34xf32>
    %2 = vector.shape_cast %1 : vector<34xf32> to vector<34x1xf32>
    %cst_1 = arith.constant 3.200000e+01 : f32
    %3 = vector.broadcast %cst_1 : f32 to vector<34x1xf32>
    %4 = arith.divf %2, %3 : vector<34x1xf32>
    %5 = vector.broadcast %4 : vector<34x1xf32> to vector<34x32xf32>
    %6 = arith.subf %0, %5 : vector<34x32xf32>
    %7 = arith.mulf %6, %6 : vector<34x32xf32>
    %cst_2 = arith.constant dense<0.000000e+00> : vector<34xf32>
    %8 = vector.multi_reduction <add>, %7, %cst_2 [1] : vector<34x32xf32> to vector<34xf32>
    %9 = vector.shape_cast %8 : vector<34xf32> to vector<34x1xf32>
    %cst_3 = arith.constant 3.200000e+01 : f32
    %10 = vector.broadcast %cst_3 : f32 to vector<34x1xf32>
    %11 = arith.divf %9, %10 : vector<34x1xf32>
    %12 = vector.broadcast %4 : vector<34x1xf32> to vector<34x32xf32>
    %13 = arith.subf %0, %12 : vector<34x32xf32>
    %cst_4 = arith.constant 9.99999974E-6 : f32
    %14 = vector.broadcast %cst_4 : f32 to vector<34x1xf32>
    %15 = arith.addf %11, %14 : vector<34x1xf32>
    %16 = math.rsqrt %15 : vector<34x1xf32>
    %17 = vector.broadcast %16 : vector<34x1xf32> to vector<34x32xf32>
    %18 = arith.mulf %13, %17 : vector<34x32xf32>
    %c0_5 = arith.constant 0 : index
    %c0_6 = arith.constant 0 : index
    %19 = vector.load %arg3[%c0_5, %c0_6] : memref<1x32xf32, #tpu.memory_space<vmem>>, vector<1x32xf32>
    %20 = vector.broadcast %19 : vector<1x32xf32> to vector<34x32xf32>
    %21 = arith.mulf %18, %20 : vector<34x32xf32>
    %c0_7 = arith.constant 0 : index
    %c0_8 = arith.constant 0 : index
    %22 = vector.load %arg4[%c0_7, %c0_8] : memref<1x32xf32, #tpu.memory_space<vmem>>, vector<1x32xf32>
    %23 = vector.broadcast %22 : vector<1x32xf32> to vector<34x32xf32>
    %24 = arith.addf %21, %23 : vector<34x32xf32>
    %25 = arith.truncf %24 : vector<34x32xf32> to vector<34x32xbf16>
    %c0_9 = arith.constant 0 : index
    %c0_10 = arith.constant 0 : index
    %26 = vector.load %arg5[%c0_9, %c0_10] : memref<32x128xbf16, #tpu.memory_space<vmem>>, vector<32x128xbf16>
    %cst_11 = arith.constant dense<0.000000e+00> : vector<34x128xf32>
    %27 = tpu.matmul %25, %26, %cst_11 {dimension_numbers = #tpu.dot_dimension_numbers<[1], [0], [0], [1], [0, 0, 1, 1], [], []>} : vector<34x32xbf16>, vector<32x128xbf16>, vector<34x128xf32> -> vector<34x128xf32>
    %c0_12 = arith.constant 0 : index
    %c0_13 = arith.constant 0 : index
    %28 = vector.load %arg6[%c0_12, %c0_13] : memref<1x128xf32, #tpu.memory_space<vmem>>, vector<1x128xf32>
    %29 = vector.broadcast %28 : vector<1x128xf32> to vector<34x128xf32>
    %30 = arith.addf %27, %29 : vector<34x128xf32>
    %cst_14 = arith.constant 5.000000e-01 : f32
    %31 = vector.broadcast %cst_14 : f32 to vector<34x128xf32>
    %32 = arith.mulf %31, %30 : vector<34x128xf32>
    %cst_15 = arith.constant 0.707106769 : f32
    %33 = vector.broadcast %cst_15 : f32 to vector<34x128xf32>
    %34 = arith.mulf %30, %33 : vector<34x128xf32>
    %35 = math.absf %34 : vector<34x128xf32>
    %cst_16 = arith.constant 0.327591091 : f32
    %36 = vector.broadcast %cst_16 : f32 to vector<34x128xf32>
    %37 = arith.mulf %36, %35 : vector<34x128xf32>
    %cst_17 = arith.constant 1.000000e+00 : f32
    %38 = vector.broadcast %cst_17 : f32 to vector<34x128xf32>
    %39 = arith.addf %38, %37 : vector<34x128xf32>
    %cst_18 = arith.constant 1.000000e+00 : f32
    %40 = vector.broadcast %cst_18 : f32 to vector<34x128xf32>
    %41 = arith.divf %40, %39 : vector<34x128xf32>
    %cst_19 = arith.constant 1.06140542 : f32
    %42 = vector.broadcast %cst_19 : f32 to vector<34x128xf32>
    %43 = arith.mulf %41, %42 : vector<34x128xf32>
    %cst_20 = arith.constant -1.45315206 : f32
    %44 = vector.broadcast %cst_20 : f32 to vector<34x128xf32>
    %45 = arith.addf %44, %43 : vector<34x128xf32>
    %46 = arith.mulf %41, %45 : vector<34x128xf32>
    %cst_21 = arith.constant 1.42141378 : f32
    %47 = vector.broadcast %cst_21 : f32 to vector<34x128xf32>
    %48 = arith.addf %47, %46 : vector<34x128xf32>
    %49 = arith.mulf %41, %48 : vector<34x128xf32>
    %cst_22 = arith.constant -0.284496725 : f32
    %50 = vector.broadcast %cst_22 : f32 to vector<34x128xf32>
    %51 = arith.addf %50, %49 : vector<34x128xf32>
    %52 = arith.mulf %41, %51 : vector<34x128xf32>
    %cst_23 = arith.constant 0.254829586 : f32
    %53 = vector.broadcast %cst_23 : f32 to vector<34x128xf32>
    %54 = arith.addf %53, %52 : vector<34x128xf32>
    %55 = arith.mulf %41, %54 : vector<34x128xf32>
    %56 = arith.mulf %35, %35 : vector<34x128xf32>
    %cst_24 = arith.constant 0.000000e+00 : f32
    %57 = vector.broadcast %cst_24 : f32 to vector<34x128xf32>
    %58 = arith.subf %57, %56 : vector<34x128xf32>
    %59 = math.exp %58 : vector<34x128xf32>
    %60 = arith.mulf %55, %59 : vector<34x128xf32>
    %cst_25 = arith.constant 1.000000e+00 : f32
    %61 = vector.broadcast %cst_25 : f32 to vector<34x128xf32>
    %62 = arith.subf %61, %60 : vector<34x128xf32>
    %cst_26 = arith.constant 0.000000e+00 : f32
    %63 = vector.broadcast %cst_26 : f32 to vector<34x128xf32>
    %64 = arith.cmpf oge, %34, %63 : vector<34x128xf32>
    %cst_27 = arith.constant 0.000000e+00 : f32
    %65 = vector.broadcast %cst_27 : f32 to vector<34x128xf32>
    %66 = arith.subf %65, %62 : vector<34x128xf32>
    %67 = arith.select %64, %62, %66 : vector<34x128xi1>, vector<34x128xf32>
    %cst_28 = arith.constant 1.000000e+00 : f32
    %68 = vector.broadcast %cst_28 : f32 to vector<34x128xf32>
    %69 = arith.addf %68, %67 : vector<34x128xf32>
    %70 = arith.mulf %32, %69 : vector<34x128xf32>
    %c0_29 = arith.constant 0 : index
    %c0_30 = arith.constant 0 : index
    %71 = vector.load %arg7[%c0_29, %c0_30] : memref<34x128xf32, #tpu.memory_space<vmem>>, vector<34x128xf32>
    tpu.vector_store %arg7[%c0_29, %c0_30], %70 {strides = array<i32>} : memref<34x128xf32, #tpu.memory_space<vmem>>, vector<34x128xf32>,
    return
  }
  func.func @transform_0(%arg0: i32, %arg1: i32) -> (i32, i32) {
    %c0_i32 = arith.constant 0 : i32
    %c0_i32_0 = arith.constant 0 : i32
    return %arg0, %c0_i32 : i32, i32
  }
  func.func @transform_1(%arg0: i32, %arg1: i32) -> (i32, i32) {
    %c0_i32 = arith.constant 0 : i32
    %c0_i32_0 = arith.constant 0 : i32
    %c0_i32_1 = arith.constant 0 : i32
    return %c0_i32, %c0_i32_0 : i32, i32
  }
  func.func @transform_2(%arg0: i32, %arg1: i32) -> (i32, i32) {
    %c0_i32 = arith.constant 0 : i32
    %c0_i32_0 = arith.constant 0 : i32
    %c0_i32_1 = arith.constant 0 : i32
    return %c0_i32, %c0_i32_0 : i32, i32
  }
  func.func @transform_3(%arg0: i32, %arg1: i32) -> (i32, i32) {
    %c0_i32 = arith.constant 0 : i32
    %c0_i32_0 = arith.constant 0 : i32
    return %c0_i32, %arg1 : i32, i32
  }
  func.func @transform_4(%arg0: i32, %arg1: i32) -> (i32, i32) {
    %c0_i32 = arith.constant 0 : i32
    %c0_i32_0 = arith.constant 0 : i32
    return %c0_i32, %arg1 : i32, i32
  }
  func.func @transform_5(%arg0: i32, %arg1: i32) -> (i32, i32) {
    %c0_i32 = arith.constant 0 : i32
    return %arg0, %arg1 : i32, i32
  }
}

module attributes {stable_mosaic.version = 11 : i64} {
  func.func @kernel(%arg0: i32, %arg1: i32, %arg2: i32, %arg3: memref<34x128xf32, #tpu.memory_space<vmem>>, %arg4: memref<128x32xbf16, #tpu.memory_space<vmem>>, %arg5: memref<1x32xf32, #tpu.memory_space<vmem>>, %arg6: memref<34x32xf32, #tpu.memory_space<vmem>>, %arg7: memref<34x32xf32, #tpu.memory_space<vmem>>, %arg8: memref<34x32xf32, #tpu.memory_space<vmem>>) attributes {dimension_semantics = [#tpu.dimension_semantics<parallel>, #tpu.dimension_semantics<parallel>, #tpu.dimension_semantics<arbitrary>], iteration_bounds = array<i64: 1, 1, 1>, scalar_prefetch = 0 : i64, scratch_operands = 1 : i64, tpu.core_type = #tpu.core_type<tc>, window_params = [{transform_indices = @transform_0, window_bounds = array<i64: 34, 128>}, {transform_indices = @transform_1, window_bounds = array<i64: 128, 32>}, {transform_indices = @transform_2, window_bounds = array<i64: 1, 32>}, {transform_indices = @transform_3, window_bounds = array<i64: 34, 32>}, {transform_indices = @transform_4, window_bounds = array<i64: 34, 32>}]} {
    %c0_i32 = arith.constant 0 : i32
    %0 = arith.cmpi eq, %arg2, %c0_i32 : i32
    %1 = arith.extui %0 : i1 to i32
    %c0_i32_0 = arith.constant 0 : i32
    %2 = arith.cmpi ne, %1, %c0_i32_0 : i32
    scf.if %2 {
      %cst_10 = arith.constant 0.000000e+00 : f32
      %13 = vector.broadcast %cst_10 : f32 to vector<34x32xf32>
      %c0_11 = arith.constant 0 : index
      %c0_12 = arith.constant 0 : index
      %14 = vector.load %arg8[%c0_11, %c0_12] : memref<34x32xf32, #tpu.memory_space<vmem>>, vector<34x32xf32>
      tpu.vector_store %arg8[%c0_11, %c0_12], %13 {strides = array<i32>} : memref<34x32xf32, #tpu.memory_space<vmem>>, vector<34x32xf32>,
    } else {
    }
    %c0 = arith.constant 0 : index
    %c0_1 = arith.constant 0 : index
    %3 = vector.load %arg8[%c0, %c0_1] : memref<34x32xf32, #tpu.memory_space<vmem>>, vector<34x32xf32>
    %c0_2 = arith.constant 0 : index
    %c0_3 = arith.constant 0 : index
    %4 = vector.load %arg3[%c0_2, %c0_3] : memref<34x128xf32, #tpu.memory_space<vmem>>, vector<34x128xf32>
    %5 = arith.truncf %4 : vector<34x128xf32> to vector<34x128xbf16>
    %c0_4 = arith.constant 0 : index
    %c0_5 = arith.constant 0 : index
    %6 = vector.load %arg4[%c0_4, %c0_5] : memref<128x32xbf16, #tpu.memory_space<vmem>>, vector<128x32xbf16>
    %cst = arith.constant dense<0.000000e+00> : vector<34x32xf32>
    %7 = tpu.matmul %5, %6, %cst {dimension_numbers = #tpu.dot_dimension_numbers<[1], [0], [0], [1], [0, 0, 1, 1], [], []>} : vector<34x128xbf16>, vector<128x32xbf16>, vector<34x32xf32> -> vector<34x32xf32>
    %8 = arith.addf %3, %7 : vector<34x32xf32>
    %c0_6 = arith.constant 0 : index
    %c0_7 = arith.constant 0 : index
    %9 = vector.load %arg8[%c0_6, %c0_7] : memref<34x32xf32, #tpu.memory_space<vmem>>, vector<34x32xf32>
    tpu.vector_store %arg8[%c0_6, %c0_7], %8 {strides = array<i32>} : memref<34x32xf32, #tpu.memory_space<vmem>>, vector<34x32xf32>,
    %c0_i32_8 = arith.constant 0 : i32
    %10 = arith.cmpi eq, %arg2, %c0_i32_8 : i32
    %11 = arith.extui %10 : i1 to i32
    %c0_i32_9 = arith.constant 0 : i32
    %12 = arith.cmpi ne, %11, %c0_i32_9 : i32
    scf.if %12 {
      %c0_10 = arith.constant 0 : index
      %c0_11 = arith.constant 0 : index
      %13 = vector.load %arg8[%c0_10, %c0_11] : memref<34x32xf32, #tpu.memory_space<vmem>>, vector<34x32xf32>
      %c0_12 = arith.constant 0 : index
      %c0_13 = arith.constant 0 : index
      %14 = vector.load %arg5[%c0_12, %c0_13] : memref<1x32xf32, #tpu.memory_space<vmem>>, vector<1x32xf32>
      %15 = vector.broadcast %14 : vector<1x32xf32> to vector<34x32xf32>
      %16 = arith.addf %13, %15 : vector<34x32xf32>
      %c0_14 = arith.constant 0 : index
      %c0_15 = arith.constant 0 : index
      %17 = vector.load %arg6[%c0_14, %c0_15] : memref<34x32xf32, #tpu.memory_space<vmem>>, vector<34x32xf32>
      %18 = arith.addf %16, %17 : vector<34x32xf32>
      %c0_16 = arith.constant 0 : index
      %c0_17 = arith.constant 0 : index
      %19 = vector.load %arg7[%c0_16, %c0_17] : memref<34x32xf32, #tpu.memory_space<vmem>>, vector<34x32xf32>
      tpu.vector_store %arg7[%c0_16, %c0_17], %18 {strides = array<i32>} : memref<34x32xf32, #tpu.memory_space<vmem>>, vector<34x32xf32>,
    } else {
    }
    return
  }
  func.func @transform_0(%arg0: i32, %arg1: i32, %arg2: i32) -> (i32, i32) {
    %c0_i32 = arith.constant 0 : i32
    return %arg0, %arg2 : i32, i32
  }
  func.func @transform_1(%arg0: i32, %arg1: i32, %arg2: i32) -> (i32, i32) {
    %c0_i32 = arith.constant 0 : i32
    return %arg2, %arg1 : i32, i32
  }
  func.func @transform_2(%arg0: i32, %arg1: i32, %arg2: i32) -> (i32, i32) {
    %c0_i32 = arith.constant 0 : i32
    %c0_i32_0 = arith.constant 0 : i32
    return %c0_i32, %arg1 : i32, i32
  }
  func.func @transform_3(%arg0: i32, %arg1: i32, %arg2: i32) -> (i32, i32) {
    %c0_i32 = arith.constant 0 : i32
    return %arg0, %arg1 : i32, i32
  }
  func.func @transform_4(%arg0: i32, %arg1: i32, %arg2: i32) -> (i32, i32) {
    %c0_i32 = arith.constant 0 : i32
    return %arg0, %arg1 : i32, i32
  }
}

module attributes {stable_mosaic.version = 11 : i64} {
  func.func @kernel(%arg0: i32, %arg1: i32, %arg2: memref<34x32xf32, #tpu.memory_space<vmem>>, %arg3: memref<1x32xf32, #tpu.memory_space<vmem>>, %arg4: memref<1x32xf32, #tpu.memory_space<vmem>>, %arg5: memref<32x16xbf16, #tpu.memory_space<vmem>>, %arg6: memref<1x16xf32, #tpu.memory_space<vmem>>, %arg7: memref<34x16xf32, #tpu.memory_space<vmem>>) attributes {dimension_semantics = [#tpu.dimension_semantics<parallel>, #tpu.dimension_semantics<parallel>], iteration_bounds = array<i64: 1, 1>, scalar_prefetch = 0 : i64, scratch_operands = 0 : i64, tpu.core_type = #tpu.core_type<tc>, window_params = [{transform_indices = @transform_0, window_bounds = array<i64: 34, 32>}, {pipeline_mode = #tpu.pipeline_mode<synchronous>, transform_indices = @transform_1, window_bounds = array<i64: 1, 32>}, {pipeline_mode = #tpu.pipeline_mode<synchronous>, transform_indices = @transform_2, window_bounds = array<i64: 1, 32>}, {transform_indices = @transform_3, window_bounds = array<i64: 32, 16>}, {transform_indices = @transform_4, window_bounds = array<i64: 1, 16>}, {transform_indices = @transform_5, window_bounds = array<i64: 34, 16>}]} {
    %c0 = arith.constant 0 : index
    %c0_0 = arith.constant 0 : index
    %0 = vector.load %arg2[%c0, %c0_0] : memref<34x32xf32, #tpu.memory_space<vmem>>, vector<34x32xf32>
    %cst = arith.constant dense<0.000000e+00> : vector<34xf32>
    %1 = vector.multi_reduction <add>, %0, %cst [1] : vector<34x32xf32> to vector<34xf32>
    %2 = vector.shape_cast %1 : vector<34xf32> to vector<34x1xf32>
    %cst_1 = arith.constant 3.200000e+01 : f32
    %3 = vector.broadcast %cst_1 : f32 to vector<34x1xf32>
    %4 = arith.divf %2, %3 : vector<34x1xf32>
    %5 = vector.broadcast %4 : vector<34x1xf32> to vector<34x32xf32>
    %6 = arith.subf %0, %5 : vector<34x32xf32>
    %7 = arith.mulf %6, %6 : vector<34x32xf32>
    %cst_2 = arith.constant dense<0.000000e+00> : vector<34xf32>
    %8 = vector.multi_reduction <add>, %7, %cst_2 [1] : vector<34x32xf32> to vector<34xf32>
    %9 = vector.shape_cast %8 : vector<34xf32> to vector<34x1xf32>
    %cst_3 = arith.constant 3.200000e+01 : f32
    %10 = vector.broadcast %cst_3 : f32 to vector<34x1xf32>
    %11 = arith.divf %9, %10 : vector<34x1xf32>
    %12 = vector.broadcast %4 : vector<34x1xf32> to vector<34x32xf32>
    %13 = arith.subf %0, %12 : vector<34x32xf32>
    %cst_4 = arith.constant 9.99999974E-6 : f32
    %14 = vector.broadcast %cst_4 : f32 to vector<34x1xf32>
    %15 = arith.addf %11, %14 : vector<34x1xf32>
    %16 = math.rsqrt %15 : vector<34x1xf32>
    %17 = vector.broadcast %16 : vector<34x1xf32> to vector<34x32xf32>
    %18 = arith.mulf %13, %17 : vector<34x32xf32>
    %c0_5 = arith.constant 0 : index
    %c0_6 = arith.constant 0 : index
    %19 = vector.load %arg3[%c0_5, %c0_6] : memref<1x32xf32, #tpu.memory_space<vmem>>, vector<1x32xf32>
    %20 = vector.broadcast %19 : vector<1x32xf32> to vector<34x32xf32>
    %21 = arith.mulf %18, %20 : vector<34x32xf32>
    %c0_7 = arith.constant 0 : index
    %c0_8 = arith.constant 0 : index
    %22 = vector.load %arg4[%c0_7, %c0_8] : memref<1x32xf32, #tpu.memory_space<vmem>>, vector<1x32xf32>
    %23 = vector.broadcast %22 : vector<1x32xf32> to vector<34x32xf32>
    %24 = arith.addf %21, %23 : vector<34x32xf32>
    %25 = arith.truncf %24 : vector<34x32xf32> to vector<34x32xbf16>
    %c0_9 = arith.constant 0 : index
    %c0_10 = arith.constant 0 : index
    %26 = vector.load %arg5[%c0_9, %c0_10] : memref<32x16xbf16, #tpu.memory_space<vmem>>, vector<32x16xbf16>
    %cst_11 = arith.constant dense<0.000000e+00> : vector<34x16xf32>
    %27 = tpu.matmul %25, %26, %cst_11 {dimension_numbers = #tpu.dot_dimension_numbers<[1], [0], [0], [1], [0, 0, 1, 1], [], []>} : vector<34x32xbf16>, vector<32x16xbf16>, vector<34x16xf32> -> vector<34x16xf32>
    %c0_12 = arith.constant 0 : index
    %c0_13 = arith.constant 0 : index
    %28 = vector.load %arg6[%c0_12, %c0_13] : memref<1x16xf32, #tpu.memory_space<vmem>>, vector<1x16xf32>
    %29 = vector.broadcast %28 : vector<1x16xf32> to vector<34x16xf32>
    %30 = arith.addf %27, %29 : vector<34x16xf32>
    %c0_14 = arith.constant 0 : index
    %c0_15 = arith.constant 0 : index
    %31 = vector.load %arg7[%c0_14, %c0_15] : memref<34x16xf32, #tpu.memory_space<vmem>>, vector<34x16xf32>
    tpu.vector_store %arg7[%c0_14, %c0_15], %30 {strides = array<i32>} : memref<34x16xf32, #tpu.memory_space<vmem>>, vector<34x16xf32>,
    return
  }
  func.func @transform_0(%arg0: i32, %arg1: i32) -> (i32, i32) {
    %c0_i32 = arith.constant 0 : i32
    %c0_i32_0 = arith.constant 0 : i32
    return %arg0, %c0_i32 : i32, i32
  }
  func.func @transform_1(%arg0: i32, %arg1: i32) -> (i32, i32) {
    %c0_i32 = arith.constant 0 : i32
    %c0_i32_0 = arith.constant 0 : i32
    %c0_i32_1 = arith.constant 0 : i32
    return %c0_i32, %c0_i32_0 : i32, i32
  }
  func.func @transform_2(%arg0: i32, %arg1: i32) -> (i32, i32) {
    %c0_i32 = arith.constant 0 : i32
    %c0_i32_0 = arith.constant 0 : i32
    %c0_i32_1 = arith.constant 0 : i32
    return %c0_i32, %c0_i32_0 : i32, i32
  }
  func.func @transform_3(%arg0: i32, %arg1: i32) -> (i32, i32) {
    %c0_i32 = arith.constant 0 : i32
    %c0_i32_0 = arith.constant 0 : i32
    return %c0_i32, %arg1 : i32, i32
  }
  func.func @transform_4(%arg0: i32, %arg1: i32) -> (i32, i32) {
    %c0_i32 = arith.constant 0 : i32
    %c0_i32_0 = arith.constant 0 : i32
    return %c0_i32, %arg1 : i32, i32
  }
  func.func @transform_5(%arg0: i32, %arg1: i32) -> (i32, i32) {
    %c0_i32 = arith.constant 0 : i32
    return %arg0, %arg1 : i32, i32
  }
}

module attributes {stable_mosaic.version = 11 : i64} {
  func.func @kernel(%arg0: i32, %arg1: memref<32x16xf32, #tpu.memory_space<vmem>>, %arg2: memref<32x16xf32, #tpu.memory_space<vmem>>, %arg3: memref<32x1xf32, #tpu.memory_space<vmem>>, %arg4: memref<1x1xf32, #tpu.memory_space<vmem>>, %arg5: memref<1x1xf32, #tpu.memory_space<vmem>>, %arg6: memref<1x1xf32, #tpu.memory_space<vmem>>, %arg7: memref<1x1xf32, #tpu.memory_space<vmem>>) attributes {dimension_semantics = [#tpu.dimension_semantics<arbitrary>], iteration_bounds = array<i64: 1>, scalar_prefetch = 0 : i64, scratch_operands = 3 : i64, tpu.core_type = #tpu.core_type<tc>, window_params = [{transform_indices = @transform_0, window_bounds = array<i64: 32, 16>}, {transform_indices = @transform_1, window_bounds = array<i64: 32, 16>}, {transform_indices = @transform_2, window_bounds = array<i64: 32, 1>}, {pipeline_mode = #tpu.pipeline_mode<synchronous>, transform_indices = @transform_3, window_bounds = array<i64: 1, 1>}]} {
    %c0_i32 = arith.constant 0 : i32
    %0 = arith.cmpi eq, %arg0, %c0_i32 : i32
    %1 = arith.extui %0 : i1 to i32
    %c0_i32_0 = arith.constant 0 : i32
    %2 = arith.cmpi ne, %1, %c0_i32_0 : i32
    scf.if %2 {
      %cst_32 = arith.constant 0.000000e+00 : f32
      %68 = vector.broadcast %cst_32 : f32 to vector<1x1xf32>
      %c0_33 = arith.constant 0 : index
      %c0_34 = arith.constant 0 : index
      %69 = vector.load %arg5[%c0_33, %c0_34] : memref<1x1xf32, #tpu.memory_space<vmem>>, vector<1x1xf32>
      tpu.vector_store %arg5[%c0_33, %c0_34], %68 {strides = array<i32>} : memref<1x1xf32, #tpu.memory_space<vmem>>, vector<1x1xf32>,
      %cst_35 = arith.constant 0.000000e+00 : f32
      %70 = vector.broadcast %cst_35 : f32 to vector<1x1xf32>
      %c0_36 = arith.constant 0 : index
      %c0_37 = arith.constant 0 : index
      %71 = vector.load %arg6[%c0_36, %c0_37] : memref<1x1xf32, #tpu.memory_space<vmem>>, vector<1x1xf32>
      tpu.vector_store %arg6[%c0_36, %c0_37], %70 {strides = array<i32>} : memref<1x1xf32, #tpu.memory_space<vmem>>, vector<1x1xf32>,
      %cst_38 = arith.constant 0.000000e+00 : f32
      %72 = vector.broadcast %cst_38 : f32 to vector<1x1xf32>
      %c0_39 = arith.constant 0 : index
      %c0_40 = arith.constant 0 : index
      %73 = vector.load %arg7[%c0_39, %c0_40] : memref<1x1xf32, #tpu.memory_space<vmem>>, vector<1x1xf32>
      tpu.vector_store %arg7[%c0_39, %c0_40], %72 {strides = array<i32>} : memref<1x1xf32, #tpu.memory_space<vmem>>, vector<1x1xf32>,
    } else {
    }
    %c0 = arith.constant 0 : index
    %c0_1 = arith.constant 0 : index
    %3 = vector.load %arg1[%c0, %c0_1] : memref<32x16xf32, #tpu.memory_space<vmem>>, vector<32x16xf32>
    %c0_2 = arith.constant 0 : index
    %c0_3 = arith.constant 0 : index
    %4 = vector.load %arg2[%c0_2, %c0_3] : memref<32x16xf32, #tpu.memory_space<vmem>>, vector<32x16xf32>
    %c0_4 = arith.constant 0 : index
    %c0_5 = arith.constant 0 : index
    %5 = vector.load %arg3[%c0_4, %c0_5] : memref<32x1xf32, #tpu.memory_space<vmem>>, vector<32x1xf32>
    %6 = math.absf %3 : vector<32x16xf32>
    %cst = arith.constant 0.000000e+00 : f32
    %7 = vector.broadcast %cst : f32 to vector<32x16xf32>
    %8 = arith.subf %7, %6 : vector<32x16xf32>
    %9 = math.exp %8 : vector<32x16xf32>
    %cst_6 = arith.constant 1.000000e+00 : f32
    %10 = vector.broadcast %cst_6 : f32 to vector<32x16xf32>
    %11 = arith.addf %10, %9 : vector<32x16xf32>
    %12 = math.log %11 : vector<32x16xf32>
    %cst_7 = arith.constant 0.000000e+00 : f32
    %13 = vector.broadcast %cst_7 : f32 to vector<32x16xf32>
    %14 = arith.cmpf oge, %3, %13 : vector<32x16xf32>
    %cst_8 = arith.constant 1.000000e+00 : f32
    %15 = vector.broadcast %cst_8 : f32 to vector<32x16xf32>
    %16 = arith.select %14, %15, %9 : vector<32x16xi1>, vector<32x16xf32>
    %cst_9 = arith.constant 1.000000e+00 : f32
    %17 = vector.broadcast %cst_9 : f32 to vector<32x16xf32>
    %18 = arith.addf %17, %9 : vector<32x16xf32>
    %19 = arith.divf %16, %18 : vector<32x16xf32>
    %cst_10 = arith.constant 0.000000e+00 : f32
    %20 = vector.broadcast %cst_10 : f32 to vector<32x16xf32>
    %21 = arith.maximumf %3, %20 : vector<32x16xf32>
    %22 = arith.addf %21, %12 : vector<32x16xf32>
    %cst_11 = arith.constant 0.000000e+00 : f32
    %23 = vector.broadcast %cst_11 : f32 to vector<32x16xf32>
    %24 = arith.subf %23, %3 : vector<32x16xf32>
    %cst_12 = arith.constant 0.000000e+00 : f32
    %25 = vector.broadcast %cst_12 : f32 to vector<32x16xf32>
    %26 = arith.maximumf %24, %25 : vector<32x16xf32>
    %27 = arith.addf %26, %12 : vector<32x16xf32>
    %28 = arith.subf %19, %4 : vector<32x16xf32>
    %29 = arith.mulf %28, %28 : vector<32x16xf32>
    %cst_13 = arith.constant 1.000000e+00 : f32
    %30 = vector.broadcast %cst_13 : f32 to vector<32x16xf32>
    %31 = arith.mulf %30, %4 : vector<32x16xf32>
    %32 = arith.mulf %31, %27 : vector<32x16xf32>
    %cst_14 = arith.constant 1.000000e+00 : f32
    %33 = vector.broadcast %cst_14 : f32 to vector<32x16xf32>
    %34 = arith.subf %33, %4 : vector<32x16xf32>
    %35 = arith.mulf %34, %22 : vector<32x16xf32>
    %36 = arith.addf %32, %35 : vector<32x16xf32>
    %c0_15 = arith.constant 0 : index
    %c0_16 = arith.constant 0 : index
    %37 = vector.load %arg5[%c0_15, %c0_16] : memref<1x1xf32, #tpu.memory_space<vmem>>, vector<1x1xf32>
    %38 = vector.broadcast %5 : vector<32x1xf32> to vector<32x16xf32>
    %39 = arith.mulf %38, %29 : vector<32x16xf32>
    %40 = vector.shape_cast %39 : vector<32x16xf32> to vector<1x32x16xf32>
    %cst_17 = arith.constant dense<0.000000e+00> : vector<1xf32>
    %41 = vector.multi_reduction <add>, %40, %cst_17 [1, 2] : vector<1x32x16xf32> to vector<1xf32>
    %42 = vector.shape_cast %41 : vector<1xf32> to vector<1x1x1xf32>
    %43 = vector.extract %42[0, 0, 0] : f32 from vector<1x1x1xf32>
    %44 = vector.broadcast %43 : f32 to vector<1x1xf32>
    %45 = arith.addf %37, %44 : vector<1x1xf32>
    %c0_18 = arith.constant 0 : index
    %c0_19 = arith.constant 0 : index
    %46 = vector.load %arg5[%c0_18, %c0_19] : memref<1x1xf32, #tpu.memory_space<vmem>>, vector<1x1xf32>
    tpu.vector_store %arg5[%c0_18, %c0_19], %45 {strides = array<i32>} : memref<1x1xf32, #tpu.memory_space<vmem>>, vector<1x1xf32>,
    %c0_20 = arith.constant 0 : index
    %c0_21 = arith.constant 0 : index
    %47 = vector.load %arg6[%c0_20, %c0_21] : memref<1x1xf32, #tpu.memory_space<vmem>>, vector<1x1xf32>
    %48 = vector.broadcast %5 : vector<32x1xf32> to vector<32x16xf32>
    %49 = arith.mulf %48, %36 : vector<32x16xf32>
    %50 = vector.shape_cast %49 : vector<32x16xf32> to vector<1x32x16xf32>
    %cst_22 = arith.constant dense<0.000000e+00> : vector<1xf32>
    %51 = vector.multi_reduction <add>, %50, %cst_22 [1, 2] : vector<1x32x16xf32> to vector<1xf32>
    %52 = vector.shape_cast %51 : vector<1xf32> to vector<1x1x1xf32>
    %53 = vector.extract %52[0, 0, 0] : f32 from vector<1x1x1xf32>
    %54 = vector.broadcast %53 : f32 to vector<1x1xf32>
    %55 = arith.addf %47, %54 : vector<1x1xf32>
    %c0_23 = arith.constant 0 : index
    %c0_24 = arith.constant 0 : index
    %56 = vector.load %arg6[%c0_23, %c0_24] : memref<1x1xf32, #tpu.memory_space<vmem>>, vector<1x1xf32>
    tpu.vector_store %arg6[%c0_23, %c0_24], %55 {strides = array<i32>} : memref<1x1xf32, #tpu.memory_space<vmem>>, vector<1x1xf32>,
    %c0_25 = arith.constant 0 : index
    %c0_26 = arith.constant 0 : index
    %57 = vector.load %arg7[%c0_25, %c0_26] : memref<1x1xf32, #tpu.memory_space<vmem>>, vector<1x1xf32>
    %58 = vector.shape_cast %5 : vector<32x1xf32> to vector<1x32x1xf32>
    %cst_27 = arith.constant dense<0.000000e+00> : vector<1xf32>
    %59 = vector.multi_reduction <add>, %58, %cst_27 [1, 2] : vector<1x32x1xf32> to vector<1xf32>
    %60 = vector.shape_cast %59 : vector<1xf32> to vector<1x1x1xf32>
    %61 = vector.extract %60[0, 0, 0] : f32 from vector<1x1x1xf32>
    %62 = vector.broadcast %61 : f32 to vector<1x1xf32>
    %63 = arith.addf %57, %62 : vector<1x1xf32>
    %c0_28 = arith.constant 0 : index
    %c0_29 = arith.constant 0 : index
    %64 = vector.load %arg7[%c0_28, %c0_29] : memref<1x1xf32, #tpu.memory_space<vmem>>, vector<1x1xf32>
    tpu.vector_store %arg7[%c0_28, %c0_29], %63 {strides = array<i32>} : memref<1x1xf32, #tpu.memory_space<vmem>>, vector<1x1xf32>,
    %c0_i32_30 = arith.constant 0 : i32
    %65 = arith.cmpi eq, %arg0, %c0_i32_30 : i32
    %66 = arith.extui %65 : i1 to i32
    %c0_i32_31 = arith.constant 0 : i32
    %67 = arith.cmpi ne, %66, %c0_i32_31 : i32
    scf.if %67 {
      %c0_32 = arith.constant 0 : index
      %c0_33 = arith.constant 0 : index
      %68 = vector.load %arg7[%c0_32, %c0_33] : memref<1x1xf32, #tpu.memory_space<vmem>>, vector<1x1xf32>
      %cst_34 = arith.constant 1.000000e+00 : f32
      %69 = vector.broadcast %cst_34 : f32 to vector<1x1xf32>
      %70 = arith.maximumf %68, %69 : vector<1x1xf32>
      %cst_35 = arith.constant 1.600000e+01 : f32
      %71 = vector.broadcast %cst_35 : f32 to vector<1x1xf32>
      %72 = arith.mulf %70, %71 : vector<1x1xf32>
      %c0_36 = arith.constant 0 : index
      %c0_37 = arith.constant 0 : index
      %73 = vector.load %arg5[%c0_36, %c0_37] : memref<1x1xf32, #tpu.memory_space<vmem>>, vector<1x1xf32>
      %cst_38 = arith.constant 4.000000e-01 : f32
      %74 = vector.broadcast %cst_38 : f32 to vector<1x1xf32>
      %75 = arith.mulf %74, %73 : vector<1x1xf32>
      %c0_39 = arith.constant 0 : index
      %c0_40 = arith.constant 0 : index
      %76 = vector.load %arg6[%c0_39, %c0_40] : memref<1x1xf32, #tpu.memory_space<vmem>>, vector<1x1xf32>
      %cst_41 = arith.constant 6.000000e-01 : f32
      %77 = vector.broadcast %cst_41 : f32 to vector<1x1xf32>
      %78 = arith.mulf %77, %76 : vector<1x1xf32>
      %79 = arith.addf %75, %78 : vector<1x1xf32>
      %80 = arith.divf %79, %72 : vector<1x1xf32>
      %c0_42 = arith.constant 0 : index
      %c0_43 = arith.constant 0 : index
      %81 = vector.load %arg4[%c0_42, %c0_43] : memref<1x1xf32, #tpu.memory_space<vmem>>, vector<1x1xf32>
      tpu.vector_store %arg4[%c0_42, %c0_43], %80 {strides = array<i32>} : memref<1x1xf32, #tpu.memory_space<vmem>>, vector<1x1xf32>,
    } else {
    }
    return
  }
  func.func @transform_0(%arg0: i32) -> (i32, i32) {
    %c0_i32 = arith.constant 0 : i32
    %c0_i32_0 = arith.constant 0 : i32
    return %arg0, %c0_i32 : i32, i32
  }
  func.func @transform_1(%arg0: i32) -> (i32, i32) {
    %c0_i32 = arith.constant 0 : i32
    %c0_i32_0 = arith.constant 0 : i32
    return %arg0, %c0_i32 : i32, i32
  }
  func.func @transform_2(%arg0: i32) -> (i32, i32) {
    %c0_i32 = arith.constant 0 : i32
    %c0_i32_0 = arith.constant 0 : i32
    return %arg0, %c0_i32 : i32, i32
  }
  func.func @transform_3(%arg0: i32) -> (i32, i32) {
    %c0_i32 = arith.constant 0 : i32
    %c0_i32_0 = arith.constant 0 : i32
    %c0_i32_1 = arith.constant 0 : i32
    return %c0_i32, %c0_i32_0 : i32, i32
  }
}

</mosaic_0001>

<bundles_post_ra>
// kernel: mae_forward.19
= control target key start
LH: loop header
LB: loop body
LE: loop exit
PB: predicated region body
PF: predicated region fallthrough
CT: control target
= control target key end

     0   :  { %8 = vsyncpa [#allocation4], 0  ;;  %s399_s0 = inlined_call_operand.hbm [shape: f32[32,16], index: 0, kind: input, shape index: {}]   ;;  %s400_s1 = inlined_call_operand.hbm [shape: bf16[16,32], index: 1, kind: input, shape index: {}]   ;;  %s401_s2 = inlined_call_operand.hbm [shape: f32[1,32], index: 2, kind: input, shape index: {}]   ;;  %s402_s3 = inlined_call_operand.hbm [shape: f32[32,32], index: 3, kind: output, shape index: {}]  }
   0x1   :  { %9 = vsyncpa [#allocation7], 0 }
   0x2   :  { %10 = vsyncpa [#allocation5], 0  ;;  %s304_s12 = smov [#allocation6]   ;;  %s210_s16 = scalar_lea.hbm %s400_s1, 128 }
   0x3   :  { %s28_s13 = sshll.u32 %s304_s12, 4  ;;  %p211_p0 = scmp.ne.s32.totalorder %s400_s1, %s210_s16  ;;  %s29_s13 = int_to_ptr.vmem [resolvable:$true] %s28_s13 }
   0x4   :  { %p214_p1 = scmp.lt.u32.totalorder %s210_s16, %s400_s1 }
   0x6   :  { %p216_p2 = pnand %p214_p1, %p211_p0 }
   0x8   :  { %219 = shalt.err (!%p216_p2)
}
   0x9   :  { %s220_s21 = scalar_lea.vmem %s29_s13, 128  ;;  %p225_p4 = scmp.lt.s32.totalorder %s29_s13, %s29_s13 }
   0xa   :  { %p221_p3 = scmp.ne.s32.totalorder %s29_s13, %s220_s21  ;;  %p226_p5 = scmp.lt.s32.totalorder %s220_s21, %s220_s21 }
   0xc   :  { %p227_p6 = por %p226_p5, %p225_p4 }
   0xe   :  { %p228_p7 = pnand %p227_p6, %p221_p3 }
  0x10   :  { %231 = shalt.err (!%p228_p7)
}
  0x11   :  { %s305_s22 = smov 64   ;;  %s306_s23 = smov 4  }
  0x12   :  { %34 = dma.hbm_to_vmem [thread:$0]  %s400_s1, 128, %s29_s13, [#allocation7], %s305_s22, %s305_s22, %s306_s23  }
  0x13   :  { %s307_s26 = smov [#allocation3]   ;;  %s232_s30 = scalar_lea.hbm %s399_s0, 512 }
  0x14   :  { %s16_s27 = sshll.u32 %s307_s26, 4  ;;  %p233_p8 = scmp.ne.s32.totalorder %s399_s0, %s232_s30  ;;  %s17_s27 = int_to_ptr.vmem [resolvable:$true] %s16_s27 }
  0x15   :  { %p236_p9 = scmp.lt.u32.totalorder %s232_s30, %s399_s0 }
  0x17   :  { %p238_p10 = pnand %p236_p9, %p233_p8 }
  0x19   :  { %241 = shalt.err (!%p238_p10)
}
  0x1a   :  { %s242_s8 = scalar_lea.vmem %s17_s27, 512  ;;  %p247_p12 = scmp.lt.s32.totalorder %s17_s27, %s17_s27 }
  0x1b   :  { %p243_p11 = scmp.ne.s32.totalorder %s17_s27, %s242_s8  ;;  %p248_p13 = scmp.lt.s32.totalorder %s242_s8, %s242_s8 }
  0x1d   :  { %p249_p0 = por %p248_p13, %p247_p12 }
  0x1f   :  { %p250_p1 = pnand %p249_p0, %p243_p11 }
  0x21   :  { %253 = shalt.err (!%p250_p1)
}
  0x22   :  { %s308_s1 = smov 128   ;;  %s309_s9 = smov 8  }
  0x23   :  { %22 = dma.hbm_to_vmem [thread:$0]  %s399_s0, 512, %s17_s27, [#allocation4], %s308_s1, %s308_s1, %s309_s9  }
  0x24   :  { %s310_s12 = smov [#allocation8]   ;;  %s254_s16 = scalar_lea.hbm %s401_s2, 16 }
  0x25   :  { %s41_s13 = sshll.u32 %s310_s12, 4  ;;  %p255_p2 = scmp.ne.s32.totalorder %s401_s2, %s254_s16  ;;  %s42_s13 = int_to_ptr.vmem [resolvable:$true] %s41_s13 }
  0x26   :  { %p258_p3 = scmp.lt.u32.totalorder %s254_s16, %s401_s2 }
  0x28   :  { %p260_p4 = pnand %p258_p3, %p255_p2 }
  0x2a   :  { %263 = shalt.err (!%p260_p4)
}
  0x2b   :  { %s264_s21 = scalar_lea.vmem %s42_s13, 16  ;;  %s268_s0 = scalar_lea.vmem %s42_s13, 32 }
  0x2c   :  { %p265_p5 = scmp.ne.s32.totalorder %s42_s13, %s264_s21  ;;  %p269_p6 = scmp.lt.s32.totalorder %s42_s13, %s42_s13 }
  0x2d   :  { %p270_p7 = scmp.lt.s32.totalorder %s268_s0, %s264_s21 }
  0x2f   :  { %p271_p8 = por %p270_p7, %p269_p6 }
  0x31   :  { %p272_p9 = pnand %p271_p8, %p265_p5 }
  0x33   :  { %275 = shalt.err (!%p272_p9)
}
  0x34   :  { %44 = dma.hbm_to_vmem [thread:$0]  %s401_s2, 16, %s42_s13, [#allocation7]  }
  0x35   :  { %298 = dma.done.wait [#allocation4], 512  }
  0x36   :  { %299 = vsyncadd [#allocation4], 4294966784 }
  0x37   :  { %300 = dma.done.wait [#allocation7], 144  }
  0x38   :  { %301 = vsyncadd [#allocation7], 4294967152  ;;  %vm59_vm0 = vcmask 261120   ;;  %v311_v0 = vmov 0.0   ;;  %v209_v1 = vld [vmem:[#allocation6] sm:$0xff]   ;;  %v69_v3 = vld [vmem:[#allocation3 + $0x8] sm:$0xff] }
  0x39   :  { %62 = vst.msk [vmem:[#allocation2 + $0x10] sm:$0xff] %vm59_vm0, %v311_v0  ;;  %60 = vst.msk [vmem:[#allocation2] sm:$0xff] %vm59_vm0, %v311_v0  ;;  %v68_v2 = vld [vmem:[#allocation3] sm:$0xff]  ;;  %vm82_vm1 = vcmask 130048   ;;  %v70_v4 = vld [vmem:[#allocation3 + $0x10] sm:$0xff]  ;;  %194 = vmatprep.subr.bf16.mxu0 %v209_v1  ;;  %s312_s2 = smov [#allocation9]  }
  0x3a   :  { %61 = vst.msk [vmem:[#allocation2 + $0x8] sm:$0xff] %vm59_vm0, %v311_v0  ;;  %63 = vst.msk [vmem:[#allocation2 + $0x18] sm:$0xff] %vm59_vm0, %v311_v0  ;;  %v72_v5 = vpack.c.bf16 %v69_v3, %v68_v2  ;;  %v71_v6 = vld [vmem:[#allocation3 + $0x18] sm:$0xff]  ;;  %195 = vmatpush3.bf16.msra.mxu0 %v209_v1  ;;  %v190_v20 = vld [vmem:[#allocation8] ss:$0 sm:$0xff]  ;;  %s174_s24 = sshll.u32 %s312_s2, 4  ;;  %s175_s24 = int_to_ptr.vmem [resolvable:$true] %s174_s24 }
  0x3b   :  { %v73_v7 = vpack.c.bf16 %v71_v6, %v70_v4  ;;  %s276_s25 = scalar_lea.vmem %s175_s24, 512  ;;  %p281_p11 = scmp.lt.s32.totalorder %s175_s24, %s175_s24 }
  0x3c   :  { %196 = vmatprep.mubr.msk.bf16.mxu0 %vm82_vm1, %v72_v5  ;;  %p277_p10 = scmp.ne.s32.totalorder %s175_s24, %s276_s25  ;;  %p282_p12 = scmp.lt.s32.totalorder %s276_s25, %s276_s25 }
  0x3d   :  { %197 = vmatmul.mubr.msk.bf16.vlgmr.msra.gmra.mrb[0].mxu0 %vm82_vm1, %v73_v7 }
  0x3e   :  { %p283_p13 = por %p282_p12, %p281_p11 }
  0x40   :  { %v66_v8 = vld [vmem:[#allocation2 + $0x10] sm:$0xff]  ;;  %v64_v9 = vld [vmem:[#allocation2] sm:$0xff]  ;;  %p284_p0 = pnand %p283_p13, %p277_p10 }
  0x41   :  { %v67_v11 = vld [vmem:[#allocation2 + $0x18] sm:$0xff]  ;;  %v65_v14 = vld [vmem:[#allocation2 + $0x8] sm:$0xff] }
 0x110   :  { %v198_v10 = vpop.f32.mrb[0].mxu0 }
 0x111   :  { %v140_v12 = vadd.f32 %v198_v10, %v66_v8  ;;  %v123_v13 = vpop.f32.mrb[1].mxu0 }
 0x112   :  { %v138_v15 = vadd.f32 %v123_v13, %v64_v9  ;;  %v199_v16 = vpop.f32.mrb[2].mxu0 }
 0x113   :  { %145 = vst.msk [vmem:[#allocation2 + $0x10] sm:$0xff] %vm59_vm0, %v140_v12  ;;  %v141_v17 = vadd.f32 %v199_v16, %v67_v11  ;;  %v126_v18 = vpop.f32.mrb[3].mxu0 }
 0x114   :  { %143 = vst.msk [vmem:[#allocation2] sm:$0xff] %vm59_vm0, %v138_v15  ;;  %v139_v19 = vadd.f32 %v126_v18, %v65_v14 }
 0x115   :  { %146 = vst.msk [vmem:[#allocation2 + $0x18] sm:$0xff] %vm59_vm0, %v141_v17 }
 0x116   :  { %144 = vst.msk [vmem:[#allocation2 + $0x8] sm:$0xff] %vm59_vm0, %v139_v19 }
 0x11a   :  { %v152_v21 = vld [vmem:[#allocation2 + $0x10] sm:$0xff] }
 0x11b   :  { %v150_v22 = vld [vmem:[#allocation2] sm:$0xff]  ;;  %v163_v23 = vadd.f32 %v190_v20, %v152_v21 }
 0x11c   :  { %v153_v24 = vld [vmem:[#allocation2 + $0x18] sm:$0xff]  ;;  %v161_v25 = vadd.f32 %v190_v20, %v150_v22 }
 0x11d   :  { %v151_v26 = vld [vmem:[#allocation2 + $0x8] sm:$0xff]  ;;  %v164_v27 = vadd.f32 %v190_v20, %v153_v24  ;;  %167 = vst.msk [vmem:[#allocation9 + $0x10] sm:$0xff] %vm59_vm0, %v163_v23 }
 0x11e   :  { %v162_v28 = vadd.f32 %v190_v20, %v151_v26  ;;  %165 = vst.msk [vmem:[#allocation9] sm:$0xff] %vm59_vm0, %v161_v25 }
 0x11f   :  { %168 = vst.msk [vmem:[#allocation9 + $0x18] sm:$0xff] %vm59_vm0, %v164_v27 }
 0x120   :  { %166 = vst.msk [vmem:[#allocation9 + $0x8] sm:$0xff] %vm59_vm0, %v162_v28 }
 0x121   :  { %287 = shalt.err (!%p284_p0)
}
 0x122   :  { %s288_s28 = scalar_lea.hbm %s402_s3, 512 }
 0x123   :  { %p289_p1 = scmp.ne.s32.totalorder %s402_s3, %s288_s28  ;;  %p292_p2 = scmp.lt.u32.totalorder %s288_s28, %s402_s3 }
 0x125   :  { %p294_p3 = pnand %p292_p2, %p289_p1 }
 0x127   :  { %297 = shalt.err (!%p294_p3)
}
 0x128   :  { %180 = dma.vmem_to_hbm [thread:$0]  %s175_s24, 512, %s402_s3, [#allocation5], %s308_s1, %s308_s1, %s309_s9  }
 0x129   :  { %302 = dma.done.wait [#allocation5], 512  }
 0x12a   :  { %303 = vsyncadd [#allocation5], 4294966784 }
 0x12b   :  { %184 = vsyncpa [#allocation4], 1 }
 0x12c   :  { %185 = vsyncpa [#allocation7], 1 }
 0x12d   :  { %186 = vsyncpa [#allocation5], 1 }

// kernel: mae_forward.20
= control target key start
LH: loop header
LB: loop body
LE: loop exit
PB: predicated region body
PF: predicated region fallthrough
CT: control target
= control target key end

     0   :  { %10 = vsyncpa [#allocation3], 0  ;;  %s529_s0 = inlined_call_operand.hbm [shape: f32[10,32], index: 0, kind: input, shape index: {}]   ;;  %s530_s1 = inlined_call_operand.hbm [shape: f32[1,32], index: 1, kind: input, shape index: {}]   ;;  %s531_s2 = inlined_call_operand.hbm [shape: f32[1,32], index: 2, kind: input, shape index: {}]   ;;  %s532_s3 = inlined_call_operand.hbm [shape: bf16[32,96], index: 3, kind: input, shape index: {}]   ;;  %s533_s4 = inlined_call_operand.hbm [shape: f32[1,96], index: 4, kind: input, shape index: {}]   ;;  %s534_s5 = inlined_call_operand.hbm [shape: f32[10,96], index: 5, kind: output, shape index: {}]  }
   0x1   :  { %11 = vsyncpa [#allocation6], 0 }
   0x2   :  { %12 = vsyncpa [#allocation9], 0 }
   0x3   :  { %13 = vsyncpa [#allocation4], 0  ;;  %s399_s18 = smov [#allocation5]   ;;  %s400_s20 = smov [#allocation8]  }
   0x4   :  { %s32_s19 = sshll.u32 %s399_s18, 4  ;;  %s51_s21 = sshll.u32 %s400_s20, 4  ;;  %s33_s19 = int_to_ptr.vmem [resolvable:$true] %s32_s19  ;;  %s441_s21 = int_to_ptr.vmem [resolvable:$true] %s51_s21 }
   0x5   :  { %s259_s24 = scalar_lea.hbm %s530_s1, 16 }
   0x6   :  { %p260_p0 = scmp.ne.s32.totalorder %s530_s1, %s259_s24  ;;  %p263_p1 = scmp.lt.u32.totalorder %s259_s24, %s530_s1 }
   0x8   :  { %p265_p2 = pnand %p263_p1, %p260_p0 }
   0xa   :  { %268 = shalt.err (!%p265_p2)
}
   0xb   :  { %s269_s29 = scalar_lea.vmem %s33_s19, 16  ;;  %s273_s30 = scalar_lea.vmem %s33_s19, 32 }
   0xc   :  { %p270_p3 = scmp.ne.s32.totalorder %s33_s19, %s269_s29  ;;  %p274_p4 = scmp.lt.s32.totalorder %s33_s19, %s33_s19 }
   0xd   :  { %p275_p5 = scmp.lt.s32.totalorder %s273_s30, %s269_s29 }
   0xf   :  { %p276_p6 = por %p275_p5, %p274_p4 }
  0x11   :  { %p277_p7 = pnand %p276_p6, %p270_p3 }
  0x13   :  { %280 = shalt.err (!%p277_p7)
}
  0x14   :  { %35 = dma.hbm_to_vmem [thread:$0]  %s530_s1, 16, %s33_s19, [#allocation6]  }
  0x15   :  { %s281_s10 = scalar_lea.hbm %s532_s3, 256 }
  0x16   :  { %p282_p8 = scmp.ne.s32.totalorder %s532_s3, %s281_s10  ;;  %p285_p9 = scmp.lt.u32.totalorder %s281_s10, %s532_s3 }
  0x18   :  { %p287_p10 = pnand %p285_p9, %p282_p8 }
  0x1a   :  { %290 = shalt.err (!%p287_p10)
}
  0x1b   :  { %s291_s15 = scalar_lea.vmem %s441_s21, 256  ;;  %p296_p12 = scmp.lt.s32.totalorder %s441_s21, %s441_s21 }
  0x1c   :  { %p292_p11 = scmp.ne.s32.totalorder %s441_s21, %s291_s15  ;;  %p297_p13 = scmp.lt.s32.totalorder %s291_s15, %s291_s15 }
  0x1e   :  { %p298_p0 = por %p297_p13, %p296_p12 }
  0x20   :  { %p299_p1 = pnand %p298_p0, %p292_p11 }
  0x22   :  { %302 = shalt.err (!%p299_p1)
}
  0x23   :  { %s401_s1 = smov 64   ;;  %s402_s16 = smov 4  }
  0x24   :  { %57 = dma.hbm_to_vmem [thread:$0]  %s532_s3, 256, %s441_s21, [#allocation9], %s401_s1, %s401_s1, %s402_s16  }
  0x25   :  { %s403_s19 = smov [#allocation2]   ;;  %s303_s24 = scalar_lea.hbm %s529_s0, 256 }
  0x26   :  { %s19_s20 = sshll.u32 %s403_s19, 4  ;;  %p304_p2 = scmp.ne.s32.totalorder %s529_s0, %s303_s24  ;;  %s20_s20 = int_to_ptr.vmem [resolvable:$true] %s19_s20 }
  0x27   :  { %p307_p3 = scmp.lt.u32.totalorder %s303_s24, %s529_s0 }
  0x29   :  { %p309_p4 = pnand %p307_p3, %p304_p2 }
  0x2b   :  { %312 = shalt.err (!%p309_p4)
}
  0x2c   :  { %s313_s29 = scalar_lea.vmem %s20_s20, 256  ;;  %p318_p6 = scmp.lt.s32.totalorder %s20_s20, %s20_s20 }
  0x2d   :  { %p314_p5 = scmp.ne.s32.totalorder %s20_s20, %s313_s29  ;;  %p319_p7 = scmp.lt.s32.totalorder %s313_s29, %s313_s29 }
  0x2f   :  { %p320_p8 = por %p319_p7, %p318_p6 }
  0x31   :  { %p321_p9 = pnand %p320_p8, %p314_p5 }
  0x33   :  { %324 = shalt.err (!%p321_p9)
}
  0x34   :  { %s404_s3 = smov 128   ;;  %s405_s21 = smov 8  }
  0x35   :  { %25 = dma.hbm_to_vmem [thread:$0]  %s529_s0, 256, %s20_s20, [#allocation3], %s404_s3, %s404_s3, %s405_s21  }
  0x36   :  { %s406_s7 = smov [#allocation7]   ;;  %s407_s9 = smov [#allocation10]  }
  0x37   :  { %s42_s8 = sshll.u32 %s406_s7, 4  ;;  %s64_s10 = sshll.u32 %s407_s9, 4  ;;  %s43_s8 = int_to_ptr.vmem [resolvable:$true] %s42_s8  ;;  %s65_s10 = int_to_ptr.vmem [resolvable:$true] %s64_s10 }
  0x38   :  { %s325_s13 = scalar_lea.hbm %s531_s2, 16 }
  0x39   :  { %p326_p10 = scmp.ne.s32.totalorder %s531_s2, %s325_s13  ;;  %p329_p11 = scmp.lt.u32.totalorder %s325_s13, %s531_s2 }
  0x3b   :  { %p331_p12 = pnand %p329_p11, %p326_p10 }
  0x3d   :  { %334 = shalt.err (!%p331_p12)
}
  0x3e   :  { %s335_s0 = scalar_lea.vmem %s43_s8, 16  ;;  %s339_s17 = scalar_lea.vmem %s43_s8, 32 }
  0x3f   :  { %p336_p13 = scmp.ne.s32.totalorder %s43_s8, %s335_s0  ;;  %p340_p0 = scmp.lt.s32.totalorder %s43_s8, %s43_s8 }
  0x40   :  { %p341_p1 = scmp.lt.s32.totalorder %s339_s17, %s335_s0 }
  0x42   :  { %p342_p2 = por %p341_p1, %p340_p0 }
  0x44   :  { %p343_p3 = pnand %p342_p2, %p336_p13 }
  0x46   :  { %346 = shalt.err (!%p343_p3)
}
  0x47   :  { %45 = dma.hbm_to_vmem [thread:$0]  %s531_s2, 16, %s43_s8, [#allocation6]  }
  0x48   :  { %s347_s23 = scalar_lea.hbm %s533_s4, 16 }
  0x49   :  { %p348_p4 = scmp.ne.s32.totalorder %s533_s4, %s347_s23  ;;  %p351_p5 = scmp.lt.u32.totalorder %s347_s23, %s533_s4 }
  0x4b   :  { %p353_p6 = pnand %p351_p5, %p348_p4 }
  0x4d   :  { %356 = shalt.err (!%p353_p6)
}
  0x4e   :  { %s357_s28 = scalar_lea.vmem %s65_s10, 16  ;;  %s361_s29 = scalar_lea.vmem %s65_s10, 32 }
  0x4f   :  { %p358_p7 = scmp.ne.s32.totalorder %s65_s10, %s357_s28  ;;  %p362_p8 = scmp.lt.s32.totalorder %s65_s10, %s65_s10 }
  0x50   :  { %p363_p9 = scmp.lt.s32.totalorder %s361_s29, %s357_s28 }
  0x52   :  { %p364_p10 = por %p363_p9, %p362_p8 }
  0x54   :  { %p365_p11 = pnand %p364_p10, %p358_p7 }
  0x56   :  { %368 = shalt.err (!%p365_p11)
}
  0x57   :  { %67 = dma.hbm_to_vmem [thread:$0]  %s533_s4, 16, %s65_s10, [#allocation9]  }
  0x58   :  { %391 = dma.done.wait [#allocation3], 256  }
  0x59   :  { %392 = vsyncadd [#allocation3], 4294967040 }
  0x5a   :  { %393 = dma.done.wait [#allocation6], 32  }
  0x5b   :  { %394 = vsyncadd [#allocation6], 4294967264 }
  0x5c   :  { %395 = dma.done.wait [#allocation9], 272  }
  0x5d   :  { %396 = vsyncadd [#allocation9], 4294967024  ;;  %vm86_vm0 = vcmask 261120   ;;  %v84_v0 = vld [vmem:[#allocation2] sm:$0xff]  ;;  %v85_v1 = vld [vmem:[#allocation2 + $0x8] sm:$0x3] }
  0x5e   :  { %vm90_vm1 = vcmask 254976   ;;  %v87_v2 = vsel %vm86_vm0, %v84_v0, 0.0  ;;  %v253_v14 = vld [vmem:[#allocation8] sm:$0xff]   ;;  %v408_v15 = vmov 0.0   ;;  %v254_v16 = vld [vmem:[#allocation8 + $0x8] sm:$0xff]   ;;  %vm409_vm2 = vmmov 0  }
  0x5f   :  { %88 = vadd.xlane.f32.xlu0 %v87_v2  ;;  %v91_v3 = vsel %vm90_vm1, %v85_v1, 0.0  ;;  %233 = vmatprep.subr.bf16.mxu0 %v408_v15  ;;  %v224_v25 = vld [vmem:[#allocation5] ss:$0 sm:$0xff]  ;;  %v225_v29 = vld [vmem:[#allocation7] ss:$0 sm:$0xff]  ;;  %vm201_vm3 = vcmask 785408  }
  0x60   :  { %234 = vmatpush3.bf16.msra.mxu0 %v253_v14  ;;  %237 = vmatprep.mubr.msk.bf16.mxu0 %vm409_vm2, %v408_v15  ;;  %v226_v34 = vld [vmem:[#allocation10] ss:$0 sm:$0xff]  ;;  %s410_s4 = smov [#allocation11]   ;;  %vm203_vm4 = vcmask 779264  }
  0x61   :  { %235 = vmatprep.subr.bf16.mxu0 %v408_v15  ;;  %s210_s6 = sshll.u32 %s410_s4, 4  ;;  %s211_s6 = int_to_ptr.vmem [resolvable:$true] %s210_s6 }
  0x62   :  { %s369_s7 = scalar_lea.vmem %s211_s6, 256  ;;  %p374_p13 = scmp.lt.s32.totalorder %s211_s6, %s211_s6 }
  0x63   :  { %92 = vadd.xlane.f32.xlu0 %v91_v3  ;;  %p370_p12 = scmp.ne.s32.totalorder %s211_s6, %s369_s7  ;;  %p375_p0 = scmp.lt.s32.totalorder %s369_s7, %s369_s7 }
  0x64   :  { %236 = vmatpush3.bf16.msra.mxu0 %v254_v16 }
  0x65   :  { %p376_p1 = por %p375_p0, %p374_p13 }
  0x67   :  { %p377_p2 = pnand %p376_p1, %p370_p12 }
  0xec   :  { %v89_v4 = vpop.xlane.xlu0 %88 }
  0xed   :  { %v95_v5 = vmul.f32 0.03125, %v89_v4 }
  0xef   :  { %v97_v6 = vsub.f32 %v84_v0, %v95_v5 }
  0xf0   :  { %v93_v7 = vpop.xlane.xlu0 %92 }
  0xf1   :  { %v96_v8 = vmul.f32 0.03125, %v93_v7  ;;  %v99_v9 = vmul.f32 %v97_v6, %v97_v6 }
  0xf3   :  { %v98_v10 = vsub.f32 %v85_v1, %v96_v8  ;;  %v101_v11 = vsel %vm86_vm0, %v99_v9, 0.0 }
  0xf4   :  { %102 = vadd.xlane.f32.xlu1 %v101_v11 }
  0xf5   :  { %v100_v12 = vmul.f32 %v98_v10, %v98_v10 }
  0xf7   :  { %v104_v13 = vsel %vm90_vm1, %v100_v12, 0.0 }
  0xf8   :  { %105 = vadd.xlane.f32.xlu1 %v104_v13 }
 0x181   :  { %v103_v17 = vpop.xlane.xlu1 %102 }
 0x182   :  { %v107_v18 = vmul.f32 0.03125, %v103_v17 }
 0x184   :  { %v109_v19 = vadd.f32 1e-05, %v107_v18 }
 0x185   :  { %v106_v20 = vpop.xlane.xlu1 %105 }
 0x186   :  { %255 = vrsqrt.f32 %v109_v19  ;;  %v108_v21 = vmul.f32 0.03125, %v106_v20 }
 0x188   :  { %v110_v22 = vadd.f32 1e-05, %v108_v21 }
 0x18a   :  { %257 = vrsqrt.f32 %v110_v22 }
 0x190   :  { %v256_v23 = vpop.eup %255 }
 0x191   :  { %v113_v24 = vmul.f32 %v256_v23, %v97_v6 }
 0x193   :  { %v122_v28 = vmul.f32 %v224_v25, %v113_v24 }
 0x194   :  { %v258_v26 = vpop.eup %257 }
 0x195   :  { %v114_v27 = vmul.f32 %v258_v26, %v98_v10  ;;  %v131_v31 = vadd.f32 %v225_v29, %v122_v28 }
 0x197   :  { %v123_v30 = vmul.f32 %v224_v25, %v114_v27 }
 0x199   :  { %v132_v32 = vadd.f32 %v225_v29, %v123_v30 }
 0x19b   :  { %v133_v33 = vpack.c.bf16 %v132_v32, %v131_v31 }
 0x19d   :  { %238 = vmatmul.mubr.msk.bf16.vlgmr.msra.gmra.mrb[0].mxu0 %vm86_vm0, %v133_v33 }
 0x270   :  { %v194_v35 = vpop.f32.mrb[0].mxu0 }
 0x271   :  { %v195_v36 = vadd.f32 %v226_v34, %v194_v35  ;;  %v239_v37 = vpop.f32.mrb[1].mxu0 }
 0x272   :  { %v197_v38 = vpop.f32.mrb[2].mxu0 }
 0x273   :  { %v198_v39 = vadd.f32 %v226_v34, %v197_v38  ;;  %v240_v40 = vpop.f32.mrb[3].mxu0  ;;  %202 = vst.msk [vmem:[#allocation11] sm:$0xff] %vm201_vm3, %v195_v36 }
 0x275   :  { %204 = vst.msk [vmem:[#allocation11 + $0x8] sm:$0x3] %vm203_vm4, %v198_v39 }
 0x276   :  { %380 = shalt.err (!%p377_p2)
}
 0x277   :  { %s381_s10 = scalar_lea.hbm %s534_s5, 256 }
 0x278   :  { %p382_p3 = scmp.ne.s32.totalorder %s534_s5, %s381_s10  ;;  %p385_p4 = scmp.lt.u32.totalorder %s381_s10, %s534_s5 }
 0x27a   :  { %p387_p5 = pnand %p385_p4, %p382_p3 }
 0x27c   :  { %390 = shalt.err (!%p387_p5)
}
 0x27d   :  { %216 = dma.vmem_to_hbm [thread:$0]  %s211_s6, 256, %s534_s5, [#allocation4], %s404_s3, %s404_s3, %s405_s21  }
 0x27e   :  { %397 = dma.done.wait [#allocation4], 256  }
 0x27f   :  { %398 = vsyncadd [#allocation4], 4294967040 }
 0x280   :  { %220 = vsyncpa [#allocation3], 1 }
 0x281   :  { %221 = vsyncpa [#allocation6], 1 }
 0x282   :  { %222 = vsyncpa [#allocation9], 1 }
 0x283   :  { %223 = vsyncpa [#allocation4], 1 }

// kernel: mae_forward.21
= control target key start
LH: loop header
LB: loop body
LE: loop exit
PB: predicated region body
PF: predicated region fallthrough
CT: control target
= control target key end

     0   :  { %s1538_s0 = inlined_call_operand.hbm [shape: f32[2,4,5,8], index: 0, kind: input, shape index: {}]   ;;  %s1539_s1 = inlined_call_operand.hbm [shape: f32[2,4,5,8], index: 1, kind: input, shape index: {}]   ;;  %s1540_s2 = inlined_call_operand.hbm [shape: f32[2,4,5,8], index: 2, kind: input, shape index: {}]   ;;  %s1541_s3 = inlined_call_operand.hbm [shape: f32[2,4,5,8], index: 3, kind: output, shape index: {}]  }
   0x1   :  { %1548 = sst [smem:[#allocation12_spill]] %s1538_s0 }
   0x2   :  { %8 = vsyncpa [#allocation3], 0 }
   0x3   :  { %10 = vsyncpa [#allocation3 + $0x1], 0 }
   0x4   :  { %11 = vsyncpa [#allocation6], 0 }
   0x5   :  { %13 = vsyncpa [#allocation6 + $0x1], 0 }
   0x6   :  { %14 = vsyncpa [#allocation4], 0 }
   0x7   :  { %16 = vsyncpa [#allocation4 + $0x1], 0  ;;  %s1223_s12 = smov 0   ;;  %s1225_s13 = smov 0  }
   0x8   :  { %s1227_s14 = smov 0   ;;  %s1229_s15 = smov 0  }
   0x9 LB: > { %s1244_s16 = sadd.s32 4294967295, %s1190_s15   ;;  %s853_s17 = sadd.s32 4294967294, %s1190_s15   ;;  %s1190_s15 = sphi %s1229_s15, %s1567_s15   ;;  %s1186_s14 = sphi %s1227_s14, %s1566_s14   ;;  %s1182_s13 = sphi %s1225_s13, %s1565_s13   ;;  %s1178_s12 = sphi %s1223_s12, %s1564_s12  }
   0xa   : > { %s1248_s18 = sadd.s32 1, %s1190_s15   ;;  %s29_s19 = sadd.s32 1, %s1186_s14 }
   0xb   : > { %s26_s20 = ssub.s32 %s1190_s15, %s1248_s18  ;;  %p36_p0 = scmp.ne.s32.totalorder %s1186_s14, %s1182_s13 }
   0xc   : > { %p27_p1 = scmp.eq.s32.totalorder %s26_s20, 0  ;;  %p37_p2 = scmp.eq.s32.totalorder %s1190_s15, 0 }
   0xd   : > { %p42_p3 = scmp.ne.s32.totalorder %s1182_s13, %s1178_s12  ;;  %p43_p4 = scmp.eq.s32.totalorder %s1244_s16, 0 }
   0xe   : > { %s1260_s21 = scalar_select %p27_p1, %s1186_s14, %s29_s19  }
   0xf   : > { %p38_p5 = por %p37_p2, %p36_p0  ;;  %p1262_p6 = por %p43_p4, %p42_p3 }
  0x10   : > { %p118_p7 = scmp.eq.s32.totalorder %s1244_s16, 1  ;;  %p124_p8 = scmp.eq.s32.totalorder %s853_s17, 1 }
  0x11   : > { %s1549_s22 = scalar_select %p1262_p6, 1, 0 }
  0x12   : > { %p973_p10 = scmp.lt.s32.totalorder %s1190_s15, 2  ;;  %p1269_p11 = por %p118_p7, %p36_p0 }
  0x13   : > { %p1273_p12 = por %p124_p8, %p42_p3  ;;  %s144_s25 = sand.u32 1, %s1186_s14  }
  0x14   : > { %s1550_s23 = scalar_select %p1269_p11, 1, 0 }
  0x15   : > { %s1551_s24 = scalar_select %p1273_p12, 1, 0 }
  0x16   : > { %s1279_s26 = sshll.u32 %s1190_s15, 9  ;;  %s1283_s27 = sshll.u32 %s144_s25, 5 }
  0x17   : > { %p1285_p13 = pnand %p973_p10, %p38_p5  ;;  %s165_s29 = sand.u32 1, %s1190_s15  }
  0x18   : > { %s1294_s5 = scalar_lea.hbm %s1539_s1, %s1279_s26  ;;  %s169_s6 = scalar_lea.vmem [#allocation5], %s1283_s27 }
  0x19   : > { %s176_s7 = sshll.u32 %s169_s6, 4  ;;  %s1300_s8 = scalar_lea.sflag [#allocation6], %s165_s29  ;;  %s1297_s7 = int_to_ptr.vmem [resolvable:$true] %s176_s7 }
  0x1a   : > { %s1030_s9 = scalar_lea.hbm %s1294_s5, 512  ;;  %p1306_p2 = pneg %p1285_p13 }
  0x1b   : > { %p1031_p1 = scmp.ne.s32.totalorder %s1294_s5, %s1030_s9  ;;  %s1035_s19 = scalar_lea.hbm %s1539_s1, 1024 }
  0x1c   : > { %p1036_p5 = scmp.lt.u32.totalorder %s1294_s5, %s1539_s1  ;;  %p1037_p7 = scmp.lt.u32.totalorder %s1035_s19, %s1030_s9 }
  0x1d   : > { %p1033_p3 = pnand %p1306_p2, %p1031_p1  ;;  %p1039_p10 = scmp.lt.u32.totalorder %s1030_s9, %s1294_s5 }
  0x1e   : > { %p1038_p8 = por %p1037_p7, %p1036_p5 }
  0x1f   : > { %p1034_p4 = pneg %p1033_p3 }
  0x20   : > { %p1040_p9 = por %p1039_p10, %p1038_p8 }
  0x22   : > { %p1041_p0 = pnand %p1040_p9, %p1034_p4 }
  0x24   : > { %1044 = shalt.err (!%p1041_p0)
}
  0x25   : > { %s1045_s29 = scalar_lea.vmem %s1297_s7, 512  ;;  %s1192_s4 = smov [#allocation5]  }
  0x26   : > { %p1046_p1 = scmp.ne.s32.totalorder %s1297_s7, %s1045_s29  ;;  %s1050_s6 = sshll.u32 %s1192_s4, 4  ;;  %s1051_s6 = int_to_ptr.vmem [resolvable:$false] %s1050_s6 }
  0x27   : > { %s1052_s11 = scalar_lea.vmem %s1051_s6, 1024  ;;  %p1053_p11 = scmp.lt.s32.totalorder %s1297_s7, %s1051_s6 }
  0x28   : > { %p1048_p3 = pnand %p1046_p1, %p1306_p2  ;;  %p1054_p6 = scmp.lt.s32.totalorder %s1052_s11, %s1045_s29 }
  0x2a   : > { %p1049_p12 = pneg %p1048_p3  ;;  %p1055_p5 = por %p1054_p6, %p1053_p11 }
  0x2c   : > { %p1056_p7 = pnand %p1055_p5, %p1049_p12 }
  0x2e   : > { %1059 = shalt.err (!%p1056_p7)
}
  0x2f   : > { %s1544_s9 = smov 128   ;;  %s1546_s17 = smov 8  }
  0x30   : > { %965 = dma.hbm_to_vmem [thread:$0]  (!%p1285_p13), %s1294_s5, 512, %s1297_s7, %s1300_s8, %s1544_s9, %s1544_s9, %s1546_s17  }
  0x31   : > { %p205_p6 = scmp.lt.s32.totalorder %s1190_s15, 3  ;;  %s1554_s0 = sld [smem:[#allocation12_spill]] }
  0x32   : > { %p1555_p9 = scmp.ge.s32.totalorder %s1190_s15, 1  ;;  %s148_s4 = scalar_lea.vmem [#allocation2], %s1283_s27 }
  0x33   : > { %s155_s6 = sshll.u32 %s148_s4, 4  ;;  %s1351_s5 = scalar_lea.sflag [#allocation3], %s144_s25  ;;  %s1347_s6 = int_to_ptr.vmem [resolvable:$true] %s155_s6 }
  0x34   : > { %p1342_p11 = pnand %p1555_p9, %p205_p6 }
  0x36   : > { %s1556_s29 = scalar_select %p1342_p11, 1, 0 }
  0x37   : > { %s1338_s30 = scalar_lea.hbm %s1554_s0, %s1279_s26  ;;  %s1065_s20 = scalar_lea.hbm %s1554_s0, 1024 }
  0x38   : > { %s1060_s7 = scalar_lea.hbm %s1338_s30, 512  ;;  %p1066_p8 = scmp.lt.u32.totalorder %s1338_s30, %s1554_s0 }
  0x39   : > { %p1061_p12 = scmp.ne.s32.totalorder %s1338_s30, %s1060_s7  ;;  %p1067_p10 = scmp.lt.u32.totalorder %s1065_s20, %s1060_s7 }
  0x3a   : > { %p1069_p3 = scmp.lt.u32.totalorder %s1060_s7, %s1338_s30 }
  0x3b   : > { %p1063_p0 = pnand %p1061_p12, %p1306_p2  ;;  %p1068_p1 = por %p1067_p10, %p1066_p8 }
  0x3d   : > { %p1064_p4 = pneg %p1063_p0  ;;  %p1070_p5 = por %p1069_p3, %p1068_p1 }
  0x3f   : > { %p1071_p7 = pnand %p1070_p5, %p1064_p4 }
  0x41   : > { %1074 = shalt.err (!%p1071_p7)
}
  0x42   : > { %s1075_s25 = scalar_lea.vmem %s1347_s6, 512  ;;  %s1195_s4 = smov [#allocation2]  }
  0x43   : > { %p1076_p6 = scmp.ne.s32.totalorder %s1347_s6, %s1075_s25  ;;  %s1080_s11 = sshll.u32 %s1195_s4, 4  ;;  %s1081_s11 = int_to_ptr.vmem [resolvable:$false] %s1080_s11 }
  0x44   : > { %s1082_s9 = scalar_lea.vmem %s1081_s11, 1024  ;;  %p1083_p0 = scmp.lt.s32.totalorder %s1347_s6, %s1081_s11 }
  0x45   : > { %p1078_p9 = pnand %p1076_p6, %p1306_p2  ;;  %p1084_p11 = scmp.lt.s32.totalorder %s1082_s9, %s1075_s25 }
  0x47   : > { %p1079_p12 = pneg %p1078_p9  ;;  %p1085_p8 = por %p1084_p11, %p1083_p0 }
  0x49   : > { %p1086_p10 = pnand %p1085_p8, %p1079_p12 }
  0x4b   : > { %1089 = shalt.err (!%p1086_p10)
}
  0x4c   : > { %s1557_s17 = smov 8   ;;  %s1558_s7 = smov 128  }
  0x4d   : > { %962 = dma.hbm_to_vmem [thread:$0]  (!%p1285_p13), %s1338_s30, 512, %s1347_s6, %s1351_s5, %s1558_s7, %s1558_s7, %s1557_s17  }
  0x4e   : > { %s1382_s4 = scalar_lea.hbm %s1540_s2, %s1279_s26  ;;  %s190_s25 = scalar_lea.vmem [#allocation7], %s1283_s27 }
  0x4f   : > { %s197_s11 = sshll.u32 %s190_s25, 4  ;;  %s1090_s9 = scalar_lea.hbm %s1382_s4, 512  ;;  %s1385_s11 = int_to_ptr.vmem [resolvable:$true] %s197_s11 }
  0x50   : > { %p1091_p11 = scmp.ne.s32.totalorder %s1382_s4, %s1090_s9  ;;  %s1095_s6 = scalar_lea.hbm %s1540_s2, 1024 }
  0x51   : > { %p1096_p3 = scmp.lt.u32.totalorder %s1382_s4, %s1540_s2  ;;  %p1097_p5 = scmp.lt.u32.totalorder %s1095_s6, %s1090_s9 }
  0x52   : > { %p1093_p4 = pnand %p1091_p11, %p1306_p2  ;;  %p1099_p6 = scmp.lt.u32.totalorder %s1090_s9, %s1382_s4 }
  0x53   : > { %p1098_p7 = por %p1097_p5, %p1096_p3 }
  0x54   : > { %p1094_p1 = pneg %p1093_p4 }
  0x55   : > { %p1100_p9 = por %p1099_p6, %p1098_p7 }
  0x57   : > { %p1101_p12 = pnand %p1100_p9, %p1094_p1 }
  0x59   : > { %1104 = shalt.err (!%p1101_p12)
}
  0x5a   : > { %s1105_s27 = scalar_lea.vmem %s1385_s11, 512  ;;  %s1196_s0 = smov [#allocation7]  }
  0x5b   : > { %p1106_p0 = scmp.ne.s32.totalorder %s1385_s11, %s1105_s27  ;;  %s1110_s19 = sshll.u32 %s1196_s0, 4  ;;  %s1111_s19 = int_to_ptr.vmem [resolvable:$false] %s1110_s19 }
  0x5c   : > { %s1112_s20 = scalar_lea.vmem %s1111_s19, 1024  ;;  %p1113_p11 = scmp.lt.s32.totalorder %s1385_s11, %s1111_s19 }
  0x5d   : > { %p1108_p8 = pnand %p1106_p0, %p1306_p2  ;;  %p1114_p4 = scmp.lt.s32.totalorder %s1112_s20, %s1105_s27 }
  0x5f   : > { %p1109_p10 = pneg %p1108_p8  ;;  %p1115_p3 = por %p1114_p4, %p1113_p11 }
  0x61   : > { %p1116_p5 = pnand %p1115_p3, %p1109_p10 }
  0x63   : > { %1119 = shalt.err (!%p1116_p5)
}
  0x64   : > { %968 = dma.hbm_to_vmem [thread:$0]  (!%p1285_p13), %s1382_s4, 512, %s1385_s11, %s1300_s8, %s1558_s7, %s1558_s7, %s1557_s17  }
  0x65   : > { %p1559_p2 = scmp.ne.s32.totalorder %s1556_s29, 0 }
  0x66   : > { %s1415_s10 = sand.u32 (!%p1559_p2), 1, %s1182_s13   ;;  %p1560_p1 = scmp.ne.s32.totalorder (!%p1559_p2), %s1549_s22, 0 }
  0x67   : > { %209 = sbr.rel (%p1559_p2) target bundleno = 895 (0x37f), region = 32  ;;  %s1418_s25 = sshll.u32 (!%p1559_p2), %s1415_s10, 5 }
  0x68   : > { %s212_s28 = scalar_lea.sflag (!%p1559_p2), [#allocation3], %s1415_s10  ;;  %s1422_s9 = scalar_lea.vmem (!%p1559_p2), [#allocation2], %s1418_s25 }
  0x6e   : > { %1165 = dma.done.wait (%p1560_p1), %s212_s28, 512  }
  0x6f   : > { %1167 = vsyncadd (%p1560_p1), %s212_s28, 4294966784  ;;  %s220_s8 = sand.u32 1, %s1244_s16   ;;  %s224_s17 = scalar_lea.vmem [#allocation5], %s1418_s25 }
  0x70   : > { %s221_s29 = scalar_lea.sflag [#allocation6], %s220_s8 }
  0x71   : > { %1169 = dma.done.wait (%p1560_p1), %s221_s29, 1024  }
  0x72   : > { %1171 = vsyncadd (%p1560_p1), %s221_s29, 4294966272  ;;  %v1197_v0 = vmov 0.0   ;;  %vm1198_vm0 = vmmov 0   ;;  %v275_v1 = vld [vmem:[%s224_s17] sm:$0x1f]  ;;  %vm291_vm1 = vcmask 64512  }
  0x73   : > { %903 = vmatprep.subr.bf16.mxu0 %v1197_v0  ;;  %909 = vmatprep.subr.bf16.mxu1 %v1197_v0  ;;  %v276_v2 = vld [vmem:[%s224_s17 + $0x8] sm:$0x1f]  ;;  %v279_v3 = vpack.c.bf16 %v275_v1, %v275_v1  ;;  %v277_v5 = vld [vmem:[%s224_s17 + $0x10] sm:$0x1f]  ;;  %v278_v6 = vld [vmem:[%s224_s17 + $0x18] sm:$0x1f] }
  0x74   : > { %905 = vmatprep.mubr.msk.bf16.mxu0 %vm1198_vm0, %v1197_v0  ;;  %911 = vmatprep.mubr.msk.bf16.mxu1 %vm1198_vm0, %v1197_v0  ;;  %v280_v4 = vpack.c.bf16 %v276_v2, %v276_v2  ;;  %v267_v9 = vld [vmem:[%s1422_s9] sm:$0x1f]  ;;  %v268_v10 = vld [vmem:[%s1422_s9 + $0x8] sm:$0x1f]  ;;  %v281_v11 = vpack.c.bf16 %v277_v5, %v277_v5  ;;  %v282_v12 = vpack.c.bf16 %v278_v6, %v278_v6  ;;  %v269_v17 = vld [vmem:[%s1422_s9 + $0x10] sm:$0x1f] }
  0x75   : > { %v296_v7 = vsel %vm291_vm1, %v279_v3, 0  ;;  %v271_v13 = vpack.c.bf16 %v267_v9, %v267_v9  ;;  %v272_v14 = vpack.c.bf16 %v268_v10, %v268_v10  ;;  %v270_v18 = vld [vmem:[%s1422_s9 + $0x18] sm:$0x1f]  ;;  %v273_v19 = vpack.c.bf16 %v269_v17, %v269_v17  ;;  %s233_s22 = scalar_lea.vmem [#allocation7], %s1418_s25  ;;  %s265_s7 = scalar_lea.vmem [#allocation8], %s1418_s25 }
  0x76   : > { %v342_v8 = vsel %vm291_vm1, %v280_v4, 0  ;;  %904 = vmatpush3.bf16.xpose.msra.mxu0 %v296_v7  ;;  %v388_v15 = vsel %vm291_vm1, %v281_v11, 0  ;;  %v434_v16 = vsel %vm291_vm1, %v282_v12, 0  ;;  %v274_v20 = vpack.c.bf16 %v270_v18, %v270_v18  ;;  %v283_v2 = vld [vmem:[%s233_s22] sm:$0x1f]  ;;  %s737_s4 = sshll.u32 %s265_s7, 4  ;;  %s1487_s4 = int_to_ptr.vmem [resolvable:$true] %s737_s4 }
  0x77   : > { %910 = vmatpush3.bf16.xpose.msra.mxu1 %v342_v8  ;;  %915 = vmatprep.subr.bf16.mxu0 %v1197_v0  ;;  %vm480_vm2 = vcmask 36864   ;;  %vm533_vm3 = vcmask 1041408   ;;  %v287_v3 = vpack.c.bf16 %v283_v2, %v283_v2  ;;  %vm534_vm4 = vcmask 1042432   ;;  %v284_v8 = vld [vmem:[%s233_s22 + $0x8] sm:$0x1f]  ;;  %s886_s11 = sshll.u32 %s1244_s16, 9 }
  0x78   : > { %921 = vmatprep.subr.bf16.mxu1 %v1197_v0  ;;  %v1199_v4 = vmov 65535   ;;  %v288_v9 = vpack.c.bf16 %v284_v8, %v284_v8  ;;  %v285_v11 = vld [vmem:[%s233_s22 + $0x10] sm:$0x1f]  ;;  %vm529_vm5 = vcmask 39936   ;;  %vm718_vm6 = vcmask 61440   ;;  %s1493_s5 = scalar_lea.hbm %s1541_s3, %s886_s11  ;;  %s724_s16 = scalar_lea.sflag [#allocation4], %s1415_s10 }
  0x79   : > { %v535_v5 = vsel %vm533_vm3, 4294967295, %v1199_v4  ;;  %v289_v12 = vpack.c.bf16 %v285_v11, %v285_v11  ;;  %s1120_s26 = scalar_lea.vmem %s1487_s4, 512  ;;  %p1561_p7 = scmp.ne.s32.totalorder %s1550_s23, 0 }
  0x7a   : > { %v536_v6 = vsel %vm534_vm4, %v535_v5, 0  ;;  %p1121_p13 = scmp.ne.s32.totalorder %s1487_s4, %s1120_s26  ;;  %s1200_s27 = smov [#allocation8]  }
  0x7b   : > { %v538_v7 = vand.u32 %v536_v6, %v287_v3  ;;  %v584_v10 = vand.u32 %v536_v6, %v288_v9  ;;  %s1124_s0 = sshll.u32 %s1200_s27, 4  ;;  %s1125_s0 = int_to_ptr.vmem [resolvable:$false] %s1124_s0 }
  0x7c   : > { %p1122_p6 = pnand %p1121_p13, %p1561_p7  ;;  %s1126_s19 = scalar_lea.vmem %s1125_s0, 1024 }
  0x7d   : > { %906 = vmatmul.mubr.msk.bf16.vlgmr.msra.gmra.mrb[0].mxu0 %vm291_vm1, %v271_v13  ;;  %v630_v13 = vand.u32 %v536_v6, %v289_v12  ;;  %p1127_p12 = scmp.lt.s32.totalorder %s1487_s4, %s1125_s0  ;;  %p1128_p0 = scmp.lt.s32.totalorder %s1126_s19, %s1120_s26 }
  0x7e   : > { %912 = vmatmul.mubr.msk.bf16.vlgmr.msra.gmra.mrb[0].mxu1 %vm291_vm1, %v272_v14  ;;  %916 = vmatpush3.bf16.xpose.msra.mxu0 %v388_v15  ;;  %v286_v14 = vld [vmem:[%s233_s22 + $0x18] sm:$0x1f]  ;;  %p1123_p9 = pneg %p1122_p6 }
  0x7f   : > { %922 = vmatpush3.bf16.xpose.msra.mxu1 %v434_v16  ;;  %917 = vmatprep.mubr.msk.bf16.mxu0 %vm1198_vm0, %v1197_v0  ;;  %v290_v15 = vpack.c.bf16 %v286_v14, %v286_v14  ;;  %p1129_p8 = por %p1128_p0, %p1127_p12 }
  0x80   : > { %923 = vmatprep.mubr.msk.bf16.mxu1 %vm1198_vm0, %v1197_v0  ;;  %927 = vmatprep.subr.bf16.mxu0 %v1197_v0 }
  0x81   : > { %933 = vmatprep.subr.bf16.mxu1 %v1197_v0  ;;  %v676_v16 = vand.u32 %v536_v6, %v290_v15  ;;  %p1130_p10 = pnand %p1129_p8, %p1123_p9 }
  0x85   : > { %918 = vmatmul.mubr.msk.bf16.vlgmr.msra.gmra.mrb[4].mxu0 %vm291_vm1, %v273_v19 }
  0x86   : > { %924 = vmatmul.mubr.msk.bf16.vlgmr.msra.gmra.mrb[4].mxu1 %vm291_vm1, %v274_v20  ;;  %929 = vmatprep.mubr.msk.bf16.mxu0 %vm1198_vm0, %v1197_v0 }
  0x87   : > { %935 = vmatprep.mubr.msk.bf16.mxu1 %vm1198_vm0, %v1197_v0  ;;  %928 = vmatpush3.bf16.msra.mxu0 %v538_v7 }
  0x88   : > { %939 = vmatprep.subr.bf16.mxu0 %v1197_v0  ;;  %934 = vmatpush3.bf16.msra.mxu1 %v584_v10 }
  0x89   : > { %945 = vmatprep.subr.bf16.mxu1 %v1197_v0 }
 0x150   : > { %v332_v21 = vpop.f32.mrb[0].mxu0 }
 0x151   : > { %v378_v22 = vpop.f32.mrb[0].mxu1  ;;  %v476_v23 = vmul.f32 0.35355338, %v332_v21  ;;  %v907_v24 = vpop.f32.mrb[1].mxu0 }
 0x152   : > { %v477_v25 = vmul.f32 0.35355338, %v378_v22  ;;  %v913_v26 = vpop.f32.mrb[1].mxu1  ;;  %v335_v27 = vpop.f32.mrb[2].mxu0 }
 0x153   : > { %v381_v28 = vpop.f32.mrb[2].mxu1  ;;  %v908_v29 = vpop.f32.mrb[3].mxu0  ;;  %v481_v30 = vsel %vm480_vm2, %v476_v23, -inf }
 0x154   : > { %v914_v31 = vpop.f32.mrb[3].mxu1  ;;  %482 = vmax.xlane.f32.xlu0 %v481_v30  ;;  %v484_v32 = vsel %vm480_vm2, %v477_v25, -inf }
 0x158   : > { %485 = vmax.xlane.f32.xlu0 %v484_v32  ;;  %v424_v33 = vpop.f32.mrb[4].mxu0 }
 0x159   : > { %v470_v34 = vpop.f32.mrb[4].mxu1  ;;  %v478_v35 = vmul.f32 0.35355338, %v424_v33  ;;  %v919_v36 = vpop.f32.mrb[5].mxu0 }
 0x15a   : > { %v479_v37 = vmul.f32 0.35355338, %v470_v34  ;;  %v925_v38 = vpop.f32.mrb[5].mxu1  ;;  %v427_v39 = vpop.f32.mrb[6].mxu0 }
 0x15b   : > { %v473_v40 = vpop.f32.mrb[6].mxu1  ;;  %v920_v41 = vpop.f32.mrb[7].mxu0  ;;  %v487_v42 = vsel %vm480_vm2, %v478_v35, -inf }
 0x15c   : > { %v926_v43 = vpop.f32.mrb[7].mxu1  ;;  %488 = vmax.xlane.f32.xlu1 %v487_v42  ;;  %v490_v44 = vsel %vm480_vm2, %v479_v37, -inf }
 0x160   : > { %491 = vmax.xlane.f32.xlu1 %v490_v44 }
 0x1e1   : > { %v483_v45 = vpop.xlane.xlu0 %482 }
 0x1e2   : > { %v493_v46 = vsub.f32 %v476_v23, %v483_v45 }
 0x1e4   : > { %v497_v47 = vmul.f32 1.442695, %v493_v46 }
 0x1e5   : > { %v486_v48 = vpop.xlane.xlu0 %485 }
 0x1e6   : > { %1014 = vpow2.f32 %v497_v47  ;;  %v494_v49 = vsub.f32 %v477_v25, %v486_v48 }
 0x1e8   : > { %v499_v50 = vmul.f32 1.442695, %v494_v49 }
 0x1e9   : > { %v489_v51 = vpop.xlane.xlu1 %488 }
 0x1ea   : > { %1016 = vpow2.f32 %v499_v50  ;;  %v495_v52 = vsub.f32 %v478_v35, %v489_v51 }
 0x1ec   : > { %v501_v53 = vmul.f32 1.442695, %v495_v52 }
 0x1ed   : > { %v492_v54 = vpop.xlane.xlu1 %491 }
 0x1ee   : > { %1018 = vpow2.f32 %v501_v53  ;;  %v496_v55 = vsub.f32 %v479_v37, %v492_v54 }
 0x1f0   : > { %v1015_v56 = vpop.eup %1014  ;;  %v503_v57 = vmul.f32 1.442695, %v496_v55 }
 0x1f1   : > { %v505_v58 = vsel %vm480_vm2, %v1015_v56, 0.0 }
 0x1f2   : > { %1020 = vpow2.f32 %v503_v57  ;;  %506 = vadd.xlane.f32.xlu0 %v505_v58 }
 0x1f4   : > { %v1017_v59 = vpop.eup %1016 }
 0x1f5   : > { %v508_v60 = vsel %vm480_vm2, %v1017_v59, 0.0 }
 0x1f6   : > { %509 = vadd.xlane.f32.xlu1 %v508_v60 }
 0x1f8   : > { %v1019_v61 = vpop.eup %1018 }
 0x1f9   : > { %v511_v62 = vsel %vm480_vm2, %v1019_v61, 0.0 }
 0x1fa   : > { %512 = vadd.xlane.f32.xlu0 %v511_v62 }
 0x1fc   : > { %v1021_v63 = vpop.eup %1020 }
 0x1fd   : > { %v514_v1 = vsel %vm480_vm2, %v1021_v63, 0.0 }
 0x1fe   : > { %515 = vadd.xlane.f32.xlu1 %v514_v1 }
 0x27f   : > { %v507_v17 = vpop.xlane.xlu0 %506 }
 0x280   : > { %1022 = vrcp.f32 %v507_v17 }
 0x283   : > { %v510_v18 = vpop.xlane.xlu1 %509 }
 0x284   : > { %1024 = vrcp.f32 %v510_v18 }
 0x287   : > { %v513_v19 = vpop.xlane.xlu0 %512 }
 0x288   : > { %1026 = vrcp.f32 %v513_v19 }
 0x28a   : > { %v1023_v20 = vpop.eup %1022 }
 0x28b   : > { %v521_v21 = vmul.f32 %v1023_v20, %v1015_v56  ;;  %v516_v22 = vpop.xlane.xlu1 %515 }
 0x28c   : > { %1028 = vrcp.f32 %v516_v22 }
 0x28d   : > { %v525_v23 = vpack.c.bf16 %v521_v21, %v521_v21 }
 0x28e   : > { %v1025_v24 = vpop.eup %1024 }
 0x28f   : > { %v522_v25 = vmul.f32 %v1025_v24, %v1017_v59  ;;  %930 = vmatmul.mubr.msk.bf16.vlgmr.msra.gmra.mrb[8].mxu0 %vm529_vm5, %v525_v23 }
 0x290   : > { %940 = vmatpush3.bf16.msra.mxu0 %v630_v13  ;;  %941 = vmatprep.mubr.msk.bf16.mxu0 %vm1198_vm0, %v1197_v0 }
 0x291   : > { %v526_v26 = vpack.c.bf16 %v522_v25, %v522_v25 }
 0x292   : > { %v1027_v27 = vpop.eup %1026 }
 0x293   : > { %v523_v28 = vmul.f32 %v1027_v27, %v1019_v61  ;;  %936 = vmatmul.mubr.msk.bf16.vlgmr.msra.gmra.mrb[8].mxu1 %vm529_vm5, %v526_v26 }
 0x294   : > { %946 = vmatpush3.bf16.msra.mxu1 %v676_v16  ;;  %947 = vmatprep.mubr.msk.bf16.mxu1 %vm1198_vm0, %v1197_v0 }
 0x295   : > { %v527_v29 = vpack.c.bf16 %v523_v28, %v523_v28 }
 0x296   : > { %v1029_v30 = vpop.eup %1028 }
 0x297   : > { %v524_v31 = vmul.f32 %v1029_v30, %v1021_v63  ;;  %942 = vmatmul.mubr.msk.bf16.vlgmr.msra.gmra.mrb[12].mxu0 %vm529_vm5, %v527_v29 }
 0x299   : > { %v528_v32 = vpack.c.bf16 %v524_v31, %v524_v31 }
 0x29b   : > { %948 = vmatmul.mubr.msk.bf16.vlgmr.msra.gmra.mrb[12].mxu1 %vm529_vm5, %v528_v32 }
 0x362   : > { %v574_v33 = vpop.f32.mrb[8].mxu0 }
 0x363   : > { %719 = vst.msk [vmem:[%s265_s7] sm:$0x1f] %vm718_vm6, %v574_v33  ;;  %v931_v34 = vpop.f32.mrb[9].mxu0 }
 0x364   : > { %v577_v35 = vpop.f32.mrb[10].mxu0 }
 0x365   : > { %v932_v36 = vpop.f32.mrb[11].mxu0 }
 0x366   : > { %v620_v37 = vpop.f32.mrb[8].mxu1 }
 0x367   : > { %720 = vst.msk [vmem:[%s265_s7 + $0x8] sm:$0x1f] %vm718_vm6, %v620_v37  ;;  %v937_v0 = vpop.f32.mrb[9].mxu1 }
 0x368   : > { %v623_v38 = vpop.f32.mrb[10].mxu1 }
 0x369   : > { %v938_v39 = vpop.f32.mrb[11].mxu1 }
 0x36a   : > { %v666_v40 = vpop.f32.mrb[12].mxu0 }
 0x36b   : > { %721 = vst.msk [vmem:[%s265_s7 + $0x10] sm:$0x1f] %vm718_vm6, %v666_v40  ;;  %v943_v41 = vpop.f32.mrb[13].mxu0 }
 0x36c   : > { %v669_v42 = vpop.f32.mrb[14].mxu0 }
 0x36d   : > { %v944_v43 = vpop.f32.mrb[15].mxu0 }
 0x36e   : > { %v712_v44 = vpop.f32.mrb[12].mxu1 }
 0x36f   : > { %722 = vst.msk [vmem:[%s265_s7 + $0x18] sm:$0x1f] %vm718_vm6, %v712_v44  ;;  %v949_v45 = vpop.f32.mrb[13].mxu1 }
 0x370   : > { %v715_v46 = vpop.f32.mrb[14].mxu1 }
 0x371   : > { %1133 = shalt.err (!%p1130_p10)
}
 0x372   : > { %s1134_s20 = scalar_lea.hbm %s1493_s5, 512  ;;  %s1138_s9 = scalar_lea.hbm %s1541_s3, 1024 }
 0x373   : > { %p1135_p11 = scmp.ne.s32.totalorder %s1493_s5, %s1134_s20  ;;  %p1139_p5 = scmp.lt.u32.totalorder %s1493_s5, %s1541_s3 }
 0x374   : > { %p1140_p2 = scmp.lt.u32.totalorder %s1138_s9, %s1134_s20  ;;  %p1142_p13 = scmp.lt.u32.totalorder %s1134_s20, %s1493_s5 }
 0x375   : > { %p1136_p4 = pnand %p1135_p11, %p1561_p7 }
 0x376   : > { %p1141_p1 = por %p1140_p2, %p1139_p5 }
 0x377   : > { %p1137_p3 = pneg %p1136_p4 }
 0x378   : > { %p1143_p6 = por %p1142_p13, %p1141_p1 }
 0x37a   : > { %p1144_p9 = pnand %p1143_p6, %p1137_p3 }
 0x37c   : > { %1147 = shalt.err (!%p1144_p9)
}
 0x37d   : > { %s1201_s17 = smov 128   ;;  %s1202_s22 = smov 8   ;;  %v950_v47 = vpop.f32.mrb[15].mxu1 }
 0x37e   : > { %957 = dma.vmem_to_hbm [thread:$0]  (%p1561_p7), %s1487_s4, 512, %s1493_s5, %s724_s16, %s1201_s17, %s1201_s17, %s1202_s22  }
 0x37f PF: > { %s752_s7 = sand.u32 1, %s1178_s12   ;;  %p1562_p12 = scmp.ne.s32.totalorder %s1551_s24, 0 }
 0x380   : > { %p1563_p0 = scmp.ge.s32.totalorder %s1190_s15, 2  ;;  %s753_s11 = scalar_lea.sflag [#allocation4], %s752_s7 }
 0x382   : > { %p970_p8 = pnand %p1563_p0, %p1562_p12 }
 0x384   : > { %1173 = dma.done.wait (!%p970_p8), %s753_s11, 512  }
 0x385   : > { %1175 = vsyncadd (!%p970_p8), %s753_s11, 4294966784  ;;  %p19_p10 = scmp.ge.s32.totalorder %s1248_s18, 4   ;;  %s1564_s12 = smov %s1182_s13 }
 0x386   : > { %s1565_s13 = smov %s1186_s14  ;;  %s1566_s14 = smov %s1260_s21 }
 0x387   : > { %s1567_s15 = smov %s1248_s18  ;;  %21 = sbr.rel (!%p19_p10) target bundleno = 9 (0x9), region = 101 }
 0x38e   :  { %758 = vsyncpa [#allocation3], 1 }
 0x38f   :  { %760 = vsyncpa [#allocation3 + $0x1], 1 }
 0x390   :  { %761 = vsyncpa [#allocation6], 1 }
 0x391   :  { %763 = vsyncpa [#allocation6 + $0x1], 1 }
 0x392   :  { %764 = vsyncpa [#allocation4], 1 }
 0x393   :  { %766 = vsyncpa [#allocation4 + $0x1], 1 }

// kernel: mae_forward.22
= control target key start
LH: loop header
LB: loop body
LE: loop exit
PB: predicated region body
PF: predicated region fallthrough
CT: control target
= control target key end

     0   :  { %9 = vsyncpa [#allocation4], 0  ;;  %s455_s0 = inlined_call_operand.hbm [shape: f32[10,32], index: 0, kind: input, shape index: {}]   ;;  %s456_s1 = inlined_call_operand.hbm [shape: bf16[32,32], index: 1, kind: input, shape index: {}]   ;;  %s457_s2 = inlined_call_operand.hbm [shape: f32[1,32], index: 2, kind: input, shape index: {}]   ;;  %s458_s3 = inlined_call_operand.hbm [shape: f32[10,32], index: 3, kind: input, shape index: {}]   ;;  %s459_s4 = inlined_call_operand.hbm [shape: f32[10,32], index: 4, kind: output, shape index: {}]  }
   0x1   :  { %10 = vsyncpa [#allocation7], 0 }
   0x2   :  { %11 = vsyncpa [#allocation10], 0 }
   0x3   :  { %12 = vsyncpa [#allocation5], 0  ;;  %s336_s15 = smov [#allocation6]   ;;  %s218_s19 = scalar_lea.hbm %s456_s1, 256 }
   0x4   :  { %s30_s16 = sshll.u32 %s336_s15, 4  ;;  %p219_p0 = scmp.ne.s32.totalorder %s456_s1, %s218_s19  ;;  %s31_s16 = int_to_ptr.vmem [resolvable:$true] %s30_s16 }
   0x5   :  { %p222_p1 = scmp.lt.u32.totalorder %s218_s19, %s456_s1 }
   0x7   :  { %p224_p2 = pnand %p222_p1, %p219_p0 }
   0x9   :  { %227 = shalt.err (!%p224_p2)
}
   0xa   :  { %s228_s24 = scalar_lea.vmem %s31_s16, 256  ;;  %p233_p4 = scmp.lt.s32.totalorder %s31_s16, %s31_s16 }
   0xb   :  { %p229_p3 = scmp.ne.s32.totalorder %s31_s16, %s228_s24  ;;  %p234_p5 = scmp.lt.s32.totalorder %s228_s24, %s228_s24 }
   0xd   :  { %p235_p6 = por %p234_p5, %p233_p4 }
   0xf   :  { %p236_p7 = pnand %p235_p6, %p229_p3 }
  0x11   :  { %239 = shalt.err (!%p236_p7)
}
  0x12   :  { %s337_s25 = smov 64   ;;  %s338_s26 = smov 4  }
  0x13   :  { %36 = dma.hbm_to_vmem [thread:$0]  %s456_s1, 256, %s31_s16, [#allocation7], %s337_s25, %s337_s25, %s338_s26  }
  0x14   :  { %s339_s29 = smov [#allocation3]   ;;  %s240_s7 = scalar_lea.hbm %s455_s0, 256 }
  0x15   :  { %s18_s30 = sshll.u32 %s339_s29, 4  ;;  %p241_p8 = scmp.ne.s32.totalorder %s455_s0, %s240_s7  ;;  %s19_s30 = int_to_ptr.vmem [resolvable:$true] %s18_s30 }
  0x16   :  { %p244_p9 = scmp.lt.u32.totalorder %s240_s7, %s455_s0 }
  0x18   :  { %p246_p10 = pnand %p244_p9, %p241_p8 }
  0x1a   :  { %249 = shalt.err (!%p246_p10)
}
  0x1b   :  { %s250_s12 = scalar_lea.vmem %s19_s30, 256  ;;  %p255_p12 = scmp.lt.s32.totalorder %s19_s30, %s19_s30 }
  0x1c   :  { %p251_p11 = scmp.ne.s32.totalorder %s19_s30, %s250_s12  ;;  %p256_p13 = scmp.lt.s32.totalorder %s250_s12, %s250_s12 }
  0x1e   :  { %p257_p0 = por %p256_p13, %p255_p12 }
  0x20   :  { %p258_p1 = pnand %p257_p0, %p251_p11 }
  0x22   :  { %261 = shalt.err (!%p258_p1)
}
  0x23   :  { %s340_s1 = smov 128   ;;  %s341_s13 = smov 8  }
  0x24   :  { %24 = dma.hbm_to_vmem [thread:$0]  %s455_s0, 256, %s19_s30, [#allocation4], %s340_s1, %s340_s1, %s341_s13  }
  0x25   :  { %s342_s16 = smov [#allocation8]   ;;  %s343_s18 = smov [#allocation9]  }
  0x26   :  { %s43_s17 = sshll.u32 %s342_s16, 4  ;;  %s52_s19 = sshll.u32 %s343_s18, 4  ;;  %s44_s17 = int_to_ptr.vmem [resolvable:$true] %s43_s17  ;;  %s399_s19 = int_to_ptr.vmem [resolvable:$true] %s52_s19 }
  0x27   :  { %s262_s22 = scalar_lea.hbm %s457_s2, 16 }
  0x28   :  { %p263_p2 = scmp.ne.s32.totalorder %s457_s2, %s262_s22  ;;  %p266_p3 = scmp.lt.u32.totalorder %s262_s22, %s457_s2 }
  0x2a   :  { %p268_p4 = pnand %p266_p3, %p263_p2 }
  0x2c   :  { %271 = shalt.err (!%p268_p4)
}
  0x2d   :  { %s272_s0 = scalar_lea.vmem %s44_s17, 16  ;;  %s276_s27 = scalar_lea.vmem %s44_s17, 32 }
  0x2e   :  { %p273_p5 = scmp.ne.s32.totalorder %s44_s17, %s272_s0  ;;  %p277_p6 = scmp.lt.s32.totalorder %s44_s17, %s44_s17 }
  0x2f   :  { %p278_p7 = scmp.lt.s32.totalorder %s276_s27, %s272_s0 }
  0x31   :  { %p279_p8 = por %p278_p7, %p277_p6 }
  0x33   :  { %p280_p9 = pnand %p279_p8, %p273_p5 }
  0x35   :  { %283 = shalt.err (!%p280_p9)
}
  0x36   :  { %46 = dma.hbm_to_vmem [thread:$0]  %s457_s2, 16, %s44_s17, [#allocation7]  }
  0x37   :  { %s284_s6 = scalar_lea.hbm %s458_s3, 256 }
  0x38   :  { %p285_p10 = scmp.ne.s32.totalorder %s458_s3, %s284_s6  ;;  %p288_p11 = scmp.lt.u32.totalorder %s284_s6, %s458_s3 }
  0x3a   :  { %p290_p12 = pnand %p288_p11, %p285_p10 }
  0x3c   :  { %293 = shalt.err (!%p290_p12)
}
  0x3d   :  { %s294_s11 = scalar_lea.vmem %s399_s19, 256  ;;  %p299_p0 = scmp.lt.s32.totalorder %s399_s19, %s399_s19 }
  0x3e   :  { %p295_p13 = scmp.ne.s32.totalorder %s399_s19, %s294_s11  ;;  %p300_p1 = scmp.lt.s32.totalorder %s294_s11, %s294_s11 }
  0x40   :  { %p301_p2 = por %p300_p1, %p299_p0 }
  0x42   :  { %p302_p3 = pnand %p301_p2, %p295_p13 }
  0x44   :  { %305 = shalt.err (!%p302_p3)
}
  0x45   :  { %58 = dma.hbm_to_vmem [thread:$0]  %s458_s3, 256, %s399_s19, [#allocation10], %s340_s1, %s340_s1, %s341_s13  }
  0x46   :  { %328 = dma.done.wait [#allocation4], 256  }
  0x47   :  { %329 = vsyncadd [#allocation4], 4294967040 }
  0x48   :  { %330 = dma.done.wait [#allocation7], 272  }
  0x49   :  { %331 = vsyncadd [#allocation7], 4294967024 }
  0x4a   :  { %332 = dma.done.wait [#allocation10], 256  }
  0x4b   :  { %333 = vsyncadd [#allocation10], 4294967040  ;;  %vm76_vm0 = vcmask 261120   ;;  %v344_v0 = vmov 0.0   ;;  %vm345_vm1 = vmmov 0   ;;  %v216_v1 = vld [vmem:[#allocation6] sm:$0xff]  }
  0x4c   :  { %197 = vmatprep.subr.bf16.mxu0 %v344_v0  ;;  %201 = vmatprep.mubr.msk.bf16.mxu0 %vm345_vm1, %v344_v0  ;;  %77 = vst.msk [vmem:[#allocation2] sm:$0xff] %vm76_vm0, %v344_v0  ;;  %v217_v2 = vld [vmem:[#allocation6 + $0x8] sm:$0xff]   ;;  %v82_v3 = vld [vmem:[#allocation3] sm:$0xff]  ;;  %v83_v4 = vld [vmem:[#allocation3 + $0x8] sm:$0x3]  ;;  %vm78_vm2 = vcmask 254976  }
  0x4d   :  { %198 = vmatpush3.bf16.msra.mxu0 %v216_v1  ;;  %v84_v5 = vpack.c.bf16 %v83_v4, %v82_v3  ;;  %79 = vst.msk [vmem:[#allocation2 + $0x8] sm:$0x3] %vm78_vm2, %v344_v0  ;;  %v193_v14 = vld [vmem:[#allocation8] ss:$0 sm:$0xff]  ;;  %v165_v16 = vld [vmem:[#allocation9] sm:$0xff]  ;;  %s346_s3 = smov [#allocation11]  }
  0x4e   :  { %199 = vmatprep.subr.bf16.mxu0 %v344_v0  ;;  %v166_v19 = vld [vmem:[#allocation9 + $0x8] sm:$0x3]  ;;  %s176_s14 = sshll.u32 %s346_s3, 4  ;;  %s177_s14 = int_to_ptr.vmem [resolvable:$true] %s176_s14 }
  0x4f   :  { %s306_s15 = scalar_lea.vmem %s177_s14, 256  ;;  %p311_p5 = scmp.lt.s32.totalorder %s177_s14, %s177_s14 }
  0x50   :  { %p307_p4 = scmp.ne.s32.totalorder %s177_s14, %s306_s15  ;;  %p312_p6 = scmp.lt.s32.totalorder %s306_s15, %s306_s15 }
  0x51   :  { %200 = vmatpush3.bf16.msra.mxu0 %v217_v2 }
  0x52   :  { %p313_p7 = por %p312_p6, %p311_p5 }
  0x53   :  { %v80_v6 = vld [vmem:[#allocation2] sm:$0xff] }
  0x54   :  { %202 = vmatmul.mubr.msk.bf16.vlgmr.msra.gmra.mrb[0].mxu0 %vm76_vm0, %v84_v5  ;;  %v81_v8 = vld [vmem:[#allocation2 + $0x8] sm:$0x3]  ;;  %p314_p8 = pnand %p313_p7, %p307_p4 }
 0x127   :  { %v139_v7 = vpop.f32.mrb[0].mxu0 }
 0x128   :  { %v146_v9 = vadd.f32 %v139_v7, %v80_v6  ;;  %v203_v10 = vpop.f32.mrb[1].mxu0 }
 0x129   :  { %v142_v11 = vpop.f32.mrb[2].mxu0 }
 0x12a   :  { %148 = vst.msk [vmem:[#allocation2] sm:$0xff] %vm76_vm0, %v146_v9  ;;  %v147_v12 = vadd.f32 %v142_v11, %v81_v8  ;;  %v204_v13 = vpop.f32.mrb[3].mxu0 }
 0x12c   :  { %150 = vst.msk [vmem:[#allocation2 + $0x8] sm:$0x3] %vm78_vm2, %v147_v12 }
 0x131   :  { %v154_v15 = vld [vmem:[#allocation2] sm:$0xff] }
 0x132   :  { %v163_v17 = vadd.f32 %v193_v14, %v154_v15 }
 0x133   :  { %v155_v18 = vld [vmem:[#allocation2 + $0x8] sm:$0x3] }
 0x134   :  { %v164_v20 = vadd.f32 %v193_v14, %v155_v18  ;;  %v167_v21 = vadd.f32 %v165_v16, %v163_v17 }
 0x136   :  { %v168_v22 = vadd.f32 %v166_v19, %v164_v20  ;;  %169 = vst.msk [vmem:[#allocation11] sm:$0xff] %vm76_vm0, %v167_v21 }
 0x138   :  { %170 = vst.msk [vmem:[#allocation11 + $0x8] sm:$0x3] %vm78_vm2, %v168_v22 }
 0x139   :  { %317 = shalt.err (!%p314_p8)
}
 0x13a   :  { %s318_s18 = scalar_lea.hbm %s459_s4, 256 }
 0x13b   :  { %p319_p9 = scmp.ne.s32.totalorder %s459_s4, %s318_s18  ;;  %p322_p10 = scmp.lt.u32.totalorder %s318_s18, %s459_s4 }
 0x13d   :  { %p324_p11 = pnand %p322_p10, %p319_p9 }
 0x13f   :  { %327 = shalt.err (!%p324_p11)
}
 0x140   :  { %182 = dma.vmem_to_hbm [thread:$0]  %s177_s14, 256, %s459_s4, [#allocation5], %s340_s1, %s340_s1, %s341_s13  }
 0x141   :  { %334 = dma.done.wait [#allocation5], 256  }
 0x142   :  { %335 = vsyncadd [#allocation5], 4294967040 }
 0x143   :  { %186 = vsyncpa [#allocation4], 1 }
 0x144   :  { %187 = vsyncpa [#allocation7], 1 }
 0x145   :  { %188 = vsyncpa [#allocation10], 1 }
 0x146   :  { %189 = vsyncpa [#allocation5], 1 }

// kernel: mae_forward.24
= control target key start
LH: loop header
LB: loop body
LE: loop exit
PB: predicated region body
PF: predicated region fallthrough
CT: control target
= control target key end

     0   :  { %9 = vsyncpa [#allocation4], 0  ;;  %s528_s0 = inlined_call_operand.hbm [shape: f32[10,128], index: 0, kind: input, shape index: {}]   ;;  %s529_s1 = inlined_call_operand.hbm [shape: bf16[128,32], index: 1, kind: input, shape index: {}]   ;;  %s530_s2 = inlined_call_operand.hbm [shape: f32[1,32], index: 2, kind: input, shape index: {}]   ;;  %s531_s3 = inlined_call_operand.hbm [shape: f32[10,32], index: 3, kind: input, shape index: {}]   ;;  %s532_s4 = inlined_call_operand.hbm [shape: f32[10,32], index: 4, kind: output, shape index: {}]  }
   0x1   :  { %10 = vsyncpa [#allocation7], 0 }
   0x2   :  { %11 = vsyncpa [#allocation10], 0 }
   0x3   :  { %12 = vsyncpa [#allocation5], 0  ;;  %s410_s15 = smov [#allocation6]   ;;  %s292_s19 = scalar_lea.hbm %s529_s1, 1024 }
   0x4   :  { %s30_s16 = sshll.u32 %s410_s15, 4  ;;  %p293_p0 = scmp.ne.s32.totalorder %s529_s1, %s292_s19  ;;  %s31_s16 = int_to_ptr.vmem [resolvable:$true] %s30_s16 }
   0x5   :  { %p296_p1 = scmp.lt.u32.totalorder %s292_s19, %s529_s1 }
   0x7   :  { %p298_p2 = pnand %p296_p1, %p293_p0 }
   0x9   :  { %301 = shalt.err (!%p298_p2)
}
   0xa   :  { %s302_s24 = scalar_lea.vmem %s31_s16, 1024  ;;  %p307_p4 = scmp.lt.s32.totalorder %s31_s16, %s31_s16 }
   0xb   :  { %p303_p3 = scmp.ne.s32.totalorder %s31_s16, %s302_s24  ;;  %p308_p5 = scmp.lt.s32.totalorder %s302_s24, %s302_s24 }
   0xd   :  { %p309_p6 = por %p308_p5, %p307_p4 }
   0xf   :  { %p310_p7 = pnand %p309_p6, %p303_p3 }
  0x11   :  { %313 = shalt.err (!%p310_p7)
}
  0x12   :  { %s411_s25 = smov 64   ;;  %s412_s26 = smov 4  }
  0x13   :  { %36 = dma.hbm_to_vmem [thread:$0]  %s529_s1, 1024, %s31_s16, [#allocation7], %s411_s25, %s411_s25, %s412_s26  }
  0x14   :  { %s413_s29 = smov [#allocation3]   ;;  %s314_s7 = scalar_lea.hbm %s528_s0, 256 }
  0x15   :  { %s18_s30 = sshll.u32 %s413_s29, 4  ;;  %p315_p8 = scmp.ne.s32.totalorder %s528_s0, %s314_s7  ;;  %s19_s30 = int_to_ptr.vmem [resolvable:$true] %s18_s30 }
  0x16   :  { %p318_p9 = scmp.lt.u32.totalorder %s314_s7, %s528_s0 }
  0x18   :  { %p320_p10 = pnand %p318_p9, %p315_p8 }
  0x1a   :  { %323 = shalt.err (!%p320_p10)
}
  0x1b   :  { %s324_s12 = scalar_lea.vmem %s19_s30, 256  ;;  %p329_p12 = scmp.lt.s32.totalorder %s19_s30, %s19_s30 }
  0x1c   :  { %p325_p11 = scmp.ne.s32.totalorder %s19_s30, %s324_s12  ;;  %p330_p13 = scmp.lt.s32.totalorder %s324_s12, %s324_s12 }
  0x1e   :  { %p331_p0 = por %p330_p13, %p329_p12 }
  0x20   :  { %p332_p1 = pnand %p331_p0, %p325_p11 }
  0x22   :  { %335 = shalt.err (!%p332_p1)
}
  0x23   :  { %s414_s1 = smov 128   ;;  %s415_s13 = smov 8  }
  0x24   :  { %24 = dma.hbm_to_vmem [thread:$0]  %s528_s0, 256, %s19_s30, [#allocation4], %s414_s1, %s414_s1, %s415_s13  }
  0x25   :  { %s416_s16 = smov [#allocation8]   ;;  %s417_s18 = smov [#allocation9]  }
  0x26   :  { %s43_s17 = sshll.u32 %s416_s16, 4  ;;  %s52_s19 = sshll.u32 %s417_s18, 4  ;;  %s44_s17 = int_to_ptr.vmem [resolvable:$true] %s43_s17  ;;  %s473_s19 = int_to_ptr.vmem [resolvable:$true] %s52_s19 }
  0x27   :  { %s336_s22 = scalar_lea.hbm %s530_s2, 16 }
  0x28   :  { %p337_p2 = scmp.ne.s32.totalorder %s530_s2, %s336_s22  ;;  %p340_p3 = scmp.lt.u32.totalorder %s336_s22, %s530_s2 }
  0x2a   :  { %p342_p4 = pnand %p340_p3, %p337_p2 }
  0x2c   :  { %345 = shalt.err (!%p342_p4)
}
  0x2d   :  { %s346_s0 = scalar_lea.vmem %s44_s17, 16  ;;  %s350_s27 = scalar_lea.vmem %s44_s17, 32 }
  0x2e   :  { %p347_p5 = scmp.ne.s32.totalorder %s44_s17, %s346_s0  ;;  %p351_p6 = scmp.lt.s32.totalorder %s44_s17, %s44_s17 }
  0x2f   :  { %p352_p7 = scmp.lt.s32.totalorder %s350_s27, %s346_s0 }
  0x31   :  { %p353_p8 = por %p352_p7, %p351_p6 }
  0x33   :  { %p354_p9 = pnand %p353_p8, %p347_p5 }
  0x35   :  { %357 = shalt.err (!%p354_p9)
}
  0x36   :  { %46 = dma.hbm_to_vmem [thread:$0]  %s530_s2, 16, %s44_s17, [#allocation7]  }
  0x37   :  { %s358_s6 = scalar_lea.hbm %s531_s3, 256 }
  0x38   :  { %p359_p10 = scmp.ne.s32.totalorder %s531_s3, %s358_s6  ;;  %p362_p11 = scmp.lt.u32.totalorder %s358_s6, %s531_s3 }
  0x3a   :  { %p364_p12 = pnand %p362_p11, %p359_p10 }
  0x3c   :  { %367 = shalt.err (!%p364_p12)
}
  0x3d   :  { %s368_s11 = scalar_lea.vmem %s473_s19, 256  ;;  %p373_p0 = scmp.lt.s32.totalorder %s473_s19, %s473_s19 }
  0x3e   :  { %p369_p13 = scmp.ne.s32.totalorder %s473_s19, %s368_s11  ;;  %p374_p1 = scmp.lt.s32.totalorder %s368_s11, %s368_s11 }
  0x40   :  { %p375_p2 = por %p374_p1, %p373_p0 }
  0x42   :  { %p376_p3 = pnand %p375_p2, %p369_p13 }
  0x44   :  { %379 = shalt.err (!%p376_p3)
}
  0x45   :  { %58 = dma.hbm_to_vmem [thread:$0]  %s531_s3, 256, %s473_s19, [#allocation10], %s414_s1, %s414_s1, %s415_s13  }
  0x46   :  { %402 = dma.done.wait [#allocation4], 256  }
  0x47   :  { %403 = vsyncadd [#allocation4], 4294967040 }
  0x48   :  { %404 = dma.done.wait [#allocation7], 1040  }
  0x49   :  { %405 = vsyncadd [#allocation7], 4294966256 }
  0x4a   :  { %406 = dma.done.wait [#allocation10], 256  }
  0x4b   :  { %407 = vsyncadd [#allocation10], 4294967040  ;;  %vm76_vm0 = vcmask 261120   ;;  %v418_v0 = vmov 0.0   ;;  %vm419_vm1 = vmmov 0   ;;  %v284_v1 = vld [vmem:[#allocation6] sm:$0xff]  }
  0x4c   :  { %253 = vmatprep.subr.bf16.mxu0 %v418_v0  ;;  %269 = vmatprep.mubr.msk.bf16.mxu0 %vm419_vm1, %v418_v0  ;;  %77 = vst.msk [vmem:[#allocation2] sm:$0xff] %vm76_vm0, %v418_v0  ;;  %v285_v2 = vld [vmem:[#allocation6 + $0x8] sm:$0xff]   ;;  %v286_v3 = vld [vmem:[#allocation6 + $0x10] sm:$0xff]   ;;  %v287_v4 = vld [vmem:[#allocation6 + $0x18] sm:$0xff]   ;;  %vm78_vm2 = vcmask 254976   ;;  %s420_s3 = smov [#allocation11]  }
  0x4d   :  { %254 = vmatpush3.bf16.msra.mxu0 %v284_v1  ;;  %v288_v5 = vld [vmem:[#allocation6 + $0x20] sm:$0xff]   ;;  %v289_v6 = vld [vmem:[#allocation6 + $0x28] sm:$0xff]   ;;  %v290_v7 = vld [vmem:[#allocation6 + $0x30] sm:$0xff]   ;;  %79 = vst.msk [vmem:[#allocation2 + $0x8] sm:$0x3] %vm78_vm2, %v418_v0  ;;  %s221_s14 = sshll.u32 %s420_s3, 4  ;;  %s222_s14 = int_to_ptr.vmem [resolvable:$true] %s221_s14 }
  0x4e   :  { %255 = vmatprep.subr.bf16.mxu0 %v418_v0  ;;  %v291_v8 = vld [vmem:[#allocation6 + $0x38] sm:$0xff]   ;;  %v82_v9 = vld [vmem:[#allocation3] sm:$0xff]  ;;  %v243_v20 = vld [vmem:[#allocation8] ss:$0 sm:$0xff]  ;;  %s380_s15 = scalar_lea.vmem %s222_s14, 256  ;;  %p385_p5 = scmp.lt.s32.totalorder %s222_s14, %s222_s14 }
  0x4f   :  { %v83_v10 = vld [vmem:[#allocation3 + $0x8] sm:$0x3]  ;;  %v210_v22 = vld [vmem:[#allocation9] sm:$0xff]  ;;  %v211_v25 = vld [vmem:[#allocation9 + $0x8] sm:$0x3]  ;;  %p381_p4 = scmp.ne.s32.totalorder %s222_s14, %s380_s15  ;;  %p386_p6 = scmp.lt.s32.totalorder %s380_s15, %s380_s15 }
  0x50   :  { %v84_v11 = vpack.c.bf16 %v83_v10, %v82_v9 }
  0x51   :  { %256 = vmatpush3.bf16.msra.mxu0 %v285_v2  ;;  %p387_p7 = por %p386_p6, %p385_p5 }
  0x52   :  { %257 = vmatprep.subr.bf16.mxu0 %v418_v0 }
  0x53   :  { %v80_v12 = vld [vmem:[#allocation2] sm:$0xff]  ;;  %p388_p8 = pnand %p387_p7, %p381_p4 }
  0x54   :  { %v81_v14 = vld [vmem:[#allocation2 + $0x8] sm:$0x3] }
  0x55   :  { %258 = vmatpush3.bf16.msra.mxu0 %v286_v3 }
  0x56   :  { %259 = vmatprep.subr.bf16.mxu0 %v418_v0 }
  0x59   :  { %260 = vmatpush3.bf16.msra.mxu0 %v287_v4 }
  0x5a   :  { %261 = vmatprep.subr.bf16.mxu0 %v418_v0 }
  0x5d   :  { %262 = vmatpush3.bf16.msra.mxu0 %v288_v5 }
  0x5e   :  { %263 = vmatprep.subr.bf16.mxu0 %v418_v0 }
  0x61   :  { %264 = vmatpush3.bf16.msra.mxu0 %v289_v6 }
  0x62   :  { %265 = vmatprep.subr.bf16.mxu0 %v418_v0 }
  0x65   :  { %266 = vmatpush3.bf16.msra.mxu0 %v290_v7 }
  0x66   :  { %267 = vmatprep.subr.bf16.mxu0 %v418_v0 }
  0x69   :  { %268 = vmatpush3.bf16.msra.mxu0 %v291_v8 }
  0x6c   :  { %270 = vmatmul.mubr.bf16.vlgmr.msra.gmra.mrb[0].mxu0 %v84_v11 }
 0x13f   :  { %v183_v13 = vpop.f32.mrb[0].mxu0 }
 0x140   :  { %v190_v15 = vadd.f32 %v183_v13, %v80_v12  ;;  %v271_v16 = vpop.f32.mrb[1].mxu0 }
 0x141   :  { %v186_v17 = vpop.f32.mrb[2].mxu0 }
 0x142   :  { %193 = vst.msk [vmem:[#allocation2] sm:$0xff] %vm76_vm0, %v190_v15  ;;  %v191_v18 = vadd.f32 %v186_v17, %v81_v14  ;;  %v272_v19 = vpop.f32.mrb[3].mxu0 }
 0x144   :  { %195 = vst.msk [vmem:[#allocation2 + $0x8] sm:$0x3] %vm78_vm2, %v191_v18 }
 0x149   :  { %v199_v21 = vld [vmem:[#allocation2] sm:$0xff] }
 0x14a   :  { %v208_v23 = vadd.f32 %v243_v20, %v199_v21 }
 0x14b   :  { %v200_v24 = vld [vmem:[#allocation2 + $0x8] sm:$0x3] }
 0x14c   :  { %v209_v26 = vadd.f32 %v243_v20, %v200_v24  ;;  %v212_v27 = vadd.f32 %v210_v22, %v208_v23 }
 0x14e   :  { %v213_v28 = vadd.f32 %v211_v25, %v209_v26  ;;  %214 = vst.msk [vmem:[#allocation11] sm:$0xff] %vm76_vm0, %v212_v27 }
 0x150   :  { %215 = vst.msk [vmem:[#allocation11 + $0x8] sm:$0x3] %vm78_vm2, %v213_v28 }
 0x151   :  { %391 = shalt.err (!%p388_p8)
}
 0x152   :  { %s392_s18 = scalar_lea.hbm %s532_s4, 256 }
 0x153   :  { %p393_p9 = scmp.ne.s32.totalorder %s532_s4, %s392_s18  ;;  %p396_p10 = scmp.lt.u32.totalorder %s392_s18, %s532_s4 }
 0x155   :  { %p398_p11 = pnand %p396_p10, %p393_p9 }
 0x157   :  { %401 = shalt.err (!%p398_p11)
}
 0x158   :  { %227 = dma.vmem_to_hbm [thread:$0]  %s222_s14, 256, %s532_s4, [#allocation5], %s414_s1, %s414_s1, %s415_s13  }
 0x159   :  { %408 = dma.done.wait [#allocation5], 256  }
 0x15a   :  { %409 = vsyncadd [#allocation5], 4294967040 }
 0x15b   :  { %231 = vsyncpa [#allocation4], 1 }
 0x15c   :  { %232 = vsyncpa [#allocation7], 1 }
 0x15d   :  { %233 = vsyncpa [#allocation10], 1 }
 0x15e   :  { %234 = vsyncpa [#allocation5], 1 }

// kernel: mae_forward.23
= control target key start
LH: loop header
LB: loop body
LE: loop exit
PB: predicated region body
PF: predicated region fallthrough
CT: control target
= control target key end

     0   :  { %10 = vsyncpa [#allocation3], 0  ;;  %s589_s0 = inlined_call_operand.hbm [shape: f32[10,32], index: 0, kind: input, shape index: {}]   ;;  %s590_s1 = inlined_call_operand.hbm [shape: f32[1,32], index: 1, kind: input, shape index: {}]   ;;  %s591_s2 = inlined_call_operand.hbm [shape: f32[1,32], index: 2, kind: input, shape index: {}]   ;;  %s592_s3 = inlined_call_operand.hbm [shape: bf16[32,128], index: 3, kind: input, shape index: {}]   ;;  %s593_s4 = inlined_call_operand.hbm [shape: f32[1,128], index: 4, kind: input, shape index: {}]   ;;  %s594_s5 = inlined_call_operand.hbm [shape: f32[10,128], index: 5, kind: output, shape index: {}]  }
   0x1   :  { %11 = vsyncpa [#allocation6], 0 }
   0x2   :  { %12 = vsyncpa [#allocation9], 0 }
   0x3   :  { %13 = vsyncpa [#allocation4], 0  ;;  %s459_s18 = smov [#allocation5]   ;;  %s460_s20 = smov [#allocation8]  }
   0x4   :  { %s32_s19 = sshll.u32 %s459_s18, 4  ;;  %s51_s21 = sshll.u32 %s460_s20, 4  ;;  %s33_s19 = int_to_ptr.vmem [resolvable:$true] %s32_s19  ;;  %s501_s21 = int_to_ptr.vmem [resolvable:$true] %s51_s21 }
   0x5   :  { %s319_s24 = scalar_lea.hbm %s590_s1, 16 }
   0x6   :  { %p320_p0 = scmp.ne.s32.totalorder %s590_s1, %s319_s24  ;;  %p323_p1 = scmp.lt.u32.totalorder %s319_s24, %s590_s1 }
   0x8   :  { %p325_p2 = pnand %p323_p1, %p320_p0 }
   0xa   :  { %328 = shalt.err (!%p325_p2)
}
   0xb   :  { %s329_s29 = scalar_lea.vmem %s33_s19, 16  ;;  %s333_s30 = scalar_lea.vmem %s33_s19, 32 }
   0xc   :  { %p330_p3 = scmp.ne.s32.totalorder %s33_s19, %s329_s29  ;;  %p334_p4 = scmp.lt.s32.totalorder %s33_s19, %s33_s19 }
   0xd   :  { %p335_p5 = scmp.lt.s32.totalorder %s333_s30, %s329_s29 }
   0xf   :  { %p336_p6 = por %p335_p5, %p334_p4 }
  0x11   :  { %p337_p7 = pnand %p336_p6, %p330_p3 }
  0x13   :  { %340 = shalt.err (!%p337_p7)
}
  0x14   :  { %35 = dma.hbm_to_vmem [thread:$0]  %s590_s1, 16, %s33_s19, [#allocation6]  }
  0x15   :  { %s341_s10 = scalar_lea.hbm %s592_s3, 256 }
  0x16   :  { %p342_p8 = scmp.ne.s32.totalorder %s592_s3, %s341_s10  ;;  %p345_p9 = scmp.lt.u32.totalorder %s341_s10, %s592_s3 }
  0x18   :  { %p347_p10 = pnand %p345_p9, %p342_p8 }
  0x1a   :  { %350 = shalt.err (!%p347_p10)
}
  0x1b   :  { %s351_s15 = scalar_lea.vmem %s501_s21, 256  ;;  %p356_p12 = scmp.lt.s32.totalorder %s501_s21, %s501_s21 }
  0x1c   :  { %p352_p11 = scmp.ne.s32.totalorder %s501_s21, %s351_s15  ;;  %p357_p13 = scmp.lt.s32.totalorder %s351_s15, %s351_s15 }
  0x1e   :  { %p358_p0 = por %p357_p13, %p356_p12 }
  0x20   :  { %p359_p1 = pnand %p358_p0, %p352_p11 }
  0x22   :  { %362 = shalt.err (!%p359_p1)
}
  0x23   :  { %s461_s1 = smov 64   ;;  %s462_s16 = smov 4  }
  0x24   :  { %57 = dma.hbm_to_vmem [thread:$0]  %s592_s3, 256, %s501_s21, [#allocation9], %s461_s1, %s461_s1, %s462_s16  }
  0x25   :  { %s463_s19 = smov [#allocation2]   ;;  %s363_s24 = scalar_lea.hbm %s589_s0, 256 }
  0x26   :  { %s19_s20 = sshll.u32 %s463_s19, 4  ;;  %p364_p2 = scmp.ne.s32.totalorder %s589_s0, %s363_s24  ;;  %s20_s20 = int_to_ptr.vmem [resolvable:$true] %s19_s20 }
  0x27   :  { %p367_p3 = scmp.lt.u32.totalorder %s363_s24, %s589_s0 }
  0x29   :  { %p369_p4 = pnand %p367_p3, %p364_p2 }
  0x2b   :  { %372 = shalt.err (!%p369_p4)
}
  0x2c   :  { %s373_s29 = scalar_lea.vmem %s20_s20, 256  ;;  %p378_p6 = scmp.lt.s32.totalorder %s20_s20, %s20_s20 }
  0x2d   :  { %p374_p5 = scmp.ne.s32.totalorder %s20_s20, %s373_s29  ;;  %p379_p7 = scmp.lt.s32.totalorder %s373_s29, %s373_s29 }
  0x2f   :  { %p380_p8 = por %p379_p7, %p378_p6 }
  0x31   :  { %p381_p9 = pnand %p380_p8, %p374_p5 }
  0x33   :  { %384 = shalt.err (!%p381_p9)
}
  0x34   :  { %s464_s3 = smov 128   ;;  %s465_s21 = smov 8  }
  0x35   :  { %25 = dma.hbm_to_vmem [thread:$0]  %s589_s0, 256, %s20_s20, [#allocation3], %s464_s3, %s464_s3, %s465_s21  }
  0x36   :  { %s466_s7 = smov [#allocation7]   ;;  %s467_s9 = smov [#allocation10]  }
  0x37   :  { %s42_s8 = sshll.u32 %s466_s7, 4  ;;  %s64_s10 = sshll.u32 %s467_s9, 4  ;;  %s43_s8 = int_to_ptr.vmem [resolvable:$true] %s42_s8  ;;  %s65_s10 = int_to_ptr.vmem [resolvable:$true] %s64_s10 }
  0x38   :  { %s385_s13 = scalar_lea.hbm %s591_s2, 16 }
  0x39   :  { %p386_p10 = scmp.ne.s32.totalorder %s591_s2, %s385_s13  ;;  %p389_p11 = scmp.lt.u32.totalorder %s385_s13, %s591_s2 }
  0x3b   :  { %p391_p12 = pnand %p389_p11, %p386_p10 }
  0x3d   :  { %394 = shalt.err (!%p391_p12)
}
  0x3e   :  { %s395_s0 = scalar_lea.vmem %s43_s8, 16  ;;  %s399_s17 = scalar_lea.vmem %s43_s8, 32 }
  0x3f   :  { %p396_p13 = scmp.ne.s32.totalorder %s43_s8, %s395_s0  ;;  %p400_p0 = scmp.lt.s32.totalorder %s43_s8, %s43_s8 }
  0x40   :  { %p401_p1 = scmp.lt.s32.totalorder %s399_s17, %s395_s0 }
  0x42   :  { %p402_p2 = por %p401_p1, %p400_p0 }
  0x44   :  { %p403_p3 = pnand %p402_p2, %p396_p13 }
  0x46   :  { %406 = shalt.err (!%p403_p3)
}
  0x47   :  { %45 = dma.hbm_to_vmem [thread:$0]  %s591_s2, 16, %s43_s8, [#allocation6]  }
  0x48   :  { %s407_s23 = scalar_lea.hbm %s593_s4, 16 }
  0x49   :  { %p408_p4 = scmp.ne.s32.totalorder %s593_s4, %s407_s23  ;;  %p411_p5 = scmp.lt.u32.totalorder %s407_s23, %s593_s4 }
  0x4b   :  { %p413_p6 = pnand %p411_p5, %p408_p4 }
  0x4d   :  { %416 = shalt.err (!%p413_p6)
}
  0x4e   :  { %s417_s28 = scalar_lea.vmem %s65_s10, 16  ;;  %s421_s29 = scalar_lea.vmem %s65_s10, 32 }
  0x4f   :  { %p418_p7 = scmp.ne.s32.totalorder %s65_s10, %s417_s28  ;;  %p422_p8 = scmp.lt.s32.totalorder %s65_s10, %s65_s10 }
  0x50   :  { %p423_p9 = scmp.lt.s32.totalorder %s421_s29, %s417_s28 }
  0x52   :  { %p424_p10 = por %p423_p9, %p422_p8 }
  0x54   :  { %p425_p11 = pnand %p424_p10, %p418_p7 }
  0x56   :  { %428 = shalt.err (!%p425_p11)
}
  0x57   :  { %67 = dma.hbm_to_vmem [thread:$0]  %s593_s4, 16, %s65_s10, [#allocation9]  }
  0x58   :  { %451 = dma.done.wait [#allocation3], 256  }
  0x59   :  { %452 = vsyncadd [#allocation3], 4294967040 }
  0x5a   :  { %453 = dma.done.wait [#allocation6], 32  }
  0x5b   :  { %454 = vsyncadd [#allocation6], 4294967264 }
  0x5c   :  { %455 = dma.done.wait [#allocation9], 272  }
  0x5d   :  { %456 = vsyncadd [#allocation9], 4294967024  ;;  %vm86_vm0 = vcmask 261120   ;;  %v84_v0 = vld [vmem:[#allocation2] sm:$0xff]  ;;  %v85_v1 = vld [vmem:[#allocation2 + $0x8] sm:$0x3] }
  0x5e   :  { %vm90_vm1 = vcmask 254976   ;;  %v87_v2 = vsel %vm86_vm0, %v84_v0, 0.0  ;;  %v305_v14 = vld [vmem:[#allocation8] sm:$0xff]   ;;  %v468_v15 = vmov 0.0   ;;  %v306_v16 = vld [vmem:[#allocation8 + $0x8] sm:$0xff]   ;;  %vm469_vm2 = vmmov 0  }
  0x5f   :  { %88 = vadd.xlane.f32.xlu0 %v87_v2  ;;  %v91_v3 = vsel %vm90_vm1, %v85_v1, 0.0  ;;  %285 = vmatprep.subr.bf16.mxu0 %v468_v15  ;;  %v276_v25 = vld [vmem:[#allocation5] ss:$0 sm:$0xff]  ;;  %v277_v29 = vld [vmem:[#allocation7] ss:$0 sm:$0xff]  ;;  %s470_s4 = smov [#allocation11]  }
  0x60   :  { %286 = vmatpush3.bf16.msra.mxu0 %v305_v14  ;;  %289 = vmatprep.mubr.msk.bf16.mxu0 %vm469_vm2, %v468_v15  ;;  %v278_v34 = vld [vmem:[#allocation10] ss:$0 sm:$0xff]  ;;  %s262_s6 = sshll.u32 %s470_s4, 4  ;;  %s263_s6 = int_to_ptr.vmem [resolvable:$true] %s262_s6 }
  0x61   :  { %287 = vmatprep.subr.bf16.mxu0 %v468_v15  ;;  %s429_s7 = scalar_lea.vmem %s263_s6, 256  ;;  %p434_p13 = scmp.lt.s32.totalorder %s263_s6, %s263_s6 }
  0x62   :  { %p430_p12 = scmp.ne.s32.totalorder %s263_s6, %s429_s7  ;;  %p435_p0 = scmp.lt.s32.totalorder %s429_s7, %s429_s7 }
  0x63   :  { %92 = vadd.xlane.f32.xlu0 %v91_v3 }
  0x64   :  { %288 = vmatpush3.bf16.msra.mxu0 %v306_v16  ;;  %p436_p1 = por %p435_p0, %p434_p13 }
  0x66   :  { %p437_p2 = pnand %p436_p1, %p430_p12 }
  0xec   :  { %v89_v4 = vpop.xlane.xlu0 %88 }
  0xed   :  { %v95_v5 = vmul.f32 0.03125, %v89_v4 }
  0xef   :  { %v97_v6 = vsub.f32 %v84_v0, %v95_v5 }
  0xf0   :  { %v93_v7 = vpop.xlane.xlu0 %92 }
  0xf1   :  { %v96_v8 = vmul.f32 0.03125, %v93_v7  ;;  %v99_v9 = vmul.f32 %v97_v6, %v97_v6 }
  0xf3   :  { %v98_v10 = vsub.f32 %v85_v1, %v96_v8  ;;  %v101_v11 = vsel %vm86_vm0, %v99_v9, 0.0 }
  0xf4   :  { %102 = vadd.xlane.f32.xlu1 %v101_v11 }
  0xf5   :  { %v100_v12 = vmul.f32 %v98_v10, %v98_v10 }
  0xf7   :  { %v104_v13 = vsel %vm90_vm1, %v100_v12, 0.0 }
  0xf8   :  { %105 = vadd.xlane.f32.xlu1 %v104_v13 }
 0x181   :  { %v103_v17 = vpop.xlane.xlu1 %102 }
 0x182   :  { %v107_v18 = vmul.f32 0.03125, %v103_v17 }
 0x184   :  { %v109_v19 = vadd.f32 1e-05, %v107_v18 }
 0x185   :  { %v106_v20 = vpop.xlane.xlu1 %105 }
 0x186   :  { %307 = vrsqrt.f32 %v109_v19  ;;  %v108_v21 = vmul.f32 0.03125, %v106_v20 }
 0x188   :  { %v110_v22 = vadd.f32 1e-05, %v108_v21 }
 0x18a   :  { %309 = vrsqrt.f32 %v110_v22 }
 0x190   :  { %v308_v23 = vpop.eup %307 }
 0x191   :  { %v113_v24 = vmul.f32 %v308_v23, %v97_v6 }
 0x193   :  { %v122_v28 = vmul.f32 %v276_v25, %v113_v24 }
 0x194   :  { %v310_v26 = vpop.eup %309 }
 0x195   :  { %v114_v27 = vmul.f32 %v310_v26, %v98_v10  ;;  %v131_v31 = vadd.f32 %v277_v29, %v122_v28 }
 0x197   :  { %v123_v30 = vmul.f32 %v276_v25, %v114_v27 }
 0x199   :  { %v132_v32 = vadd.f32 %v277_v29, %v123_v30 }
 0x19b   :  { %v133_v33 = vpack.c.bf16 %v132_v32, %v131_v31 }
 0x19d   :  { %290 = vmatmul.mubr.msk.bf16.vlgmr.msra.gmra.mrb[0].mxu0 %vm86_vm0, %v133_v33 }
 0x270   :  { %v194_v35 = vpop.f32.mrb[0].mxu0 }
 0x271   :  { %v195_v36 = vadd.f32 %v278_v34, %v194_v35  ;;  %v291_v37 = vpop.f32.mrb[1].mxu0 }
 0x272   :  { %v197_v38 = vpop.f32.mrb[2].mxu0 }
 0x273   :  { %v203_v39 = vmul.f32 0.70710677, %v195_v36  ;;  %v198_v40 = vadd.f32 %v278_v34, %v197_v38  ;;  %v292_v41 = vpop.f32.mrb[3].mxu0  ;;  %v201_v19 = vmul.f32 0.5, %v195_v36 }
 0x275   :  { %v205_v42 = vand.u32 2147483647, %v203_v39  ;;  %v204_v43 = vmul.f32 0.70710677, %v198_v40  ;;  %vm245_vm3 = vcmp.ge.f32.partialorder %v203_v39, 0.0  ;;  %v202_v24 = vmul.f32 0.5, %v198_v40 }
 0x277   :  { %v207_v44 = vmul.f32 0.3275911, %v205_v42  ;;  %v206_v45 = vand.u32 2147483647, %v204_v43  ;;  %v233_v49 = vmul.f32 %v205_v42, %v205_v42  ;;  %vm246_vm4 = vcmp.ge.f32.partialorder %v204_v43, 0.0 }
 0x279   :  { %v209_v46 = vadd.f32 1.0, %v207_v44  ;;  %v208_v47 = vmul.f32 0.3275911, %v206_v45  ;;  %v234_v50 = vmul.f32 %v206_v45, %v206_v45  ;;  %v235_v52 = vsub.f32 0.0, %v233_v49 }
 0x27b   :  { %311 = vrcp.f32 %v209_v46  ;;  %v210_v48 = vadd.f32 1.0, %v208_v47  ;;  %v236_v56 = vsub.f32 0.0, %v234_v50  ;;  %v237_v57 = vmul.f32 1.442695, %v235_v52 }
 0x27d   :  { %313 = vrcp.f32 %v210_v48  ;;  %v239_v62 = vmul.f32 1.442695, %v236_v56 }
 0x27e   :  { %315 = vpow2.f32 %v237_v57 }
 0x27f   :  { %317 = vpow2.f32 %v239_v62 }
 0x285   :  { %v312_v51 = vpop.eup %311 }
 0x286   :  { %v215_v53 = vmul.f32 1.0614054, %v312_v51 }
 0x287   :  { %v314_v54 = vpop.eup %313 }
 0x288   :  { %v217_v55 = vadd.f32 -1.4531521, %v215_v53  ;;  %v216_v58 = vmul.f32 1.0614054, %v314_v54  ;;  %v316_v9 = vpop.eup %315 }
 0x289   :  { %v318_v13 = vpop.eup %317 }
 0x28a   :  { %v219_v59 = vmul.f32 %v312_v51, %v217_v55  ;;  %v218_v60 = vadd.f32 -1.4531521, %v216_v58 }
 0x28c   :  { %v221_v61 = vadd.f32 1.4214138, %v219_v59  ;;  %v220_v63 = vmul.f32 %v314_v54, %v218_v60 }
 0x28e   :  { %v223_v0 = vmul.f32 %v312_v51, %v221_v61  ;;  %v222_v1 = vadd.f32 1.4214138, %v220_v63 }
 0x290   :  { %v225_v2 = vadd.f32 -0.28449672, %v223_v0  ;;  %v224_v3 = vmul.f32 %v314_v54, %v222_v1 }
 0x292   :  { %v227_v4 = vmul.f32 %v312_v51, %v225_v2  ;;  %v226_v5 = vadd.f32 -0.28449672, %v224_v3 }
 0x294   :  { %v229_v6 = vadd.f32 0.2548296, %v227_v4  ;;  %v228_v7 = vmul.f32 %v314_v54, %v226_v5 }
 0x296   :  { %v231_v8 = vmul.f32 %v312_v51, %v229_v6  ;;  %v230_v10 = vadd.f32 0.2548296, %v228_v7 }
 0x298   :  { %v241_v11 = vmul.f32 %v316_v9, %v231_v8  ;;  %v232_v12 = vmul.f32 %v314_v54, %v230_v10 }
 0x29a   :  { %v243_v14 = vsub.f32 1.0, %v241_v11  ;;  %v242_v15 = vmul.f32 %v318_v13, %v232_v12 }
 0x29c   :  { %v247_v16 = vsub.f32 0.0, %v243_v14  ;;  %v244_v17 = vsub.f32 1.0, %v242_v15 }
 0x29e   :  { %v249_v18 = vsel %vm245_vm3, %v243_v14, %v247_v16  ;;  %v248_v21 = vsub.f32 0.0, %v244_v17 }
 0x29f   :  { %v251_v20 = vadd.f32 1.0, %v249_v18 }
 0x2a0   :  { %v250_v23 = vsel %vm246_vm4, %v244_v17, %v248_v21 }
 0x2a1   :  { %v253_v22 = vmul.f32 %v251_v20, %v201_v19  ;;  %v252_v25 = vadd.f32 1.0, %v250_v23 }
 0x2a3   :  { %255 = vst [vmem:[#allocation11] sm:$0xff] %v253_v22  ;;  %v254_v26 = vmul.f32 %v252_v25, %v202_v24 }
 0x2a5   :  { %256 = vst [vmem:[#allocation11 + $0x8] sm:$0x3] %v254_v26 }
 0x2a6   :  { %440 = shalt.err (!%p437_p2)
}
 0x2a7   :  { %s441_s10 = scalar_lea.hbm %s594_s5, 256 }
 0x2a8   :  { %p442_p3 = scmp.ne.s32.totalorder %s594_s5, %s441_s10  ;;  %p445_p4 = scmp.lt.u32.totalorder %s441_s10, %s594_s5 }
 0x2aa   :  { %p447_p5 = pnand %p445_p4, %p442_p3 }
 0x2ac   :  { %450 = shalt.err (!%p447_p5)
}
 0x2ad   :  { %268 = dma.vmem_to_hbm [thread:$0]  %s263_s6, 256, %s594_s5, [#allocation4], %s464_s3, %s464_s3, %s465_s21  }
 0x2ae   :  { %457 = dma.done.wait [#allocation4], 256  }
 0x2af   :  { %458 = vsyncadd [#allocation4], 4294967040 }
 0x2b0   :  { %272 = vsyncpa [#allocation3], 1 }
 0x2b1   :  { %273 = vsyncpa [#allocation6], 1 }
 0x2b2   :  { %274 = vsyncpa [#allocation9], 1 }
 0x2b3   :  { %275 = vsyncpa [#allocation4], 1 }

// kernel: mae_forward.30
= control target key start
LH: loop header
LB: loop body
LE: loop exit
PB: predicated region body
PF: predicated region fallthrough
CT: control target
= control target key end

     0   :  { %10 = vsyncpa [#allocation3], 0  ;;  %s531_s0 = inlined_call_operand.hbm [shape: f32[10,32], index: 0, kind: input, shape index: {}]   ;;  %s532_s1 = inlined_call_operand.hbm [shape: f32[1,32], index: 1, kind: input, shape index: {}]   ;;  %s533_s2 = inlined_call_operand.hbm [shape: f32[1,32], index: 2, kind: input, shape index: {}]   ;;  %s534_s3 = inlined_call_operand.hbm [shape: bf16[32,32], index: 3, kind: input, shape index: {}]   ;;  %s535_s4 = inlined_call_operand.hbm [shape: f32[1,32], index: 4, kind: input, shape index: {}]   ;;  %s536_s5 = inlined_call_operand.hbm [shape: f32[10,32], index: 5, kind: output, shape index: {}]  }
   0x1   :  { %11 = vsyncpa [#allocation6], 0 }
   0x2   :  { %12 = vsyncpa [#allocation9], 0 }
   0x3   :  { %13 = vsyncpa [#allocation4], 0  ;;  %s397_s18 = smov [#allocation5]   ;;  %s398_s20 = smov [#allocation8]  }
   0x4   :  { %s32_s19 = sshll.u32 %s397_s18, 4  ;;  %s51_s21 = sshll.u32 %s398_s20, 4  ;;  %s33_s19 = int_to_ptr.vmem [resolvable:$true] %s32_s19  ;;  %s439_s21 = int_to_ptr.vmem [resolvable:$true] %s51_s21 }
   0x5   :  { %s257_s24 = scalar_lea.hbm %s532_s1, 16 }
   0x6   :  { %p258_p0 = scmp.ne.s32.totalorder %s532_s1, %s257_s24  ;;  %p261_p1 = scmp.lt.u32.totalorder %s257_s24, %s532_s1 }
   0x8   :  { %p263_p2 = pnand %p261_p1, %p258_p0 }
   0xa   :  { %266 = shalt.err (!%p263_p2)
}
   0xb   :  { %s267_s29 = scalar_lea.vmem %s33_s19, 16  ;;  %s271_s30 = scalar_lea.vmem %s33_s19, 32 }
   0xc   :  { %p268_p3 = scmp.ne.s32.totalorder %s33_s19, %s267_s29  ;;  %p272_p4 = scmp.lt.s32.totalorder %s33_s19, %s33_s19 }
   0xd   :  { %p273_p5 = scmp.lt.s32.totalorder %s271_s30, %s267_s29 }
   0xf   :  { %p274_p6 = por %p273_p5, %p272_p4 }
  0x11   :  { %p275_p7 = pnand %p274_p6, %p268_p3 }
  0x13   :  { %278 = shalt.err (!%p275_p7)
}
  0x14   :  { %35 = dma.hbm_to_vmem [thread:$0]  %s532_s1, 16, %s33_s19, [#allocation6]  }
  0x15   :  { %s279_s10 = scalar_lea.hbm %s534_s3, 256 }
  0x16   :  { %p280_p8 = scmp.ne.s32.totalorder %s534_s3, %s279_s10  ;;  %p283_p9 = scmp.lt.u32.totalorder %s279_s10, %s534_s3 }
  0x18   :  { %p285_p10 = pnand %p283_p9, %p280_p8 }
  0x1a   :  { %288 = shalt.err (!%p285_p10)
}
  0x1b   :  { %s289_s15 = scalar_lea.vmem %s439_s21, 256  ;;  %p294_p12 = scmp.lt.s32.totalorder %s439_s21, %s439_s21 }
  0x1c   :  { %p290_p11 = scmp.ne.s32.totalorder %s439_s21, %s289_s15  ;;  %p295_p13 = scmp.lt.s32.totalorder %s289_s15, %s289_s15 }
  0x1e   :  { %p296_p0 = por %p295_p13, %p294_p12 }
  0x20   :  { %p297_p1 = pnand %p296_p0, %p290_p11 }
  0x22   :  { %300 = shalt.err (!%p297_p1)
}
  0x23   :  { %s399_s1 = smov 64   ;;  %s400_s16 = smov 4  }
  0x24   :  { %57 = dma.hbm_to_vmem [thread:$0]  %s534_s3, 256, %s439_s21, [#allocation9], %s399_s1, %s399_s1, %s400_s16  }
  0x25   :  { %s401_s19 = smov [#allocation2]   ;;  %s301_s24 = scalar_lea.hbm %s531_s0, 256 }
  0x26   :  { %s19_s20 = sshll.u32 %s401_s19, 4  ;;  %p302_p2 = scmp.ne.s32.totalorder %s531_s0, %s301_s24  ;;  %s20_s20 = int_to_ptr.vmem [resolvable:$true] %s19_s20 }
  0x27   :  { %p305_p3 = scmp.lt.u32.totalorder %s301_s24, %s531_s0 }
  0x29   :  { %p307_p4 = pnand %p305_p3, %p302_p2 }
  0x2b   :  { %310 = shalt.err (!%p307_p4)
}
  0x2c   :  { %s311_s29 = scalar_lea.vmem %s20_s20, 256  ;;  %p316_p6 = scmp.lt.s32.totalorder %s20_s20, %s20_s20 }
  0x2d   :  { %p312_p5 = scmp.ne.s32.totalorder %s20_s20, %s311_s29  ;;  %p317_p7 = scmp.lt.s32.totalorder %s311_s29, %s311_s29 }
  0x2f   :  { %p318_p8 = por %p317_p7, %p316_p6 }
  0x31   :  { %p319_p9 = pnand %p318_p8, %p312_p5 }
  0x33   :  { %322 = shalt.err (!%p319_p9)
}
  0x34   :  { %s402_s3 = smov 128   ;;  %s403_s21 = smov 8  }
  0x35   :  { %25 = dma.hbm_to_vmem [thread:$0]  %s531_s0, 256, %s20_s20, [#allocation3], %s402_s3, %s402_s3, %s403_s21  }
  0x36   :  { %s404_s7 = smov [#allocation7]   ;;  %s405_s9 = smov [#allocation10]  }
  0x37   :  { %s42_s8 = sshll.u32 %s404_s7, 4  ;;  %s64_s10 = sshll.u32 %s405_s9, 4  ;;  %s43_s8 = int_to_ptr.vmem [resolvable:$true] %s42_s8  ;;  %s65_s10 = int_to_ptr.vmem [resolvable:$true] %s64_s10 }
  0x38   :  { %s323_s13 = scalar_lea.hbm %s533_s2, 16 }
  0x39   :  { %p324_p10 = scmp.ne.s32.totalorder %s533_s2, %s323_s13  ;;  %p327_p11 = scmp.lt.u32.totalorder %s323_s13, %s533_s2 }
  0x3b   :  { %p329_p12 = pnand %p327_p11, %p324_p10 }
  0x3d   :  { %332 = shalt.err (!%p329_p12)
}
  0x3e   :  { %s333_s0 = scalar_lea.vmem %s43_s8, 16  ;;  %s337_s17 = scalar_lea.vmem %s43_s8, 32 }
  0x3f   :  { %p334_p13 = scmp.ne.s32.totalorder %s43_s8, %s333_s0  ;;  %p338_p0 = scmp.lt.s32.totalorder %s43_s8, %s43_s8 }
  0x40   :  { %p339_p1 = scmp.lt.s32.totalorder %s337_s17, %s333_s0 }
  0x42   :  { %p340_p2 = por %p339_p1, %p338_p0 }
  0x44   :  { %p341_p3 = pnand %p340_p2, %p334_p13 }
  0x46   :  { %344 = shalt.err (!%p341_p3)
}
  0x47   :  { %45 = dma.hbm_to_vmem [thread:$0]  %s533_s2, 16, %s43_s8, [#allocation6]  }
  0x48   :  { %s345_s23 = scalar_lea.hbm %s535_s4, 16 }
  0x49   :  { %p346_p4 = scmp.ne.s32.totalorder %s535_s4, %s345_s23  ;;  %p349_p5 = scmp.lt.u32.totalorder %s345_s23, %s535_s4 }
  0x4b   :  { %p351_p6 = pnand %p349_p5, %p346_p4 }
  0x4d   :  { %354 = shalt.err (!%p351_p6)
}
  0x4e   :  { %s355_s28 = scalar_lea.vmem %s65_s10, 16  ;;  %s359_s29 = scalar_lea.vmem %s65_s10, 32 }
  0x4f   :  { %p356_p7 = scmp.ne.s32.totalorder %s65_s10, %s355_s28  ;;  %p360_p8 = scmp.lt.s32.totalorder %s65_s10, %s65_s10 }
  0x50   :  { %p361_p9 = scmp.lt.s32.totalorder %s359_s29, %s355_s28 }
  0x52   :  { %p362_p10 = por %p361_p9, %p360_p8 }
  0x54   :  { %p363_p11 = pnand %p362_p10, %p356_p7 }
  0x56   :  { %366 = shalt.err (!%p363_p11)
}
  0x57   :  { %67 = dma.hbm_to_vmem [thread:$0]  %s535_s4, 16, %s65_s10, [#allocation9]  }
  0x58   :  { %389 = dma.done.wait [#allocation3], 256  }
  0x59   :  { %390 = vsyncadd [#allocation3], 4294967040 }
  0x5a   :  { %391 = dma.done.wait [#allocation6], 32  }
  0x5b   :  { %392 = vsyncadd [#allocation6], 4294967264 }
  0x5c   :  { %393 = dma.done.wait [#allocation9], 272  }
  0x5d   :  { %394 = vsyncadd [#allocation9], 4294967024  ;;  %vm86_vm0 = vcmask 261120   ;;  %v84_v0 = vld [vmem:[#allocation2] sm:$0xff]  ;;  %v85_v1 = vld [vmem:[#allocation2 + $0x8] sm:$0x3] }
  0x5e   :  { %vm90_vm1 = vcmask 254976   ;;  %v87_v2 = vsel %vm86_vm0, %v84_v0, 0.0  ;;  %v251_v14 = vld [vmem:[#allocation8] sm:$0xff]   ;;  %v406_v15 = vmov 0.0   ;;  %v252_v16 = vld [vmem:[#allocation8 + $0x8] sm:$0xff]   ;;  %vm407_vm2 = vmmov 0  }
  0x5f   :  { %88 = vadd.xlane.f32.xlu0 %v87_v2  ;;  %v91_v3 = vsel %vm90_vm1, %v85_v1, 0.0  ;;  %231 = vmatprep.subr.bf16.mxu0 %v406_v15  ;;  %v222_v25 = vld [vmem:[#allocation5] ss:$0 sm:$0xff]  ;;  %v223_v29 = vld [vmem:[#allocation7] ss:$0 sm:$0xff]  ;;  %s408_s4 = smov [#allocation11]  }
  0x60   :  { %232 = vmatpush3.bf16.msra.mxu0 %v251_v14  ;;  %235 = vmatprep.mubr.msk.bf16.mxu0 %vm407_vm2, %v406_v15  ;;  %v224_v34 = vld [vmem:[#allocation10] ss:$0 sm:$0xff]  ;;  %s208_s6 = sshll.u32 %s408_s4, 4  ;;  %s209_s6 = int_to_ptr.vmem [resolvable:$true] %s208_s6 }
  0x61   :  { %233 = vmatprep.subr.bf16.mxu0 %v406_v15  ;;  %s367_s7 = scalar_lea.vmem %s209_s6, 256  ;;  %p372_p13 = scmp.lt.s32.totalorder %s209_s6, %s209_s6 }
  0x62   :  { %p368_p12 = scmp.ne.s32.totalorder %s209_s6, %s367_s7  ;;  %p373_p0 = scmp.lt.s32.totalorder %s367_s7, %s367_s7 }
  0x63   :  { %92 = vadd.xlane.f32.xlu0 %v91_v3 }
  0x64   :  { %234 = vmatpush3.bf16.msra.mxu0 %v252_v16  ;;  %p374_p1 = por %p373_p0, %p372_p13 }
  0x66   :  { %p375_p2 = pnand %p374_p1, %p368_p12 }
  0xec   :  { %v89_v4 = vpop.xlane.xlu0 %88 }
  0xed   :  { %v95_v5 = vmul.f32 0.03125, %v89_v4 }
  0xef   :  { %v97_v6 = vsub.f32 %v84_v0, %v95_v5 }
  0xf0   :  { %v93_v7 = vpop.xlane.xlu0 %92 }
  0xf1   :  { %v96_v8 = vmul.f32 0.03125, %v93_v7  ;;  %v99_v9 = vmul.f32 %v97_v6, %v97_v6 }
  0xf3   :  { %v98_v10 = vsub.f32 %v85_v1, %v96_v8  ;;  %v101_v11 = vsel %vm86_vm0, %v99_v9, 0.0 }
  0xf4   :  { %102 = vadd.xlane.f32.xlu1 %v101_v11 }
  0xf5   :  { %v100_v12 = vmul.f32 %v98_v10, %v98_v10 }
  0xf7   :  { %v104_v13 = vsel %vm90_vm1, %v100_v12, 0.0 }
  0xf8   :  { %105 = vadd.xlane.f32.xlu1 %v104_v13 }
 0x181   :  { %v103_v17 = vpop.xlane.xlu1 %102 }
 0x182   :  { %v107_v18 = vmul.f32 0.03125, %v103_v17 }
 0x184   :  { %v109_v19 = vadd.f32 1e-05, %v107_v18 }
 0x185   :  { %v106_v20 = vpop.xlane.xlu1 %105 }
 0x186   :  { %253 = vrsqrt.f32 %v109_v19  ;;  %v108_v21 = vmul.f32 0.03125, %v106_v20 }
 0x188   :  { %v110_v22 = vadd.f32 1e-05, %v108_v21 }
 0x18a   :  { %255 = vrsqrt.f32 %v110_v22 }
 0x190   :  { %v254_v23 = vpop.eup %253 }
 0x191   :  { %v113_v24 = vmul.f32 %v254_v23, %v97_v6 }
 0x193   :  { %v122_v28 = vmul.f32 %v222_v25, %v113_v24 }
 0x194   :  { %v256_v26 = vpop.eup %255 }
 0x195   :  { %v114_v27 = vmul.f32 %v256_v26, %v98_v10  ;;  %v131_v31 = vadd.f32 %v223_v29, %v122_v28 }
 0x197   :  { %v123_v30 = vmul.f32 %v222_v25, %v114_v27 }
 0x199   :  { %v132_v32 = vadd.f32 %v223_v29, %v123_v30 }
 0x19b   :  { %v133_v33 = vpack.c.bf16 %v132_v32, %v131_v31 }
 0x19d   :  { %236 = vmatmul.mubr.msk.bf16.vlgmr.msra.gmra.mrb[0].mxu0 %vm86_vm0, %v133_v33 }
 0x270   :  { %v194_v35 = vpop.f32.mrb[0].mxu0 }
 0x271   :  { %v195_v36 = vadd.f32 %v224_v34, %v194_v35  ;;  %v237_v37 = vpop.f32.mrb[1].mxu0 }
 0x272   :  { %v197_v38 = vpop.f32.mrb[2].mxu0 }
 0x273   :  { %201 = vst.msk [vmem:[#allocation11] sm:$0xff] %vm86_vm0, %v195_v36  ;;  %v198_v39 = vadd.f32 %v224_v34, %v197_v38  ;;  %v238_v40 = vpop.f32.mrb[3].mxu0 }
 0x275   :  { %202 = vst.msk [vmem:[#allocation11 + $0x8] sm:$0x3] %vm90_vm1, %v198_v39 }
 0x276   :  { %378 = shalt.err (!%p375_p2)
}
 0x277   :  { %s379_s10 = scalar_lea.hbm %s536_s5, 256 }
 0x278   :  { %p380_p3 = scmp.ne.s32.totalorder %s536_s5, %s379_s10  ;;  %p383_p4 = scmp.lt.u32.totalorder %s379_s10, %s536_s5 }
 0x27a   :  { %p385_p5 = pnand %p383_p4, %p380_p3 }
 0x27c   :  { %388 = shalt.err (!%p385_p5)
}
 0x27d   :  { %214 = dma.vmem_to_hbm [thread:$0]  %s209_s6, 256, %s536_s5, [#allocation4], %s402_s3, %s402_s3, %s403_s21  }
 0x27e   :  { %395 = dma.done.wait [#allocation4], 256  }
 0x27f   :  { %396 = vsyncadd [#allocation4], 4294967040 }
 0x280   :  { %218 = vsyncpa [#allocation3], 1 }
 0x281   :  { %219 = vsyncpa [#allocation6], 1 }
 0x282   :  { %220 = vsyncpa [#allocation9], 1 }
 0x283   :  { %221 = vsyncpa [#allocation4], 1 }

// kernel: mae_forward.31
= control target key start
LH: loop header
LB: loop body
LE: loop exit
PB: predicated region body
PF: predicated region fallthrough
CT: control target
= control target key end

     0   :  { %10 = vsyncpa [#allocation3], 0  ;;  %s647_s0 = inlined_call_operand.hbm [shape: f32[34,32], index: 0, kind: input, shape index: {}]   ;;  %s648_s1 = inlined_call_operand.hbm [shape: f32[1,32], index: 1, kind: input, shape index: {}]   ;;  %s649_s2 = inlined_call_operand.hbm [shape: f32[1,32], index: 2, kind: input, shape index: {}]   ;;  %s650_s3 = inlined_call_operand.hbm [shape: bf16[32,96], index: 3, kind: input, shape index: {}]   ;;  %s651_s4 = inlined_call_operand.hbm [shape: f32[1,96], index: 4, kind: input, shape index: {}]   ;;  %s652_s5 = inlined_call_operand.hbm [shape: f32[34,96], index: 5, kind: output, shape index: {}]  }
   0x1   :  { %11 = vsyncpa [#allocation6], 0 }
   0x2   :  { %12 = vsyncpa [#allocation9], 0 }
   0x3   :  { %13 = vsyncpa [#allocation4], 0  ;;  %s495_s18 = smov [#allocation5]   ;;  %s496_s20 = smov [#allocation8]  }
   0x4   :  { %s32_s19 = sshll.u32 %s495_s18, 4  ;;  %s51_s21 = sshll.u32 %s496_s20, 4  ;;  %s33_s19 = int_to_ptr.vmem [resolvable:$true] %s32_s19  ;;  %s537_s21 = int_to_ptr.vmem [resolvable:$true] %s51_s21 }
   0x5   :  { %s355_s24 = scalar_lea.hbm %s648_s1, 16 }
   0x6   :  { %p356_p0 = scmp.ne.s32.totalorder %s648_s1, %s355_s24  ;;  %p359_p1 = scmp.lt.u32.totalorder %s355_s24, %s648_s1 }
   0x8   :  { %p361_p2 = pnand %p359_p1, %p356_p0 }
   0xa   :  { %364 = shalt.err (!%p361_p2)
}
   0xb   :  { %s365_s29 = scalar_lea.vmem %s33_s19, 16  ;;  %s369_s30 = scalar_lea.vmem %s33_s19, 32 }
   0xc   :  { %p366_p3 = scmp.ne.s32.totalorder %s33_s19, %s365_s29  ;;  %p370_p4 = scmp.lt.s32.totalorder %s33_s19, %s33_s19 }
   0xd   :  { %p371_p5 = scmp.lt.s32.totalorder %s369_s30, %s365_s29 }
   0xf   :  { %p372_p6 = por %p371_p5, %p370_p4 }
  0x11   :  { %p373_p7 = pnand %p372_p6, %p366_p3 }
  0x13   :  { %376 = shalt.err (!%p373_p7)
}
  0x14   :  { %35 = dma.hbm_to_vmem [thread:$0]  %s648_s1, 16, %s33_s19, [#allocation6]  }
  0x15   :  { %s377_s10 = scalar_lea.hbm %s650_s3, 256 }
  0x16   :  { %p378_p8 = scmp.ne.s32.totalorder %s650_s3, %s377_s10  ;;  %p381_p9 = scmp.lt.u32.totalorder %s377_s10, %s650_s3 }
  0x18   :  { %p383_p10 = pnand %p381_p9, %p378_p8 }
  0x1a   :  { %386 = shalt.err (!%p383_p10)
}
  0x1b   :  { %s387_s15 = scalar_lea.vmem %s537_s21, 256  ;;  %p392_p12 = scmp.lt.s32.totalorder %s537_s21, %s537_s21 }
  0x1c   :  { %p388_p11 = scmp.ne.s32.totalorder %s537_s21, %s387_s15  ;;  %p393_p13 = scmp.lt.s32.totalorder %s387_s15, %s387_s15 }
  0x1e   :  { %p394_p0 = por %p393_p13, %p392_p12 }
  0x20   :  { %p395_p1 = pnand %p394_p0, %p388_p11 }
  0x22   :  { %398 = shalt.err (!%p395_p1)
}
  0x23   :  { %s497_s1 = smov 64   ;;  %s498_s16 = smov 4  }
  0x24   :  { %57 = dma.hbm_to_vmem [thread:$0]  %s650_s3, 256, %s537_s21, [#allocation9], %s497_s1, %s497_s1, %s498_s16  }
  0x25   :  { %s499_s19 = smov [#allocation2]   ;;  %s399_s24 = scalar_lea.hbm %s647_s0, 640 }
  0x26   :  { %s19_s20 = sshll.u32 %s499_s19, 4  ;;  %p400_p2 = scmp.ne.s32.totalorder %s647_s0, %s399_s24  ;;  %s20_s20 = int_to_ptr.vmem [resolvable:$true] %s19_s20 }
  0x27   :  { %p403_p3 = scmp.lt.u32.totalorder %s399_s24, %s647_s0 }
  0x29   :  { %p405_p4 = pnand %p403_p3, %p400_p2 }
  0x2b   :  { %408 = shalt.err (!%p405_p4)
}
  0x2c   :  { %s409_s29 = scalar_lea.vmem %s20_s20, 640  ;;  %p414_p6 = scmp.lt.s32.totalorder %s20_s20, %s20_s20 }
  0x2d   :  { %p410_p5 = scmp.ne.s32.totalorder %s20_s20, %s409_s29  ;;  %p415_p7 = scmp.lt.s32.totalorder %s409_s29, %s409_s29 }
  0x2f   :  { %p416_p8 = por %p415_p7, %p414_p6 }
  0x31   :  { %p417_p9 = pnand %p416_p8, %p410_p5 }
  0x33   :  { %420 = shalt.err (!%p417_p9)
}
  0x34   :  { %s500_s3 = smov 128   ;;  %s501_s21 = smov 8  }
  0x35   :  { %25 = dma.hbm_to_vmem [thread:$0]  %s647_s0, 640, %s20_s20, [#allocation3], %s500_s3, %s500_s3, %s501_s21  }
  0x36   :  { %s502_s7 = smov [#allocation7]   ;;  %s503_s9 = smov [#allocation10]  }
  0x37   :  { %s42_s8 = sshll.u32 %s502_s7, 4  ;;  %s64_s10 = sshll.u32 %s503_s9, 4  ;;  %s43_s8 = int_to_ptr.vmem [resolvable:$true] %s42_s8  ;;  %s65_s10 = int_to_ptr.vmem [resolvable:$true] %s64_s10 }
  0x38   :  { %s421_s13 = scalar_lea.hbm %s649_s2, 16 }
  0x39   :  { %p422_p10 = scmp.ne.s32.totalorder %s649_s2, %s421_s13  ;;  %p425_p11 = scmp.lt.u32.totalorder %s421_s13, %s649_s2 }
  0x3b   :  { %p427_p12 = pnand %p425_p11, %p422_p10 }
  0x3d   :  { %430 = shalt.err (!%p427_p12)
}
  0x3e   :  { %s431_s0 = scalar_lea.vmem %s43_s8, 16  ;;  %s435_s17 = scalar_lea.vmem %s43_s8, 32 }
  0x3f   :  { %p432_p13 = scmp.ne.s32.totalorder %s43_s8, %s431_s0  ;;  %p436_p0 = scmp.lt.s32.totalorder %s43_s8, %s43_s8 }
  0x40   :  { %p437_p1 = scmp.lt.s32.totalorder %s435_s17, %s431_s0 }
  0x42   :  { %p438_p2 = por %p437_p1, %p436_p0 }
  0x44   :  { %p439_p3 = pnand %p438_p2, %p432_p13 }
  0x46   :  { %442 = shalt.err (!%p439_p3)
}
  0x47   :  { %45 = dma.hbm_to_vmem [thread:$0]  %s649_s2, 16, %s43_s8, [#allocation6]  }
  0x48   :  { %s443_s23 = scalar_lea.hbm %s651_s4, 16 }
  0x49   :  { %p444_p4 = scmp.ne.s32.totalorder %s651_s4, %s443_s23  ;;  %p447_p5 = scmp.lt.u32.totalorder %s443_s23, %s651_s4 }
  0x4b   :  { %p449_p6 = pnand %p447_p5, %p444_p4 }
  0x4d   :  { %452 = shalt.err (!%p449_p6)
}
  0x4e   :  { %s453_s28 = scalar_lea.vmem %s65_s10, 16  ;;  %s457_s29 = scalar_lea.vmem %s65_s10, 32 }
  0x4f   :  { %p454_p7 = scmp.ne.s32.totalorder %s65_s10, %s453_s28  ;;  %p458_p8 = scmp.lt.s32.totalorder %s65_s10, %s65_s10 }
  0x50   :  { %p459_p9 = scmp.lt.s32.totalorder %s457_s29, %s453_s28 }
  0x52   :  { %p460_p10 = por %p459_p9, %p458_p8 }
  0x54   :  { %p461_p11 = pnand %p460_p10, %p454_p7 }
  0x56   :  { %464 = shalt.err (!%p461_p11)
}
  0x57   :  { %67 = dma.hbm_to_vmem [thread:$0]  %s651_s4, 16, %s65_s10, [#allocation9]  }
  0x58   :  { %487 = dma.done.wait [#allocation3], 640  }
  0x59   :  { %488 = vsyncadd [#allocation3], 4294966656 }
  0x5a   :  { %489 = dma.done.wait [#allocation6], 32  }
  0x5b   :  { %490 = vsyncadd [#allocation6], 4294967264 }
  0x5c   :  { %491 = dma.done.wait [#allocation9], 272  }
  0x5d   :  { %492 = vsyncadd [#allocation9], 4294967024  ;;  %vm89_vm0 = vcmask 261120   ;;  %v86_v0 = vld [vmem:[#allocation2 + $0x10] sm:$0xff]  ;;  %v87_v1 = vld [vmem:[#allocation2 + $0x18] sm:$0xff]  ;;  %vm102_vm1 = vcmask 254976  }
  0x5e   :  { %v84_v2 = vld [vmem:[#allocation2] sm:$0xff]  ;;  %v96_v3 = vsel %vm89_vm0, %v86_v0, 0.0  ;;  %v85_v5 = vld [vmem:[#allocation2 + $0x8] sm:$0xff]  ;;  %v99_v6 = vsel %vm89_vm0, %v87_v1, 0.0  ;;  %v504_v36 = vmov 0.0   ;;  %v344_v37 = vld [vmem:[#allocation8 + $0x8] sm:$0xff]  }
  0x5f   :  { %v90_v4 = vsel %vm89_vm0, %v84_v2, 0.0  ;;  %97 = vadd.xlane.f32.xlu0 %v96_v3  ;;  %v93_v7 = vsel %vm89_vm0, %v85_v5, 0.0  ;;  %v88_v8 = vld [vmem:[#allocation2 + $0x20] sm:$0x3]  ;;  %v343_v35 = vld [vmem:[#allocation8] sm:$0xff]   ;;  %327 = vmatprep.subr.bf16.mxu1 %v504_v36  ;;  %vm505_vm2 = vmmov 0  }
  0x60   :  { %91 = vadd.xlane.f32.xlu1 %v90_v4  ;;  %v103_v9 = vsel %vm102_vm1, %v88_v8, 0.0  ;;  %311 = vmatprep.subr.bf16.mxu0 %v504_v36  ;;  %v298_v55 = vld [vmem:[#allocation5] ss:$0 sm:$0xff]  ;;  %v299_v61 = vld [vmem:[#allocation7] ss:$0 sm:$0xff]  ;;  %vm272_vm3 = vcmask 785408  }
  0x61   :  { %329 = vmatpush3.bf16.msra.mxu1 %v343_v35  ;;  %312 = vmatpush3.bf16.msra.mxu0 %v343_v35  ;;  %s506_s4 = smov [#allocation11]   ;;  %vm277_vm4 = vcmask 779264  }
  0x62   :  { %328 = vmatprep.subr.bf16.mxu1 %v504_v36  ;;  %313 = vmatprep.subr.bf16.mxu0 %v504_v36  ;;  %s284_s6 = sshll.u32 %s506_s4, 4  ;;  %s285_s6 = int_to_ptr.vmem [resolvable:$true] %s284_s6 }
  0x63   :  { %100 = vadd.xlane.f32.xlu0 %v99_v6  ;;  %319 = vmatprep.mubr.msk.bf16.mxu1 %vm505_vm2, %v504_v36  ;;  %s465_s7 = scalar_lea.vmem %s285_s6, 640  ;;  %p470_p13 = scmp.lt.s32.totalorder %s285_s6, %s285_s6 }
  0x64   :  { %94 = vadd.xlane.f32.xlu1 %v93_v7  ;;  %315 = vmatprep.mubr.msk.bf16.mxu0 %vm505_vm2, %v504_v36  ;;  %p466_p12 = scmp.ne.s32.totalorder %s285_s6, %s465_s7  ;;  %p471_p0 = scmp.lt.s32.totalorder %s465_s7, %s465_s7 }
  0x65   :  { %330 = vmatpush3.bf16.msra.mxu1 %v344_v37  ;;  %314 = vmatpush3.bf16.msra.mxu0 %v344_v37 }
  0x66   :  { %p472_p1 = por %p471_p0, %p470_p13 }
  0x67   :  { %104 = vadd.xlane.f32.xlu0 %v103_v9 }
  0x68   :  { %p473_p2 = pnand %p472_p1, %p466_p12 }
  0xec   :  { %v98_v10 = vpop.xlane.xlu0 %97 }
  0xed   :  { %v92_v11 = vpop.xlane.xlu1 %91  ;;  %v109_v12 = vmul.f32 0.03125, %v98_v10 }
  0xee   :  { %v107_v13 = vmul.f32 0.03125, %v92_v11 }
  0xef   :  { %v114_v14 = vsub.f32 %v86_v0, %v109_v12 }
  0xf0   :  { %v612_v15 = vsub.f32 %v84_v2, %v107_v13  ;;  %v101_v16 = vpop.xlane.xlu0 %100 }
  0xf1   :  { %v95_v17 = vpop.xlane.xlu1 %94  ;;  %v110_v18 = vmul.f32 0.03125, %v101_v16  ;;  %v119_v19 = vmul.f32 %v114_v14, %v114_v14 }
  0xf2   :  { %v108_v20 = vmul.f32 0.03125, %v95_v17  ;;  %v117_v21 = vmul.f32 %v612_v15, %v612_v15 }
  0xf3   :  { %v115_v22 = vsub.f32 %v87_v1, %v110_v18  ;;  %v128_v23 = vsel %vm89_vm0, %v119_v19, 0.0 }
  0xf4   :  { %v113_v24 = vsub.f32 %v85_v5, %v108_v20  ;;  %v105_v25 = vpop.xlane.xlu0 %104  ;;  %129 = vadd.xlane.f32.xlu1 %v128_v23  ;;  %v122_v28 = vsel %vm89_vm0, %v117_v21, 0.0 }
  0xf5   :  { %v111_v26 = vmul.f32 0.03125, %v105_v25  ;;  %v120_v27 = vmul.f32 %v115_v22, %v115_v22 }
  0xf6   :  { %v118_v29 = vmul.f32 %v113_v24, %v113_v24 }
  0xf7   :  { %v116_v30 = vsub.f32 %v88_v8, %v111_v26  ;;  %v131_v31 = vsel %vm89_vm0, %v120_v27, 0.0 }
  0xf8   :  { %132 = vadd.xlane.f32.xlu0 %v131_v31  ;;  %123 = vadd.xlane.f32.xlu1 %v122_v28  ;;  %v125_v33 = vsel %vm89_vm0, %v118_v29, 0.0 }
  0xf9   :  { %v121_v32 = vmul.f32 %v116_v30, %v116_v30 }
  0xfb   :  { %v134_v34 = vsel %vm102_vm1, %v121_v32, 0.0 }
  0xfc   :  { %135 = vadd.xlane.f32.xlu1 %v134_v34  ;;  %126 = vadd.xlane.f32.xlu0 %v125_v33 }
 0x181   :  { %v130_v38 = vpop.xlane.xlu1 %129 }
 0x182   :  { %v139_v39 = vmul.f32 0.03125, %v130_v38 }
 0x184   :  { %v144_v40 = vadd.f32 1e-05, %v139_v39 }
 0x185   :  { %v133_v41 = vpop.xlane.xlu0 %132  ;;  %v124_v42 = vpop.xlane.xlu1 %123 }
 0x186   :  { %345 = vrsqrt.f32 %v144_v40  ;;  %v140_v43 = vmul.f32 0.03125, %v133_v41  ;;  %v137_v44 = vmul.f32 0.03125, %v124_v42 }
 0x188   :  { %v145_v45 = vadd.f32 1e-05, %v140_v43  ;;  %v142_v46 = vadd.f32 1e-05, %v137_v44 }
 0x189   :  { %v127_v47 = vpop.xlane.xlu0 %126  ;;  %v136_v48 = vpop.xlane.xlu1 %135 }
 0x18a   :  { %347 = vrsqrt.f32 %v145_v45  ;;  %v138_v49 = vmul.f32 0.03125, %v127_v47  ;;  %v141_v50 = vmul.f32 0.03125, %v136_v48 }
 0x18b   :  { %349 = vrsqrt.f32 %v142_v46 }
 0x18c   :  { %v143_v51 = vadd.f32 1e-05, %v138_v49  ;;  %v146_v52 = vadd.f32 1e-05, %v141_v50 }
 0x18e   :  { %351 = vrsqrt.f32 %v143_v51 }
 0x18f   :  { %353 = vrsqrt.f32 %v146_v52 }
 0x190   :  { %v346_v53 = vpop.eup %345 }
 0x191   :  { %v154_v54 = vmul.f32 %v346_v53, %v114_v14  ;;  %v300_v14 = vld [vmem:[#allocation10] ss:$0 sm:$0xff] }
 0x193   :  { %v166_v59 = vmul.f32 %v298_v55, %v154_v54 }
 0x194   :  { %v348_v56 = vpop.eup %347 }
 0x195   :  { %v350_v57 = vpop.eup %349  ;;  %v155_v58 = vmul.f32 %v348_v56, %v115_v22  ;;  %v178_v2 = vadd.f32 %v299_v61, %v166_v59 }
 0x196   :  { %v152_v60 = vmul.f32 %v350_v57, %v612_v15 }
 0x197   :  { %v167_v62 = vmul.f32 %v298_v55, %v155_v58 }
 0x198   :  { %v352_v63 = vpop.eup %351  ;;  %v164_v4 = vmul.f32 %v298_v55, %v152_v60 }
 0x199   :  { %v354_v0 = vpop.eup %353  ;;  %v153_v1 = vmul.f32 %v352_v63, %v113_v24  ;;  %v179_v3 = vadd.f32 %v299_v61, %v167_v62 }
 0x19a   :  { %v156_v5 = vmul.f32 %v354_v0, %v116_v30  ;;  %v176_v9 = vadd.f32 %v299_v61, %v164_v4 }
 0x19b   :  { %v182_v6 = vpack.c.bf16 %v179_v3, %v178_v2  ;;  %v165_v7 = vmul.f32 %v298_v55, %v153_v1 }
 0x19c   :  { %v168_v8 = vmul.f32 %v298_v55, %v156_v5 }
 0x19d   :  { %320 = vmatmul.mubr.msk.bf16.vlgmr.msra.gmra.mrb[0].mxu1 %vm89_vm0, %v182_v6  ;;  %v177_v10 = vadd.f32 %v299_v61, %v165_v7 }
 0x19e   :  { %323 = vmatprep.mubr.msk.bf16.mxu1 %vm505_vm2, %v504_v36  ;;  %v180_v12 = vadd.f32 %v299_v61, %v168_v8 }
 0x19f   :  { %v181_v11 = vpack.c.bf16 %v177_v10, %v176_v9 }
 0x1a0   :  { %v183_v13 = vpack.c.bf16 %v180_v12, %v180_v12 }
 0x1a1   :  { %316 = vmatmul.mubr.msk.bf16.vlgmr.msra.gmra.mrb[0].mxu0 %vm89_vm0, %v181_v11 }
 0x1a5   :  { %324 = vmatmul.mubr.msk.bf16.gmra.mrb[4].mxu1 %vm89_vm0, %v183_v13 }
 0x270   :  { %v258_v15 = vpop.f32.mrb[0].mxu1 }
 0x271   :  { %v259_v16 = vadd.f32 %v300_v14, %v258_v15  ;;  %v321_v17 = vpop.f32.mrb[1].mxu1 }
 0x272   :  { %v261_v18 = vpop.f32.mrb[2].mxu1 }
 0x273   :  { %275 = vst.msk [vmem:[#allocation11 + $0x10] sm:$0xff] %vm272_vm3, %v259_v16  ;;  %v262_v19 = vadd.f32 %v300_v14, %v261_v18  ;;  %v322_v20 = vpop.f32.mrb[3].mxu1 }
 0x274   :  { %v250_v21 = vpop.f32.mrb[0].mxu0 }
 0x275   :  { %276 = vst.msk [vmem:[#allocation11 + $0x18] sm:$0xff] %vm272_vm3, %v262_v19  ;;  %v251_v22 = vadd.f32 %v300_v14, %v250_v21  ;;  %v317_v23 = vpop.f32.mrb[1].mxu0 }
 0x276   :  { %v253_v24 = vpop.f32.mrb[2].mxu0 }
 0x277   :  { %273 = vst.msk [vmem:[#allocation11] sm:$0xff] %vm272_vm3, %v251_v22  ;;  %v254_v25 = vadd.f32 %v300_v14, %v253_v24  ;;  %v318_v26 = vpop.f32.mrb[3].mxu0 }
 0x278   :  { %v266_v27 = vpop.f32.mrb[4].mxu1 }
 0x279   :  { %274 = vst.msk [vmem:[#allocation11 + $0x8] sm:$0xff] %vm272_vm3, %v254_v25  ;;  %v267_v28 = vadd.f32 %v300_v14, %v266_v27  ;;  %v325_v29 = vpop.f32.mrb[5].mxu1 }
 0x27a   :  { %v269_v30 = vpop.f32.mrb[6].mxu1 }
 0x27b   :  { %278 = vst.msk [vmem:[#allocation11 + $0x20] sm:$0x3] %vm277_vm4, %v267_v28  ;;  %v326_v31 = vpop.f32.mrb[7].mxu1 }
 0x27c   :  { %476 = shalt.err (!%p473_p2)
}
 0x27d   :  { %s477_s10 = scalar_lea.hbm %s652_s5, 640 }
 0x27e   :  { %p478_p3 = scmp.ne.s32.totalorder %s652_s5, %s477_s10  ;;  %p481_p4 = scmp.lt.u32.totalorder %s477_s10, %s652_s5 }
 0x280   :  { %p483_p5 = pnand %p481_p4, %p478_p3 }
 0x282   :  { %486 = shalt.err (!%p483_p5)
}
 0x283   :  { %290 = dma.vmem_to_hbm [thread:$0]  %s285_s6, 640, %s652_s5, [#allocation4], %s500_s3, %s500_s3, %s501_s21  }
 0x284   :  { %493 = dma.done.wait [#allocation4], 640  }
 0x285   :  { %494 = vsyncadd [#allocation4], 4294966656 }
 0x286   :  { %294 = vsyncpa [#allocation3], 1 }
 0x287   :  { %295 = vsyncpa [#allocation6], 1 }
 0x288   :  { %296 = vsyncpa [#allocation9], 1 }
 0x289   :  { %297 = vsyncpa [#allocation4], 1 }

// kernel: mae_forward.33
= control target key start
LH: loop header
LB: loop body
LE: loop exit
PB: predicated region body
PF: predicated region fallthrough
CT: control target
= control target key end

     0   :  { %9 = vsyncpa [#allocation4], 0  ;;  %s538_s0 = inlined_call_operand.hbm [shape: f32[34,32], index: 0, kind: input, shape index: {}]   ;;  %s539_s1 = inlined_call_operand.hbm [shape: bf16[32,32], index: 1, kind: input, shape index: {}]   ;;  %s540_s2 = inlined_call_operand.hbm [shape: f32[1,32], index: 2, kind: input, shape index: {}]   ;;  %s541_s3 = inlined_call_operand.hbm [shape: f32[34,32], index: 3, kind: input, shape index: {}]   ;;  %s542_s4 = inlined_call_operand.hbm [shape: f32[34,32], index: 4, kind: output, shape index: {}]  }
   0x1   :  { %10 = vsyncpa [#allocation7], 0 }
   0x2   :  { %11 = vsyncpa [#allocation10], 0 }
   0x3   :  { %12 = vsyncpa [#allocation5], 0  ;;  %s405_s15 = smov [#allocation6]   ;;  %s287_s19 = scalar_lea.hbm %s539_s1, 256 }
   0x4   :  { %s30_s16 = sshll.u32 %s405_s15, 4  ;;  %p288_p0 = scmp.ne.s32.totalorder %s539_s1, %s287_s19  ;;  %s31_s16 = int_to_ptr.vmem [resolvable:$true] %s30_s16 }
   0x5   :  { %p291_p1 = scmp.lt.u32.totalorder %s287_s19, %s539_s1 }
   0x7   :  { %p293_p2 = pnand %p291_p1, %p288_p0 }
   0x9   :  { %296 = shalt.err (!%p293_p2)
}
   0xa   :  { %s297_s24 = scalar_lea.vmem %s31_s16, 256  ;;  %p302_p4 = scmp.lt.s32.totalorder %s31_s16, %s31_s16 }
   0xb   :  { %p298_p3 = scmp.ne.s32.totalorder %s31_s16, %s297_s24  ;;  %p303_p5 = scmp.lt.s32.totalorder %s297_s24, %s297_s24 }
   0xd   :  { %p304_p6 = por %p303_p5, %p302_p4 }
   0xf   :  { %p305_p7 = pnand %p304_p6, %p298_p3 }
  0x11   :  { %308 = shalt.err (!%p305_p7)
}
  0x12   :  { %s406_s25 = smov 64   ;;  %s407_s26 = smov 4  }
  0x13   :  { %36 = dma.hbm_to_vmem [thread:$0]  %s539_s1, 256, %s31_s16, [#allocation7], %s406_s25, %s406_s25, %s407_s26  }
  0x14   :  { %s408_s29 = smov [#allocation3]   ;;  %s309_s7 = scalar_lea.hbm %s538_s0, 640 }
  0x15   :  { %s18_s30 = sshll.u32 %s408_s29, 4  ;;  %p310_p8 = scmp.ne.s32.totalorder %s538_s0, %s309_s7  ;;  %s19_s30 = int_to_ptr.vmem [resolvable:$true] %s18_s30 }
  0x16   :  { %p313_p9 = scmp.lt.u32.totalorder %s309_s7, %s538_s0 }
  0x18   :  { %p315_p10 = pnand %p313_p9, %p310_p8 }
  0x1a   :  { %318 = shalt.err (!%p315_p10)
}
  0x1b   :  { %s319_s12 = scalar_lea.vmem %s19_s30, 640  ;;  %p324_p12 = scmp.lt.s32.totalorder %s19_s30, %s19_s30 }
  0x1c   :  { %p320_p11 = scmp.ne.s32.totalorder %s19_s30, %s319_s12  ;;  %p325_p13 = scmp.lt.s32.totalorder %s319_s12, %s319_s12 }
  0x1e   :  { %p326_p0 = por %p325_p13, %p324_p12 }
  0x20   :  { %p327_p1 = pnand %p326_p0, %p320_p11 }
  0x22   :  { %330 = shalt.err (!%p327_p1)
}
  0x23   :  { %s409_s1 = smov 128   ;;  %s410_s13 = smov 8  }
  0x24   :  { %24 = dma.hbm_to_vmem [thread:$0]  %s538_s0, 640, %s19_s30, [#allocation4], %s409_s1, %s409_s1, %s410_s13  }
  0x25   :  { %s411_s16 = smov [#allocation8]   ;;  %s412_s18 = smov [#allocation9]  }
  0x26   :  { %s43_s17 = sshll.u32 %s411_s16, 4  ;;  %s52_s19 = sshll.u32 %s412_s18, 4  ;;  %s44_s17 = int_to_ptr.vmem [resolvable:$true] %s43_s17  ;;  %s468_s19 = int_to_ptr.vmem [resolvable:$true] %s52_s19 }
  0x27   :  { %s331_s22 = scalar_lea.hbm %s540_s2, 16 }
  0x28   :  { %p332_p2 = scmp.ne.s32.totalorder %s540_s2, %s331_s22  ;;  %p335_p3 = scmp.lt.u32.totalorder %s331_s22, %s540_s2 }
  0x2a   :  { %p337_p4 = pnand %p335_p3, %p332_p2 }
  0x2c   :  { %340 = shalt.err (!%p337_p4)
}
  0x2d   :  { %s341_s0 = scalar_lea.vmem %s44_s17, 16  ;;  %s345_s27 = scalar_lea.vmem %s44_s17, 32 }
  0x2e   :  { %p342_p5 = scmp.ne.s32.totalorder %s44_s17, %s341_s0  ;;  %p346_p6 = scmp.lt.s32.totalorder %s44_s17, %s44_s17 }
  0x2f   :  { %p347_p7 = scmp.lt.s32.totalorder %s345_s27, %s341_s0 }
  0x31   :  { %p348_p8 = por %p347_p7, %p346_p6 }
  0x33   :  { %p349_p9 = pnand %p348_p8, %p342_p5 }
  0x35   :  { %352 = shalt.err (!%p349_p9)
}
  0x36   :  { %46 = dma.hbm_to_vmem [thread:$0]  %s540_s2, 16, %s44_s17, [#allocation7]  }
  0x37   :  { %s353_s6 = scalar_lea.hbm %s541_s3, 640 }
  0x38   :  { %p354_p10 = scmp.ne.s32.totalorder %s541_s3, %s353_s6  ;;  %p357_p11 = scmp.lt.u32.totalorder %s353_s6, %s541_s3 }
  0x3a   :  { %p359_p12 = pnand %p357_p11, %p354_p10 }
  0x3c   :  { %362 = shalt.err (!%p359_p12)
}
  0x3d   :  { %s363_s11 = scalar_lea.vmem %s468_s19, 640  ;;  %p368_p0 = scmp.lt.s32.totalorder %s468_s19, %s468_s19 }
  0x3e   :  { %p364_p13 = scmp.ne.s32.totalorder %s468_s19, %s363_s11  ;;  %p369_p1 = scmp.lt.s32.totalorder %s363_s11, %s363_s11 }
  0x40   :  { %p370_p2 = por %p369_p1, %p368_p0 }
  0x42   :  { %p371_p3 = pnand %p370_p2, %p364_p13 }
  0x44   :  { %374 = shalt.err (!%p371_p3)
}
  0x45   :  { %58 = dma.hbm_to_vmem [thread:$0]  %s541_s3, 640, %s468_s19, [#allocation10], %s409_s1, %s409_s1, %s410_s13  }
  0x46   :  { %397 = dma.done.wait [#allocation4], 640  }
  0x47   :  { %398 = vsyncadd [#allocation4], 4294966656 }
  0x48   :  { %399 = dma.done.wait [#allocation7], 272  }
  0x49   :  { %400 = vsyncadd [#allocation7], 4294967024 }
  0x4a   :  { %401 = dma.done.wait [#allocation10], 640  }
  0x4b   :  { %402 = vsyncadd [#allocation10], 4294966656  ;;  %vm76_vm0 = vcmask 261120   ;;  %v413_v0 = vmov 0.0   ;;  %vm414_vm1 = vmmov 0   ;;  %v285_v1 = vld [vmem:[#allocation6] sm:$0xff]  }
  0x4c   :  { %270 = vmatprep.subr.bf16.mxu1 %v413_v0  ;;  %254 = vmatprep.subr.bf16.mxu0 %v413_v0  ;;  %77 = vst.msk [vmem:[#allocation2] sm:$0xff] %vm76_vm0, %v413_v0  ;;  %78 = vst.msk [vmem:[#allocation2 + $0x8] sm:$0xff] %vm76_vm0, %v413_v0  ;;  %v286_v2 = vld [vmem:[#allocation6 + $0x8] sm:$0xff]   ;;  %v91_v4 = vld [vmem:[#allocation3 + $0x18] sm:$0xff]  ;;  %vm81_vm2 = vcmask 254976   ;;  %s415_s3 = smov [#allocation11]  }
  0x4d   :  { %79 = vst.msk [vmem:[#allocation2 + $0x10] sm:$0xff] %vm76_vm0, %v413_v0  ;;  %80 = vst.msk [vmem:[#allocation2 + $0x18] sm:$0xff] %vm76_vm0, %v413_v0  ;;  %262 = vmatprep.mubr.msk.bf16.mxu1 %vm414_vm1, %v413_v0  ;;  %258 = vmatprep.mubr.msk.bf16.mxu0 %vm414_vm1, %v413_v0  ;;  %v90_v3 = vld [vmem:[#allocation3 + $0x10] sm:$0xff]  ;;  %v88_v5 = vld [vmem:[#allocation3] sm:$0xff]  ;;  %s229_s14 = sshll.u32 %s415_s3, 4  ;;  %s230_s14 = int_to_ptr.vmem [resolvable:$true] %s229_s14 }
  0x4e   :  { %272 = vmatpush3.bf16.msra.mxu1 %v285_v1  ;;  %255 = vmatpush3.bf16.msra.mxu0 %v285_v1  ;;  %v89_v6 = vld [vmem:[#allocation3 + $0x8] sm:$0xff]  ;;  %v94_v7 = vpack.c.bf16 %v91_v4, %v90_v3  ;;  %v92_v9 = vld [vmem:[#allocation3 + $0x20] sm:$0x3]  ;;  %82 = vst.msk [vmem:[#allocation2 + $0x20] sm:$0x3] %vm81_vm2, %v413_v0  ;;  %v212_v40 = vld [vmem:[#allocation9 + $0x18] sm:$0xff]  ;;  %p380_p5 = scmp.lt.s32.totalorder %s230_s14, %s230_s14 }
  0x4f   :  { %271 = vmatprep.subr.bf16.mxu1 %v413_v0  ;;  %256 = vmatprep.subr.bf16.mxu0 %v413_v0  ;;  %v93_v8 = vpack.c.bf16 %v89_v6, %v88_v5  ;;  %v95_v10 = vpack.c.bf16 %v92_v9, %v92_v9  ;;  %v248_v29 = vld [vmem:[#allocation8] ss:$0 sm:$0xff]  ;;  %v211_v32 = vld [vmem:[#allocation9 + $0x10] sm:$0xff]  ;;  %v209_v36 = vld [vmem:[#allocation9] sm:$0xff]  ;;  %s375_s15 = scalar_lea.vmem %s230_s14, 640 }
  0x50   :  { %v210_v43 = vld [vmem:[#allocation9 + $0x8] sm:$0xff]  ;;  %v213_v51 = vld [vmem:[#allocation9 + $0x20] sm:$0x3]  ;;  %p376_p4 = scmp.ne.s32.totalorder %s230_s14, %s375_s15  ;;  %p381_p6 = scmp.lt.s32.totalorder %s375_s15, %s375_s15 }
  0x52   :  { %273 = vmatpush3.bf16.msra.mxu1 %v286_v2  ;;  %257 = vmatpush3.bf16.msra.mxu0 %v286_v2  ;;  %p382_p7 = por %p381_p6, %p380_p5 }
  0x53   :  { %v83_v12 = vld [vmem:[#allocation2] sm:$0xff]  ;;  %v84_v16 = vld [vmem:[#allocation2 + $0x8] sm:$0xff] }
  0x54   :  { %v85_v11 = vld [vmem:[#allocation2 + $0x10] sm:$0xff]  ;;  %v86_v14 = vld [vmem:[#allocation2 + $0x18] sm:$0xff]  ;;  %p383_p8 = pnand %p382_p7, %p376_p4 }
  0x55   :  { %263 = vmatmul.mubr.msk.bf16.vlgmr.msra.gmra.mrb[0].mxu1 %vm76_vm0, %v94_v7  ;;  %259 = vmatmul.mubr.msk.bf16.vlgmr.msra.gmra.mrb[0].mxu0 %vm76_vm0, %v93_v8  ;;  %v87_v27 = vld [vmem:[#allocation2 + $0x20] sm:$0x3] }
  0x56   :  { %266 = vmatprep.mubr.msk.bf16.mxu1 %vm414_vm1, %v413_v0 }
  0x5d   :  { %267 = vmatmul.mubr.msk.bf16.gmra.mrb[4].mxu1 %vm76_vm0, %v95_v10 }
 0x128   :  { %v164_v13 = vpop.f32.mrb[0].mxu1  ;;  %v156_v15 = vpop.f32.mrb[0].mxu0 }
 0x129   :  { %v180_v17 = vadd.f32 %v164_v13, %v85_v11  ;;  %v264_v18 = vpop.f32.mrb[1].mxu1  ;;  %v178_v19 = vadd.f32 %v156_v15, %v83_v12  ;;  %v260_v20 = vpop.f32.mrb[1].mxu0 }
 0x12a   :  { %v167_v21 = vpop.f32.mrb[2].mxu1  ;;  %v159_v22 = vpop.f32.mrb[2].mxu0 }
 0x12b   :  { %185 = vst.msk [vmem:[#allocation2 + $0x10] sm:$0xff] %vm76_vm0, %v180_v17  ;;  %v181_v23 = vadd.f32 %v167_v21, %v86_v14  ;;  %183 = vst.msk [vmem:[#allocation2] sm:$0xff] %vm76_vm0, %v178_v19  ;;  %v265_v24 = vpop.f32.mrb[3].mxu1  ;;  %v179_v25 = vadd.f32 %v159_v22, %v84_v16  ;;  %v261_v26 = vpop.f32.mrb[3].mxu0 }
 0x12d   :  { %186 = vst.msk [vmem:[#allocation2 + $0x18] sm:$0xff] %vm76_vm0, %v181_v23  ;;  %184 = vst.msk [vmem:[#allocation2 + $0x8] sm:$0xff] %vm76_vm0, %v179_v25 }
 0x130   :  { %v172_v28 = vpop.f32.mrb[4].mxu1 }
 0x131   :  { %v182_v30 = vadd.f32 %v172_v28, %v87_v27  ;;  %v268_v31 = vpop.f32.mrb[5].mxu1 }
 0x132   :  { %v175_v33 = vpop.f32.mrb[6].mxu1  ;;  %v192_v34 = vld [vmem:[#allocation2] sm:$0xff]  ;;  %v194_v35 = vld [vmem:[#allocation2 + $0x10] sm:$0xff] }
 0x133   :  { %188 = vst.msk [vmem:[#allocation2 + $0x20] sm:$0x3] %vm81_vm2, %v182_v30  ;;  %v269_v37 = vpop.f32.mrb[7].mxu1  ;;  %v204_v38 = vadd.f32 %v248_v29, %v192_v34  ;;  %v206_v39 = vadd.f32 %v248_v29, %v194_v35 }
 0x134   :  { %v193_v41 = vld [vmem:[#allocation2 + $0x8] sm:$0xff]  ;;  %v195_v42 = vld [vmem:[#allocation2 + $0x18] sm:$0xff] }
 0x135   :  { %v205_v44 = vadd.f32 %v248_v29, %v193_v41  ;;  %v207_v45 = vadd.f32 %v248_v29, %v195_v42  ;;  %v214_v46 = vadd.f32 %v209_v36, %v204_v38  ;;  %v216_v47 = vadd.f32 %v211_v32, %v206_v39 }
 0x137   :  { %v215_v48 = vadd.f32 %v210_v43, %v205_v44  ;;  %v217_v49 = vadd.f32 %v212_v40, %v207_v45  ;;  %219 = vst.msk [vmem:[#allocation11] sm:$0xff] %vm76_vm0, %v214_v46  ;;  %221 = vst.msk [vmem:[#allocation11 + $0x10] sm:$0xff] %vm76_vm0, %v216_v47 }
 0x139   :  { %220 = vst.msk [vmem:[#allocation11 + $0x8] sm:$0xff] %vm76_vm0, %v215_v48  ;;  %222 = vst.msk [vmem:[#allocation11 + $0x18] sm:$0xff] %vm76_vm0, %v217_v49 }
 0x13a   :  { %v196_v50 = vld [vmem:[#allocation2 + $0x20] sm:$0x3] }
 0x13b   :  { %v208_v52 = vadd.f32 %v248_v29, %v196_v50 }
 0x13d   :  { %v218_v53 = vadd.f32 %v213_v51, %v208_v52 }
 0x13f   :  { %223 = vst.msk [vmem:[#allocation11 + $0x20] sm:$0x3] %vm81_vm2, %v218_v53 }
 0x140   :  { %386 = shalt.err (!%p383_p8)
}
 0x141   :  { %s387_s18 = scalar_lea.hbm %s542_s4, 640 }
 0x142   :  { %p388_p9 = scmp.ne.s32.totalorder %s542_s4, %s387_s18  ;;  %p391_p10 = scmp.lt.u32.totalorder %s387_s18, %s542_s4 }
 0x144   :  { %p393_p11 = pnand %p391_p10, %p388_p9 }
 0x146   :  { %396 = shalt.err (!%p393_p11)
}
 0x147   :  { %235 = dma.vmem_to_hbm [thread:$0]  %s230_s14, 640, %s542_s4, [#allocation5], %s409_s1, %s409_s1, %s410_s13  }
 0x148   :  { %403 = dma.done.wait [#allocation5], 640  }
 0x149   :  { %404 = vsyncadd [#allocation5], 4294966656 }
 0x14a   :  { %239 = vsyncpa [#allocation4], 1 }
 0x14b   :  { %240 = vsyncpa [#allocation7], 1 }
 0x14c   :  { %241 = vsyncpa [#allocation10], 1 }
 0x14d   :  { %242 = vsyncpa [#allocation5], 1 }

// kernel: mae_forward.32
= control target key start
LH: loop header
LB: loop body
LE: loop exit
PB: predicated region body
PF: predicated region fallthrough
CT: control target
= control target key end

     0   :  { %s1984_s0 = inlined_call_operand.hbm [shape: f32[2,4,17,8], index: 0, kind: input, shape index: {}]   ;;  %s1985_s1 = inlined_call_operand.hbm [shape: f32[2,4,17,8], index: 1, kind: input, shape index: {}]   ;;  %s1986_s2 = inlined_call_operand.hbm [shape: f32[2,4,17,8], index: 2, kind: input, shape index: {}]   ;;  %s1987_s3 = inlined_call_operand.hbm [shape: f32[2,4,17,8], index: 3, kind: output, shape index: {}]  }
   0x1   :  { %1994 = sst [smem:[#allocation12_spill]] %s1984_s0 }
   0x2   :  { %8 = vsyncpa [#allocation3], 0 }
   0x3   :  { %10 = vsyncpa [#allocation3 + $0x1], 0 }
   0x4   :  { %11 = vsyncpa [#allocation6], 0 }
   0x5   :  { %13 = vsyncpa [#allocation6 + $0x1], 0 }
   0x6   :  { %14 = vsyncpa [#allocation4], 0 }
   0x7   :  { %16 = vsyncpa [#allocation4 + $0x1], 0  ;;  %s1534_s12 = smov 0   ;;  %s1536_s13 = smov 0  }
   0x8   :  { %s1538_s14 = smov 0   ;;  %s1540_s15 = smov 0  }
   0x9 LB: > { %s1555_s16 = sadd.s32 4294967295, %s1503_s15   ;;  %s1096_s17 = sadd.s32 4294967294, %s1503_s15   ;;  %s1503_s15 = sphi %s1540_s15, %s2013_s15   ;;  %s1499_s14 = sphi %s1538_s14, %s2012_s14   ;;  %s1495_s13 = sphi %s1536_s13, %s2011_s13   ;;  %s1491_s12 = sphi %s1534_s12, %s2010_s12  }
   0xa   : > { %s1559_s18 = sadd.s32 1, %s1503_s15   ;;  %s29_s19 = sadd.s32 1, %s1499_s14 }
   0xb   : > { %s26_s20 = ssub.s32 %s1503_s15, %s1559_s18  ;;  %p36_p0 = scmp.ne.s32.totalorder %s1499_s14, %s1495_s13 }
   0xc   : > { %p27_p1 = scmp.eq.s32.totalorder %s26_s20, 0  ;;  %p37_p2 = scmp.eq.s32.totalorder %s1503_s15, 0 }
   0xd   : > { %p42_p3 = scmp.ne.s32.totalorder %s1495_s13, %s1491_s12  ;;  %p43_p4 = scmp.eq.s32.totalorder %s1555_s16, 0 }
   0xe   : > { %s1571_s21 = scalar_select %p27_p1, %s1499_s14, %s29_s19  }
   0xf   : > { %p38_p5 = por %p37_p2, %p36_p0  ;;  %p1573_p6 = por %p43_p4, %p42_p3 }
  0x10   : > { %p118_p7 = scmp.eq.s32.totalorder %s1555_s16, 1  ;;  %p124_p8 = scmp.eq.s32.totalorder %s1096_s17, 1 }
  0x11   : > { %s1995_s22 = scalar_select %p1573_p6, 1, 0 }
  0x12   : > { %p1256_p10 = scmp.lt.s32.totalorder %s1503_s15, 2  ;;  %p1580_p11 = por %p118_p7, %p36_p0 }
  0x13   : > { %p1584_p12 = por %p124_p8, %p42_p3  ;;  %s144_s25 = sand.u32 1, %s1499_s14  }
  0x14   : > { %s1996_s23 = scalar_select %p1580_p11, 1, 0 }
  0x15   : > { %s1997_s24 = scalar_select %p1584_p12, 1, 0 }
  0x16   : > { %s1590_s26 = smul.u32 1536, %s1503_s15  ;;  %p1596_p13 = pnand %p1256_p10, %p38_p5 }
  0x17   : > { %s1594_s27 = smul.u32 96, %s144_s25  ;;  %s165_s29 = sand.u32 1, %s1503_s15  }
  0x18   : > { %s1605_s5 = scalar_lea.hbm %s1985_s1, %s1590_s26  ;;  %s1611_s8 = scalar_lea.sflag [#allocation6], %s165_s29 }
  0x19   : > { %s169_s6 = scalar_lea.vmem [#allocation5], %s1594_s27  ;;  %s1343_s9 = scalar_lea.hbm %s1605_s5, 1536 }
  0x1a   : > { %s176_s7 = sshll.u32 %s169_s6, 4  ;;  %p1344_p1 = scmp.ne.s32.totalorder %s1605_s5, %s1343_s9  ;;  %s1608_s7 = int_to_ptr.vmem [resolvable:$true] %s176_s7 }
  0x1b   : > { %p1617_p2 = pneg %p1596_p13  ;;  %s1348_s19 = scalar_lea.hbm %s1985_s1, 3072 }
  0x1c   : > { %p1349_p5 = scmp.lt.u32.totalorder %s1605_s5, %s1985_s1  ;;  %p1350_p7 = scmp.lt.u32.totalorder %s1348_s19, %s1343_s9 }
  0x1d   : > { %p1346_p3 = pnand %p1617_p2, %p1344_p1  ;;  %p1352_p10 = scmp.lt.u32.totalorder %s1343_s9, %s1605_s5 }
  0x1e   : > { %p1351_p8 = por %p1350_p7, %p1349_p5 }
  0x1f   : > { %p1347_p4 = pneg %p1346_p3 }
  0x20   : > { %p1353_p9 = por %p1352_p10, %p1351_p8 }
  0x22   : > { %p1354_p0 = pnand %p1353_p9, %p1347_p4 }
  0x24   : > { %1357 = shalt.err (!%p1354_p0)
}
  0x25   : > { %s1358_s29 = scalar_lea.vmem %s1608_s7, 1536  ;;  %s1505_s4 = smov [#allocation5]  }
  0x26   : > { %p1359_p1 = scmp.ne.s32.totalorder %s1608_s7, %s1358_s29  ;;  %s1363_s6 = sshll.u32 %s1505_s4, 4  ;;  %s1364_s6 = int_to_ptr.vmem [resolvable:$false] %s1363_s6 }
  0x27   : > { %s1365_s11 = scalar_lea.vmem %s1364_s6, 3072  ;;  %p1366_p11 = scmp.lt.s32.totalorder %s1608_s7, %s1364_s6 }
  0x28   : > { %p1361_p3 = pnand %p1359_p1, %p1617_p2  ;;  %p1367_p6 = scmp.lt.s32.totalorder %s1365_s11, %s1358_s29 }
  0x2a   : > { %p1362_p12 = pneg %p1361_p3  ;;  %p1368_p5 = por %p1367_p6, %p1366_p11 }
  0x2c   : > { %p1369_p7 = pnand %p1368_p5, %p1362_p12 }
  0x2e   : > { %1372 = shalt.err (!%p1369_p7)
}
  0x2f   : > { %s1990_s9 = smov 128   ;;  %s1992_s17 = smov 8  }
  0x30   : > { %1248 = dma.hbm_to_vmem [thread:$0]  (!%p1596_p13), %s1605_s5, 1536, %s1608_s7, %s1611_s8, %s1990_s9, %s1990_s9, %s1992_s17  }
  0x31   : > { %p205_p6 = scmp.lt.s32.totalorder %s1503_s15, 3  ;;  %s2000_s0 = sld [smem:[#allocation12_spill]] }
  0x32   : > { %p2001_p9 = scmp.ge.s32.totalorder %s1503_s15, 1  ;;  %s148_s4 = scalar_lea.vmem [#allocation2], %s1594_s27 }
  0x33   : > { %s155_s6 = sshll.u32 %s148_s4, 4  ;;  %s1662_s5 = scalar_lea.sflag [#allocation3], %s144_s25  ;;  %s1658_s6 = int_to_ptr.vmem [resolvable:$true] %s155_s6 }
  0x34   : > { %p1653_p11 = pnand %p2001_p9, %p205_p6 }
  0x36   : > { %s2002_s29 = scalar_select %p1653_p11, 1, 0 }
  0x37   : > { %s1649_s30 = scalar_lea.hbm %s2000_s0, %s1590_s26  ;;  %s1378_s20 = scalar_lea.hbm %s2000_s0, 3072 }
  0x38   : > { %s1373_s7 = scalar_lea.hbm %s1649_s30, 1536  ;;  %p1379_p8 = scmp.lt.u32.totalorder %s1649_s30, %s2000_s0 }
  0x39   : > { %p1374_p12 = scmp.ne.s32.totalorder %s1649_s30, %s1373_s7  ;;  %p1380_p10 = scmp.lt.u32.totalorder %s1378_s20, %s1373_s7 }
  0x3a   : > { %p1382_p3 = scmp.lt.u32.totalorder %s1373_s7, %s1649_s30 }
  0x3b   : > { %p1376_p0 = pnand %p1374_p12, %p1617_p2  ;;  %p1381_p1 = por %p1380_p10, %p1379_p8 }
  0x3d   : > { %p1377_p4 = pneg %p1376_p0  ;;  %p1383_p5 = por %p1382_p3, %p1381_p1 }
  0x3f   : > { %p1384_p7 = pnand %p1383_p5, %p1377_p4 }
  0x41   : > { %1387 = shalt.err (!%p1384_p7)
}
  0x42   : > { %s1388_s25 = scalar_lea.vmem %s1658_s6, 1536  ;;  %s1508_s4 = smov [#allocation2]  }
  0x43   : > { %p1389_p6 = scmp.ne.s32.totalorder %s1658_s6, %s1388_s25  ;;  %s1393_s11 = sshll.u32 %s1508_s4, 4  ;;  %s1394_s11 = int_to_ptr.vmem [resolvable:$false] %s1393_s11 }
  0x44   : > { %s1395_s9 = scalar_lea.vmem %s1394_s11, 3072  ;;  %p1396_p0 = scmp.lt.s32.totalorder %s1658_s6, %s1394_s11 }
  0x45   : > { %p1391_p9 = pnand %p1389_p6, %p1617_p2  ;;  %p1397_p11 = scmp.lt.s32.totalorder %s1395_s9, %s1388_s25 }
  0x47   : > { %p1392_p12 = pneg %p1391_p9  ;;  %p1398_p8 = por %p1397_p11, %p1396_p0 }
  0x49   : > { %p1399_p10 = pnand %p1398_p8, %p1392_p12 }
  0x4b   : > { %1402 = shalt.err (!%p1399_p10)
}
  0x4c   : > { %s2003_s17 = smov 8   ;;  %s2004_s7 = smov 128  }
  0x4d   : > { %1245 = dma.hbm_to_vmem [thread:$0]  (!%p1596_p13), %s1649_s30, 1536, %s1658_s6, %s1662_s5, %s2004_s7, %s2004_s7, %s2003_s17  }
  0x4e   : > { %s1693_s4 = scalar_lea.hbm %s1986_s2, %s1590_s26  ;;  %s190_s25 = scalar_lea.vmem [#allocation7], %s1594_s27 }
  0x4f   : > { %s197_s11 = sshll.u32 %s190_s25, 4  ;;  %s1403_s9 = scalar_lea.hbm %s1693_s4, 1536  ;;  %s1696_s11 = int_to_ptr.vmem [resolvable:$true] %s197_s11 }
  0x50   : > { %p1404_p11 = scmp.ne.s32.totalorder %s1693_s4, %s1403_s9  ;;  %s1408_s6 = scalar_lea.hbm %s1986_s2, 3072 }
  0x51   : > { %p1409_p3 = scmp.lt.u32.totalorder %s1693_s4, %s1986_s2  ;;  %p1410_p5 = scmp.lt.u32.totalorder %s1408_s6, %s1403_s9 }
  0x52   : > { %p1406_p4 = pnand %p1404_p11, %p1617_p2  ;;  %p1412_p6 = scmp.lt.u32.totalorder %s1403_s9, %s1693_s4 }
  0x53   : > { %p1411_p7 = por %p1410_p5, %p1409_p3 }
  0x54   : > { %p1407_p1 = pneg %p1406_p4 }
  0x55   : > { %p1413_p9 = por %p1412_p6, %p1411_p7 }
  0x57   : > { %p1414_p12 = pnand %p1413_p9, %p1407_p1 }
  0x59   : > { %1417 = shalt.err (!%p1414_p12)
}
  0x5a   : > { %s1418_s27 = scalar_lea.vmem %s1696_s11, 1536  ;;  %s1509_s0 = smov [#allocation7]  }
  0x5b   : > { %p1419_p0 = scmp.ne.s32.totalorder %s1696_s11, %s1418_s27  ;;  %s1423_s19 = sshll.u32 %s1509_s0, 4  ;;  %s1424_s19 = int_to_ptr.vmem [resolvable:$false] %s1423_s19 }
  0x5c   : > { %s1425_s20 = scalar_lea.vmem %s1424_s19, 3072  ;;  %p1426_p11 = scmp.lt.s32.totalorder %s1696_s11, %s1424_s19 }
  0x5d   : > { %p1421_p8 = pnand %p1419_p0, %p1617_p2  ;;  %p1427_p4 = scmp.lt.s32.totalorder %s1425_s20, %s1418_s27 }
  0x5f   : > { %p1422_p10 = pneg %p1421_p8  ;;  %p1428_p3 = por %p1427_p4, %p1426_p11 }
  0x61   : > { %p1429_p5 = pnand %p1428_p3, %p1422_p10 }
  0x63   : > { %1432 = shalt.err (!%p1429_p5)
}
  0x64   : > { %1251 = dma.hbm_to_vmem [thread:$0]  (!%p1596_p13), %s1693_s4, 1536, %s1696_s11, %s1611_s8, %s2004_s7, %s2004_s7, %s2003_s17  }
  0x65   : > { %p2005_p2 = scmp.ne.s32.totalorder %s2002_s29, 0 }
  0x66   : > { %s1726_s10 = sand.u32 (!%p2005_p2), 1, %s1495_s13   ;;  %p2006_p1 = scmp.ne.s32.totalorder (!%p2005_p2), %s1995_s22, 0 }
  0x67   : > { %209 = sbr.rel (%p2005_p2) target bundleno = 920 (0x398), region = 32  ;;  %s212_s28 = scalar_lea.sflag (!%p2005_p2), [#allocation3], %s1726_s10 }
  0x68   : > { %s1729_s25 = smul.u32 (!%p2005_p2), 96, %s1726_s10 }
  0x6a   : > { %s1733_s9 = scalar_lea.vmem (!%p2005_p2), [#allocation2], %s1729_s25 }
  0x6e   : > { %1478 = dma.done.wait (%p2006_p1), %s212_s28, 1536  }
  0x6f   : > { %1480 = vsyncadd (%p2006_p1), %s212_s28, 4294965760  ;;  %s220_s8 = sand.u32 1, %s1555_s16   ;;  %s1741_s17 = scalar_lea.vmem [#allocation5], %s1729_s25 }
  0x70   : > { %s221_s29 = scalar_lea.sflag [#allocation6], %s220_s8 }
  0x71   : > { %1482 = dma.done.wait (%p2006_p1), %s221_s29, 3072  }
  0x72   : > { %1484 = vsyncadd (%p2006_p1), %s221_s29, 4294964224  ;;  %v287_v0 = vld [vmem:[%s1741_s17] sm:$0xff]  ;;  %v288_v1 = vld [vmem:[%s1741_s17 + $0x8] sm:$0xff]  ;;  %vm327_vm0 = vcmask 64512   ;;  %vm587_vm1 = vcmask 131072   ;;  %vm580_vm2 = vcmask 138240  }
  0x73   : > { %v290_v2 = vld [vmem:[%s1741_s17 + $0x18] sm:$0xff]  ;;  %v299_v3 = vpack.c.bf16 %v288_v1, %v287_v0  ;;  %v291_v4 = vld [vmem:[%s1741_s17 + $0x20] sm:$0xff]  ;;  %v289_v5 = vld [vmem:[%s1741_s17 + $0x10] sm:$0x1]  ;;  %s1872_s22 = scalar_lea.vmem [#allocation7], %s1729_s25  ;;  %vm728_vm3 = vcmask 1040384  }
  0x74   : > { %v292_v6 = vld [vmem:[%s1741_s17 + $0x28] sm:$0x1]  ;;  %v301_v7 = vpack.c.bf16 %v291_v4, %v290_v2  ;;  %v300_v8 = vpack.c.bf16 %v289_v5, %v289_v5  ;;  %v267_v10 = vld [vmem:[%s1733_s9] sm:$0xff]  ;;  %v270_v12 = vld [vmem:[%s1733_s9 + $0x18] sm:$0xff]  ;;  %vm955_vm4 = vcmask 57344   ;;  %s1907_s7 = scalar_lea.vmem [#allocation8], %s1729_s25 }
  0x75   : > { %v302_v9 = vpack.c.bf16 %v292_v6, %v292_v6  ;;  %v268_v11 = vld [vmem:[%s1733_s9 + $0x8] sm:$0xff]  ;;  %1218 = vmatprep.subr.msk.bf16.mxu0 %vm327_vm0, %v299_v3  ;;  %v335_v13 = vsel %vm327_vm0, %v299_v3, 0  ;;  %v271_v15 = vld [vmem:[%s1733_s9 + $0x20] sm:$0xff]  ;;  %v293_v18 = vld [vmem:[%s1741_s17 + $0x30] sm:$0xff]  ;;  %s1233_s4 = smul.u32 1536, %s1555_s16  ;;  %s980_s11 = sshll.u32 %s1907_s7, 4  ;;  %s1934_s11 = int_to_ptr.vmem [resolvable:$true] %s980_s11 }
  0x76   : > { %v279_v14 = vpack.c.bf16 %v268_v11, %v267_v10  ;;  %1220 = vmatprep.subr.msk.bf16.mxu1 %vm327_vm0, %v301_v7  ;;  %1155 = vmatpush3.bf16.xpose.msra.mxu0 %v335_v13  ;;  %v395_v16 = vsel %vm327_vm0, %v301_v7, 0  ;;  %v281_v17 = vpack.c.bf16 %v271_v15, %v270_v12  ;;  %v294_v19 = vld [vmem:[%s1741_s17 + $0x38] sm:$0xff]  ;;  %v296_v20 = vld [vmem:[%s1741_s17 + $0x48] sm:$0xff]  ;;  %v297_v21 = vld [vmem:[%s1741_s17 + $0x50] sm:$0xff]  ;;  %v338_v22 = vsel %vm327_vm0, %v300_v8, 0  ;;  %s967_s5 = scalar_lea.sflag [#allocation4], %s1726_s10 }
  0x77   : > { %1163 = vmatpush3.bf16.xpose.msra.mxu1 %v395_v16  ;;  %1219 = vmatprep.subr.msk.bf16.mxu0 %vm327_vm0, %v300_v8  ;;  %v303_v23 = vpack.c.bf16 %v294_v19, %v293_v18  ;;  %v398_v24 = vsel %vm327_vm0, %v302_v9, 0  ;;  %v305_v25 = vpack.c.bf16 %v297_v21, %v296_v20  ;;  %v269_v26 = vld [vmem:[%s1733_s9 + $0x10] sm:$0x1]  ;;  %v272_v27 = vld [vmem:[%s1733_s9 + $0x28] sm:$0x1]  ;;  %v274_v32 = vld [vmem:[%s1733_s9 + $0x38] sm:$0xff]  ;;  %s1932_s16 = scalar_lea.hbm %s1987_s3, %s1233_s4 }
  0x78   : > { %1221 = vmatprep.subr.msk.bf16.mxu1 %vm327_vm0, %v302_v9  ;;  %1158 = vmatprep.mubr.msk.bf16.mxu0 %vm327_vm0, %v279_v14  ;;  %v295_v28 = vld [vmem:[%s1741_s17 + $0x40] sm:$0x1]  ;;  %v280_v29 = vpack.c.bf16 %v269_v26, %v269_v26  ;;  %v298_v30 = vld [vmem:[%s1741_s17 + $0x58] sm:$0x1]  ;;  %v273_v31 = vld [vmem:[%s1733_s9 + $0x30] sm:$0xff]  ;;  %v282_v33 = vpack.c.bf16 %v272_v27, %v272_v27  ;;  %s1433_s26 = scalar_lea.vmem %s1934_s11, 1536 }
  0x79   : > { %1166 = vmatprep.mubr.msk.bf16.mxu1 %vm327_vm0, %v281_v17  ;;  %v276_v34 = vld [vmem:[%s1733_s9 + $0x48] sm:$0xff]  ;;  %v277_v35 = vld [vmem:[%s1733_s9 + $0x50] sm:$0xff]  ;;  %v455_v36 = vsel %vm327_vm0, %v303_v23, 0  ;;  %v304_v37 = vpack.c.bf16 %v295_v28, %v295_v28  ;;  %v515_v38 = vsel %vm327_vm0, %v305_v25, 0  ;;  %v306_v39 = vpack.c.bf16 %v298_v30, %v298_v30  ;;  %v275_v44 = vld [vmem:[%s1733_s9 + $0x40] sm:$0x1]  ;;  %p1434_p13 = scmp.ne.s32.totalorder %s1934_s11, %s1433_s26 }
  0x7a   : > { %v283_v40 = vpack.c.bf16 %v274_v32, %v273_v31  ;;  %v285_v41 = vpack.c.bf16 %v277_v35, %v276_v34  ;;  %v278_v45 = vld [vmem:[%s1733_s9 + $0x58] sm:$0x1]  ;;  %v284_v46 = vpack.c.bf16 %v275_v44, %v275_v44  ;;  %p2007_p7 = scmp.ne.s32.totalorder %s1996_s23, 0  ;;  %s1511_s27 = smov [#allocation8]  }
  0x7b   : > { %v458_v42 = vsel %vm327_vm0, %v304_v37, 0  ;;  %v518_v43 = vsel %vm327_vm0, %v306_v39, 0  ;;  %v286_v47 = vpack.c.bf16 %v278_v45, %v278_v45  ;;  %s1437_s0 = sshll.u32 %s1511_s27, 4  ;;  %s1438_s0 = int_to_ptr.vmem [resolvable:$false] %s1437_s0 }
  0x7c   : > { %p1435_p6 = pnand %p1434_p13, %p2007_p7  ;;  %s1439_s19 = scalar_lea.vmem %s1438_s0, 3072 }
  0x7d   : > { %p1440_p12 = scmp.lt.s32.totalorder %s1934_s11, %s1438_s0  ;;  %p1441_p0 = scmp.lt.s32.totalorder %s1439_s19, %s1433_s26 }
  0x7e   : > { %1157 = vmatpush3.bf16.xpose.msra.mxu0 %v338_v22  ;;  %p1436_p9 = pneg %p1435_p6 }
  0x7f   : > { %1165 = vmatpush3.bf16.xpose.msra.mxu1 %v398_v24  ;;  %1222 = vmatprep.subr.msk.bf16.mxu0 %vm327_vm0, %v303_v23  ;;  %p1442_p8 = por %p1441_p0, %p1440_p12 }
  0x80   : > { %1224 = vmatprep.subr.msk.bf16.mxu1 %vm327_vm0, %v305_v25 }
  0x81   : > { %p1443_p10 = pnand %p1442_p8, %p1436_p9 }
  0x85   : > { %1159 = vmatmul.mubr.msk.bf16.vlgmr.msra.gmra.mrb[0].mxu0 %vm327_vm0, %v280_v29 }
  0x86   : > { %1167 = vmatmul.mubr.msk.bf16.vlgmr.msra.gmra.mrb[0].mxu1 %vm327_vm0, %v282_v33  ;;  %1171 = vmatpush3.bf16.xpose.msra.mxu0 %v455_v36 }
  0x87   : > { %1179 = vmatpush3.bf16.xpose.msra.mxu1 %v515_v38  ;;  %1223 = vmatprep.subr.msk.bf16.mxu0 %vm327_vm0, %v304_v37 }
  0x88   : > { %1225 = vmatprep.subr.msk.bf16.mxu1 %vm327_vm0, %v306_v39  ;;  %1174 = vmatprep.mubr.msk.bf16.mxu0 %vm327_vm0, %v283_v40 }
  0x89   : > { %1182 = vmatprep.mubr.msk.bf16.mxu1 %vm327_vm0, %v285_v41 }
  0x8e   : > { %1173 = vmatpush3.bf16.xpose.msra.mxu0 %v458_v42 }
  0x8f   : > { %1181 = vmatpush3.bf16.xpose.msra.mxu1 %v518_v43 }
  0x95   : > { %1175 = vmatmul.mubr.msk.bf16.vlgmr.msra.gmra.mrb[4].mxu0 %vm327_vm0, %v284_v46 }
  0x96   : > { %1183 = vmatmul.mubr.msk.bf16.vlgmr.msra.gmra.mrb[4].mxu1 %vm327_vm0, %v286_v47 }
 0x158   : > { %v1160_v48 = vpop.f32.mrb[0].mxu0 }
 0x159   : > { %v570_v49 = vmul.f32 0.35355338, %v1160_v48  ;;  %v1168_v50 = vpop.f32.mrb[0].mxu1  ;;  %v374_v51 = vpop.f32.mrb[1].mxu0 }
 0x15a   : > { %v573_v52 = vmul.f32 0.35355338, %v1168_v50  ;;  %v568_v53 = vmul.f32 0.35355338, %v374_v51  ;;  %v1161_v54 = vpop.f32.mrb[2].mxu0  ;;  %v434_v55 = vpop.f32.mrb[1].mxu1 }
 0x15b   : > { %v377_v56 = vpop.f32.mrb[3].mxu0  ;;  %v571_v57 = vmul.f32 0.35355338, %v434_v55  ;;  %v1169_v58 = vpop.f32.mrb[2].mxu1  ;;  %v588_v59 = vsel %vm587_vm1, %v570_v49, -inf }
 0x15c   : > { %v597_v60 = vsel %vm587_vm1, %v573_v52, -inf  ;;  %589 = vmax.xlane.f32.xlu0 %v588_v59  ;;  %v437_v61 = vpop.f32.mrb[3].mxu1  ;;  %v569_v63 = vmul.f32 0.35355338, %v377_v56  ;;  %v581_v0 = vsel %vm580_vm2, %v568_v53, -inf }
 0x15d   : > { %598 = vmax.xlane.f32.xlu1 %v597_v60  ;;  %v591_v62 = vsel %vm580_vm2, %v571_v57, -inf  ;;  %v572_v1 = vmul.f32 0.35355338, %v437_v61 }
 0x15e   : > { %v584_v2 = vsel %vm580_vm2, %v569_v63, -inf }
 0x15f   : > { %v594_v3 = vsel %vm580_vm2, %v572_v1, -inf }
 0x160   : > { %582 = vmax.xlane.f32.xlu0 %v581_v0 }
 0x161   : > { %592 = vmax.xlane.f32.xlu1 %v591_v62 }
 0x164   : > { %585 = vmax.xlane.f32.xlu0 %v584_v2 }
 0x165   : > { %595 = vmax.xlane.f32.xlu1 %v594_v3 }
 0x168   : > { %v1176_v4 = vpop.f32.mrb[4].mxu0 }
 0x169   : > { %v494_v5 = vpop.f32.mrb[5].mxu0  ;;  %v1184_v6 = vpop.f32.mrb[4].mxu1  ;;  %v1809_v19 = vmul.f32 0.35355338, %v1176_v4 }
 0x16a   : > { %v574_v7 = vmul.f32 0.35355338, %v494_v5  ;;  %v1177_v8 = vpop.f32.mrb[6].mxu0  ;;  %v554_v9 = vpop.f32.mrb[5].mxu1  ;;  %v1811_v20 = vmul.f32 0.35355338, %v1184_v6 }
 0x16b   : > { %v1801_v10 = vmul.f32 0.35355338, %v554_v9  ;;  %v497_v11 = vpop.f32.mrb[7].mxu0  ;;  %v1185_v12 = vpop.f32.mrb[6].mxu1  ;;  %v606_v22 = vsel %vm587_vm1, %v1809_v19, -inf }
 0x16c   : > { %v575_v13 = vmul.f32 0.35355338, %v497_v11  ;;  %v557_v14 = vpop.f32.mrb[7].mxu1  ;;  %v600_v15 = vsel %vm580_vm2, %v574_v7, -inf  ;;  %v615_v23 = vsel %vm587_vm1, %v1811_v20, -inf }
 0x16d   : > { %601 = vmax.xlane.f32.xlu0 %v600_v15  ;;  %v1804_v16 = vmul.f32 0.35355338, %v557_v14  ;;  %v609_v18 = vsel %vm580_vm2, %v1801_v10, -inf }
 0x16e   : > { %v603_v17 = vsel %vm580_vm2, %v575_v13, -inf }
 0x16f   : > { %604 = vmax.xlane.f32.xlu1 %v603_v17  ;;  %v612_v21 = vsel %vm580_vm2, %v1804_v16, -inf }
 0x171   : > { %610 = vmax.xlane.f32.xlu0 %v609_v18 }
 0x173   : > { %613 = vmax.xlane.f32.xlu1 %v612_v21  ;;  %v308_v21 = vld [vmem:[%s1872_s22 + $0x8] sm:$0xff] }
 0x175   : > { %607 = vmax.xlane.f32.xlu0 %v606_v22 }
 0x177   : > { %616 = vmax.xlane.f32.xlu1 %v615_v23  ;;  %v309_v23 = vld [vmem:[%s1872_s22 + $0x10] sm:$0x1] }
 0x1e9   : > { %v590_v24 = vpop.xlane.xlu0 %589 }
 0x1ea   : > { %v599_v25 = vpop.xlane.xlu1 %598  ;;  %v620_v26 = vsub.f32 %v570_v49, %v590_v24  ;;  %v320_v24 = vpack.c.bf16 %v309_v23, %v309_v23 }
 0x1eb   : > { %v623_v27 = vsub.f32 %v573_v52, %v599_v25  ;;  %v1510_v25 = vmov 0  }
 0x1ec   : > { %v634_v28 = vmul.f32 1.442695, %v620_v26  ;;  %v730_v26 = vsel %vm728_vm3, 65535, %v1510_v25 }
 0x1ed   : > { %v640_v29 = vmul.f32 1.442695, %v623_v27  ;;  %v583_v30 = vpop.xlane.xlu0 %582  ;;  %v310_v27 = vld [vmem:[%s1872_s22 + $0x18] sm:$0xff] }
 0x1ee   : > { %1295 = vpow2.f32 %v634_v28  ;;  %v593_v31 = vpop.xlane.xlu1 %592  ;;  %v618_v32 = vsub.f32 %v568_v53, %v583_v30  ;;  %v311_v28 = vld [vmem:[%s1872_s22 + $0x20] sm:$0xff] }
 0x1ef   : > { %1297 = vpow2.f32 %v640_v29  ;;  %v621_v33 = vsub.f32 %v571_v57, %v593_v31  ;;  %v732_v29 = vand.u32 %v730_v26, %v320_v24  ;;  %v321_v30 = vpack.c.bf16 %v311_v28, %v310_v27  ;;  %v312_v31 = vld [vmem:[%s1872_s22 + $0x28] sm:$0x1] }
 0x1f0   : > { %v630_v34 = vmul.f32 1.442695, %v618_v32  ;;  %v322_v32 = vpack.c.bf16 %v312_v31, %v312_v31 }
 0x1f1   : > { %v636_v35 = vmul.f32 1.442695, %v621_v33  ;;  %v586_v36 = vpop.xlane.xlu0 %585  ;;  %1194 = vmatprep.subr.bf16.mxu1 %v321_v30 }
 0x1f2   : > { %1299 = vpow2.f32 %v630_v34  ;;  %v596_v37 = vpop.xlane.xlu1 %595  ;;  %v619_v38 = vsub.f32 %v569_v63, %v586_v36  ;;  %1195 = vmatpush3.bf16.msra.mxu1 %v321_v30  ;;  %v789_v33 = vand.u32 %v730_v26, %v322_v32  ;;  %v313_v34 = vld [vmem:[%s1872_s22 + $0x30] sm:$0xff] }
 0x1f3   : > { %1301 = vpow2.f32 %v636_v35  ;;  %v622_v39 = vsub.f32 %v572_v1, %v596_v37  ;;  %v314_v35 = vld [vmem:[%s1872_s22 + $0x38] sm:$0xff]  ;;  %v316_v37 = vld [vmem:[%s1872_s22 + $0x48] sm:$0xff] }
 0x1f4   : > { %v632_v40 = vmul.f32 1.442695, %v619_v38  ;;  %1196 = vmatprep.subr.bf16.mxu1 %v789_v33  ;;  %v323_v36 = vpack.c.bf16 %v314_v35, %v313_v34  ;;  %v317_v38 = vld [vmem:[%s1872_s22 + $0x50] sm:$0xff] }
 0x1f5   : > { %v638_v41 = vmul.f32 1.442695, %v622_v39  ;;  %v315_v39 = vld [vmem:[%s1872_s22 + $0x40] sm:$0x1] }
 0x1f6   : > { %1303 = vpow2.f32 %v632_v40  ;;  %1197 = vmatpush3.bf16.msra.mxu1 %v789_v33  ;;  %v325_v40 = vpack.c.bf16 %v317_v38, %v316_v37 }
 0x1f7   : > { %1305 = vpow2.f32 %v638_v41  ;;  %v324_v41 = vpack.c.bf16 %v315_v39, %v315_v39 }
 0x1f8   : > { %v1819_v42 = vpop.eup %1295  ;;  %1210 = vmatprep.subr.bf16.mxu1 %v325_v40 }
 0x1f9   : > { %v1821_v43 = vpop.eup %1297  ;;  %v660_v44 = vsel %vm587_vm1, %v1819_v42, 0.0 }
 0x1fa   : > { %661 = vadd.xlane.f32.xlu0 %v660_v44  ;;  %v602_v45 = vpop.xlane.xlu0 %601  ;;  %v669_v46 = vsel %vm587_vm1, %v1821_v43, 0.0  ;;  %v318_v44 = vld [vmem:[%s1872_s22 + $0x58] sm:$0x1] }
 0x1fb   : > { %v624_v47 = vsub.f32 %v574_v7, %v602_v45  ;;  %670 = vadd.xlane.f32.xlu1 %v669_v46  ;;  %v846_v45 = vand.u32 %v730_v26, %v324_v41  ;;  %v326_v46 = vpack.c.bf16 %v318_v44, %v318_v44 }
 0x1fc   : > { %v1827_v48 = vpop.eup %1299  ;;  %v605_v49 = vpop.xlane.xlu1 %604 }
 0x1fd   : > { %v1829_v50 = vpop.eup %1301  ;;  %v642_v51 = vmul.f32 1.442695, %v624_v47  ;;  %v625_v52 = vsub.f32 %v575_v13, %v605_v49  ;;  %v654_v53 = vsel %vm580_vm2, %v1827_v48, 0.0  ;;  %v903_v47 = vand.u32 %v730_v26, %v326_v46 }
 0x1fe   : > { %655 = vadd.xlane.f32.xlu0 %v654_v53  ;;  %v611_v54 = vpop.xlane.xlu0 %610  ;;  %v663_v59 = vsel %vm580_vm2, %v1829_v50, 0.0 }
 0x1ff   : > { %1307 = vpow2.f32 %v642_v51  ;;  %v644_v55 = vmul.f32 1.442695, %v625_v52  ;;  %v627_v56 = vsub.f32 %v1801_v10, %v611_v54 }
 0x200   : > { %v1834_v57 = vpop.eup %1303  ;;  %v614_v58 = vpop.xlane.xlu1 %613 }
 0x201   : > { %1309 = vpow2.f32 %v644_v55  ;;  %v648_v60 = vmul.f32 1.442695, %v627_v56  ;;  %v628_v61 = vsub.f32 %v1804_v16, %v614_v58  ;;  %v657_v62 = vsel %vm580_vm2, %v1834_v57, 0.0  ;;  %v1841_v63 = vpop.eup %1305 }
 0x202   : > { %664 = vadd.xlane.f32.xlu0 %v663_v59  ;;  %v608_v0 = vpop.xlane.xlu0 %607  ;;  %658 = vadd.xlane.f32.xlu1 %v657_v62  ;;  %v666_v6 = vsel %vm580_vm2, %v1841_v63, 0.0 }
 0x203   : > { %1311 = vpow2.f32 %v648_v60  ;;  %v650_v1 = vmul.f32 1.442695, %v628_v61  ;;  %v626_v2 = vsub.f32 %v1809_v19, %v608_v0 }
 0x204   : > { %v617_v3 = vpop.xlane.xlu1 %616 }
 0x205   : > { %1313 = vpow2.f32 %v650_v1  ;;  %v646_v4 = vmul.f32 1.442695, %v626_v2  ;;  %v629_v5 = vsub.f32 %v1811_v20, %v617_v3  ;;  %v307_v20 = vld [vmem:[%s1872_s22] sm:$0xff] }
 0x206   : > { %667 = vadd.xlane.f32.xlu1 %v666_v6  ;;  %v319_v22 = vpack.c.bf16 %v308_v21, %v307_v20 }
 0x207   : > { %1315 = vpow2.f32 %v646_v4  ;;  %v652_v7 = vmul.f32 1.442695, %v629_v5 }
 0x208   : > { %1186 = vmatprep.subr.bf16.mxu0 %v319_v22 }
 0x209   : > { %v1847_v8 = vpop.eup %1307  ;;  %1317 = vpow2.f32 %v652_v7  ;;  %1187 = vmatpush3.bf16.msra.mxu0 %v319_v22 }
 0x20a   : > { %v672_v9 = vsel %vm580_vm2, %v1847_v8, 0.0  ;;  %1188 = vmatprep.subr.bf16.mxu0 %v732_v29 }
 0x20b   : > { %v1851_v10 = vpop.eup %1309  ;;  %673 = vadd.xlane.f32.xlu0 %v672_v9 }
 0x20c   : > { %v675_v11 = vsel %vm580_vm2, %v1851_v10, 0.0 }
 0x20d   : > { %v1855_v12 = vpop.eup %1311  ;;  %676 = vadd.xlane.f32.xlu1 %v675_v11  ;;  %1189 = vmatpush3.bf16.msra.mxu0 %v732_v29 }
 0x20e   : > { %v681_v13 = vsel %vm580_vm2, %v1855_v12, 0.0  ;;  %1202 = vmatprep.subr.bf16.mxu0 %v323_v36 }
 0x20f   : > { %v1859_v14 = vpop.eup %1313  ;;  %682 = vadd.xlane.f32.xlu0 %v681_v13 }
 0x210   : > { %v684_v15 = vsel %vm580_vm2, %v1859_v14, 0.0 }
 0x211   : > { %v1863_v16 = vpop.eup %1315  ;;  %685 = vadd.xlane.f32.xlu1 %v684_v15 }
 0x212   : > { %v678_v17 = vsel %vm587_vm1, %v1863_v16, 0.0 }
 0x213   : > { %v1867_v18 = vpop.eup %1317  ;;  %679 = vadd.xlane.f32.xlu0 %v678_v17 }
 0x214   : > { %v687_v19 = vsel %vm587_vm1, %v1867_v18, 0.0 }
 0x215   : > { %688 = vadd.xlane.f32.xlu1 %v687_v19 }
 0x287   : > { %v662_v49 = vpop.xlane.xlu0 %661 }
 0x288   : > { %v671_v51 = vpop.xlane.xlu1 %670  ;;  %1319 = vrcp.f32 %v662_v49 }
 0x28b   : > { %v656_v52 = vpop.xlane.xlu0 %655 }
 0x28c   : > { %1321 = vrcp.f32 %v656_v52 }
 0x28d   : > { %1323 = vrcp.f32 %v671_v51 }
 0x28f   : > { %v665_v53 = vpop.xlane.xlu0 %664  ;;  %v659_v54 = vpop.xlane.xlu1 %658 }
 0x290   : > { %1325 = vrcp.f32 %v659_v54 }
 0x291   : > { %1327 = vrcp.f32 %v665_v53 }
 0x292   : > { %v1320_v56 = vpop.eup %1319 }
 0x293   : > { %v668_v55 = vpop.xlane.xlu1 %667  ;;  %v704_v0 = vmul.f32 %v1320_v56, %v1819_v42 }
 0x294   : > { %1329 = vrcp.f32 %v668_v55 }
 0x295   : > { %v715_v11 = vpack.c.bf16 %v704_v0, %v704_v0 }
 0x296   : > { %v1322_v59 = vpop.eup %1321 }
 0x297   : > { %v1324_v60 = vpop.eup %1323  ;;  %v702_v3 = vmul.f32 %v1322_v59, %v1827_v48 }
 0x298   : > { %v674_v58 = vpop.xlane.xlu0 %673  ;;  %v707_v6 = vmul.f32 %v1324_v60, %v1821_v43 }
 0x299   : > { %1331 = vrcp.f32 %v674_v58 }
 0x29a   : > { %v677_v61 = vpop.xlane.xlu1 %676  ;;  %v1326_v62 = vpop.eup %1325  ;;  %v717_v17 = vpack.c.bf16 %v707_v6, %v707_v6 }
 0x29b   : > { %1333 = vrcp.f32 %v677_v61  ;;  %v1328_v1 = vpop.eup %1327  ;;  %v703_v4 = vmul.f32 %v1326_v62, %v1834_v57 }
 0x29c   : > { %v683_v2 = vpop.xlane.xlu0 %682  ;;  %v705_v13 = vmul.f32 %v1328_v1, %v1829_v50 }
 0x29d   : > { %1335 = vrcp.f32 %v683_v2  ;;  %v714_v9 = vpack.c.bf16 %v703_v4, %v702_v3 }
 0x29e   : > { %v1330_v5 = vpop.eup %1329  ;;  %v686_v7 = vpop.xlane.xlu1 %685 }
 0x29f   : > { %1337 = vrcp.f32 %v686_v7  ;;  %v706_v15 = vmul.f32 %v1330_v5, %v1841_v63  ;;  %1190 = vmatprep.mubr.msk.bf16.mxu0 %vm580_vm2, %v714_v9 }
 0x2a0   : > { %v680_v42 = vpop.xlane.xlu0 %679  ;;  %1191 = vmatmul.mubr.msk.bf16.vlgmr.msra.gmra.mrb[8].mxu0 %vm580_vm2, %v715_v11 }
 0x2a1   : > { %1339 = vrcp.f32 %v680_v42  ;;  %v716_v48 = vpack.c.bf16 %v706_v15, %v705_v13  ;;  %1203 = vmatpush3.bf16.msra.mxu0 %v323_v36 }
 0x2a2   : > { %v689_v57 = vpop.xlane.xlu1 %688  ;;  %1204 = vmatprep.subr.bf16.mxu0 %v846_v45 }
 0x2a3   : > { %v1332_v19 = vpop.eup %1331  ;;  %1341 = vrcp.f32 %v689_v57  ;;  %1198 = vmatprep.mubr.msk.bf16.mxu1 %vm580_vm2, %v716_v48 }
 0x2a4   : > { %1199 = vmatmul.mubr.msk.bf16.vlgmr.msra.gmra.mrb[8].mxu1 %vm580_vm2, %v717_v17  ;;  %v708_v50 = vmul.f32 %v1332_v19, %v1847_v8 }
 0x2a5   : > { %v1334_v43 = vpop.eup %1333  ;;  %1211 = vmatpush3.bf16.msra.mxu1 %v325_v40  ;;  %1205 = vmatpush3.bf16.msra.mxu0 %v846_v45 }
 0x2a6   : > { %v709_v63 = vmul.f32 %v1334_v43, %v1851_v10  ;;  %1212 = vmatprep.subr.bf16.mxu1 %v903_v47 }
 0x2a7   : > { %v1336_v20 = vpop.eup %1335 }
 0x2a8   : > { %v718_v21 = vpack.c.bf16 %v709_v63, %v708_v50  ;;  %v711_v23 = vmul.f32 %v1336_v20, %v1855_v12 }
 0x2a9   : > { %v1338_v22 = vpop.eup %1337  ;;  %1213 = vmatpush3.bf16.msra.mxu1 %v903_v47 }
 0x2aa   : > { %1206 = vmatprep.mubr.msk.bf16.mxu0 %vm580_vm2, %v718_v21  ;;  %v712_v24 = vmul.f32 %v1338_v22, %v1859_v14 }
 0x2ab   : > { %v1340_v25 = vpop.eup %1339 }
 0x2ac   : > { %v710_v26 = vmul.f32 %v1340_v25, %v1863_v16  ;;  %v720_v27 = vpack.c.bf16 %v712_v24, %v711_v23 }
 0x2ad   : > { %v1342_v8 = vpop.eup %1341 }
 0x2ae   : > { %v719_v28 = vpack.c.bf16 %v710_v26, %v710_v26  ;;  %v713_v10 = vmul.f32 %v1342_v8, %v1867_v18  ;;  %1214 = vmatprep.mubr.msk.bf16.mxu1 %vm580_vm2, %v720_v27 }
 0x2b0   : > { %v721_v29 = vpack.c.bf16 %v713_v10, %v713_v10  ;;  %1207 = vmatmul.mubr.msk.bf16.vlgmr.msra.gmra.mrb[12].mxu0 %vm580_vm2, %v719_v28 }
 0x2b2   : > { %1215 = vmatmul.mubr.msk.bf16.vlgmr.msra.gmra.mrb[12].mxu1 %vm580_vm2, %v721_v29 }
 0x373   : > { %v1192_v12 = vpop.f32.mrb[8].mxu0 }
 0x374   : > { %956 = vst.msk [vmem:[%s1907_s7 + $0x10] sm:$0x1] %vm955_vm4, %v1192_v12  ;;  %v768_v14 = vpop.f32.mrb[9].mxu0 }
 0x375   : > { %953 = vst.msk [vmem:[%s1907_s7] sm:$0xff] %vm327_vm0, %v768_v14  ;;  %v1193_v16 = vpop.f32.mrb[10].mxu0 }
 0x376   : > { %v771_v18 = vpop.f32.mrb[11].mxu0 }
 0x377   : > { %v1200_v30 = vpop.f32.mrb[8].mxu1  ;;  %954 = vst.msk [vmem:[%s1907_s7 + $0x8] sm:$0xff] %vm327_vm0, %v771_v18 }
 0x378   : > { %959 = vst.msk [vmem:[%s1907_s7 + $0x28] sm:$0x1] %vm955_vm4, %v1200_v30  ;;  %v825_v31 = vpop.f32.mrb[9].mxu1 }
 0x379   : > { %957 = vst.msk [vmem:[%s1907_s7 + $0x18] sm:$0xff] %vm327_vm0, %v825_v31  ;;  %v1201_v32 = vpop.f32.mrb[10].mxu1 }
 0x37a   : > { %v828_v33 = vpop.f32.mrb[11].mxu1 }
 0x37b   : > { %958 = vst.msk [vmem:[%s1907_s7 + $0x20] sm:$0xff] %vm327_vm0, %v828_v33 }
 0x383   : > { %v1208_v34 = vpop.f32.mrb[12].mxu0 }
 0x384   : > { %962 = vst.msk [vmem:[%s1907_s7 + $0x40] sm:$0x1] %vm955_vm4, %v1208_v34  ;;  %v882_v35 = vpop.f32.mrb[13].mxu0 }
 0x385   : > { %960 = vst.msk [vmem:[%s1907_s7 + $0x30] sm:$0xff] %vm327_vm0, %v882_v35  ;;  %v1209_v36 = vpop.f32.mrb[14].mxu0  ;;  %v1216_v37 = vpop.f32.mrb[12].mxu1 }
 0x386   : > { %965 = vst.msk [vmem:[%s1907_s7 + $0x58] sm:$0x1] %vm955_vm4, %v1216_v37  ;;  %v885_v38 = vpop.f32.mrb[15].mxu0  ;;  %v939_v39 = vpop.f32.mrb[13].mxu1 }
 0x387   : > { %961 = vst.msk [vmem:[%s1907_s7 + $0x38] sm:$0xff] %vm327_vm0, %v885_v38  ;;  %963 = vst.msk [vmem:[%s1907_s7 + $0x48] sm:$0xff] %vm327_vm0, %v939_v39  ;;  %v1217_v40 = vpop.f32.mrb[14].mxu1 }
 0x388   : > { %v942_v41 = vpop.f32.mrb[15].mxu1 }
 0x389   : > { %964 = vst.msk [vmem:[%s1907_s7 + $0x50] sm:$0xff] %vm327_vm0, %v942_v41 }
 0x38a   : > { %1446 = shalt.err (!%p1443_p10)
}
 0x38b   : > { %s1447_s20 = scalar_lea.hbm %s1932_s16, 1536  ;;  %s1451_s9 = scalar_lea.hbm %s1987_s3, 3072 }
 0x38c   : > { %p1448_p11 = scmp.ne.s32.totalorder %s1932_s16, %s1447_s20  ;;  %p1452_p5 = scmp.lt.u32.totalorder %s1932_s16, %s1987_s3 }
 0x38d   : > { %p1453_p2 = scmp.lt.u32.totalorder %s1451_s9, %s1447_s20  ;;  %p1455_p13 = scmp.lt.u32.totalorder %s1447_s20, %s1932_s16 }
 0x38e   : > { %p1449_p4 = pnand %p1448_p11, %p2007_p7 }
 0x38f   : > { %p1454_p1 = por %p1453_p2, %p1452_p5 }
 0x390   : > { %p1450_p3 = pneg %p1449_p4 }
 0x391   : > { %p1456_p6 = por %p1455_p13, %p1454_p1 }
 0x393   : > { %p1457_p9 = pnand %p1456_p6, %p1450_p3 }
 0x395   : > { %1460 = shalt.err (!%p1457_p9)
}
 0x396   : > { %s1512_s17 = smov 128   ;;  %s1513_s22 = smov 8  }
 0x397   : > { %1240 = dma.vmem_to_hbm [thread:$0]  (%p2007_p7), %s1934_s11, 1536, %s1932_s16, %s967_s5, %s1512_s17, %s1512_s17, %s1513_s22  }
 0x398 PF: > { %s995_s7 = sand.u32 1, %s1491_s12   ;;  %p2008_p12 = scmp.ne.s32.totalorder %s1997_s24, 0 }
 0x399   : > { %p2009_p0 = scmp.ge.s32.totalorder %s1503_s15, 2  ;;  %s996_s4 = scalar_lea.sflag [#allocation4], %s995_s7 }
 0x39b   : > { %p1253_p8 = pnand %p2009_p0, %p2008_p12 }
 0x39d   : > { %1486 = dma.done.wait (!%p1253_p8), %s996_s4, 1536  }
 0x39e   : > { %1488 = vsyncadd (!%p1253_p8), %s996_s4, 4294965760  ;;  %p19_p10 = scmp.ge.s32.totalorder %s1559_s18, 4   ;;  %s2010_s12 = smov %s1495_s13 }
 0x39f   : > { %s2011_s13 = smov %s1499_s14  ;;  %s2012_s14 = smov %s1571_s21 }
 0x3a0   : > { %s2013_s15 = smov %s1559_s18  ;;  %21 = sbr.rel (!%p19_p10) target bundleno = 9 (0x9), region = 101 }
 0x3a7   :  { %1001 = vsyncpa [#allocation3], 1 }
 0x3a8   :  { %1003 = vsyncpa [#allocation3 + $0x1], 1 }
 0x3a9   :  { %1004 = vsyncpa [#allocation6], 1 }
 0x3aa   :  { %1006 = vsyncpa [#allocation6 + $0x1], 1 }
 0x3ab   :  { %1007 = vsyncpa [#allocation4], 1 }
 0x3ac   :  { %1009 = vsyncpa [#allocation4 + $0x1], 1 }

// kernel: mae_forward.34
= control target key start
LH: loop header
LB: loop body
LE: loop exit
PB: predicated region body
PF: predicated region fallthrough
CT: control target
= control target key end

     0   :  { %10 = vsyncpa [#allocation3], 0  ;;  %s836_s0 = inlined_call_operand.hbm [shape: f32[34,32], index: 0, kind: input, shape index: {}]   ;;  %s837_s1 = inlined_call_operand.hbm [shape: f32[1,32], index: 1, kind: input, shape index: {}]   ;;  %s838_s2 = inlined_call_operand.hbm [shape: f32[1,32], index: 2, kind: input, shape index: {}]   ;;  %s839_s3 = inlined_call_operand.hbm [shape: bf16[32,128], index: 3, kind: input, shape index: {}]   ;;  %s840_s4 = inlined_call_operand.hbm [shape: f32[1,128], index: 4, kind: input, shape index: {}]   ;;  %s841_s5 = inlined_call_operand.hbm [shape: f32[34,128], index: 5, kind: output, shape index: {}]  }
   0x1   :  { %11 = vsyncpa [#allocation6], 0 }
   0x2   :  { %12 = vsyncpa [#allocation9], 0 }
   0x3   :  { %13 = vsyncpa [#allocation4], 0  ;;  %s648_s18 = smov [#allocation5]   ;;  %s649_s20 = smov [#allocation8]  }
   0x4   :  { %s32_s19 = sshll.u32 %s648_s18, 4  ;;  %s51_s21 = sshll.u32 %s649_s20, 4  ;;  %s33_s19 = int_to_ptr.vmem [resolvable:$true] %s32_s19  ;;  %s690_s21 = int_to_ptr.vmem [resolvable:$true] %s51_s21 }
   0x5   :  { %s508_s24 = scalar_lea.hbm %s837_s1, 16 }
   0x6   :  { %p509_p0 = scmp.ne.s32.totalorder %s837_s1, %s508_s24  ;;  %p512_p1 = scmp.lt.u32.totalorder %s508_s24, %s837_s1 }
   0x8   :  { %p514_p2 = pnand %p512_p1, %p509_p0 }
   0xa   :  { %517 = shalt.err (!%p514_p2)
}
   0xb   :  { %s518_s29 = scalar_lea.vmem %s33_s19, 16  ;;  %s522_s30 = scalar_lea.vmem %s33_s19, 32 }
   0xc   :  { %p519_p3 = scmp.ne.s32.totalorder %s33_s19, %s518_s29  ;;  %p523_p4 = scmp.lt.s32.totalorder %s33_s19, %s33_s19 }
   0xd   :  { %p524_p5 = scmp.lt.s32.totalorder %s522_s30, %s518_s29 }
   0xf   :  { %p525_p6 = por %p524_p5, %p523_p4 }
  0x11   :  { %p526_p7 = pnand %p525_p6, %p519_p3 }
  0x13   :  { %529 = shalt.err (!%p526_p7)
}
  0x14   :  { %35 = dma.hbm_to_vmem [thread:$0]  %s837_s1, 16, %s33_s19, [#allocation6]  }
  0x15   :  { %s530_s10 = scalar_lea.hbm %s839_s3, 256 }
  0x16   :  { %p531_p8 = scmp.ne.s32.totalorder %s839_s3, %s530_s10  ;;  %p534_p9 = scmp.lt.u32.totalorder %s530_s10, %s839_s3 }
  0x18   :  { %p536_p10 = pnand %p534_p9, %p531_p8 }
  0x1a   :  { %539 = shalt.err (!%p536_p10)
}
  0x1b   :  { %s540_s15 = scalar_lea.vmem %s690_s21, 256  ;;  %p545_p12 = scmp.lt.s32.totalorder %s690_s21, %s690_s21 }
  0x1c   :  { %p541_p11 = scmp.ne.s32.totalorder %s690_s21, %s540_s15  ;;  %p546_p13 = scmp.lt.s32.totalorder %s540_s15, %s540_s15 }
  0x1e   :  { %p547_p0 = por %p546_p13, %p545_p12 }
  0x20   :  { %p548_p1 = pnand %p547_p0, %p541_p11 }
  0x22   :  { %551 = shalt.err (!%p548_p1)
}
  0x23   :  { %s650_s1 = smov 64   ;;  %s651_s16 = smov 4  }
  0x24   :  { %57 = dma.hbm_to_vmem [thread:$0]  %s839_s3, 256, %s690_s21, [#allocation9], %s650_s1, %s650_s1, %s651_s16  }
  0x25   :  { %s652_s19 = smov [#allocation2]   ;;  %s552_s24 = scalar_lea.hbm %s836_s0, 640 }
  0x26   :  { %s19_s20 = sshll.u32 %s652_s19, 4  ;;  %p553_p2 = scmp.ne.s32.totalorder %s836_s0, %s552_s24  ;;  %s20_s20 = int_to_ptr.vmem [resolvable:$true] %s19_s20 }
  0x27   :  { %p556_p3 = scmp.lt.u32.totalorder %s552_s24, %s836_s0 }
  0x29   :  { %p558_p4 = pnand %p556_p3, %p553_p2 }
  0x2b   :  { %561 = shalt.err (!%p558_p4)
}
  0x2c   :  { %s562_s29 = scalar_lea.vmem %s20_s20, 640  ;;  %p567_p6 = scmp.lt.s32.totalorder %s20_s20, %s20_s20 }
  0x2d   :  { %p563_p5 = scmp.ne.s32.totalorder %s20_s20, %s562_s29  ;;  %p568_p7 = scmp.lt.s32.totalorder %s562_s29, %s562_s29 }
  0x2f   :  { %p569_p8 = por %p568_p7, %p567_p6 }
  0x31   :  { %p570_p9 = pnand %p569_p8, %p563_p5 }
  0x33   :  { %573 = shalt.err (!%p570_p9)
}
  0x34   :  { %s653_s3 = smov 128   ;;  %s654_s21 = smov 8  }
  0x35   :  { %25 = dma.hbm_to_vmem [thread:$0]  %s836_s0, 640, %s20_s20, [#allocation3], %s653_s3, %s653_s3, %s654_s21  }
  0x36   :  { %s655_s7 = smov [#allocation7]   ;;  %s656_s9 = smov [#allocation10]  }
  0x37   :  { %s42_s8 = sshll.u32 %s655_s7, 4  ;;  %s64_s10 = sshll.u32 %s656_s9, 4  ;;  %s43_s8 = int_to_ptr.vmem [resolvable:$true] %s42_s8  ;;  %s65_s10 = int_to_ptr.vmem [resolvable:$true] %s64_s10 }
  0x38   :  { %s574_s13 = scalar_lea.hbm %s838_s2, 16 }
  0x39   :  { %p575_p10 = scmp.ne.s32.totalorder %s838_s2, %s574_s13  ;;  %p578_p11 = scmp.lt.u32.totalorder %s574_s13, %s838_s2 }
  0x3b   :  { %p580_p12 = pnand %p578_p11, %p575_p10 }
  0x3d   :  { %583 = shalt.err (!%p580_p12)
}
  0x3e   :  { %s584_s0 = scalar_lea.vmem %s43_s8, 16  ;;  %s588_s17 = scalar_lea.vmem %s43_s8, 32 }
  0x3f   :  { %p585_p13 = scmp.ne.s32.totalorder %s43_s8, %s584_s0  ;;  %p589_p0 = scmp.lt.s32.totalorder %s43_s8, %s43_s8 }
  0x40   :  { %p590_p1 = scmp.lt.s32.totalorder %s588_s17, %s584_s0 }
  0x42   :  { %p591_p2 = por %p590_p1, %p589_p0 }
  0x44   :  { %p592_p3 = pnand %p591_p2, %p585_p13 }
  0x46   :  { %595 = shalt.err (!%p592_p3)
}
  0x47   :  { %45 = dma.hbm_to_vmem [thread:$0]  %s838_s2, 16, %s43_s8, [#allocation6]  }
  0x48   :  { %s596_s23 = scalar_lea.hbm %s840_s4, 16 }
  0x49   :  { %p597_p4 = scmp.ne.s32.totalorder %s840_s4, %s596_s23  ;;  %p600_p5 = scmp.lt.u32.totalorder %s596_s23, %s840_s4 }
  0x4b   :  { %p602_p6 = pnand %p600_p5, %p597_p4 }
  0x4d   :  { %605 = shalt.err (!%p602_p6)
}
  0x4e   :  { %s606_s28 = scalar_lea.vmem %s65_s10, 16  ;;  %s610_s29 = scalar_lea.vmem %s65_s10, 32 }
  0x4f   :  { %p607_p7 = scmp.ne.s32.totalorder %s65_s10, %s606_s28  ;;  %p611_p8 = scmp.lt.s32.totalorder %s65_s10, %s65_s10 }
  0x50   :  { %p612_p9 = scmp.lt.s32.totalorder %s610_s29, %s606_s28 }
  0x52   :  { %p613_p10 = por %p612_p9, %p611_p8 }
  0x54   :  { %p614_p11 = pnand %p613_p10, %p607_p7 }
  0x56   :  { %617 = shalt.err (!%p614_p11)
}
  0x57   :  { %67 = dma.hbm_to_vmem [thread:$0]  %s840_s4, 16, %s65_s10, [#allocation9]  }
  0x58   :  { %640 = dma.done.wait [#allocation3], 640  }
  0x59   :  { %641 = vsyncadd [#allocation3], 4294966656 }
  0x5a   :  { %642 = dma.done.wait [#allocation6], 32  }
  0x5b   :  { %643 = vsyncadd [#allocation6], 4294967264 }
  0x5c   :  { %644 = dma.done.wait [#allocation9], 272  }
  0x5d   :  { %645 = vsyncadd [#allocation9], 4294967024  ;;  %vm89_vm0 = vcmask 261120   ;;  %v86_v0 = vld [vmem:[#allocation2 + $0x10] sm:$0xff]  ;;  %v87_v1 = vld [vmem:[#allocation2 + $0x18] sm:$0xff]  ;;  %vm102_vm1 = vcmask 254976  }
  0x5e   :  { %v84_v2 = vld [vmem:[#allocation2] sm:$0xff]  ;;  %v96_v3 = vsel %vm89_vm0, %v86_v0, 0.0  ;;  %v85_v5 = vld [vmem:[#allocation2 + $0x8] sm:$0xff]  ;;  %v99_v6 = vsel %vm89_vm0, %v87_v1, 0.0  ;;  %v657_v36 = vmov 0.0   ;;  %v477_v37 = vld [vmem:[#allocation8 + $0x8] sm:$0xff]  }
  0x5f   :  { %v90_v4 = vsel %vm89_vm0, %v84_v2, 0.0  ;;  %97 = vadd.xlane.f32.xlu0 %v96_v3  ;;  %v93_v7 = vsel %vm89_vm0, %v85_v5, 0.0  ;;  %v88_v8 = vld [vmem:[#allocation2 + $0x20] sm:$0x3]  ;;  %v476_v35 = vld [vmem:[#allocation8] sm:$0xff]   ;;  %460 = vmatprep.subr.bf16.mxu1 %v657_v36  ;;  %vm658_vm2 = vmmov 0  }
  0x60   :  { %91 = vadd.xlane.f32.xlu1 %v90_v4  ;;  %v103_v9 = vsel %vm102_vm1, %v88_v8, 0.0  ;;  %444 = vmatprep.subr.bf16.mxu0 %v657_v36  ;;  %v431_v55 = vld [vmem:[#allocation5] ss:$0 sm:$0xff]  ;;  %v432_v61 = vld [vmem:[#allocation7] ss:$0 sm:$0xff]  ;;  %s659_s4 = smov [#allocation11]  }
  0x61   :  { %462 = vmatpush3.bf16.msra.mxu1 %v476_v35  ;;  %445 = vmatpush3.bf16.msra.mxu0 %v476_v35  ;;  %s417_s6 = sshll.u32 %s659_s4, 4  ;;  %s418_s6 = int_to_ptr.vmem [resolvable:$true] %s417_s6 }
  0x62   :  { %461 = vmatprep.subr.bf16.mxu1 %v657_v36  ;;  %446 = vmatprep.subr.bf16.mxu0 %v657_v36  ;;  %s618_s7 = scalar_lea.vmem %s418_s6, 640  ;;  %p623_p13 = scmp.lt.s32.totalorder %s418_s6, %s418_s6 }
  0x63   :  { %100 = vadd.xlane.f32.xlu0 %v99_v6  ;;  %452 = vmatprep.mubr.msk.bf16.mxu1 %vm658_vm2, %v657_v36  ;;  %p619_p12 = scmp.ne.s32.totalorder %s418_s6, %s618_s7  ;;  %p624_p0 = scmp.lt.s32.totalorder %s618_s7, %s618_s7 }
  0x64   :  { %94 = vadd.xlane.f32.xlu1 %v93_v7  ;;  %448 = vmatprep.mubr.msk.bf16.mxu0 %vm658_vm2, %v657_v36 }
  0x65   :  { %463 = vmatpush3.bf16.msra.mxu1 %v477_v37  ;;  %447 = vmatpush3.bf16.msra.mxu0 %v477_v37  ;;  %p625_p1 = por %p624_p0, %p623_p13 }
  0x67   :  { %104 = vadd.xlane.f32.xlu0 %v103_v9  ;;  %p626_p2 = pnand %p625_p1, %p619_p12 }
  0xec   :  { %v98_v10 = vpop.xlane.xlu0 %97 }
  0xed   :  { %v92_v11 = vpop.xlane.xlu1 %91  ;;  %v109_v12 = vmul.f32 0.03125, %v98_v10 }
  0xee   :  { %v107_v13 = vmul.f32 0.03125, %v92_v11 }
  0xef   :  { %v114_v14 = vsub.f32 %v86_v0, %v109_v12 }
  0xf0   :  { %v765_v15 = vsub.f32 %v84_v2, %v107_v13  ;;  %v101_v16 = vpop.xlane.xlu0 %100 }
  0xf1   :  { %v95_v17 = vpop.xlane.xlu1 %94  ;;  %v110_v18 = vmul.f32 0.03125, %v101_v16  ;;  %v119_v19 = vmul.f32 %v114_v14, %v114_v14 }
  0xf2   :  { %v108_v20 = vmul.f32 0.03125, %v95_v17  ;;  %v117_v21 = vmul.f32 %v765_v15, %v765_v15 }
  0xf3   :  { %v115_v22 = vsub.f32 %v87_v1, %v110_v18  ;;  %v128_v23 = vsel %vm89_vm0, %v119_v19, 0.0 }
  0xf4   :  { %v113_v24 = vsub.f32 %v85_v5, %v108_v20  ;;  %v105_v25 = vpop.xlane.xlu0 %104  ;;  %129 = vadd.xlane.f32.xlu1 %v128_v23  ;;  %v122_v28 = vsel %vm89_vm0, %v117_v21, 0.0 }
  0xf5   :  { %v111_v26 = vmul.f32 0.03125, %v105_v25  ;;  %v120_v27 = vmul.f32 %v115_v22, %v115_v22 }
  0xf6   :  { %v118_v29 = vmul.f32 %v113_v24, %v113_v24 }
  0xf7   :  { %v116_v30 = vsub.f32 %v88_v8, %v111_v26  ;;  %v131_v31 = vsel %vm89_vm0, %v120_v27, 0.0 }
  0xf8   :  { %132 = vadd.xlane.f32.xlu0 %v131_v31  ;;  %123 = vadd.xlane.f32.xlu1 %v122_v28  ;;  %v125_v33 = vsel %vm89_vm0, %v118_v29, 0.0 }
  0xf9   :  { %v121_v32 = vmul.f32 %v116_v30, %v116_v30 }
  0xfb   :  { %v134_v34 = vsel %vm102_vm1, %v121_v32, 0.0 }
  0xfc   :  { %135 = vadd.xlane.f32.xlu1 %v134_v34  ;;  %126 = vadd.xlane.f32.xlu0 %v125_v33 }
 0x181   :  { %v130_v38 = vpop.xlane.xlu1 %129 }
 0x182   :  { %v139_v39 = vmul.f32 0.03125, %v130_v38 }
 0x184   :  { %v144_v40 = vadd.f32 1e-05, %v139_v39 }
 0x185   :  { %v133_v41 = vpop.xlane.xlu0 %132  ;;  %v124_v42 = vpop.xlane.xlu1 %123 }
 0x186   :  { %478 = vrsqrt.f32 %v144_v40  ;;  %v140_v43 = vmul.f32 0.03125, %v133_v41  ;;  %v137_v44 = vmul.f32 0.03125, %v124_v42 }
 0x188   :  { %v145_v45 = vadd.f32 1e-05, %v140_v43  ;;  %v142_v46 = vadd.f32 1e-05, %v137_v44 }
 0x189   :  { %v127_v47 = vpop.xlane.xlu0 %126  ;;  %v136_v48 = vpop.xlane.xlu1 %135 }
 0x18a   :  { %480 = vrsqrt.f32 %v145_v45  ;;  %v138_v49 = vmul.f32 0.03125, %v127_v47  ;;  %v141_v50 = vmul.f32 0.03125, %v136_v48 }
 0x18b   :  { %482 = vrsqrt.f32 %v142_v46 }
 0x18c   :  { %v143_v51 = vadd.f32 1e-05, %v138_v49  ;;  %v146_v52 = vadd.f32 1e-05, %v141_v50 }
 0x18e   :  { %484 = vrsqrt.f32 %v143_v51 }
 0x18f   :  { %486 = vrsqrt.f32 %v146_v52 }
 0x190   :  { %v479_v53 = vpop.eup %478 }
 0x191   :  { %v154_v54 = vmul.f32 %v479_v53, %v114_v14  ;;  %v433_v14 = vld [vmem:[#allocation10] ss:$0 sm:$0xff] }
 0x193   :  { %v166_v59 = vmul.f32 %v431_v55, %v154_v54 }
 0x194   :  { %v481_v56 = vpop.eup %480 }
 0x195   :  { %v483_v57 = vpop.eup %482  ;;  %v155_v58 = vmul.f32 %v481_v56, %v115_v22  ;;  %v178_v2 = vadd.f32 %v432_v61, %v166_v59 }
 0x196   :  { %v152_v60 = vmul.f32 %v483_v57, %v765_v15 }
 0x197   :  { %v167_v62 = vmul.f32 %v431_v55, %v155_v58 }
 0x198   :  { %v485_v63 = vpop.eup %484  ;;  %v164_v4 = vmul.f32 %v431_v55, %v152_v60 }
 0x199   :  { %v487_v0 = vpop.eup %486  ;;  %v153_v1 = vmul.f32 %v485_v63, %v113_v24  ;;  %v179_v3 = vadd.f32 %v432_v61, %v167_v62 }
 0x19a   :  { %v156_v5 = vmul.f32 %v487_v0, %v116_v30  ;;  %v176_v9 = vadd.f32 %v432_v61, %v164_v4 }
 0x19b   :  { %v182_v6 = vpack.c.bf16 %v179_v3, %v178_v2  ;;  %v165_v7 = vmul.f32 %v431_v55, %v153_v1 }
 0x19c   :  { %v168_v8 = vmul.f32 %v431_v55, %v156_v5 }
 0x19d   :  { %453 = vmatmul.mubr.msk.bf16.vlgmr.msra.gmra.mrb[0].mxu1 %vm89_vm0, %v182_v6  ;;  %v177_v10 = vadd.f32 %v432_v61, %v165_v7 }
 0x19e   :  { %456 = vmatprep.mubr.msk.bf16.mxu1 %vm658_vm2, %v657_v36  ;;  %v180_v12 = vadd.f32 %v432_v61, %v168_v8 }
 0x19f   :  { %v181_v11 = vpack.c.bf16 %v177_v10, %v176_v9 }
 0x1a0   :  { %v183_v13 = vpack.c.bf16 %v180_v12, %v180_v12 }
 0x1a1   :  { %449 = vmatmul.mubr.msk.bf16.vlgmr.msra.gmra.mrb[0].mxu0 %vm89_vm0, %v181_v11 }
 0x1a5   :  { %457 = vmatmul.mubr.msk.bf16.gmra.mrb[4].mxu1 %vm89_vm0, %v183_v13 }
 0x270   :  { %v258_v15 = vpop.f32.mrb[0].mxu1 }
 0x271   :  { %v781_v16 = vadd.f32 %v433_v14, %v258_v15  ;;  %v454_v17 = vpop.f32.mrb[1].mxu1 }
 0x272   :  { %v261_v18 = vpop.f32.mrb[2].mxu1 }
 0x273   :  { %v784_v19 = vmul.f32 0.70710677, %v781_v16  ;;  %v786_v20 = vadd.f32 %v433_v14, %v261_v18  ;;  %v455_v21 = vpop.f32.mrb[3].mxu1 }
 0x274   :  { %v250_v22 = vpop.f32.mrb[0].mxu0 }
 0x275   :  { %v284_v23 = vand.u32 2147483647, %v784_v19  ;;  %v790_v24 = vmul.f32 0.70710677, %v786_v20  ;;  %v792_v25 = vadd.f32 %v433_v14, %v250_v22  ;;  %v450_v26 = vpop.f32.mrb[1].mxu0  ;;  %vm384_vm3 = vcmp.ge.f32.partialorder %v784_v19, 0.0 }
 0x276   :  { %v253_v29 = vpop.f32.mrb[2].mxu0 }
 0x277   :  { %v289_v27 = vmul.f32 0.3275911, %v284_v23  ;;  %v285_v28 = vand.u32 2147483647, %v790_v24  ;;  %v796_v30 = vmul.f32 0.70710677, %v792_v25  ;;  %v798_v31 = vadd.f32 %v433_v14, %v253_v29 }
 0x278   :  { %v451_v32 = vpop.f32.mrb[3].mxu0  ;;  %v266_v33 = vpop.f32.mrb[4].mxu1  ;;  %v354_v48 = vmul.f32 %v284_v23, %v284_v23  ;;  %vm385_vm4 = vcmp.ge.f32.partialorder %v790_v24, 0.0 }
 0x279   :  { %v294_v34 = vadd.f32 1.0, %v289_v27  ;;  %v290_v35 = vmul.f32 0.3275911, %v285_v28  ;;  %v458_v36 = vpop.f32.mrb[5].mxu1  ;;  %v282_v37 = vand.u32 2147483647, %v796_v30  ;;  %v805_v44 = vadd.f32 %v433_v14, %v266_v33 }
 0x27a   :  { %v802_v38 = vmul.f32 0.70710677, %v798_v31  ;;  %v269_v40 = vpop.f32.mrb[6].mxu1  ;;  %v359_v52 = vsub.f32 0.0, %v354_v48  ;;  %v355_v53 = vmul.f32 %v285_v28, %v285_v28  ;;  %vm382_vm5 = vcmp.ge.f32.partialorder %v796_v30, 0.0 }
 0x27b   :  { %488 = vrcp.f32 %v294_v34  ;;  %v295_v39 = vadd.f32 1.0, %v290_v35  ;;  %v287_v41 = vmul.f32 0.3275911, %v282_v37  ;;  %v459_v43 = vpop.f32.mrb[7].mxu1  ;;  %v808_v47 = vmul.f32 0.70710677, %v805_v44 }
 0x27c   :  { %v283_v42 = vand.u32 2147483647, %v802_v38  ;;  %v352_v57 = vmul.f32 %v282_v37, %v282_v37  ;;  %v366_v60 = vmul.f32 1.442695, %v359_v52  ;;  %v360_v61 = vsub.f32 0.0, %v355_v53 }
 0x27d   :  { %490 = vrcp.f32 %v295_v39  ;;  %v292_v45 = vadd.f32 1.0, %v287_v41  ;;  %v286_v50 = vand.u32 2147483647, %v808_v47  ;;  %vm383_vm6 = vcmp.ge.f32.partialorder %v802_v38, 0.0 }
 0x27e   :  { %v288_v46 = vmul.f32 0.3275911, %v283_v42  ;;  %v353_v63 = vmul.f32 %v283_v42, %v283_v42  ;;  %v357_v2 = vsub.f32 0.0, %v352_v57  ;;  %v368_v6 = vmul.f32 1.442695, %v360_v61 }
 0x27f   :  { %492 = vrcp.f32 %v292_v45  ;;  %v291_v51 = vmul.f32 0.3275911, %v286_v50  ;;  %v356_v11 = vmul.f32 %v286_v50, %v286_v50  ;;  %vm386_vm7 = vcmp.ge.f32.partialorder %v808_v47, 0.0 }
 0x280   :  { %v293_v49 = vadd.f32 1.0, %v288_v46  ;;  %v358_v10 = vsub.f32 0.0, %v353_v63  ;;  %v362_v13 = vmul.f32 1.442695, %v357_v2 }
 0x281   :  { %v296_v55 = vadd.f32 1.0, %v291_v51  ;;  %v361_v28 = vsub.f32 0.0, %v356_v11 }
 0x282   :  { %494 = vrcp.f32 %v293_v49  ;;  %v364_v27 = vmul.f32 1.442695, %v358_v10  ;;  %v274_v10 = vmul.f32 0.5, %v781_v16  ;;  %v272_v16 = vmul.f32 0.5, %v792_v25 }
 0x283   :  { %496 = vrcp.f32 %v296_v55  ;;  %v370_v42 = vmul.f32 1.442695, %v361_v28 }
 0x284   :  { %498 = vpow2.f32 %v366_v60 }
 0x285   :  { %v489_v54 = vpop.eup %488  ;;  %500 = vpow2.f32 %v368_v6 }
 0x286   :  { %v309_v56 = vmul.f32 1.0614054, %v489_v54  ;;  %502 = vpow2.f32 %v362_v13 }
 0x287   :  { %v491_v58 = vpop.eup %490  ;;  %504 = vpow2.f32 %v364_v27 }
 0x288   :  { %v314_v59 = vadd.f32 -1.4531521, %v309_v56  ;;  %v310_v62 = vmul.f32 1.0614054, %v491_v58  ;;  %506 = vpow2.f32 %v370_v42 }
 0x289   :  { %v493_v0 = vpop.eup %492 }
 0x28a   :  { %v319_v1 = vmul.f32 %v489_v54, %v314_v59  ;;  %v315_v3 = vadd.f32 -1.4531521, %v310_v62  ;;  %v307_v4 = vmul.f32 1.0614054, %v493_v0 }
 0x28c   :  { %v324_v5 = vadd.f32 1.4214138, %v319_v1  ;;  %v495_v7 = vpop.eup %494  ;;  %v320_v8 = vmul.f32 %v491_v58, %v315_v3  ;;  %v312_v9 = vadd.f32 -1.4531521, %v307_v4 }
 0x28d   :  { %v308_v14 = vmul.f32 1.0614054, %v495_v7  ;;  %v497_v22 = vpop.eup %496 }
 0x28e   :  { %v329_v12 = vmul.f32 %v489_v54, %v324_v5  ;;  %v325_v15 = vadd.f32 1.4214138, %v320_v8  ;;  %v317_v17 = vmul.f32 %v493_v0, %v312_v9  ;;  %v311_v33 = vmul.f32 1.0614054, %v497_v22  ;;  %v499_v43 = vpop.eup %498 }
 0x28f   :  { %v313_v21 = vadd.f32 -1.4531521, %v308_v14  ;;  %v501_v57 = vpop.eup %500 }
 0x290   :  { %v334_v18 = vadd.f32 -0.28449672, %v329_v12  ;;  %v330_v23 = vmul.f32 %v491_v58, %v325_v15  ;;  %v322_v26 = vadd.f32 1.4214138, %v317_v17  ;;  %v316_v39 = vadd.f32 -1.4531521, %v311_v33  ;;  %v503_v1 = vpop.eup %502 }
 0x291   :  { %v318_v32 = vmul.f32 %v495_v7, %v313_v21  ;;  %v275_v17 = vmul.f32 0.5, %v786_v20 }
 0x292   :  { %v339_v29 = vmul.f32 %v489_v54, %v334_v18  ;;  %v335_v34 = vadd.f32 -0.28449672, %v330_v23  ;;  %v327_v35 = vmul.f32 %v493_v0, %v322_v26  ;;  %v321_v48 = vmul.f32 %v497_v22, %v316_v39 }
 0x293   :  { %v323_v37 = vadd.f32 1.4214138, %v318_v32 }
 0x294   :  { %v344_v36 = vadd.f32 0.2548296, %v339_v29  ;;  %v340_v40 = vmul.f32 %v491_v58, %v335_v34  ;;  %v332_v41 = vadd.f32 -0.28449672, %v327_v35  ;;  %v326_v53 = vadd.f32 1.4214138, %v321_v48 }
 0x295   :  { %v328_v46 = vmul.f32 %v495_v7, %v323_v37  ;;  %v273_v35 = vmul.f32 0.5, %v798_v31  ;;  %v276_v37 = vmul.f32 0.5, %v805_v44 }
 0x296   :  { %v349_v45 = vmul.f32 %v489_v54, %v344_v36  ;;  %v345_v49 = vadd.f32 0.2548296, %v340_v40  ;;  %v337_v50 = vmul.f32 %v493_v0, %v332_v41  ;;  %v331_v61 = vmul.f32 %v497_v22, %v326_v53 }
 0x297   :  { %v333_v52 = vadd.f32 -0.28449672, %v328_v46 }
 0x298   :  { %v374_v51 = vmul.f32 %v499_v43, %v349_v45  ;;  %v350_v55 = vmul.f32 %v491_v58, %v345_v49  ;;  %v342_v56 = vadd.f32 0.2548296, %v337_v50  ;;  %v336_v54 = vadd.f32 -0.28449672, %v331_v61  ;;  %v505_v58 = vpop.eup %504 }
 0x299   :  { %v338_v60 = vmul.f32 %v495_v7, %v333_v52  ;;  %v507_v26 = vpop.eup %506 }
 0x29a   :  { %v379_v59 = vsub.f32 1.0, %v374_v51  ;;  %v375_v62 = vmul.f32 %v501_v57, %v350_v55  ;;  %v347_v63 = vmul.f32 %v493_v0, %v342_v56  ;;  %v341_v9 = vmul.f32 %v497_v22, %v336_v54 }
 0x29b   :  { %v343_v3 = vadd.f32 0.2548296, %v338_v60 }
 0x29c   :  { %v389_v2 = vsub.f32 0.0, %v379_v59  ;;  %v380_v4 = vsub.f32 1.0, %v375_v62  ;;  %v372_v5 = vmul.f32 %v503_v1, %v347_v63  ;;  %v346_v14 = vadd.f32 0.2548296, %v341_v9 }
 0x29d   :  { %v348_v8 = vmul.f32 %v495_v7, %v343_v3 }
 0x29e   :  { %v394_v6 = vsel %vm384_vm3, %v379_v59, %v389_v2  ;;  %v390_v12 = vsub.f32 0.0, %v380_v4  ;;  %v377_v13 = vsub.f32 1.0, %v372_v5  ;;  %v351_v23 = vmul.f32 %v497_v22, %v346_v14 }
 0x29f   :  { %v399_v11 = vadd.f32 1.0, %v394_v6  ;;  %v373_v0 = vmul.f32 %v505_v58, %v348_v8 }
 0x2a0   :  { %v395_v18 = vsel %vm385_vm4, %v380_v4, %v390_v12  ;;  %v387_v19 = vsub.f32 0.0, %v377_v13  ;;  %v376_v32 = vmul.f32 %v507_v26, %v351_v23 }
 0x2a1   :  { %v404_v15 = vmul.f32 %v399_v11, %v274_v10  ;;  %v400_v21 = vadd.f32 1.0, %v395_v18  ;;  %v378_v7 = vsub.f32 1.0, %v373_v0 }
 0x2a2   :  { %v392_v27 = vsel %vm382_vm5, %v377_v13, %v387_v19  ;;  %v381_v34 = vsub.f32 1.0, %v376_v32 }
 0x2a3   :  { %409 = vst [vmem:[#allocation11 + $0x10] sm:$0xff] %v404_v15  ;;  %v405_v28 = vmul.f32 %v400_v21, %v275_v17  ;;  %v397_v29 = vadd.f32 1.0, %v392_v27  ;;  %v388_v24 = vsub.f32 0.0, %v378_v7 }
 0x2a4   :  { %v391_v22 = vsub.f32 0.0, %v381_v34 }
 0x2a5   :  { %410 = vst [vmem:[#allocation11 + $0x18] sm:$0xff] %v405_v28  ;;  %v402_v20 = vmul.f32 %v397_v29, %v272_v16  ;;  %v393_v33 = vsel %vm383_vm6, %v378_v7, %v388_v24 }
 0x2a6   :  { %v398_v30 = vadd.f32 1.0, %v393_v33  ;;  %v396_v25 = vsel %vm386_vm7, %v381_v34, %v391_v22 }
 0x2a7   :  { %407 = vst [vmem:[#allocation11] sm:$0xff] %v402_v20  ;;  %v401_v39 = vadd.f32 1.0, %v396_v25 }
 0x2a8   :  { %v403_v36 = vmul.f32 %v398_v30, %v273_v35 }
 0x2a9   :  { %v406_v38 = vmul.f32 %v401_v39, %v276_v37 }
 0x2aa   :  { %408 = vst [vmem:[#allocation11 + $0x8] sm:$0xff] %v403_v36 }
 0x2ab   :  { %411 = vst [vmem:[#allocation11 + $0x20] sm:$0x3] %v406_v38 }
 0x2ac   :  { %629 = shalt.err (!%p626_p2)
}
 0x2ad   :  { %s630_s10 = scalar_lea.hbm %s841_s5, 640 }
 0x2ae   :  { %p631_p3 = scmp.ne.s32.totalorder %s841_s5, %s630_s10  ;;  %p634_p4 = scmp.lt.u32.totalorder %s630_s10, %s841_s5 }
 0x2b0   :  { %p636_p5 = pnand %p634_p4, %p631_p3 }
 0x2b2   :  { %639 = shalt.err (!%p636_p5)
}
 0x2b3   :  { %423 = dma.vmem_to_hbm [thread:$0]  %s418_s6, 640, %s841_s5, [#allocation4], %s653_s3, %s653_s3, %s654_s21  }
 0x2b4   :  { %646 = dma.done.wait [#allocation4], 640  }
 0x2b5   :  { %647 = vsyncadd [#allocation4], 4294966656 }
 0x2b6   :  { %427 = vsyncpa [#allocation3], 1 }
 0x2b7   :  { %428 = vsyncpa [#allocation6], 1 }
 0x2b8   :  { %429 = vsyncpa [#allocation9], 1 }
 0x2b9   :  { %430 = vsyncpa [#allocation4], 1 }

// kernel: mae_forward.35
= control target key start
LH: loop header
LB: loop body
LE: loop exit
PB: predicated region body
PF: predicated region fallthrough
CT: control target
= control target key end

     0   :  { %9 = vsyncpa [#allocation4], 0  ;;  %s613_s0 = inlined_call_operand.hbm [shape: f32[34,128], index: 0, kind: input, shape index: {}]   ;;  %s614_s1 = inlined_call_operand.hbm [shape: bf16[128,32], index: 1, kind: input, shape index: {}]   ;;  %s615_s2 = inlined_call_operand.hbm [shape: f32[1,32], index: 2, kind: input, shape index: {}]   ;;  %s616_s3 = inlined_call_operand.hbm [shape: f32[34,32], index: 3, kind: input, shape index: {}]   ;;  %s617_s4 = inlined_call_operand.hbm [shape: f32[34,32], index: 4, kind: output, shape index: {}]  }
   0x1   :  { %10 = vsyncpa [#allocation7], 0 }
   0x2   :  { %11 = vsyncpa [#allocation10], 0 }
   0x3   :  { %12 = vsyncpa [#allocation5], 0  ;;  %s483_s15 = smov [#allocation6]   ;;  %s365_s19 = scalar_lea.hbm %s614_s1, 1024 }
   0x4   :  { %s30_s16 = sshll.u32 %s483_s15, 4  ;;  %p366_p0 = scmp.ne.s32.totalorder %s614_s1, %s365_s19  ;;  %s31_s16 = int_to_ptr.vmem [resolvable:$true] %s30_s16 }
   0x5   :  { %p369_p1 = scmp.lt.u32.totalorder %s365_s19, %s614_s1 }
   0x7   :  { %p371_p2 = pnand %p369_p1, %p366_p0 }
   0x9   :  { %374 = shalt.err (!%p371_p2)
}
   0xa   :  { %s375_s24 = scalar_lea.vmem %s31_s16, 1024  ;;  %p380_p4 = scmp.lt.s32.totalorder %s31_s16, %s31_s16 }
   0xb   :  { %p376_p3 = scmp.ne.s32.totalorder %s31_s16, %s375_s24  ;;  %p381_p5 = scmp.lt.s32.totalorder %s375_s24, %s375_s24 }
   0xd   :  { %p382_p6 = por %p381_p5, %p380_p4 }
   0xf   :  { %p383_p7 = pnand %p382_p6, %p376_p3 }
  0x11   :  { %386 = shalt.err (!%p383_p7)
}
  0x12   :  { %s484_s25 = smov 64   ;;  %s485_s26 = smov 4  }
  0x13   :  { %36 = dma.hbm_to_vmem [thread:$0]  %s614_s1, 1024, %s31_s16, [#allocation7], %s484_s25, %s484_s25, %s485_s26  }
  0x14   :  { %s486_s29 = smov [#allocation3]   ;;  %s387_s7 = scalar_lea.hbm %s613_s0, 640 }
  0x15   :  { %s18_s30 = sshll.u32 %s486_s29, 4  ;;  %p388_p8 = scmp.ne.s32.totalorder %s613_s0, %s387_s7  ;;  %s19_s30 = int_to_ptr.vmem [resolvable:$true] %s18_s30 }
  0x16   :  { %p391_p9 = scmp.lt.u32.totalorder %s387_s7, %s613_s0 }
  0x18   :  { %p393_p10 = pnand %p391_p9, %p388_p8 }
  0x1a   :  { %396 = shalt.err (!%p393_p10)
}
  0x1b   :  { %s397_s12 = scalar_lea.vmem %s19_s30, 640  ;;  %p402_p12 = scmp.lt.s32.totalorder %s19_s30, %s19_s30 }
  0x1c   :  { %p398_p11 = scmp.ne.s32.totalorder %s19_s30, %s397_s12  ;;  %p403_p13 = scmp.lt.s32.totalorder %s397_s12, %s397_s12 }
  0x1e   :  { %p404_p0 = por %p403_p13, %p402_p12 }
  0x20   :  { %p405_p1 = pnand %p404_p0, %p398_p11 }
  0x22   :  { %408 = shalt.err (!%p405_p1)
}
  0x23   :  { %s487_s1 = smov 128   ;;  %s488_s13 = smov 8  }
  0x24   :  { %24 = dma.hbm_to_vmem [thread:$0]  %s613_s0, 640, %s19_s30, [#allocation4], %s487_s1, %s487_s1, %s488_s13  }
  0x25   :  { %s489_s16 = smov [#allocation8]   ;;  %s490_s18 = smov [#allocation9]  }
  0x26   :  { %s43_s17 = sshll.u32 %s489_s16, 4  ;;  %s52_s19 = sshll.u32 %s490_s18, 4  ;;  %s44_s17 = int_to_ptr.vmem [resolvable:$true] %s43_s17  ;;  %s546_s19 = int_to_ptr.vmem [resolvable:$true] %s52_s19 }
  0x27   :  { %s409_s22 = scalar_lea.hbm %s615_s2, 16 }
  0x28   :  { %p410_p2 = scmp.ne.s32.totalorder %s615_s2, %s409_s22  ;;  %p413_p3 = scmp.lt.u32.totalorder %s409_s22, %s615_s2 }
  0x2a   :  { %p415_p4 = pnand %p413_p3, %p410_p2 }
  0x2c   :  { %418 = shalt.err (!%p415_p4)
}
  0x2d   :  { %s419_s0 = scalar_lea.vmem %s44_s17, 16  ;;  %s423_s27 = scalar_lea.vmem %s44_s17, 32 }
  0x2e   :  { %p420_p5 = scmp.ne.s32.totalorder %s44_s17, %s419_s0  ;;  %p424_p6 = scmp.lt.s32.totalorder %s44_s17, %s44_s17 }
  0x2f   :  { %p425_p7 = scmp.lt.s32.totalorder %s423_s27, %s419_s0 }
  0x31   :  { %p426_p8 = por %p425_p7, %p424_p6 }
  0x33   :  { %p427_p9 = pnand %p426_p8, %p420_p5 }
  0x35   :  { %430 = shalt.err (!%p427_p9)
}
  0x36   :  { %46 = dma.hbm_to_vmem [thread:$0]  %s615_s2, 16, %s44_s17, [#allocation7]  }
  0x37   :  { %s431_s6 = scalar_lea.hbm %s616_s3, 640 }
  0x38   :  { %p432_p10 = scmp.ne.s32.totalorder %s616_s3, %s431_s6  ;;  %p435_p11 = scmp.lt.u32.totalorder %s431_s6, %s616_s3 }
  0x3a   :  { %p437_p12 = pnand %p435_p11, %p432_p10 }
  0x3c   :  { %440 = shalt.err (!%p437_p12)
}
  0x3d   :  { %s441_s11 = scalar_lea.vmem %s546_s19, 640  ;;  %p446_p0 = scmp.lt.s32.totalorder %s546_s19, %s546_s19 }
  0x3e   :  { %p442_p13 = scmp.ne.s32.totalorder %s546_s19, %s441_s11  ;;  %p447_p1 = scmp.lt.s32.totalorder %s441_s11, %s441_s11 }
  0x40   :  { %p448_p2 = por %p447_p1, %p446_p0 }
  0x42   :  { %p449_p3 = pnand %p448_p2, %p442_p13 }
  0x44   :  { %452 = shalt.err (!%p449_p3)
}
  0x45   :  { %58 = dma.hbm_to_vmem [thread:$0]  %s616_s3, 640, %s546_s19, [#allocation10], %s487_s1, %s487_s1, %s488_s13  }
  0x46   :  { %475 = dma.done.wait [#allocation4], 640  }
  0x47   :  { %476 = vsyncadd [#allocation4], 4294966656 }
  0x48   :  { %477 = dma.done.wait [#allocation7], 1040  }
  0x49   :  { %478 = vsyncadd [#allocation7], 4294966256 }
  0x4a   :  { %479 = dma.done.wait [#allocation10], 640  }
  0x4b   :  { %480 = vsyncadd [#allocation10], 4294966656  ;;  %vm76_vm0 = vcmask 261120   ;;  %v491_v0 = vmov 0.0   ;;  %vm492_vm1 = vmmov 0   ;;  %v357_v1 = vld [vmem:[#allocation6] sm:$0xff]  }
  0x4c   :  { %330 = vmatprep.subr.bf16.mxu1 %v491_v0  ;;  %302 = vmatprep.subr.bf16.mxu0 %v491_v0  ;;  %79 = vst.msk [vmem:[#allocation2 + $0x10] sm:$0xff] %vm76_vm0, %v491_v0  ;;  %77 = vst.msk [vmem:[#allocation2] sm:$0xff] %vm76_vm0, %v491_v0  ;;  %v358_v2 = vld [vmem:[#allocation6 + $0x8] sm:$0xff]   ;;  %v359_v3 = vld [vmem:[#allocation6 + $0x10] sm:$0xff]   ;;  %vm81_vm2 = vcmask 254976   ;;  %s493_s3 = smov [#allocation11]  }
  0x4d   :  { %78 = vst.msk [vmem:[#allocation2 + $0x8] sm:$0xff] %vm76_vm0, %v491_v0  ;;  %80 = vst.msk [vmem:[#allocation2 + $0x18] sm:$0xff] %vm76_vm0, %v491_v0  ;;  %322 = vmatprep.mubr.msk.bf16.mxu1 %vm492_vm1, %v491_v0  ;;  %318 = vmatprep.mubr.msk.bf16.mxu0 %vm492_vm1, %v491_v0  ;;  %v360_v4 = vld [vmem:[#allocation6 + $0x18] sm:$0xff]   ;;  %v361_v5 = vld [vmem:[#allocation6 + $0x20] sm:$0xff]   ;;  %s268_s14 = sshll.u32 %s493_s3, 4  ;;  %s269_s14 = int_to_ptr.vmem [resolvable:$true] %s268_s14 }
  0x4e   :  { %338 = vmatpush3.bf16.msra.mxu1 %v357_v1  ;;  %303 = vmatpush3.bf16.msra.mxu0 %v357_v1  ;;  %v362_v6 = vld [vmem:[#allocation6 + $0x28] sm:$0xff]   ;;  %v363_v7 = vld [vmem:[#allocation6 + $0x30] sm:$0xff]   ;;  %v364_v8 = vld [vmem:[#allocation6 + $0x38] sm:$0xff]   ;;  %82 = vst.msk [vmem:[#allocation2 + $0x20] sm:$0x3] %vm81_vm2, %v491_v0  ;;  %s453_s15 = scalar_lea.vmem %s269_s14, 640  ;;  %p458_p5 = scmp.lt.s32.totalorder %s269_s14, %s269_s14 }
  0x4f   :  { %331 = vmatprep.subr.bf16.mxu1 %v491_v0  ;;  %304 = vmatprep.subr.bf16.mxu0 %v491_v0  ;;  %v90_v9 = vld [vmem:[#allocation3 + $0x10] sm:$0xff]  ;;  %v91_v10 = vld [vmem:[#allocation3 + $0x18] sm:$0xff]  ;;  %v88_v11 = vld [vmem:[#allocation3] sm:$0xff]  ;;  %p454_p4 = scmp.ne.s32.totalorder %s269_s14, %s453_s15  ;;  %p459_p6 = scmp.lt.s32.totalorder %s453_s15, %s453_s15 }
  0x50   :  { %v89_v12 = vld [vmem:[#allocation3 + $0x8] sm:$0xff]  ;;  %v94_v13 = vpack.c.bf16 %v91_v10, %v90_v9  ;;  %v92_v15 = vld [vmem:[#allocation3 + $0x20] sm:$0x3]  ;;  %v249_v49 = vld [vmem:[#allocation9 + $0x8] sm:$0xff] }
  0x51   :  { %v93_v14 = vpack.c.bf16 %v89_v12, %v88_v11  ;;  %v95_v16 = vpack.c.bf16 %v92_v15, %v92_v15  ;;  %v290_v35 = vld [vmem:[#allocation8] ss:$0 sm:$0xff]  ;;  %v250_v38 = vld [vmem:[#allocation9 + $0x10] sm:$0xff]  ;;  %v248_v42 = vld [vmem:[#allocation9] sm:$0xff]  ;;  %p460_p7 = por %p459_p6, %p458_p5 }
  0x52   :  { %339 = vmatpush3.bf16.msra.mxu1 %v358_v2  ;;  %305 = vmatpush3.bf16.msra.mxu0 %v358_v2  ;;  %v251_v46 = vld [vmem:[#allocation9 + $0x18] sm:$0xff]  ;;  %v252_v57 = vld [vmem:[#allocation9 + $0x20] sm:$0x3] }
  0x53   :  { %332 = vmatprep.subr.bf16.mxu1 %v491_v0  ;;  %306 = vmatprep.subr.bf16.mxu0 %v491_v0  ;;  %v85_v17 = vld [vmem:[#allocation2 + $0x10] sm:$0xff]  ;;  %v83_v18 = vld [vmem:[#allocation2] sm:$0xff]  ;;  %p461_p8 = pnand %p460_p7, %p454_p4 }
  0x54   :  { %v86_v20 = vld [vmem:[#allocation2 + $0x18] sm:$0xff]  ;;  %v84_v22 = vld [vmem:[#allocation2 + $0x8] sm:$0xff] }
  0x55   :  { %v87_v33 = vld [vmem:[#allocation2 + $0x20] sm:$0x3] }
  0x56   :  { %340 = vmatpush3.bf16.msra.mxu1 %v359_v3  ;;  %307 = vmatpush3.bf16.msra.mxu0 %v359_v3 }
  0x57   :  { %333 = vmatprep.subr.bf16.mxu1 %v491_v0  ;;  %308 = vmatprep.subr.bf16.mxu0 %v491_v0 }
  0x5a   :  { %341 = vmatpush3.bf16.msra.mxu1 %v360_v4  ;;  %309 = vmatpush3.bf16.msra.mxu0 %v360_v4 }
  0x5b   :  { %334 = vmatprep.subr.bf16.mxu1 %v491_v0  ;;  %310 = vmatprep.subr.bf16.mxu0 %v491_v0 }
  0x5e   :  { %342 = vmatpush3.bf16.msra.mxu1 %v361_v5  ;;  %311 = vmatpush3.bf16.msra.mxu0 %v361_v5 }
  0x5f   :  { %335 = vmatprep.subr.bf16.mxu1 %v491_v0  ;;  %312 = vmatprep.subr.bf16.mxu0 %v491_v0 }
  0x62   :  { %343 = vmatpush3.bf16.msra.mxu1 %v362_v6  ;;  %313 = vmatpush3.bf16.msra.mxu0 %v362_v6 }
  0x63   :  { %336 = vmatprep.subr.bf16.mxu1 %v491_v0  ;;  %314 = vmatprep.subr.bf16.mxu0 %v491_v0 }
  0x66   :  { %344 = vmatpush3.bf16.msra.mxu1 %v363_v7  ;;  %315 = vmatpush3.bf16.msra.mxu0 %v363_v7 }
  0x67   :  { %337 = vmatprep.subr.bf16.mxu1 %v491_v0  ;;  %316 = vmatprep.subr.bf16.mxu0 %v491_v0 }
  0x6a   :  { %345 = vmatpush3.bf16.msra.mxu1 %v364_v8  ;;  %317 = vmatpush3.bf16.msra.mxu0 %v364_v8 }
  0x6d   :  { %323 = vmatmul.mubr.bf16.vlgmr.msra.gmra.mrb[0].mxu1 %v94_v13  ;;  %319 = vmatmul.mubr.bf16.vlgmr.msra.gmra.mrb[0].mxu0 %v93_v14 }
  0x6e   :  { %326 = vmatprep.mubr.msk.bf16.mxu1 %vm492_vm1, %v491_v0 }
  0x75   :  { %327 = vmatmul.mubr.bf16.gmra.mrb[4].mxu1 %v95_v16 }
 0x140   :  { %v202_v19 = vpop.f32.mrb[0].mxu1  ;;  %v194_v21 = vpop.f32.mrb[0].mxu0 }
 0x141   :  { %v218_v23 = vadd.f32 %v202_v19, %v85_v17  ;;  %v324_v24 = vpop.f32.mrb[1].mxu1  ;;  %v216_v25 = vadd.f32 %v194_v21, %v83_v18  ;;  %v320_v26 = vpop.f32.mrb[1].mxu0 }
 0x142   :  { %v205_v27 = vpop.f32.mrb[2].mxu1  ;;  %v197_v28 = vpop.f32.mrb[2].mxu0 }
 0x143   :  { %224 = vst.msk [vmem:[#allocation2 + $0x10] sm:$0xff] %vm76_vm0, %v218_v23  ;;  %v219_v29 = vadd.f32 %v205_v27, %v86_v20  ;;  %222 = vst.msk [vmem:[#allocation2] sm:$0xff] %vm76_vm0, %v216_v25  ;;  %v325_v30 = vpop.f32.mrb[3].mxu1  ;;  %v217_v31 = vadd.f32 %v197_v28, %v84_v22  ;;  %v321_v32 = vpop.f32.mrb[3].mxu0 }
 0x145   :  { %225 = vst.msk [vmem:[#allocation2 + $0x18] sm:$0xff] %vm76_vm0, %v219_v29  ;;  %223 = vst.msk [vmem:[#allocation2 + $0x8] sm:$0xff] %vm76_vm0, %v217_v31 }
 0x148   :  { %v210_v34 = vpop.f32.mrb[4].mxu1 }
 0x149   :  { %v220_v36 = vadd.f32 %v210_v34, %v87_v33  ;;  %v328_v37 = vpop.f32.mrb[5].mxu1 }
 0x14a   :  { %v213_v39 = vpop.f32.mrb[6].mxu1  ;;  %v231_v40 = vld [vmem:[#allocation2] sm:$0xff]  ;;  %v233_v41 = vld [vmem:[#allocation2 + $0x10] sm:$0xff] }
 0x14b   :  { %227 = vst.msk [vmem:[#allocation2 + $0x20] sm:$0x3] %vm81_vm2, %v220_v36  ;;  %v329_v43 = vpop.f32.mrb[7].mxu1  ;;  %v243_v44 = vadd.f32 %v290_v35, %v231_v40  ;;  %v245_v45 = vadd.f32 %v290_v35, %v233_v41 }
 0x14c   :  { %v232_v47 = vld [vmem:[#allocation2 + $0x8] sm:$0xff]  ;;  %v234_v48 = vld [vmem:[#allocation2 + $0x18] sm:$0xff] }
 0x14d   :  { %v244_v50 = vadd.f32 %v290_v35, %v232_v47  ;;  %v246_v51 = vadd.f32 %v290_v35, %v234_v48  ;;  %v253_v52 = vadd.f32 %v248_v42, %v243_v44  ;;  %v255_v53 = vadd.f32 %v250_v38, %v245_v45 }
 0x14f   :  { %v254_v54 = vadd.f32 %v249_v49, %v244_v50  ;;  %v256_v55 = vadd.f32 %v251_v46, %v246_v51  ;;  %258 = vst.msk [vmem:[#allocation11] sm:$0xff] %vm76_vm0, %v253_v52  ;;  %260 = vst.msk [vmem:[#allocation11 + $0x10] sm:$0xff] %vm76_vm0, %v255_v53 }
 0x151   :  { %259 = vst.msk [vmem:[#allocation11 + $0x8] sm:$0xff] %vm76_vm0, %v254_v54  ;;  %261 = vst.msk [vmem:[#allocation11 + $0x18] sm:$0xff] %vm76_vm0, %v256_v55 }
 0x152   :  { %v235_v56 = vld [vmem:[#allocation2 + $0x20] sm:$0x3] }
 0x153   :  { %v247_v58 = vadd.f32 %v290_v35, %v235_v56 }
 0x155   :  { %v257_v59 = vadd.f32 %v252_v57, %v247_v58 }
 0x157   :  { %262 = vst.msk [vmem:[#allocation11 + $0x20] sm:$0x3] %vm81_vm2, %v257_v59 }
 0x158   :  { %464 = shalt.err (!%p461_p8)
}
 0x159   :  { %s465_s18 = scalar_lea.hbm %s617_s4, 640 }
 0x15a   :  { %p466_p9 = scmp.ne.s32.totalorder %s617_s4, %s465_s18  ;;  %p469_p10 = scmp.lt.u32.totalorder %s465_s18, %s617_s4 }
 0x15c   :  { %p471_p11 = pnand %p469_p10, %p466_p9 }
 0x15e   :  { %474 = shalt.err (!%p471_p11)
}
 0x15f   :  { %274 = dma.vmem_to_hbm [thread:$0]  %s269_s14, 640, %s617_s4, [#allocation5], %s487_s1, %s487_s1, %s488_s13  }
 0x160   :  { %481 = dma.done.wait [#allocation5], 640  }
 0x161   :  { %482 = vsyncadd [#allocation5], 4294966656 }
 0x162   :  { %278 = vsyncpa [#allocation4], 1 }
 0x163   :  { %279 = vsyncpa [#allocation7], 1 }
 0x164   :  { %280 = vsyncpa [#allocation10], 1 }
 0x165   :  { %281 = vsyncpa [#allocation5], 1 }

// kernel: mae_forward.36
= control target key start
LH: loop header
LB: loop body
LE: loop exit
PB: predicated region body
PF: predicated region fallthrough
CT: control target
= control target key end

     0   :  { %10 = vsyncpa [#allocation3], 0  ;;  %s647_s0 = inlined_call_operand.hbm [shape: f32[34,32], index: 0, kind: input, shape index: {}]   ;;  %s648_s1 = inlined_call_operand.hbm [shape: f32[1,32], index: 1, kind: input, shape index: {}]   ;;  %s649_s2 = inlined_call_operand.hbm [shape: f32[1,32], index: 2, kind: input, shape index: {}]   ;;  %s650_s3 = inlined_call_operand.hbm [shape: bf16[32,16], index: 3, kind: input, shape index: {}]   ;;  %s651_s4 = inlined_call_operand.hbm [shape: f32[1,16], index: 4, kind: input, shape index: {}]   ;;  %s652_s5 = inlined_call_operand.hbm [shape: f32[34,16], index: 5, kind: output, shape index: {}]  }
   0x1   :  { %11 = vsyncpa [#allocation6], 0 }
   0x2   :  { %12 = vsyncpa [#allocation9], 0 }
   0x3   :  { %13 = vsyncpa [#allocation4], 0  ;;  %s495_s18 = smov [#allocation5]   ;;  %s496_s20 = smov [#allocation8]  }
   0x4   :  { %s32_s19 = sshll.u32 %s495_s18, 4  ;;  %s51_s21 = sshll.u32 %s496_s20, 4  ;;  %s33_s19 = int_to_ptr.vmem [resolvable:$true] %s32_s19  ;;  %s537_s21 = int_to_ptr.vmem [resolvable:$true] %s51_s21 }
   0x5   :  { %s355_s24 = scalar_lea.hbm %s648_s1, 16 }
   0x6   :  { %p356_p0 = scmp.ne.s32.totalorder %s648_s1, %s355_s24  ;;  %p359_p1 = scmp.lt.u32.totalorder %s355_s24, %s648_s1 }
   0x8   :  { %p361_p2 = pnand %p359_p1, %p356_p0 }
   0xa   :  { %364 = shalt.err (!%p361_p2)
}
   0xb   :  { %s365_s29 = scalar_lea.vmem %s33_s19, 16  ;;  %s369_s30 = scalar_lea.vmem %s33_s19, 32 }
   0xc   :  { %p366_p3 = scmp.ne.s32.totalorder %s33_s19, %s365_s29  ;;  %p370_p4 = scmp.lt.s32.totalorder %s33_s19, %s33_s19 }
   0xd   :  { %p371_p5 = scmp.lt.s32.totalorder %s369_s30, %s365_s29 }
   0xf   :  { %p372_p6 = por %p371_p5, %p370_p4 }
  0x11   :  { %p373_p7 = pnand %p372_p6, %p366_p3 }
  0x13   :  { %376 = shalt.err (!%p373_p7)
}
  0x14   :  { %35 = dma.hbm_to_vmem [thread:$0]  %s648_s1, 16, %s33_s19, [#allocation6]  }
  0x15   :  { %s377_s10 = scalar_lea.hbm %s650_s3, 256 }
  0x16   :  { %p378_p8 = scmp.ne.s32.totalorder %s650_s3, %s377_s10  ;;  %p381_p9 = scmp.lt.u32.totalorder %s377_s10, %s650_s3 }
  0x18   :  { %p383_p10 = pnand %p381_p9, %p378_p8 }
  0x1a   :  { %386 = shalt.err (!%p383_p10)
}
  0x1b   :  { %s387_s15 = scalar_lea.vmem %s537_s21, 256  ;;  %p392_p12 = scmp.lt.s32.totalorder %s537_s21, %s537_s21 }
  0x1c   :  { %p388_p11 = scmp.ne.s32.totalorder %s537_s21, %s387_s15  ;;  %p393_p13 = scmp.lt.s32.totalorder %s387_s15, %s387_s15 }
  0x1e   :  { %p394_p0 = por %p393_p13, %p392_p12 }
  0x20   :  { %p395_p1 = pnand %p394_p0, %p388_p11 }
  0x22   :  { %398 = shalt.err (!%p395_p1)
}
  0x23   :  { %s497_s1 = smov 64   ;;  %s498_s16 = smov 4  }
  0x24   :  { %57 = dma.hbm_to_vmem [thread:$0]  %s650_s3, 256, %s537_s21, [#allocation9], %s497_s1, %s497_s1, %s498_s16  }
  0x25   :  { %s499_s19 = smov [#allocation2]   ;;  %s399_s24 = scalar_lea.hbm %s647_s0, 640 }
  0x26   :  { %s19_s20 = sshll.u32 %s499_s19, 4  ;;  %p400_p2 = scmp.ne.s32.totalorder %s647_s0, %s399_s24  ;;  %s20_s20 = int_to_ptr.vmem [resolvable:$true] %s19_s20 }
  0x27   :  { %p403_p3 = scmp.lt.u32.totalorder %s399_s24, %s647_s0 }
  0x29   :  { %p405_p4 = pnand %p403_p3, %p400_p2 }
  0x2b   :  { %408 = shalt.err (!%p405_p4)
}
  0x2c   :  { %s409_s29 = scalar_lea.vmem %s20_s20, 640  ;;  %p414_p6 = scmp.lt.s32.totalorder %s20_s20, %s20_s20 }
  0x2d   :  { %p410_p5 = scmp.ne.s32.totalorder %s20_s20, %s409_s29  ;;  %p415_p7 = scmp.lt.s32.totalorder %s409_s29, %s409_s29 }
  0x2f   :  { %p416_p8 = por %p415_p7, %p414_p6 }
  0x31   :  { %p417_p9 = pnand %p416_p8, %p410_p5 }
  0x33   :  { %420 = shalt.err (!%p417_p9)
}
  0x34   :  { %s500_s3 = smov 128   ;;  %s501_s21 = smov 8  }
  0x35   :  { %25 = dma.hbm_to_vmem [thread:$0]  %s647_s0, 640, %s20_s20, [#allocation3], %s500_s3, %s500_s3, %s501_s21  }
  0x36   :  { %s502_s7 = smov [#allocation7]   ;;  %s503_s9 = smov [#allocation10]  }
  0x37   :  { %s42_s8 = sshll.u32 %s502_s7, 4  ;;  %s64_s10 = sshll.u32 %s503_s9, 4  ;;  %s43_s8 = int_to_ptr.vmem [resolvable:$true] %s42_s8  ;;  %s65_s10 = int_to_ptr.vmem [resolvable:$true] %s64_s10 }
  0x38   :  { %s421_s13 = scalar_lea.hbm %s649_s2, 16 }
  0x39   :  { %p422_p10 = scmp.ne.s32.totalorder %s649_s2, %s421_s13  ;;  %p425_p11 = scmp.lt.u32.totalorder %s421_s13, %s649_s2 }
  0x3b   :  { %p427_p12 = pnand %p425_p11, %p422_p10 }
  0x3d   :  { %430 = shalt.err (!%p427_p12)
}
  0x3e   :  { %s431_s0 = scalar_lea.vmem %s43_s8, 16  ;;  %s435_s17 = scalar_lea.vmem %s43_s8, 32 }
  0x3f   :  { %p432_p13 = scmp.ne.s32.totalorder %s43_s8, %s431_s0  ;;  %p436_p0 = scmp.lt.s32.totalorder %s43_s8, %s43_s8 }
  0x40   :  { %p437_p1 = scmp.lt.s32.totalorder %s435_s17, %s431_s0 }
  0x42   :  { %p438_p2 = por %p437_p1, %p436_p0 }
  0x44   :  { %p439_p3 = pnand %p438_p2, %p432_p13 }
  0x46   :  { %442 = shalt.err (!%p439_p3)
}
  0x47   :  { %45 = dma.hbm_to_vmem [thread:$0]  %s649_s2, 16, %s43_s8, [#allocation6]  }
  0x48   :  { %s443_s23 = scalar_lea.hbm %s651_s4, 16 }
  0x49   :  { %p444_p4 = scmp.ne.s32.totalorder %s651_s4, %s443_s23  ;;  %p447_p5 = scmp.lt.u32.totalorder %s443_s23, %s651_s4 }
  0x4b   :  { %p449_p6 = pnand %p447_p5, %p444_p4 }
  0x4d   :  { %452 = shalt.err (!%p449_p6)
}
  0x4e   :  { %s453_s28 = scalar_lea.vmem %s65_s10, 16  ;;  %s457_s29 = scalar_lea.vmem %s65_s10, 32 }
  0x4f   :  { %p454_p7 = scmp.ne.s32.totalorder %s65_s10, %s453_s28  ;;  %p458_p8 = scmp.lt.s32.totalorder %s65_s10, %s65_s10 }
  0x50   :  { %p459_p9 = scmp.lt.s32.totalorder %s457_s29, %s453_s28 }
  0x52   :  { %p460_p10 = por %p459_p9, %p458_p8 }
  0x54   :  { %p461_p11 = pnand %p460_p10, %p454_p7 }
  0x56   :  { %464 = shalt.err (!%p461_p11)
}
  0x57   :  { %67 = dma.hbm_to_vmem [thread:$0]  %s651_s4, 16, %s65_s10, [#allocation9]  }
  0x58   :  { %487 = dma.done.wait [#allocation3], 640  }
  0x59   :  { %488 = vsyncadd [#allocation3], 4294966656 }
  0x5a   :  { %489 = dma.done.wait [#allocation6], 32  }
  0x5b   :  { %490 = vsyncadd [#allocation6], 4294967264 }
  0x5c   :  { %491 = dma.done.wait [#allocation9], 272  }
  0x5d   :  { %492 = vsyncadd [#allocation9], 4294967024  ;;  %vm89_vm0 = vcmask 261120   ;;  %v86_v0 = vld [vmem:[#allocation2 + $0x10] sm:$0xff]  ;;  %v87_v1 = vld [vmem:[#allocation2 + $0x18] sm:$0xff]  ;;  %vm102_vm1 = vcmask 254976  }
  0x5e   :  { %v84_v2 = vld [vmem:[#allocation2] sm:$0xff]  ;;  %v96_v3 = vsel %vm89_vm0, %v86_v0, 0.0  ;;  %v85_v5 = vld [vmem:[#allocation2 + $0x8] sm:$0xff]  ;;  %v99_v6 = vsel %vm89_vm0, %v87_v1, 0.0  ;;  %v504_v36 = vmov 0.0   ;;  %v344_v37 = vld [vmem:[#allocation8 + $0x8] sm:$0xff]  }
  0x5f   :  { %v90_v4 = vsel %vm89_vm0, %v84_v2, 0.0  ;;  %97 = vadd.xlane.f32.xlu0 %v96_v3  ;;  %v93_v7 = vsel %vm89_vm0, %v85_v5, 0.0  ;;  %v88_v8 = vld [vmem:[#allocation2 + $0x20] sm:$0x3]  ;;  %v343_v35 = vld [vmem:[#allocation8] sm:$0xff]   ;;  %327 = vmatprep.subr.bf16.mxu1 %v504_v36  ;;  %vm505_vm2 = vmmov 0  }
  0x60   :  { %91 = vadd.xlane.f32.xlu1 %v90_v4  ;;  %v103_v9 = vsel %vm102_vm1, %v88_v8, 0.0  ;;  %311 = vmatprep.subr.bf16.mxu0 %v504_v36  ;;  %v298_v55 = vld [vmem:[#allocation5] ss:$0 sm:$0xff]  ;;  %v299_v61 = vld [vmem:[#allocation7] ss:$0 sm:$0xff]  ;;  %vm272_vm3 = vcmask 130048  }
  0x61   :  { %329 = vmatpush3.bf16.msra.mxu1 %v343_v35  ;;  %312 = vmatpush3.bf16.msra.mxu0 %v343_v35  ;;  %s506_s4 = smov [#allocation11]   ;;  %vm277_vm4 = vcmask 123904  }
  0x62   :  { %328 = vmatprep.subr.bf16.mxu1 %v504_v36  ;;  %313 = vmatprep.subr.bf16.mxu0 %v504_v36  ;;  %s284_s6 = sshll.u32 %s506_s4, 4  ;;  %s285_s6 = int_to_ptr.vmem [resolvable:$true] %s284_s6 }
  0x63   :  { %100 = vadd.xlane.f32.xlu0 %v99_v6  ;;  %319 = vmatprep.mubr.msk.bf16.mxu1 %vm505_vm2, %v504_v36  ;;  %s465_s7 = scalar_lea.vmem %s285_s6, 640  ;;  %p470_p13 = scmp.lt.s32.totalorder %s285_s6, %s285_s6 }
  0x64   :  { %94 = vadd.xlane.f32.xlu1 %v93_v7  ;;  %315 = vmatprep.mubr.msk.bf16.mxu0 %vm505_vm2, %v504_v36  ;;  %p466_p12 = scmp.ne.s32.totalorder %s285_s6, %s465_s7  ;;  %p471_p0 = scmp.lt.s32.totalorder %s465_s7, %s465_s7 }
  0x65   :  { %330 = vmatpush3.bf16.msra.mxu1 %v344_v37  ;;  %314 = vmatpush3.bf16.msra.mxu0 %v344_v37 }
  0x66   :  { %p472_p1 = por %p471_p0, %p470_p13 }
  0x67   :  { %104 = vadd.xlane.f32.xlu0 %v103_v9 }
  0x68   :  { %p473_p2 = pnand %p472_p1, %p466_p12 }
  0xec   :  { %v98_v10 = vpop.xlane.xlu0 %97 }
  0xed   :  { %v92_v11 = vpop.xlane.xlu1 %91  ;;  %v109_v12 = vmul.f32 0.03125, %v98_v10 }
  0xee   :  { %v107_v13 = vmul.f32 0.03125, %v92_v11 }
  0xef   :  { %v114_v14 = vsub.f32 %v86_v0, %v109_v12 }
  0xf0   :  { %v612_v15 = vsub.f32 %v84_v2, %v107_v13  ;;  %v101_v16 = vpop.xlane.xlu0 %100 }
  0xf1   :  { %v95_v17 = vpop.xlane.xlu1 %94  ;;  %v110_v18 = vmul.f32 0.03125, %v101_v16  ;;  %v119_v19 = vmul.f32 %v114_v14, %v114_v14 }
  0xf2   :  { %v108_v20 = vmul.f32 0.03125, %v95_v17  ;;  %v117_v21 = vmul.f32 %v612_v15, %v612_v15 }
  0xf3   :  { %v115_v22 = vsub.f32 %v87_v1, %v110_v18  ;;  %v128_v23 = vsel %vm89_vm0, %v119_v19, 0.0 }
  0xf4   :  { %v113_v24 = vsub.f32 %v85_v5, %v108_v20  ;;  %v105_v25 = vpop.xlane.xlu0 %104  ;;  %129 = vadd.xlane.f32.xlu1 %v128_v23  ;;  %v122_v28 = vsel %vm89_vm0, %v117_v21, 0.0 }
  0xf5   :  { %v111_v26 = vmul.f32 0.03125, %v105_v25  ;;  %v120_v27 = vmul.f32 %v115_v22, %v115_v22 }
  0xf6   :  { %v118_v29 = vmul.f32 %v113_v24, %v113_v24 }
  0xf7   :  { %v116_v30 = vsub.f32 %v88_v8, %v111_v26  ;;  %v131_v31 = vsel %vm89_vm0, %v120_v27, 0.0 }
  0xf8   :  { %132 = vadd.xlane.f32.xlu0 %v131_v31  ;;  %123 = vadd.xlane.f32.xlu1 %v122_v28  ;;  %v125_v33 = vsel %vm89_vm0, %v118_v29, 0.0 }
  0xf9   :  { %v121_v32 = vmul.f32 %v116_v30, %v116_v30 }
  0xfb   :  { %v134_v34 = vsel %vm102_vm1, %v121_v32, 0.0 }
  0xfc   :  { %135 = vadd.xlane.f32.xlu1 %v134_v34  ;;  %126 = vadd.xlane.f32.xlu0 %v125_v33 }
 0x181   :  { %v130_v38 = vpop.xlane.xlu1 %129 }
 0x182   :  { %v139_v39 = vmul.f32 0.03125, %v130_v38 }
 0x184   :  { %v144_v40 = vadd.f32 1e-05, %v139_v39 }
 0x185   :  { %v133_v41 = vpop.xlane.xlu0 %132  ;;  %v124_v42 = vpop.xlane.xlu1 %123 }
 0x186   :  { %345 = vrsqrt.f32 %v144_v40  ;;  %v140_v43 = vmul.f32 0.03125, %v133_v41  ;;  %v137_v44 = vmul.f32 0.03125, %v124_v42 }
 0x188   :  { %v145_v45 = vadd.f32 1e-05, %v140_v43  ;;  %v142_v46 = vadd.f32 1e-05, %v137_v44 }
 0x189   :  { %v127_v47 = vpop.xlane.xlu0 %126  ;;  %v136_v48 = vpop.xlane.xlu1 %135 }
 0x18a   :  { %347 = vrsqrt.f32 %v145_v45  ;;  %v138_v49 = vmul.f32 0.03125, %v127_v47  ;;  %v141_v50 = vmul.f32 0.03125, %v136_v48 }
 0x18b   :  { %349 = vrsqrt.f32 %v142_v46 }
 0x18c   :  { %v143_v51 = vadd.f32 1e-05, %v138_v49  ;;  %v146_v52 = vadd.f32 1e-05, %v141_v50 }
 0x18e   :  { %351 = vrsqrt.f32 %v143_v51 }
 0x18f   :  { %353 = vrsqrt.f32 %v146_v52 }
 0x190   :  { %v346_v53 = vpop.eup %345 }
 0x191   :  { %v154_v54 = vmul.f32 %v346_v53, %v114_v14  ;;  %v300_v14 = vld [vmem:[#allocation10] ss:$0 sm:$0xff] }
 0x193   :  { %v166_v59 = vmul.f32 %v298_v55, %v154_v54 }
 0x194   :  { %v348_v56 = vpop.eup %347 }
 0x195   :  { %v350_v57 = vpop.eup %349  ;;  %v155_v58 = vmul.f32 %v348_v56, %v115_v22  ;;  %v178_v2 = vadd.f32 %v299_v61, %v166_v59 }
 0x196   :  { %v152_v60 = vmul.f32 %v350_v57, %v612_v15 }
 0x197   :  { %v167_v62 = vmul.f32 %v298_v55, %v155_v58 }
 0x198   :  { %v352_v63 = vpop.eup %351  ;;  %v164_v4 = vmul.f32 %v298_v55, %v152_v60 }
 0x199   :  { %v354_v0 = vpop.eup %353  ;;  %v153_v1 = vmul.f32 %v352_v63, %v113_v24  ;;  %v179_v3 = vadd.f32 %v299_v61, %v167_v62 }
 0x19a   :  { %v156_v5 = vmul.f32 %v354_v0, %v116_v30  ;;  %v176_v9 = vadd.f32 %v299_v61, %v164_v4 }
 0x19b   :  { %v182_v6 = vpack.c.bf16 %v179_v3, %v178_v2  ;;  %v165_v7 = vmul.f32 %v298_v55, %v153_v1 }
 0x19c   :  { %v168_v8 = vmul.f32 %v298_v55, %v156_v5 }
 0x19d   :  { %320 = vmatmul.mubr.msk.bf16.vlgmr.msra.gmra.mrb[0].mxu1 %vm89_vm0, %v182_v6  ;;  %v177_v10 = vadd.f32 %v299_v61, %v165_v7 }
 0x19e   :  { %323 = vmatprep.mubr.msk.bf16.mxu1 %vm505_vm2, %v504_v36  ;;  %v180_v12 = vadd.f32 %v299_v61, %v168_v8 }
 0x19f   :  { %v181_v11 = vpack.c.bf16 %v177_v10, %v176_v9 }
 0x1a0   :  { %v183_v13 = vpack.c.bf16 %v180_v12, %v180_v12 }
 0x1a1   :  { %316 = vmatmul.mubr.msk.bf16.vlgmr.msra.gmra.mrb[0].mxu0 %vm89_vm0, %v181_v11 }
 0x1a5   :  { %324 = vmatmul.mubr.msk.bf16.gmra.mrb[4].mxu1 %vm89_vm0, %v183_v13 }
 0x270   :  { %v258_v15 = vpop.f32.mrb[0].mxu1 }
 0x271   :  { %v259_v16 = vadd.f32 %v300_v14, %v258_v15  ;;  %v321_v17 = vpop.f32.mrb[1].mxu1 }
 0x272   :  { %v261_v18 = vpop.f32.mrb[2].mxu1 }
 0x273   :  { %275 = vst.msk [vmem:[#allocation11 + $0x10] sm:$0xff] %vm272_vm3, %v259_v16  ;;  %v262_v19 = vadd.f32 %v300_v14, %v261_v18  ;;  %v322_v20 = vpop.f32.mrb[3].mxu1 }
 0x274   :  { %v250_v21 = vpop.f32.mrb[0].mxu0 }
 0x275   :  { %276 = vst.msk [vmem:[#allocation11 + $0x18] sm:$0xff] %vm272_vm3, %v262_v19  ;;  %v251_v22 = vadd.f32 %v300_v14, %v250_v21  ;;  %v317_v23 = vpop.f32.mrb[1].mxu0 }
 0x276   :  { %v253_v24 = vpop.f32.mrb[2].mxu0 }
 0x277   :  { %273 = vst.msk [vmem:[#allocation11] sm:$0xff] %vm272_vm3, %v251_v22  ;;  %v254_v25 = vadd.f32 %v300_v14, %v253_v24  ;;  %v318_v26 = vpop.f32.mrb[3].mxu0 }
 0x278   :  { %v266_v27 = vpop.f32.mrb[4].mxu1 }
 0x279   :  { %274 = vst.msk [vmem:[#allocation11 + $0x8] sm:$0xff] %vm272_vm3, %v254_v25  ;;  %v267_v28 = vadd.f32 %v300_v14, %v266_v27  ;;  %v325_v29 = vpop.f32.mrb[5].mxu1 }
 0x27a   :  { %v269_v30 = vpop.f32.mrb[6].mxu1 }
 0x27b   :  { %278 = vst.msk [vmem:[#allocation11 + $0x20] sm:$0x3] %vm277_vm4, %v267_v28  ;;  %v326_v31 = vpop.f32.mrb[7].mxu1 }
 0x27c   :  { %476 = shalt.err (!%p473_p2)
}
 0x27d   :  { %s477_s10 = scalar_lea.hbm %s652_s5, 640 }
 0x27e   :  { %p478_p3 = scmp.ne.s32.totalorder %s652_s5, %s477_s10  ;;  %p481_p4 = scmp.lt.u32.totalorder %s477_s10, %s652_s5 }
 0x280   :  { %p483_p5 = pnand %p481_p4, %p478_p3 }
 0x282   :  { %486 = shalt.err (!%p483_p5)
}
 0x283   :  { %290 = dma.vmem_to_hbm [thread:$0]  %s285_s6, 640, %s652_s5, [#allocation4], %s500_s3, %s500_s3, %s501_s21  }
 0x284   :  { %493 = dma.done.wait [#allocation4], 640  }
 0x285   :  { %494 = vsyncadd [#allocation4], 4294966656 }
 0x286   :  { %294 = vsyncpa [#allocation3], 1 }
 0x287   :  { %295 = vsyncpa [#allocation6], 1 }
 0x288   :  { %296 = vsyncpa [#allocation9], 1 }
 0x289   :  { %297 = vsyncpa [#allocation4], 1 }

// kernel: mae_forward.37
= control target key start
LH: loop header
LB: loop body
LE: loop exit
PB: predicated region body
PF: predicated region fallthrough
CT: control target
= control target key end

     0   :  { %8 = vsyncpa [#allocation6], 0  ;;  %s561_s0 = inlined_call_operand.hbm [shape: f32[32,16], index: 0, kind: input, shape index: {}]   ;;  %s562_s1 = inlined_call_operand.hbm [shape: f32[32,16], index: 1, kind: input, shape index: {}]   ;;  %s563_s2 = inlined_call_operand.hbm [shape: f32[32,1], index: 2, kind: input, shape index: {}]   ;;  %s564_s3 = inlined_call_operand.hbm [shape: f32[1,1], index: 3, kind: output, shape index: {}]  }
   0x1   :  { %9 = vsyncpa [#allocation9], 0 }
   0x2   :  { %10 = vsyncpa [#allocation7], 0  ;;  %s421_s12 = smov [#allocation8]   ;;  %s422_s14 = smov [#allocation5]  }
   0x3   :  { %s28_s13 = sshll.u32 %s421_s12, 4  ;;  %s16_s15 = sshll.u32 %s422_s14, 4  ;;  %s29_s13 = int_to_ptr.vmem [resolvable:$true] %s28_s13  ;;  %s449_s15 = int_to_ptr.vmem [resolvable:$true] %s16_s15 }
   0x4   :  { %s327_s18 = scalar_lea.hbm %s562_s1, 512 }
   0x5   :  { %p328_p0 = scmp.ne.s32.totalorder %s562_s1, %s327_s18  ;;  %p331_p1 = scmp.lt.u32.totalorder %s327_s18, %s562_s1 }
   0x7   :  { %p333_p2 = pnand %p331_p1, %p328_p0 }
   0x9   :  { %336 = shalt.err (!%p333_p2)
}
   0xa   :  { %s337_s23 = scalar_lea.vmem %s29_s13, 512  ;;  %p342_p4 = scmp.lt.s32.totalorder %s29_s13, %s29_s13 }
   0xb   :  { %p338_p3 = scmp.ne.s32.totalorder %s29_s13, %s337_s23  ;;  %p343_p5 = scmp.lt.s32.totalorder %s337_s23, %s337_s23 }
   0xd   :  { %p344_p6 = por %p343_p5, %p342_p4 }
   0xf   :  { %p345_p7 = pnand %p344_p6, %p338_p3 }
  0x11   :  { %348 = shalt.err (!%p345_p7)
}
  0x12   :  { %s423_s24 = smov 128   ;;  %s424_s25 = smov 8  }
  0x13   :  { %34 = dma.hbm_to_vmem [thread:$0]  %s562_s1, 512, %s29_s13, [#allocation9], %s423_s24, %s423_s24, %s424_s25  }
  0x14   :  { %s349_s30 = scalar_lea.hbm %s561_s0, 512 }
  0x15   :  { %p350_p8 = scmp.ne.s32.totalorder %s561_s0, %s349_s30  ;;  %p353_p9 = scmp.lt.u32.totalorder %s349_s30, %s561_s0 }
  0x17   :  { %p355_p10 = pnand %p353_p9, %p350_p8 }
  0x19   :  { %358 = shalt.err (!%p355_p10)
}
  0x1a   :  { %s359_s8 = scalar_lea.vmem %s449_s15, 512  ;;  %p364_p12 = scmp.lt.s32.totalorder %s449_s15, %s449_s15 }
  0x1b   :  { %p360_p11 = scmp.ne.s32.totalorder %s449_s15, %s359_s8  ;;  %p365_p13 = scmp.lt.s32.totalorder %s359_s8, %s359_s8 }
  0x1d   :  { %p366_p0 = por %p365_p13, %p364_p12 }
  0x1f   :  { %p367_p1 = pnand %p366_p0, %p360_p11 }
  0x21   :  { %370 = shalt.err (!%p367_p1)
}
  0x22   :  { %22 = dma.hbm_to_vmem [thread:$0]  %s561_s0, 512, %s449_s15, [#allocation6], %s423_s24, %s423_s24, %s424_s25  }
  0x23   :  { %s425_s10 = smov [#allocation10]   ;;  %s371_s14 = scalar_lea.hbm %s563_s2, 512 }
  0x24   :  { %s40_s11 = sshll.u32 %s425_s10, 4  ;;  %p372_p2 = scmp.ne.s32.totalorder %s563_s2, %s371_s14  ;;  %s41_s11 = int_to_ptr.vmem [resolvable:$true] %s40_s11 }
  0x25   :  { %p375_p3 = scmp.lt.u32.totalorder %s371_s14, %s563_s2 }
  0x27   :  { %p377_p4 = pnand %p375_p3, %p372_p2 }
  0x29   :  { %380 = shalt.err (!%p377_p4)
}
  0x2a   :  { %s381_s20 = scalar_lea.vmem %s41_s11, 512  ;;  %p386_p6 = scmp.lt.s32.totalorder %s41_s11, %s41_s11 }
  0x2b   :  { %p382_p5 = scmp.ne.s32.totalorder %s41_s11, %s381_s20  ;;  %p387_p7 = scmp.lt.s32.totalorder %s381_s20, %s381_s20 }
  0x2d   :  { %p388_p8 = por %p387_p7, %p386_p6 }
  0x2f   :  { %p389_p9 = pnand %p388_p8, %p382_p5 }
  0x31   :  { %392 = shalt.err (!%p389_p9)
}
  0x32   :  { %46 = dma.hbm_to_vmem [thread:$0]  %s563_s2, 512, %s41_s11, [#allocation9], %s423_s24, %s423_s24, %s424_s25  }
  0x33   :  { %415 = dma.done.wait [#allocation6], 512  }
  0x34   :  { %416 = vsyncadd [#allocation6], 4294966784 }
  0x35   :  { %417 = dma.done.wait [#allocation9], 1024  }
  0x36   :  { %418 = vsyncadd [#allocation9], 4294966272  ;;  %v426_v0 = vmov 0   ;;  %vm235_vm0 = vcmask 7168   ;;  %v74_v1 = vld [vmem:[#allocation10 + $0x10] sm:$0xff]  ;;  %v72_v2 = vld [vmem:[#allocation10] sm:$0xff] }
  0x37   :  { %300 = vset.pattern.permute.xlu1 %v426_v0  ;;  %299 = vset.pattern.permute.xlu0 %v426_v0  ;;  %v236_v3 = vsel %vm235_vm0, %v72_v2, 0.0  ;;  %v73_v4 = vld [vmem:[#allocation10 + $0x8] sm:$0xff]  ;;  %v75_v5 = vld [vmem:[#allocation10 + $0x18] sm:$0xff]  ;;  %v239_v8 = vsel %vm235_vm0, %v74_v1, 0.0  ;;  %v503_v12 = vld [vmem:[#allocation5] sm:$0xff]  ;;  %vm189_vm5 = vcmask 130048  }
  0x38   :  { %177 = vperm.xlu1 %300, %v74_v1   ;;  %167 = vperm.xlu0 %299, %v72_v2   ;;  %v237_v6 = vsel %vm235_vm0, %v73_v4, 0.0  ;;  %v241_v10 = vsel %vm235_vm0, %v75_v5, 0.0  ;;  %v505_v13 = vld [vmem:[#allocation5 + $0x10] sm:$0xff]  ;;  %v76_v14 = vand.u32 2147483647, %v503_v12  ;;  %v508_v15 = vld [vmem:[#allocation5 + $0x8] sm:$0xff] }
  0x39   :  { %v238_v7 = vadd.f32 %v237_v6, %v236_v3  ;;  %v78_v16 = vand.u32 2147483647, %v505_v13  ;;  %v511_v17 = vld [vmem:[#allocation5 + $0x18] sm:$0xff]  ;;  %v77_v18 = vand.u32 2147483647, %v508_v15  ;;  %v128_v36 = vsub.f32 0.0, %v503_v12 }
  0x3a   :  { %v80_v19 = vsub.f32 0.0, %v76_v14  ;;  %v79_v20 = vand.u32 2147483647, %v511_v17  ;;  %v130_v38 = vsub.f32 0.0, %v505_v13  ;;  %vm104_vm1 = vcmp.ge.f32.partialorder %v503_v12, 0.0  ;;  %v68_v40 = vld [vmem:[#allocation8] sm:$0xff] }
  0x3b   :  { %v240_v9 = vadd.f32 %v239_v8, %v238_v7  ;;  %v82_v21 = vsub.f32 0.0, %v78_v16  ;;  %v81_v22 = vsub.f32 0.0, %v77_v18  ;;  %v129_v41 = vsub.f32 0.0, %v508_v15  ;;  %v70_v51 = vld [vmem:[#allocation8 + $0x10] sm:$0xff]  ;;  %v69_v57 = vld [vmem:[#allocation8 + $0x8] sm:$0xff]  ;;  %s428_s23 = smov [#allocation11]  }
  0x3c   :  { %182 = vperm.xlu1 %300, %v75_v5   ;;  %172 = vperm.xlu0 %299, %v73_v4   ;;  %v84_v23 = vmul.f32 1.442695, %v80_v19  ;;  %v83_v24 = vsub.f32 0.0, %v79_v20  ;;  %vm106_vm2 = vcmp.ge.f32.partialorder %v505_v13, 0.0  ;;  %v120_v44 = vmax.f32 %v503_v12, 0.0  ;;  %s275_s24 = sshll.u32 %s428_s23, 4  ;;  %s276_s24 = int_to_ptr.vmem [resolvable:$true] %s275_s24 }
  0x3d   :  { %v501_v11 = vadd.f32 %v241_v10, %v240_v9  ;;  %v88_v25 = vmul.f32 1.442695, %v82_v21  ;;  %v86_v26 = vmul.f32 1.442695, %v81_v22  ;;  %v132_v45 = vmax.f32 %v128_v36, 0.0  ;;  %v71_v9 = vld [vmem:[#allocation8 + $0x18] sm:$0xff]  ;;  %p398_p11 = scmp.lt.s32.totalorder %s276_s24, %s276_s24 }
  0x3e   :  { %301 = vpow2.f32 %v84_v23  ;;  %v90_v27 = vmul.f32 1.442695, %v83_v24  ;;  %v122_v47 = vmax.f32 %v505_v13, 0.0  ;;  %v131_v49 = vsub.f32 0.0, %v511_v17  ;;  %s393_s25 = scalar_lea.vmem %s276_s24, 16  ;;  %s397_s26 = scalar_lea.vmem %s276_s24, 32 }
  0x3f   :  { %303 = vpow2.f32 %v88_v25  ;;  %vm105_vm3 = vcmp.ge.f32.partialorder %v508_v15, 0.0  ;;  %v134_v53 = vmax.f32 %v130_v38, 0.0  ;;  %v152_v54 = vsub.f32 1.0, %v68_v40  ;;  %p394_p10 = scmp.ne.s32.totalorder %s276_s24, %s393_s25  ;;  %p399_p12 = scmp.lt.s32.totalorder %s397_s26, %s393_s25 }
  0x40   :  { %305 = vpow2.f32 %v86_v26  ;;  %vm107_vm4 = vcmp.ge.f32.partialorder %v511_v17, 0.0  ;;  %v121_v59 = vmax.f32 %v508_v15, 0.0  ;;  %v133_v60 = vmax.f32 %v129_v41, 0.0 }
  0x41   :  { %307 = vpow2.f32 %v90_v27  ;;  %v154_v2 = vsub.f32 1.0, %v70_v51  ;;  %v123_v4 = vmax.f32 %v511_v17, 0.0  ;;  %v135_v5 = vmax.f32 %v131_v49, 0.0  ;;  %p400_p13 = por %p399_p12, %p398_p11 }
  0x42   :  { %v153_v12 = vsub.f32 1.0, %v69_v57  ;;  %v155_v24 = vsub.f32 1.0, %v71_v9  ;;  %vm60_vm6 = vcmask 0  }
  0x43   :  { %p401_p0 = pnand %p400_p13, %p394_p10 }
  0x48   :  { %v302_v28 = vpop.eup %301 }
  0x49   :  { %v304_v29 = vpop.eup %303  ;;  %v92_v31 = vadd.f32 1.0, %v302_v28  ;;  %v108_v48 = vsel %vm104_vm1, 1.0, %v302_v28 }
  0x4a   :  { %v306_v30 = vpop.eup %305  ;;  %v94_v33 = vadd.f32 1.0, %v304_v29  ;;  %v110_v56 = vsel %vm106_vm2, 1.0, %v304_v29 }
  0x4b   :  { %v308_v32 = vpop.eup %307  ;;  %v93_v34 = vadd.f32 1.0, %v306_v30  ;;  %309 = vlog2.f32 %v92_v31  ;;  %v109_v1 = vsel %vm105_vm3, 1.0, %v306_v30 }
  0x4c   :  { %v95_v35 = vadd.f32 1.0, %v308_v32  ;;  %311 = vlog2.f32 %v94_v33  ;;  %v111_v10 = vsel %vm107_vm4, 1.0, %v308_v32 }
  0x4d   :  { %313 = vlog2.f32 %v93_v34 }
  0x4e   :  { %315 = vrcp.f32 %v92_v31 }
  0x4f   :  { %317 = vlog2.f32 %v95_v35 }
  0x50   :  { %319 = vrcp.f32 %v94_v33 }
  0x51   :  { %321 = vrcp.f32 %v93_v34 }
  0x52   :  { %323 = vrcp.f32 %v95_v35 }
  0x55   :  { %v310_v37 = vpop.eup %309 }
  0x56   :  { %v312_v39 = vpop.eup %311  ;;  %v97_v43 = vmul.f32 0.6931472, %v310_v37 }
  0x57   :  { %v314_v42 = vpop.eup %313  ;;  %v101_v52 = vmul.f32 0.6931472, %v312_v39 }
  0x58   :  { %v316_v46 = vpop.eup %315  ;;  %v99_v58 = vmul.f32 0.6931472, %v314_v42  ;;  %v124_v63 = vadd.f32 %v120_v44, %v97_v43  ;;  %v136_v0 = vadd.f32 %v132_v45, %v97_v43 }
  0x59   :  { %v318_v50 = vpop.eup %317  ;;  %v113_v62 = vmul.f32 %v316_v46, %v108_v48  ;;  %v138_v8 = vadd.f32 %v134_v53, %v101_v52  ;;  %v126_v13 = vadd.f32 %v122_v47, %v101_v52 }
  0x5a   :  { %v320_v55 = vpop.eup %319  ;;  %v103_v3 = vmul.f32 0.6931472, %v318_v50  ;;  %v125_v16 = vadd.f32 %v121_v59, %v99_v58  ;;  %v137_v18 = vadd.f32 %v133_v60, %v99_v58  ;;  %v148_v15 = vmul.f32 %v136_v0, %v68_v40 }
  0x5b   :  { %v322_v61 = vpop.eup %321  ;;  %v117_v7 = vmul.f32 %v320_v55, %v110_v56  ;;  %v140_v19 = vsub.f32 %v113_v62, %v68_v40  ;;  %v156_v20 = vmul.f32 %v152_v54, %v124_v63  ;;  %v150_v26 = vmul.f32 %v138_v8, %v70_v51 }
  0x5c   :  { %v324_v6 = vpop.eup %323  ;;  %v115_v14 = vmul.f32 %v322_v61, %v109_v1  ;;  %v127_v22 = vadd.f32 %v123_v4, %v103_v3  ;;  %v139_v23 = vadd.f32 %v135_v5, %v103_v3  ;;  %v158_v27 = vmul.f32 %v154_v2, %v126_v13 }
  0x5d   :  { %v119_v21 = vmul.f32 %v324_v6, %v111_v10  ;;  %v142_v25 = vsub.f32 %v117_v7, %v70_v51  ;;  %v149_v29 = vmul.f32 %v137_v18, %v69_v57  ;;  %v157_v30 = vmul.f32 %v153_v12, %v125_v16 }
  0x5e   :  { %v141_v28 = vsub.f32 %v115_v14, %v69_v57  ;;  %v144_v17 = vmul.f32 %v140_v19, %v140_v19  ;;  %v160_v31 = vadd.f32 %v156_v20, %v148_v15  ;;  %v151_v33 = vmul.f32 %v139_v23, %v71_v9 }
  0x5f   :  { %v143_v32 = vsub.f32 %v119_v21, %v71_v9  ;;  %v159_v34 = vmul.f32 %v155_v24, %v127_v22  ;;  %v146_v37 = vmul.f32 %v142_v25, %v142_v25  ;;  %v162_v38 = vadd.f32 %v158_v27, %v150_v26 }
  0x60   :  { %v145_v39 = vmul.f32 %v141_v28, %v141_v28  ;;  %v161_v40 = vadd.f32 %v157_v30, %v149_v29  ;;  %v427_v3 = vmov 0.0  }
  0x61   :  { %v147_v43 = vmul.f32 %v143_v32, %v143_v32  ;;  %v163_v44 = vadd.f32 %v159_v34, %v151_v33  ;;  %61 = vst.msk [vmem:[#allocation2] sm:$0x1] %vm60_vm6, %v427_v3  ;;  %62 = vst.msk [vmem:[#allocation3] sm:$0x1] %vm60_vm6, %v427_v3 }
  0x62   :  { %63 = vst.msk [vmem:[#allocation4] sm:$0x1] %vm60_vm6, %v427_v3 }
  0x68   :  { %v164_v26 = vld [vmem:[#allocation2] sm:$0x1]  ;;  %v210_v27 = vld [vmem:[#allocation3] sm:$0x1] }
  0xb7   :  { %v178_v35 = vpop.permute.xlu1 %177  ;;  %v168_v36 = vpop.permute.xlu0 %167 }
  0xb8   :  { %v185_v41 = vmul.f32 %v168_v36, %v144_v17  ;;  %v211_v42 = vmul.f32 %v168_v36, %v160_v31  ;;  %v187_v47 = vmul.f32 %v178_v35, %v146_v37  ;;  %v213_v48 = vmul.f32 %v178_v35, %v162_v38  ;;  %v234_v31 = vld [vmem:[#allocation4] sm:$0x1] }
  0xba   :  { %v190_v51 = vsel %vm189_vm5, %v185_v41, 0.0  ;;  %v215_v52 = vsel %vm189_vm5, %v211_v42, 0.0  ;;  %v193_v59 = vsel %vm189_vm5, %v187_v47, 0.0  ;;  %v218_v60 = vsel %vm189_vm5, %v213_v48, 0.0 }
  0xbb   :  { %v183_v45 = vpop.permute.xlu1 %182  ;;  %v173_v46 = vpop.permute.xlu0 %172 }
  0xbc   :  { %v186_v49 = vmul.f32 %v173_v46, %v145_v39  ;;  %v212_v50 = vmul.f32 %v173_v46, %v161_v40  ;;  %v188_v53 = vmul.f32 %v183_v45, %v147_v43  ;;  %v214_v54 = vmul.f32 %v183_v45, %v163_v44 }
  0xbe   :  { %v191_v55 = vsel %vm189_vm5, %v186_v49, 0.0  ;;  %v216_v56 = vsel %vm189_vm5, %v212_v50, 0.0  ;;  %v195_v63 = vsel %vm189_vm5, %v188_v53, 0.0  ;;  %v220_v0 = vsel %vm189_vm5, %v214_v54, 0.0 }
  0xbf   :  { %v192_v57 = vadd.f32 %v191_v55, %v190_v51  ;;  %v217_v58 = vadd.f32 %v216_v56, %v215_v52 }
  0xc1   :  { %v194_v61 = vadd.f32 %v193_v59, %v192_v57  ;;  %v219_v62 = vadd.f32 %v218_v60, %v217_v58 }
  0xc3   :  { %v196_v1 = vadd.f32 %v195_v63, %v194_v61  ;;  %v221_v2 = vadd.f32 %v220_v0, %v219_v62 }
  0xc5   :  { %197 = vadd.xlane.f32.xlu0 %v196_v1  ;;  %222 = vadd.xlane.f32.xlu1 %v221_v2 }
  0xc9   :  { %243 = vadd.xlane.f32.xlu0 %v501_v11 }
 0x152   :  { %v198_v4 = vpop.xlane.xlu0 %197  ;;  %v223_v5 = vpop.xlane.xlu1 %222 }
 0x153   :  { %v199_v6 = vrot.slane %v198_v4, 4  ;;  %v224_v7 = vrot.slane %v223_v5, 4 }
 0x155   :  { %v200_v8 = vadd.f32 %v199_v6, %v198_v4  ;;  %v225_v9 = vadd.f32 %v224_v7, %v223_v5 }
 0x156   :  { %v244_v10 = vpop.xlane.xlu0 %243 }
 0x157   :  { %v201_v12 = vrot.slane %v200_v8, 2  ;;  %v226_v13 = vrot.slane %v225_v9, 2  ;;  %v245_v14 = vrot.slane %v244_v10, 4 }
 0x159   :  { %v227_v16 = vadd.f32 %v226_v13, %v225_v9  ;;  %v246_v11 = vadd.f32 %v245_v14, %v244_v10  ;;  %v202_v18 = vadd.f32 %v201_v12, %v200_v8 }
 0x15b   :  { %v247_v19 = vrot.slane %v246_v11, 2  ;;  %v203_v15 = vrot.slane %v202_v18, 1  ;;  %v228_v20 = vrot.slane %v227_v16, 1 }
 0x15d   :  { %v248_v21 = vadd.f32 %v247_v19, %v246_v11  ;;  %v204_v22 = vadd.f32 %v203_v15, %v202_v18  ;;  %v229_v23 = vadd.f32 %v228_v20, %v227_v16 }
 0x15f   :  { %285 = vpush %v204_v22  ;;  %v249_v24 = vrot.slane %v248_v21, 1 }
 0x160   :  { %287 = vpush %v229_v23 }
 0x161   :  { %v250_v25 = vadd.f32 %v249_v24, %v248_v21 }
 0x163   :  { %289 = vpush %v250_v25 }
 0x190   :  { %s286_s2 = spop %285 }
 0x191   :  { %v206_v28 = vstv %s286_s2  ;;  %s288_s21 = spop %287 }
 0x192   :  { %v207_v29 = vadd.f32 %v206_v28, %v164_v26  ;;  %v231_v30 = vstv %s288_s21 }
 0x193   :  { %v232_v17 = vadd.f32 %v231_v30, %v210_v27 }
 0x194   :  { %209 = vst.msk [vmem:[#allocation2] sm:$0x1] %vm60_vm6, %v207_v29  ;;  %s290_s22 = spop %289 }
 0x195   :  { %233 = vst.msk [vmem:[#allocation3] sm:$0x1] %vm60_vm6, %v232_v17  ;;  %v252_v32 = vstv %s290_s22 }
 0x196   :  { %v253_v33 = vadd.f32 %v252_v32, %v234_v31 }
 0x198   :  { %254 = vst.msk [vmem:[#allocation4] sm:$0x1] %vm60_vm6, %v253_v33 }
 0x19b   :  { %v261_v37 = vld [vmem:[#allocation2] sm:$0x1] }
 0x19c   :  { %v263_v38 = vld [vmem:[#allocation3] sm:$0x1]  ;;  %v262_v39 = vmul.f32 0.4, %v261_v37 }
 0x19d   :  { %v264_v40 = vmul.f32 0.6, %v263_v38 }
 0x19f   :  { %v258_v34 = vld [vmem:[#allocation4] sm:$0x1]  ;;  %v265_v41 = vadd.f32 %v264_v40, %v262_v39 }
 0x1a0   :  { %v259_v35 = vmax.f32 %v258_v34, 1.0 }
 0x1a2   :  { %v260_v36 = vmul.f32 16.0, %v259_v35 }
 0x1a4   :  { %325 = vrcp.f32 %v260_v36 }
 0x1ae   :  { %v326_v42 = vpop.eup %325 }
 0x1af   :  { %v267_v43 = vmul.f32 %v326_v42, %v265_v41 }
 0x1b1   :  { %268 = vst.msk [vmem:[#allocation11] sm:$0x1] %vm60_vm6, %v267_v43 }
 0x1b2   :  { %404 = shalt.err (!%p401_p0)
}
 0x1b3   :  { %s405_s29 = scalar_lea.hbm %s564_s3, 16 }
 0x1b4   :  { %p406_p1 = scmp.ne.s32.totalorder %s564_s3, %s405_s29  ;;  %p409_p2 = scmp.lt.u32.totalorder %s405_s29, %s564_s3 }
 0x1b6   :  { %p411_p3 = pnand %p409_p2, %p406_p1 }
 0x1b8   :  { %414 = shalt.err (!%p411_p3)
}
 0x1b9   :  { %278 = dma.vmem_to_hbm [thread:$0]  %s276_s24, 16, %s564_s3, [#allocation7]  }
 0x1ba   :  { %419 = dma.done.wait [#allocation7], 16  }
 0x1bb   :  { %420 = vsyncadd [#allocation7], 4294967280 }
 0x1bc   :  { %282 = vsyncpa [#allocation6], 1 }
 0x1bd   :  { %283 = vsyncpa [#allocation9], 1 }
 0x1be   :  { %284 = vsyncpa [#allocation7], 1 }

</bundles_post_ra>
